<compile_context>
chip_gen: v7x
topology: tpu7x:2x2x1
jax: 0.10.0
libtpu: 0.0.40
codegen_flags: <defaults>
</compile_context>

<pallas_src>
import functools

import jax
import jax.numpy as jnp
from jax.experimental import pallas as pl
from jax.experimental.pallas import tpu as pltpu

NUM_CLASSES = 6    # {stop, go, warning, adjust+warning, adjust+go, lights off}
HIDDEN = 128       # synthetic classification-head width (sublane-dense)
LANE_PAD = 128     # logits are written into a lane-dense 128-wide slab
TB = 8             # crops processed per grid step


def _pick_hw_tile(hw):
    """Largest lane tile (multiple of 128) dividing HW; else the full extent."""
    for t in (2048, 1024, 512, 256, 128):
        if hw % t == 0:
            return t
    return hw


def _head_kernel(x_ref, w1t_ref, b1t_ref, w2p_ref, b2p_ref, out_ref, acc_ref,
                 *, tb, nchan, inv_hw):
    # x_ref:   (TB, C, HW_T)      crops, native NCHW, spatial flattened on lanes
    # w1t_ref: (HIDDEN, C)        1x1-conv weights (normalization folded in)
    # b1t_ref: (HIDDEN, 1)        1x1-conv bias    (normalization folded in)
    # w2p_ref: (HIDDEN, LANE_PAD) classifier weights, zero-padded 6 -> 128 lanes
    # b2p_ref: (1, LANE_PAD)      classifier bias,    zero-padded 6 -> 128 lanes
    # out_ref: (TB, LANE_PAD)     lane-dense logits slab (valid classes [:, :6])
    # acc_ref: (HIDDEN, TB)       pooled-sum accumulator across HW tiles
    t = pl.program_id(1)

    @pl.when(t == 0)
    def _init():
        acc_ref[...] = jnp.zeros_like(acc_ref)

    w1t = w1t_ref[...]                                   # (HIDDEN, C)
    b1t = b1t_ref[...]                                   # (HIDDEN, 1)

    # 1x1 conv + ReLU + partial global-average-pool for this spatial tile.
    for b in range(tb):                                  # static unroll
        x = x_ref[b]                                     # (C, HW_T)
        h = w1t[:, 0:1] * x[0:1, :]                      # (HIDDEN, HW_T), VPU FMA
        for c in range(1, nchan):
            h = h + w1t[:, c:c + 1] * x[c:c + 1, :]
        h = jnp.maximum(h + b1t, 0.0)                    # ReLU
        col = jnp.sum(h, axis=1, keepdims=True)          # (HIDDEN, 1) lane reduce
        acc_ref[:, b:b + 1] = acc_ref[:, b:b + 1] + col

    # Finalize once per crop block: mean-pool scaling + linear head.
    @pl.when(t == pl.num_programs(1) - 1)
    def _finalize():
        w2p = w2p_ref[...]                               # (HIDDEN, LANE_PAD)
        b2p = b2p_ref[...]                               # (1, LANE_PAD)
        for b in range(tb):
            pooled = acc_ref[:, b:b + 1] * inv_hw        # (HIDDEN, 1)
            # pooled.T @ w2p as broadcast-mul + sublane reduce (no transpose).
            row = jnp.sum(pooled * w2p, axis=0, keepdims=True)   # (1, LANE_PAD)
            out_ref[b:b + 1, :] = row + b2p


def czech_railway_classify(crops_nchw, params):
    """crops_nchw: (B, 3, H, W) float32 in [0, 1] (post ToTensor).

    Returns (logits (B, NUM_CLASSES), class_ids (B,) int32) — the same
    semantics as classification_head(Normalize(crop))['logits'] + argmax(dim=1).
    """
    mean, std, w1, b1, w2, b2 = params
    B, C, H, W = crops_nchw.shape
    HW = H * W

    # Fold transforms.Normalize(mean, std) into the 1x1-conv weights/bias.
    inv_std = 1.0 / std                                   # (1, C)
    w1f = w1 * inv_std.reshape(C, 1)                      # (C, HIDDEN)
    b1f = b1 - (mean * inv_std) @ w1                      # (1, HIDDEN)
    w1t = jnp.transpose(w1f)                              # (HIDDEN, C)
    b1t = jnp.transpose(b1f)                              # (HIDDEN, 1)

    # Lane-pad the classifier head to a dense 128-lane output slab.
    w2p = jnp.zeros((HIDDEN, LANE_PAD), jnp.float32).at[:, :NUM_CLASSES].set(w2)
    b2p = jnp.zeros((1, LANE_PAD), jnp.float32).at[:, :NUM_CLASSES].set(b2)

    # Native NCHW, spatial flattened onto lanes: (B, C, HW). Reshape only.
    # (Casting x to bf16 would halve DMA bytes; kept f32 for exact parity.)
    x = crops_nchw.reshape(B, C, HW)

    # Pad the crop batch to a multiple of TB (padded rows are sliced away).
    nb = pl.cdiv(B, TB)
    b_pad = nb * TB
    if b_pad != B:
        x = jnp.pad(x, ((0, b_pad - B), (0, 0), (0, 0)))

    hw_t = _pick_hw_tile(HW)
    nt = HW // hw_t

    kernel = functools.partial(_head_kernel, tb=TB, nchan=C, inv_hw=1.0 / HW)

    out = pl.pallas_call(
        kernel,
        out_shape=jax.ShapeDtypeStruct((b_pad, LANE_PAD), jnp.float32),
        grid_spec=pltpu.PrefetchScalarGridSpec(
            num_scalar_prefetch=0,
            grid=(nb, nt),
            in_specs=[
                pl.BlockSpec((TB, C, hw_t), lambda i, t: (i, 0, t)),    # crops
                pl.BlockSpec((HIDDEN, C), lambda i, t: (0, 0)),         # w1'
                pl.BlockSpec((HIDDEN, 1), lambda i, t: (0, 0)),         # b1'
                pl.BlockSpec((HIDDEN, LANE_PAD), lambda i, t: (0, 0)),  # w2 pad
                pl.BlockSpec((1, LANE_PAD), lambda i, t: (0, 0)),       # b2 pad
            ],
            out_specs=pl.BlockSpec((TB, LANE_PAD), lambda i, t: (i, 0)),
            scratch_shapes=[pltpu.VMEM((HIDDEN, TB), jnp.float32)],
        ),
        compiler_params=pltpu.CompilerParams(
            dimension_semantics=("parallel", "arbitrary")),
    )(x, w1t, b1t, w2p, b2p)

    logits = out[:B, :NUM_CLASSES]
    class_ids = jnp.argmax(logits, axis=1).astype(jnp.int32)
    return logits, class_ids


def make_params(key, C=3):
    """Deterministic synthetic classification-head parameters."""
    k1, k2 = jax.random.split(key)
    mean = jnp.array([[0.485, 0.456, 0.406]], dtype=jnp.float32)   # (1, C)
    std = jnp.array([[0.229, 0.224, 0.225]], dtype=jnp.float32)    # (1, C)
    w1 = jax.random.normal(k1, (C, HIDDEN), jnp.float32) * 0.1
    b1 = jnp.zeros((1, HIDDEN), jnp.float32)
    w2 = jax.random.normal(k2, (HIDDEN, NUM_CLASSES), jnp.float32) * 0.1
    b2 = jnp.zeros((1, NUM_CLASSES), jnp.float32)
    return mean, std, w1, b1, w2, b2


def _reference(crops_nchw, params):
    """Pure-JAX reference of the same head (normalize -> conv -> pool -> fc)."""
    mean, std, w1, b1, w2, b2 = params
    B, C, H, W = crops_nchw.shape
    x = jnp.transpose(crops_nchw, (0, 2, 3, 1)).reshape(B, H * W, C)
    xn = (x - mean[None]) / std[None]
    h = jnp.maximum(jnp.einsum('bpc,ch->bph', xn, w1) + b1[None], 0.0)
    pooled = jnp.mean(h, axis=1)
    logits = pooled @ w2 + b2
    return logits, jnp.argmax(logits, axis=1).astype(jnp.int32)


if __name__ == "__main__":
    key = jax.random.PRNGKey(0)
    kx, kp = jax.random.split(key)

    # Small synthetic "crops" (batch of detected railway-light boxes,
    # post-resize, post-ToTensor): B=2, C=3, H=W=16, values in [0, 1].
    crops = jax.random.uniform(kx, (2, 3, 16, 16), jnp.float32)
    params = make_params(kp)

    logits, class_ids = czech_railway_classify(crops, params)
    jax.block_until_ready((logits, class_ids))

    ref_logits, ref_ids = _reference(crops, params)
    assert jnp.allclose(logits, ref_logits, atol=1e-4, rtol=1e-4)
    assert jnp.array_equal(class_ids, ref_ids)

    print("KERNEL_OK")
</pallas_src>

<mosaic_0001>
module attributes {stable_mosaic.version = 11 : i64} {
  func.func @_head_kernel(%arg0: i32, %arg1: i32, %arg2: memref<8x3x256xf32, #tpu.memory_space<vmem>>, %arg3: memref<128x3xf32, #tpu.memory_space<vmem>>, %arg4: memref<128x1xf32, #tpu.memory_space<vmem>>, %arg5: memref<128x128xf32, #tpu.memory_space<vmem>>, %arg6: memref<1x128xf32, #tpu.memory_space<vmem>>, %arg7: memref<8x128xf32, #tpu.memory_space<vmem>>, %arg8: memref<128x8xf32, #tpu.memory_space<vmem>>) attributes {dimension_semantics = [#tpu.dimension_semantics<parallel>, #tpu.dimension_semantics<arbitrary>], iteration_bounds = array<i64: 1, 1>, scalar_prefetch = 0 : i64, scratch_operands = 1 : i64, tpu.core_type = #tpu.core_type<tc>, window_params = [{transform_indices = @transform_0, window_bounds = array<i64: 8, 3, 256>}, {pipeline_mode = #tpu.pipeline_mode<synchronous>, transform_indices = @transform_1, window_bounds = array<i64: 128, 3>}, {pipeline_mode = #tpu.pipeline_mode<synchronous>, transform_indices = @transform_2, window_bounds = array<i64: 128, 1>}, {pipeline_mode = #tpu.pipeline_mode<synchronous>, transform_indices = @transform_3, window_bounds = array<i64: 128, 128>}, {pipeline_mode = #tpu.pipeline_mode<synchronous>, transform_indices = @transform_4, window_bounds = array<i64: 1, 128>}, {transform_indices = @transform_5, window_bounds = array<i64: 8, 128>}]} {
    %c0_i32 = arith.constant 0 : i32
    %0 = arith.cmpi eq, %arg1, %c0_i32 : i32
    %1 = arith.extui %0 : i1 to i32
    %c0_i32_0 = arith.constant 0 : i32
    %2 = arith.cmpi ne, %1, %c0_i32_0 : i32
    scf.if %2 {
      %cst_70 = arith.constant 0.000000e+00 : f32
      %232 = vector.broadcast %cst_70 : f32 to vector<128x8xf32>
      %c0_71 = arith.constant 0 : index
      %c0_72 = arith.constant 0 : index
      %233 = vector.load %arg8[%c0_71, %c0_72] : memref<128x8xf32, #tpu.memory_space<vmem>>, vector<128x8xf32>
      tpu.vector_store %arg8[%c0_71, %c0_72], %232 {strides = array<i32>} : memref<128x8xf32, #tpu.memory_space<vmem>>, vector<128x8xf32>,
    } else {
    }
    %c0 = arith.constant 0 : index
    %c0_1 = arith.constant 0 : index
    %3 = vector.load %arg3[%c0, %c0_1] : memref<128x3xf32, #tpu.memory_space<vmem>>, vector<128x3xf32>
    %c0_2 = arith.constant 0 : index
    %c0_3 = arith.constant 0 : index
    %4 = vector.load %arg4[%c0_2, %c0_3] : memref<128x1xf32, #tpu.memory_space<vmem>>, vector<128x1xf32>
    %c0_4 = arith.constant 0 : index
    %c0_5 = arith.constant 0 : index
    %c0_6 = arith.constant 0 : index
    %5 = vector.load %arg2[%c0_4, %c0_5, %c0_6] : memref<8x3x256xf32, #tpu.memory_space<vmem>>, vector<1x3x256xf32>
    %6 = vector.shape_cast %5 : vector<1x3x256xf32> to vector<3x256xf32>
    %7 = vector.extract_strided_slice %3 {offsets = [0, 0], sizes = [128, 1], strides = [1, 1]} : vector<128x3xf32> to vector<128x1xf32>
    %8 = vector.extract_strided_slice %6 {offsets = [0, 0], sizes = [1, 256], strides = [1, 1]} : vector<3x256xf32> to vector<1x256xf32>
    %9 = vector.broadcast %7 : vector<128x1xf32> to vector<128x256xf32>
    %10 = vector.broadcast %8 : vector<1x256xf32> to vector<128x256xf32>
    %11 = arith.mulf %9, %10 : vector<128x256xf32>
    %12 = vector.extract_strided_slice %3 {offsets = [0, 1], sizes = [128, 1], strides = [1, 1]} : vector<128x3xf32> to vector<128x1xf32>
    %13 = vector.extract_strided_slice %6 {offsets = [1, 0], sizes = [1, 256], strides = [1, 1]} : vector<3x256xf32> to vector<1x256xf32>
    %14 = vector.broadcast %12 : vector<128x1xf32> to vector<128x256xf32>
    %15 = vector.broadcast %13 : vector<1x256xf32> to vector<128x256xf32>
    %16 = arith.mulf %14, %15 : vector<128x256xf32>
    %17 = arith.addf %11, %16 : vector<128x256xf32>
    %18 = vector.extract_strided_slice %3 {offsets = [0, 2], sizes = [128, 1], strides = [1, 1]} : vector<128x3xf32> to vector<128x1xf32>
    %19 = vector.extract_strided_slice %6 {offsets = [2, 0], sizes = [1, 256], strides = [1, 1]} : vector<3x256xf32> to vector<1x256xf32>
    %20 = vector.broadcast %18 : vector<128x1xf32> to vector<128x256xf32>
    %21 = vector.broadcast %19 : vector<1x256xf32> to vector<128x256xf32>
    %22 = arith.mulf %20, %21 : vector<128x256xf32>
    %23 = arith.addf %17, %22 : vector<128x256xf32>
    %24 = vector.broadcast %4 : vector<128x1xf32> to vector<128x256xf32>
    %25 = arith.addf %23, %24 : vector<128x256xf32>
    %cst = arith.constant 0.000000e+00 : f32
    %26 = vector.broadcast %cst : f32 to vector<128x256xf32>
    %27 = arith.maximumf %25, %26 : vector<128x256xf32>
    %cst_7 = arith.constant dense<0.000000e+00> : vector<128xf32>
    %28 = vector.multi_reduction <add>, %27, %cst_7 [1] : vector<128x256xf32> to vector<128xf32>
    %29 = vector.shape_cast %28 : vector<128xf32> to vector<128x1xf32>
    %c0_8 = arith.constant 0 : index
    %c0_9 = arith.constant 0 : index
    %30 = vector.load %arg8[%c0_8, %c0_9] : memref<128x8xf32, #tpu.memory_space<vmem>>, vector<128x1xf32>
    %31 = arith.addf %30, %29 : vector<128x1xf32>
    %c0_10 = arith.constant 0 : index
    %c0_11 = arith.constant 0 : index
    %32 = vector.load %arg8[%c0_10, %c0_11] : memref<128x8xf32, #tpu.memory_space<vmem>>, vector<128x1xf32>
    tpu.vector_store %arg8[%c0_10, %c0_11], %31 {strides = array<i32>} : memref<128x8xf32, #tpu.memory_space<vmem>>, vector<128x1xf32>,
    %c1 = arith.constant 1 : index
    %c0_12 = arith.constant 0 : index
    %c0_13 = arith.constant 0 : index
    %33 = vector.load %arg2[%c1, %c0_12, %c0_13] : memref<8x3x256xf32, #tpu.memory_space<vmem>>, vector<1x3x256xf32>
    %34 = vector.shape_cast %33 : vector<1x3x256xf32> to vector<3x256xf32>
    %35 = vector.extract_strided_slice %3 {offsets = [0, 0], sizes = [128, 1], strides = [1, 1]} : vector<128x3xf32> to vector<128x1xf32>
    %36 = vector.extract_strided_slice %34 {offsets = [0, 0], sizes = [1, 256], strides = [1, 1]} : vector<3x256xf32> to vector<1x256xf32>
    %37 = vector.broadcast %35 : vector<128x1xf32> to vector<128x256xf32>
    %38 = vector.broadcast %36 : vector<1x256xf32> to vector<128x256xf32>
    %39 = arith.mulf %37, %38 : vector<128x256xf32>
    %40 = vector.extract_strided_slice %3 {offsets = [0, 1], sizes = [128, 1], strides = [1, 1]} : vector<128x3xf32> to vector<128x1xf32>
    %41 = vector.extract_strided_slice %34 {offsets = [1, 0], sizes = [1, 256], strides = [1, 1]} : vector<3x256xf32> to vector<1x256xf32>
    %42 = vector.broadcast %40 : vector<128x1xf32> to vector<128x256xf32>
    %43 = vector.broadcast %41 : vector<1x256xf32> to vector<128x256xf32>
    %44 = arith.mulf %42, %43 : vector<128x256xf32>
    %45 = arith.addf %39, %44 : vector<128x256xf32>
    %46 = vector.extract_strided_slice %3 {offsets = [0, 2], sizes = [128, 1], strides = [1, 1]} : vector<128x3xf32> to vector<128x1xf32>
    %47 = vector.extract_strided_slice %34 {offsets = [2, 0], sizes = [1, 256], strides = [1, 1]} : vector<3x256xf32> to vector<1x256xf32>
    %48 = vector.broadcast %46 : vector<128x1xf32> to vector<128x256xf32>
    %49 = vector.broadcast %47 : vector<1x256xf32> to vector<128x256xf32>
    %50 = arith.mulf %48, %49 : vector<128x256xf32>
    %51 = arith.addf %45, %50 : vector<128x256xf32>
    %52 = vector.broadcast %4 : vector<128x1xf32> to vector<128x256xf32>
    %53 = arith.addf %51, %52 : vector<128x256xf32>
    %cst_14 = arith.constant 0.000000e+00 : f32
    %54 = vector.broadcast %cst_14 : f32 to vector<128x256xf32>
    %55 = arith.maximumf %53, %54 : vector<128x256xf32>
    %cst_15 = arith.constant dense<0.000000e+00> : vector<128xf32>
    %56 = vector.multi_reduction <add>, %55, %cst_15 [1] : vector<128x256xf32> to vector<128xf32>
    %57 = vector.shape_cast %56 : vector<128xf32> to vector<128x1xf32>
    %c0_16 = arith.constant 0 : index
    %c1_17 = arith.constant 1 : index
    %58 = vector.load %arg8[%c0_16, %c1_17] : memref<128x8xf32, #tpu.memory_space<vmem>>, vector<128x1xf32>
    %59 = arith.addf %58, %57 : vector<128x1xf32>
    %c0_18 = arith.constant 0 : index
    %c1_19 = arith.constant 1 : index
    %60 = vector.load %arg8[%c0_18, %c1_19] : memref<128x8xf32, #tpu.memory_space<vmem>>, vector<128x1xf32>
    tpu.vector_store %arg8[%c0_18, %c1_19], %59 {strides = array<i32>} : memref<128x8xf32, #tpu.memory_space<vmem>>, vector<128x1xf32>,
    %c2 = arith.constant 2 : index
    %c0_20 = arith.constant 0 : index
    %c0_21 = arith.constant 0 : index
    %61 = vector.load %arg2[%c2, %c0_20, %c0_21] : memref<8x3x256xf32, #tpu.memory_space<vmem>>, vector<1x3x256xf32>
    %62 = vector.shape_cast %61 : vector<1x3x256xf32> to vector<3x256xf32>
    %63 = vector.extract_strided_slice %3 {offsets = [0, 0], sizes = [128, 1], strides = [1, 1]} : vector<128x3xf32> to vector<128x1xf32>
    %64 = vector.extract_strided_slice %62 {offsets = [0, 0], sizes = [1, 256], strides = [1, 1]} : vector<3x256xf32> to vector<1x256xf32>
    %65 = vector.broadcast %63 : vector<128x1xf32> to vector<128x256xf32>
    %66 = vector.broadcast %64 : vector<1x256xf32> to vector<128x256xf32>
    %67 = arith.mulf %65, %66 : vector<128x256xf32>
    %68 = vector.extract_strided_slice %3 {offsets = [0, 1], sizes = [128, 1], strides = [1, 1]} : vector<128x3xf32> to vector<128x1xf32>
    %69 = vector.extract_strided_slice %62 {offsets = [1, 0], sizes = [1, 256], strides = [1, 1]} : vector<3x256xf32> to vector<1x256xf32>
    %70 = vector.broadcast %68 : vector<128x1xf32> to vector<128x256xf32>
    %71 = vector.broadcast %69 : vector<1x256xf32> to vector<128x256xf32>
    %72 = arith.mulf %70, %71 : vector<128x256xf32>
    %73 = arith.addf %67, %72 : vector<128x256xf32>
    %74 = vector.extract_strided_slice %3 {offsets = [0, 2], sizes = [128, 1], strides = [1, 1]} : vector<128x3xf32> to vector<128x1xf32>
    %75 = vector.extract_strided_slice %62 {offsets = [2, 0], sizes = [1, 256], strides = [1, 1]} : vector<3x256xf32> to vector<1x256xf32>
    %76 = vector.broadcast %74 : vector<128x1xf32> to vector<128x256xf32>
    %77 = vector.broadcast %75 : vector<1x256xf32> to vector<128x256xf32>
    %78 = arith.mulf %76, %77 : vector<128x256xf32>
    %79 = arith.addf %73, %78 : vector<128x256xf32>
    %80 = vector.broadcast %4 : vector<128x1xf32> to vector<128x256xf32>
    %81 = arith.addf %79, %80 : vector<128x256xf32>
    %cst_22 = arith.constant 0.000000e+00 : f32
    %82 = vector.broadcast %cst_22 : f32 to vector<128x256xf32>
    %83 = arith.maximumf %81, %82 : vector<128x256xf32>
    %cst_23 = arith.constant dense<0.000000e+00> : vector<128xf32>
    %84 = vector.multi_reduction <add>, %83, %cst_23 [1] : vector<128x256xf32> to vector<128xf32>
    %85 = vector.shape_cast %84 : vector<128xf32> to vector<128x1xf32>
    %c0_24 = arith.constant 0 : index
    %c2_25 = arith.constant 2 : index
    %86 = vector.load %arg8[%c0_24, %c2_25] : memref<128x8xf32, #tpu.memory_space<vmem>>, vector<128x1xf32>
    %87 = arith.addf %86, %85 : vector<128x1xf32>
    %c0_26 = arith.constant 0 : index
    %c2_27 = arith.constant 2 : index
    %88 = vector.load %arg8[%c0_26, %c2_27] : memref<128x8xf32, #tpu.memory_space<vmem>>, vector<128x1xf32>
    tpu.vector_store %arg8[%c0_26, %c2_27], %87 {strides = array<i32>} : memref<128x8xf32, #tpu.memory_space<vmem>>, vector<128x1xf32>,
    %c3 = arith.constant 3 : index
    %c0_28 = arith.constant 0 : index
    %c0_29 = arith.constant 0 : index
    %89 = vector.load %arg2[%c3, %c0_28, %c0_29] : memref<8x3x256xf32, #tpu.memory_space<vmem>>, vector<1x3x256xf32>
    %90 = vector.shape_cast %89 : vector<1x3x256xf32> to vector<3x256xf32>
    %91 = vector.extract_strided_slice %3 {offsets = [0, 0], sizes = [128, 1], strides = [1, 1]} : vector<128x3xf32> to vector<128x1xf32>
    %92 = vector.extract_strided_slice %90 {offsets = [0, 0], sizes = [1, 256], strides = [1, 1]} : vector<3x256xf32> to vector<1x256xf32>
    %93 = vector.broadcast %91 : vector<128x1xf32> to vector<128x256xf32>
    %94 = vector.broadcast %92 : vector<1x256xf32> to vector<128x256xf32>
    %95 = arith.mulf %93, %94 : vector<128x256xf32>
    %96 = vector.extract_strided_slice %3 {offsets = [0, 1], sizes = [128, 1], strides = [1, 1]} : vector<128x3xf32> to vector<128x1xf32>
    %97 = vector.extract_strided_slice %90 {offsets = [1, 0], sizes = [1, 256], strides = [1, 1]} : vector<3x256xf32> to vector<1x256xf32>
    %98 = vector.broadcast %96 : vector<128x1xf32> to vector<128x256xf32>
    %99 = vector.broadcast %97 : vector<1x256xf32> to vector<128x256xf32>
    %100 = arith.mulf %98, %99 : vector<128x256xf32>
    %101 = arith.addf %95, %100 : vector<128x256xf32>
    %102 = vector.extract_strided_slice %3 {offsets = [0, 2], sizes = [128, 1], strides = [1, 1]} : vector<128x3xf32> to vector<128x1xf32>
    %103 = vector.extract_strided_slice %90 {offsets = [2, 0], sizes = [1, 256], strides = [1, 1]} : vector<3x256xf32> to vector<1x256xf32>
    %104 = vector.broadcast %102 : vector<128x1xf32> to vector<128x256xf32>
    %105 = vector.broadcast %103 : vector<1x256xf32> to vector<128x256xf32>
    %106 = arith.mulf %104, %105 : vector<128x256xf32>
    %107 = arith.addf %101, %106 : vector<128x256xf32>
    %108 = vector.broadcast %4 : vector<128x1xf32> to vector<128x256xf32>
    %109 = arith.addf %107, %108 : vector<128x256xf32>
    %cst_30 = arith.constant 0.000000e+00 : f32
    %110 = vector.broadcast %cst_30 : f32 to vector<128x256xf32>
    %111 = arith.maximumf %109, %110 : vector<128x256xf32>
    %cst_31 = arith.constant dense<0.000000e+00> : vector<128xf32>
    %112 = vector.multi_reduction <add>, %111, %cst_31 [1] : vector<128x256xf32> to vector<128xf32>
    %113 = vector.shape_cast %112 : vector<128xf32> to vector<128x1xf32>
    %c0_32 = arith.constant 0 : index
    %c3_33 = arith.constant 3 : index
    %114 = vector.load %arg8[%c0_32, %c3_33] : memref<128x8xf32, #tpu.memory_space<vmem>>, vector<128x1xf32>
    %115 = arith.addf %114, %113 : vector<128x1xf32>
    %c0_34 = arith.constant 0 : index
    %c3_35 = arith.constant 3 : index
    %116 = vector.load %arg8[%c0_34, %c3_35] : memref<128x8xf32, #tpu.memory_space<vmem>>, vector<128x1xf32>
    tpu.vector_store %arg8[%c0_34, %c3_35], %115 {strides = array<i32>} : memref<128x8xf32, #tpu.memory_space<vmem>>, vector<128x1xf32>,
    %c4 = arith.constant 4 : index
    %c0_36 = arith.constant 0 : index
    %c0_37 = arith.constant 0 : index
    %117 = vector.load %arg2[%c4, %c0_36, %c0_37] : memref<8x3x256xf32, #tpu.memory_space<vmem>>, vector<1x3x256xf32>
    %118 = vector.shape_cast %117 : vector<1x3x256xf32> to vector<3x256xf32>
    %119 = vector.extract_strided_slice %3 {offsets = [0, 0], sizes = [128, 1], strides = [1, 1]} : vector<128x3xf32> to vector<128x1xf32>
    %120 = vector.extract_strided_slice %118 {offsets = [0, 0], sizes = [1, 256], strides = [1, 1]} : vector<3x256xf32> to vector<1x256xf32>
    %121 = vector.broadcast %119 : vector<128x1xf32> to vector<128x256xf32>
    %122 = vector.broadcast %120 : vector<1x256xf32> to vector<128x256xf32>
    %123 = arith.mulf %121, %122 : vector<128x256xf32>
    %124 = vector.extract_strided_slice %3 {offsets = [0, 1], sizes = [128, 1], strides = [1, 1]} : vector<128x3xf32> to vector<128x1xf32>
    %125 = vector.extract_strided_slice %118 {offsets = [1, 0], sizes = [1, 256], strides = [1, 1]} : vector<3x256xf32> to vector<1x256xf32>
    %126 = vector.broadcast %124 : vector<128x1xf32> to vector<128x256xf32>
    %127 = vector.broadcast %125 : vector<1x256xf32> to vector<128x256xf32>
    %128 = arith.mulf %126, %127 : vector<128x256xf32>
    %129 = arith.addf %123, %128 : vector<128x256xf32>
    %130 = vector.extract_strided_slice %3 {offsets = [0, 2], sizes = [128, 1], strides = [1, 1]} : vector<128x3xf32> to vector<128x1xf32>
    %131 = vector.extract_strided_slice %118 {offsets = [2, 0], sizes = [1, 256], strides = [1, 1]} : vector<3x256xf32> to vector<1x256xf32>
    %132 = vector.broadcast %130 : vector<128x1xf32> to vector<128x256xf32>
    %133 = vector.broadcast %131 : vector<1x256xf32> to vector<128x256xf32>
    %134 = arith.mulf %132, %133 : vector<128x256xf32>
    %135 = arith.addf %129, %134 : vector<128x256xf32>
    %136 = vector.broadcast %4 : vector<128x1xf32> to vector<128x256xf32>
    %137 = arith.addf %135, %136 : vector<128x256xf32>
    %cst_38 = arith.constant 0.000000e+00 : f32
    %138 = vector.broadcast %cst_38 : f32 to vector<128x256xf32>
    %139 = arith.maximumf %137, %138 : vector<128x256xf32>
    %cst_39 = arith.constant dense<0.000000e+00> : vector<128xf32>
    %140 = vector.multi_reduction <add>, %139, %cst_39 [1] : vector<128x256xf32> to vector<128xf32>
    %141 = vector.shape_cast %140 : vector<128xf32> to vector<128x1xf32>
    %c0_40 = arith.constant 0 : index
    %c4_41 = arith.constant 4 : index
    %142 = vector.load %arg8[%c0_40, %c4_41] : memref<128x8xf32, #tpu.memory_space<vmem>>, vector<128x1xf32>
    %143 = arith.addf %142, %141 : vector<128x1xf32>
    %c0_42 = arith.constant 0 : index
    %c4_43 = arith.constant 4 : index
    %144 = vector.load %arg8[%c0_42, %c4_43] : memref<128x8xf32, #tpu.memory_space<vmem>>, vector<128x1xf32>
    tpu.vector_store %arg8[%c0_42, %c4_43], %143 {strides = array<i32>} : memref<128x8xf32, #tpu.memory_space<vmem>>, vector<128x1xf32>,
    %c5 = arith.constant 5 : index
    %c0_44 = arith.constant 0 : index
    %c0_45 = arith.constant 0 : index
    %145 = vector.load %arg2[%c5, %c0_44, %c0_45] : memref<8x3x256xf32, #tpu.memory_space<vmem>>, vector<1x3x256xf32>
    %146 = vector.shape_cast %145 : vector<1x3x256xf32> to vector<3x256xf32>
    %147 = vector.extract_strided_slice %3 {offsets = [0, 0], sizes = [128, 1], strides = [1, 1]} : vector<128x3xf32> to vector<128x1xf32>
    %148 = vector.extract_strided_slice %146 {offsets = [0, 0], sizes = [1, 256], strides = [1, 1]} : vector<3x256xf32> to vector<1x256xf32>
    %149 = vector.broadcast %147 : vector<128x1xf32> to vector<128x256xf32>
    %150 = vector.broadcast %148 : vector<1x256xf32> to vector<128x256xf32>
    %151 = arith.mulf %149, %150 : vector<128x256xf32>
    %152 = vector.extract_strided_slice %3 {offsets = [0, 1], sizes = [128, 1], strides = [1, 1]} : vector<128x3xf32> to vector<128x1xf32>
    %153 = vector.extract_strided_slice %146 {offsets = [1, 0], sizes = [1, 256], strides = [1, 1]} : vector<3x256xf32> to vector<1x256xf32>
    %154 = vector.broadcast %152 : vector<128x1xf32> to vector<128x256xf32>
    %155 = vector.broadcast %153 : vector<1x256xf32> to vector<128x256xf32>
    %156 = arith.mulf %154, %155 : vector<128x256xf32>
    %157 = arith.addf %151, %156 : vector<128x256xf32>
    %158 = vector.extract_strided_slice %3 {offsets = [0, 2], sizes = [128, 1], strides = [1, 1]} : vector<128x3xf32> to vector<128x1xf32>
    %159 = vector.extract_strided_slice %146 {offsets = [2, 0], sizes = [1, 256], strides = [1, 1]} : vector<3x256xf32> to vector<1x256xf32>
    %160 = vector.broadcast %158 : vector<128x1xf32> to vector<128x256xf32>
    %161 = vector.broadcast %159 : vector<1x256xf32> to vector<128x256xf32>
    %162 = arith.mulf %160, %161 : vector<128x256xf32>
    %163 = arith.addf %157, %162 : vector<128x256xf32>
    %164 = vector.broadcast %4 : vector<128x1xf32> to vector<128x256xf32>
    %165 = arith.addf %163, %164 : vector<128x256xf32>
    %cst_46 = arith.constant 0.000000e+00 : f32
    %166 = vector.broadcast %cst_46 : f32 to vector<128x256xf32>
    %167 = arith.maximumf %165, %166 : vector<128x256xf32>
    %cst_47 = arith.constant dense<0.000000e+00> : vector<128xf32>
    %168 = vector.multi_reduction <add>, %167, %cst_47 [1] : vector<128x256xf32> to vector<128xf32>
    %169 = vector.shape_cast %168 : vector<128xf32> to vector<128x1xf32>
    %c0_48 = arith.constant 0 : index
    %c5_49 = arith.constant 5 : index
    %170 = vector.load %arg8[%c0_48, %c5_49] : memref<128x8xf32, #tpu.memory_space<vmem>>, vector<128x1xf32>
    %171 = arith.addf %170, %169 : vector<128x1xf32>
    %c0_50 = arith.constant 0 : index
    %c5_51 = arith.constant 5 : index
    %172 = vector.load %arg8[%c0_50, %c5_51] : memref<128x8xf32, #tpu.memory_space<vmem>>, vector<128x1xf32>
    tpu.vector_store %arg8[%c0_50, %c5_51], %171 {strides = array<i32>} : memref<128x8xf32, #tpu.memory_space<vmem>>, vector<128x1xf32>,
    %c6 = arith.constant 6 : index
    %c0_52 = arith.constant 0 : index
    %c0_53 = arith.constant 0 : index
    %173 = vector.load %arg2[%c6, %c0_52, %c0_53] : memref<8x3x256xf32, #tpu.memory_space<vmem>>, vector<1x3x256xf32>
    %174 = vector.shape_cast %173 : vector<1x3x256xf32> to vector<3x256xf32>
    %175 = vector.extract_strided_slice %3 {offsets = [0, 0], sizes = [128, 1], strides = [1, 1]} : vector<128x3xf32> to vector<128x1xf32>
    %176 = vector.extract_strided_slice %174 {offsets = [0, 0], sizes = [1, 256], strides = [1, 1]} : vector<3x256xf32> to vector<1x256xf32>
    %177 = vector.broadcast %175 : vector<128x1xf32> to vector<128x256xf32>
    %178 = vector.broadcast %176 : vector<1x256xf32> to vector<128x256xf32>
    %179 = arith.mulf %177, %178 : vector<128x256xf32>
    %180 = vector.extract_strided_slice %3 {offsets = [0, 1], sizes = [128, 1], strides = [1, 1]} : vector<128x3xf32> to vector<128x1xf32>
    %181 = vector.extract_strided_slice %174 {offsets = [1, 0], sizes = [1, 256], strides = [1, 1]} : vector<3x256xf32> to vector<1x256xf32>
    %182 = vector.broadcast %180 : vector<128x1xf32> to vector<128x256xf32>
    %183 = vector.broadcast %181 : vector<1x256xf32> to vector<128x256xf32>
    %184 = arith.mulf %182, %183 : vector<128x256xf32>
    %185 = arith.addf %179, %184 : vector<128x256xf32>
    %186 = vector.extract_strided_slice %3 {offsets = [0, 2], sizes = [128, 1], strides = [1, 1]} : vector<128x3xf32> to vector<128x1xf32>
    %187 = vector.extract_strided_slice %174 {offsets = [2, 0], sizes = [1, 256], strides = [1, 1]} : vector<3x256xf32> to vector<1x256xf32>
    %188 = vector.broadcast %186 : vector<128x1xf32> to vector<128x256xf32>
    %189 = vector.broadcast %187 : vector<1x256xf32> to vector<128x256xf32>
    %190 = arith.mulf %188, %189 : vector<128x256xf32>
    %191 = arith.addf %185, %190 : vector<128x256xf32>
    %192 = vector.broadcast %4 : vector<128x1xf32> to vector<128x256xf32>
    %193 = arith.addf %191, %192 : vector<128x256xf32>
    %cst_54 = arith.constant 0.000000e+00 : f32
    %194 = vector.broadcast %cst_54 : f32 to vector<128x256xf32>
    %195 = arith.maximumf %193, %194 : vector<128x256xf32>
    %cst_55 = arith.constant dense<0.000000e+00> : vector<128xf32>
    %196 = vector.multi_reduction <add>, %195, %cst_55 [1] : vector<128x256xf32> to vector<128xf32>
    %197 = vector.shape_cast %196 : vector<128xf32> to vector<128x1xf32>
    %c0_56 = arith.constant 0 : index
    %c6_57 = arith.constant 6 : index
    %198 = vector.load %arg8[%c0_56, %c6_57] : memref<128x8xf32, #tpu.memory_space<vmem>>, vector<128x1xf32>
    %199 = arith.addf %198, %197 : vector<128x1xf32>
    %c0_58 = arith.constant 0 : index
    %c6_59 = arith.constant 6 : index
    %200 = vector.load %arg8[%c0_58, %c6_59] : memref<128x8xf32, #tpu.memory_space<vmem>>, vector<128x1xf32>
    tpu.vector_store %arg8[%c0_58, %c6_59], %199 {strides = array<i32>} : memref<128x8xf32, #tpu.memory_space<vmem>>, vector<128x1xf32>,
    %c7 = arith.constant 7 : index
    %c0_60 = arith.constant 0 : index
    %c0_61 = arith.constant 0 : index
    %201 = vector.load %arg2[%c7, %c0_60, %c0_61] : memref<8x3x256xf32, #tpu.memory_space<vmem>>, vector<1x3x256xf32>
    %202 = vector.shape_cast %201 : vector<1x3x256xf32> to vector<3x256xf32>
    %203 = vector.extract_strided_slice %3 {offsets = [0, 0], sizes = [128, 1], strides = [1, 1]} : vector<128x3xf32> to vector<128x1xf32>
    %204 = vector.extract_strided_slice %202 {offsets = [0, 0], sizes = [1, 256], strides = [1, 1]} : vector<3x256xf32> to vector<1x256xf32>
    %205 = vector.broadcast %203 : vector<128x1xf32> to vector<128x256xf32>
    %206 = vector.broadcast %204 : vector<1x256xf32> to vector<128x256xf32>
    %207 = arith.mulf %205, %206 : vector<128x256xf32>
    %208 = vector.extract_strided_slice %3 {offsets = [0, 1], sizes = [128, 1], strides = [1, 1]} : vector<128x3xf32> to vector<128x1xf32>
    %209 = vector.extract_strided_slice %202 {offsets = [1, 0], sizes = [1, 256], strides = [1, 1]} : vector<3x256xf32> to vector<1x256xf32>
    %210 = vector.broadcast %208 : vector<128x1xf32> to vector<128x256xf32>
    %211 = vector.broadcast %209 : vector<1x256xf32> to vector<128x256xf32>
    %212 = arith.mulf %210, %211 : vector<128x256xf32>
    %213 = arith.addf %207, %212 : vector<128x256xf32>
    %214 = vector.extract_strided_slice %3 {offsets = [0, 2], sizes = [128, 1], strides = [1, 1]} : vector<128x3xf32> to vector<128x1xf32>
    %215 = vector.extract_strided_slice %202 {offsets = [2, 0], sizes = [1, 256], strides = [1, 1]} : vector<3x256xf32> to vector<1x256xf32>
    %216 = vector.broadcast %214 : vector<128x1xf32> to vector<128x256xf32>
    %217 = vector.broadcast %215 : vector<1x256xf32> to vector<128x256xf32>
    %218 = arith.mulf %216, %217 : vector<128x256xf32>
    %219 = arith.addf %213, %218 : vector<128x256xf32>
    %220 = vector.broadcast %4 : vector<128x1xf32> to vector<128x256xf32>
    %221 = arith.addf %219, %220 : vector<128x256xf32>
    %cst_62 = arith.constant 0.000000e+00 : f32
    %222 = vector.broadcast %cst_62 : f32 to vector<128x256xf32>
    %223 = arith.maximumf %221, %222 : vector<128x256xf32>
    %cst_63 = arith.constant dense<0.000000e+00> : vector<128xf32>
    %224 = vector.multi_reduction <add>, %223, %cst_63 [1] : vector<128x256xf32> to vector<128xf32>
    %225 = vector.shape_cast %224 : vector<128xf32> to vector<128x1xf32>
    %c0_64 = arith.constant 0 : index
    %c7_65 = arith.constant 7 : index
    %226 = vector.load %arg8[%c0_64, %c7_65] : memref<128x8xf32, #tpu.memory_space<vmem>>, vector<128x1xf32>
    %227 = arith.addf %226, %225 : vector<128x1xf32>
    %c0_66 = arith.constant 0 : index
    %c7_67 = arith.constant 7 : index
    %228 = vector.load %arg8[%c0_66, %c7_67] : memref<128x8xf32, #tpu.memory_space<vmem>>, vector<128x1xf32>
    tpu.vector_store %arg8[%c0_66, %c7_67], %227 {strides = array<i32>} : memref<128x8xf32, #tpu.memory_space<vmem>>, vector<128x1xf32>,
    %c0_i32_68 = arith.constant 0 : i32
    %229 = arith.cmpi eq, %arg1, %c0_i32_68 : i32
    %230 = arith.extui %229 : i1 to i32
    %c0_i32_69 = arith.constant 0 : i32
    %231 = arith.cmpi ne, %230, %c0_i32_69 : i32
    scf.if %231 {
      %c0_70 = arith.constant 0 : index
      %c0_71 = arith.constant 0 : index
      %232 = vector.load %arg5[%c0_70, %c0_71] : memref<128x128xf32, #tpu.memory_space<vmem>>, vector<128x128xf32>
      %c0_72 = arith.constant 0 : index
      %c0_73 = arith.constant 0 : index
      %233 = vector.load %arg6[%c0_72, %c0_73] : memref<1x128xf32, #tpu.memory_space<vmem>>, vector<1x128xf32>
      %c0_74 = arith.constant 0 : index
      %c0_75 = arith.constant 0 : index
      %234 = vector.load %arg8[%c0_74, %c0_75] : memref<128x8xf32, #tpu.memory_space<vmem>>, vector<128x1xf32>
      %cst_76 = arith.constant 3.906250e-03 : f32
      %235 = vector.broadcast %cst_76 : f32 to vector<128x1xf32>
      %236 = arith.mulf %234, %235 : vector<128x1xf32>
      %237 = vector.broadcast %236 : vector<128x1xf32> to vector<128x128xf32>
      %238 = arith.mulf %237, %232 : vector<128x128xf32>
      %cst_77 = arith.constant dense<0.000000e+00> : vector<128xf32>
      %239 = vector.multi_reduction <add>, %238, %cst_77 [0] : vector<128x128xf32> to vector<128xf32>
      %240 = vector.shape_cast %239 : vector<128xf32> to vector<1x128xf32>
      %241 = arith.addf %240, %233 : vector<1x128xf32>
      %c0_78 = arith.constant 0 : index
      %c0_79 = arith.constant 0 : index
      %242 = vector.load %arg7[%c0_78, %c0_79] : memref<8x128xf32, #tpu.memory_space<vmem>>, vector<1x128xf32>
      tpu.vector_store %arg7[%c0_78, %c0_79], %241 {strides = array<i32>} : memref<8x128xf32, #tpu.memory_space<vmem>>, vector<1x128xf32>,
      %c0_80 = arith.constant 0 : index
      %c1_81 = arith.constant 1 : index
      %243 = vector.load %arg8[%c0_80, %c1_81] : memref<128x8xf32, #tpu.memory_space<vmem>>, vector<128x1xf32>
      %cst_82 = arith.constant 3.906250e-03 : f32
      %244 = vector.broadcast %cst_82 : f32 to vector<128x1xf32>
      %245 = arith.mulf %243, %244 : vector<128x1xf32>
      %246 = vector.broadcast %245 : vector<128x1xf32> to vector<128x128xf32>
      %247 = arith.mulf %246, %232 : vector<128x128xf32>
      %cst_83 = arith.constant dense<0.000000e+00> : vector<128xf32>
      %248 = vector.multi_reduction <add>, %247, %cst_83 [0] : vector<128x128xf32> to vector<128xf32>
      %249 = vector.shape_cast %248 : vector<128xf32> to vector<1x128xf32>
      %250 = arith.addf %249, %233 : vector<1x128xf32>
      %c1_84 = arith.constant 1 : index
      %c0_85 = arith.constant 0 : index
      %251 = vector.load %arg7[%c1_84, %c0_85] : memref<8x128xf32, #tpu.memory_space<vmem>>, vector<1x128xf32>
      tpu.vector_store %arg7[%c1_84, %c0_85], %250 {strides = array<i32>} : memref<8x128xf32, #tpu.memory_space<vmem>>, vector<1x128xf32>,
      %c0_86 = arith.constant 0 : index
      %c2_87 = arith.constant 2 : index
      %252 = vector.load %arg8[%c0_86, %c2_87] : memref<128x8xf32, #tpu.memory_space<vmem>>, vector<128x1xf32>
      %cst_88 = arith.constant 3.906250e-03 : f32
      %253 = vector.broadcast %cst_88 : f32 to vector<128x1xf32>
      %254 = arith.mulf %252, %253 : vector<128x1xf32>
      %255 = vector.broadcast %254 : vector<128x1xf32> to vector<128x128xf32>
      %256 = arith.mulf %255, %232 : vector<128x128xf32>
      %cst_89 = arith.constant dense<0.000000e+00> : vector<128xf32>
      %257 = vector.multi_reduction <add>, %256, %cst_89 [0] : vector<128x128xf32> to vector<128xf32>
      %258 = vector.shape_cast %257 : vector<128xf32> to vector<1x128xf32>
      %259 = arith.addf %258, %233 : vector<1x128xf32>
      %c2_90 = arith.constant 2 : index
      %c0_91 = arith.constant 0 : index
      %260 = vector.load %arg7[%c2_90, %c0_91] : memref<8x128xf32, #tpu.memory_space<vmem>>, vector<1x128xf32>
      tpu.vector_store %arg7[%c2_90, %c0_91], %259 {strides = array<i32>} : memref<8x128xf32, #tpu.memory_space<vmem>>, vector<1x128xf32>,
      %c0_92 = arith.constant 0 : index
      %c3_93 = arith.constant 3 : index
      %261 = vector.load %arg8[%c0_92, %c3_93] : memref<128x8xf32, #tpu.memory_space<vmem>>, vector<128x1xf32>
      %cst_94 = arith.constant 3.906250e-03 : f32
      %262 = vector.broadcast %cst_94 : f32 to vector<128x1xf32>
      %263 = arith.mulf %261, %262 : vector<128x1xf32>
      %264 = vector.broadcast %263 : vector<128x1xf32> to vector<128x128xf32>
      %265 = arith.mulf %264, %232 : vector<128x128xf32>
      %cst_95 = arith.constant dense<0.000000e+00> : vector<128xf32>
      %266 = vector.multi_reduction <add>, %265, %cst_95 [0] : vector<128x128xf32> to vector<128xf32>
      %267 = vector.shape_cast %266 : vector<128xf32> to vector<1x128xf32>
      %268 = arith.addf %267, %233 : vector<1x128xf32>
      %c3_96 = arith.constant 3 : index
      %c0_97 = arith.constant 0 : index
      %269 = vector.load %arg7[%c3_96, %c0_97] : memref<8x128xf32, #tpu.memory_space<vmem>>, vector<1x128xf32>
      tpu.vector_store %arg7[%c3_96, %c0_97], %268 {strides = array<i32>} : memref<8x128xf32, #tpu.memory_space<vmem>>, vector<1x128xf32>,
      %c0_98 = arith.constant 0 : index
      %c4_99 = arith.constant 4 : index
      %270 = vector.load %arg8[%c0_98, %c4_99] : memref<128x8xf32, #tpu.memory_space<vmem>>, vector<128x1xf32>
      %cst_100 = arith.constant 3.906250e-03 : f32
      %271 = vector.broadcast %cst_100 : f32 to vector<128x1xf32>
      %272 = arith.mulf %270, %271 : vector<128x1xf32>
      %273 = vector.broadcast %272 : vector<128x1xf32> to vector<128x128xf32>
      %274 = arith.mulf %273, %232 : vector<128x128xf32>
      %cst_101 = arith.constant dense<0.000000e+00> : vector<128xf32>
      %275 = vector.multi_reduction <add>, %274, %cst_101 [0] : vector<128x128xf32> to vector<128xf32>
      %276 = vector.shape_cast %275 : vector<128xf32> to vector<1x128xf32>
      %277 = arith.addf %276, %233 : vector<1x128xf32>
      %c4_102 = arith.constant 4 : index
      %c0_103 = arith.constant 0 : index
      %278 = vector.load %arg7[%c4_102, %c0_103] : memref<8x128xf32, #tpu.memory_space<vmem>>, vector<1x128xf32>
      tpu.vector_store %arg7[%c4_102, %c0_103], %277 {strides = array<i32>} : memref<8x128xf32, #tpu.memory_space<vmem>>, vector<1x128xf32>,
      %c0_104 = arith.constant 0 : index
      %c5_105 = arith.constant 5 : index
      %279 = vector.load %arg8[%c0_104, %c5_105] : memref<128x8xf32, #tpu.memory_space<vmem>>, vector<128x1xf32>
      %cst_106 = arith.constant 3.906250e-03 : f32
      %280 = vector.broadcast %cst_106 : f32 to vector<128x1xf32>
      %281 = arith.mulf %279, %280 : vector<128x1xf32>
      %282 = vector.broadcast %281 : vector<128x1xf32> to vector<128x128xf32>
      %283 = arith.mulf %282, %232 : vector<128x128xf32>
      %cst_107 = arith.constant dense<0.000000e+00> : vector<128xf32>
      %284 = vector.multi_reduction <add>, %283, %cst_107 [0] : vector<128x128xf32> to vector<128xf32>
      %285 = vector.shape_cast %284 : vector<128xf32> to vector<1x128xf32>
      %286 = arith.addf %285, %233 : vector<1x128xf32>
      %c5_108 = arith.constant 5 : index
      %c0_109 = arith.constant 0 : index
      %287 = vector.load %arg7[%c5_108, %c0_109] : memref<8x128xf32, #tpu.memory_space<vmem>>, vector<1x128xf32>
      tpu.vector_store %arg7[%c5_108, %c0_109], %286 {strides = array<i32>} : memref<8x128xf32, #tpu.memory_space<vmem>>, vector<1x128xf32>,
      %c0_110 = arith.constant 0 : index
      %c6_111 = arith.constant 6 : index
      %288 = vector.load %arg8[%c0_110, %c6_111] : memref<128x8xf32, #tpu.memory_space<vmem>>, vector<128x1xf32>
      %cst_112 = arith.constant 3.906250e-03 : f32
      %289 = vector.broadcast %cst_112 : f32 to vector<128x1xf32>
      %290 = arith.mulf %288, %289 : vector<128x1xf32>
      %291 = vector.broadcast %290 : vector<128x1xf32> to vector<128x128xf32>
      %292 = arith.mulf %291, %232 : vector<128x128xf32>
      %cst_113 = arith.constant dense<0.000000e+00> : vector<128xf32>
      %293 = vector.multi_reduction <add>, %292, %cst_113 [0] : vector<128x128xf32> to vector<128xf32>
      %294 = vector.shape_cast %293 : vector<128xf32> to vector<1x128xf32>
      %295 = arith.addf %294, %233 : vector<1x128xf32>
      %c6_114 = arith.constant 6 : index
      %c0_115 = arith.constant 0 : index
      %296 = vector.load %arg7[%c6_114, %c0_115] : memref<8x128xf32, #tpu.memory_space<vmem>>, vector<1x128xf32>
      tpu.vector_store %arg7[%c6_114, %c0_115], %295 {strides = array<i32>} : memref<8x128xf32, #tpu.memory_space<vmem>>, vector<1x128xf32>,
      %c0_116 = arith.constant 0 : index
      %c7_117 = arith.constant 7 : index
      %297 = vector.load %arg8[%c0_116, %c7_117] : memref<128x8xf32, #tpu.memory_space<vmem>>, vector<128x1xf32>
      %cst_118 = arith.constant 3.906250e-03 : f32
      %298 = vector.broadcast %cst_118 : f32 to vector<128x1xf32>
      %299 = arith.mulf %297, %298 : vector<128x1xf32>
      %300 = vector.broadcast %299 : vector<128x1xf32> to vector<128x128xf32>
      %301 = arith.mulf %300, %232 : vector<128x128xf32>
      %cst_119 = arith.constant dense<0.000000e+00> : vector<128xf32>
      %302 = vector.multi_reduction <add>, %301, %cst_119 [0] : vector<128x128xf32> to vector<128xf32>
      %303 = vector.shape_cast %302 : vector<128xf32> to vector<1x128xf32>
      %304 = arith.addf %303, %233 : vector<1x128xf32>
      %c7_120 = arith.constant 7 : index
      %c0_121 = arith.constant 0 : index
      %305 = vector.load %arg7[%c7_120, %c0_121] : memref<8x128xf32, #tpu.memory_space<vmem>>, vector<1x128xf32>
      tpu.vector_store %arg7[%c7_120, %c0_121], %304 {strides = array<i32>} : memref<8x128xf32, #tpu.memory_space<vmem>>, vector<1x128xf32>,
    } else {
    }
    return
  }
  func.func @transform_0(%arg0: i32, %arg1: i32) -> (i32, i32, i32) {
    %c0_i32 = arith.constant 0 : i32
    %c0_i32_0 = arith.constant 0 : i32
    return %arg0, %c0_i32, %arg1 : i32, i32, i32
  }
  func.func @transform_1(%arg0: i32, %arg1: i32) -> (i32, i32) {
    %c0_i32 = arith.constant 0 : i32
    %c0_i32_0 = arith.constant 0 : i32
    %c0_i32_1 = arith.constant 0 : i32
    return %c0_i32, %c0_i32_0 : i32, i32
  }
  func.func @transform_2(%arg0: i32, %arg1: i32) -> (i32, i32) {
    %c0_i32 = arith.constant 0 : i32
    %c0_i32_0 = arith.constant 0 : i32
    %c0_i32_1 = arith.constant 0 : i32
    return %c0_i32, %c0_i32_0 : i32, i32
  }
  func.func @transform_3(%arg0: i32, %arg1: i32) -> (i32, i32) {
    %c0_i32 = arith.constant 0 : i32
    %c0_i32_0 = arith.constant 0 : i32
    %c0_i32_1 = arith.constant 0 : i32
    return %c0_i32, %c0_i32_0 : i32, i32
  }
  func.func @transform_4(%arg0: i32, %arg1: i32) -> (i32, i32) {
    %c0_i32 = arith.constant 0 : i32
    %c0_i32_0 = arith.constant 0 : i32
    %c0_i32_1 = arith.constant 0 : i32
    return %c0_i32, %c0_i32_0 : i32, i32
  }
  func.func @transform_5(%arg0: i32, %arg1: i32) -> (i32, i32) {
    %c0_i32 = arith.constant 0 : i32
    %c0_i32_0 = arith.constant 0 : i32
    return %arg0, %c0_i32 : i32, i32
  }
}

</mosaic_0001>

<bundles_post_ra>
// kernel: tpu_custom_call.1
= control target key start
LH: loop header
LB: loop body
LE: loop exit
PB: predicated region body
PF: predicated region fallthrough
CT: control target
= control target key end

     0   :  { %v8504_v2 = vmov 1   ;;  %v4699_v3 = vmov 0   ;;  %s8496_s0 = inlined_call_operand.vmem [shape: f32[8,3,256], index: 0, kind: input, shape index: {}]   ;;  %s8497_s1 = inlined_call_operand.vmem [shape: f32[128,3], index: 1, kind: input, shape index: {}]   ;;  %s8498_s2 = inlined_call_operand.vmem [shape: f32[128,1], index: 2, kind: input, shape index: {}]   ;;  %s8499_s3 = inlined_call_operand.vmem [shape: f32[128,128], index: 3, kind: input, shape index: {}]   ;;  %s8500_s4 = inlined_call_operand.vmem [shape: f32[1,128], index: 4, kind: input, shape index: {}]   ;;  %s8501_s5 = inlined_call_operand.hbm [shape: f32[8,128], index: 5, kind: output, shape index: {}]  }
   0x1   :  { %v44_v0 = vld [vmem:[%s8497_s1 + $0x10] sm:$0xff]  ;;  %v42_v1 = vld [vmem:[%s8497_s1] sm:$0xff]  ;;  %4645 = vset.pattern.permute.xlu0 %v8504_v2  ;;  %4644 = vset.pattern.permute.xlu1 %v4699_v3  ;;  %v45_v4 = vld [vmem:[%s8497_s1 + $0x18] sm:$0xff] }
   0x2   :  { %87 = vperm.xlu1 %4644, %v44_v0   ;;  %207 = vperm.xlu0 %4645, %v42_v1   ;;  %v47_v5 = vld [vmem:[%s8497_s1 + $0x28] sm:$0xff]  ;;  %v49_v6 = vld [vmem:[%s8497_s1 + $0x38] sm:$0xff] }
   0x6   :  { %92 = vperm.xlu1 %4644, %v45_v4   ;;  %219 = vperm.xlu0 %4645, %v45_v4  }
   0xa   :  { %102 = vperm.xlu1 %4644, %v47_v5   ;;  %227 = vperm.xlu0 %4645, %v47_v5  }
   0xb   :  { %10 = vsyncpa [#allocation4], 0  ;;  %v51_v7 = vld [vmem:[%s8497_s1 + $0x48] sm:$0xff]  ;;  %v53_v8 = vld [vmem:[%s8497_s1 + $0x58] sm:$0xff]  ;;  %v8502_v12 = vmov 2   ;;  %v156_v25 = vlaneseq  ;;  %vm722_vm0 = vcmask 7168  }
   0xc   :  { %v55_v9 = vld [vmem:[%s8497_s1 + $0x68] sm:$0xff]  ;;  %v57_v10 = vld [vmem:[%s8497_s1 + $0x78] sm:$0xff]  ;;  %v46_v13 = vld [vmem:[%s8497_s1 + $0x20] sm:$0xff]  ;;  %vm25_vm1 = vcmask 64512   ;;  %vm1100_vm2 = vcmask 15368   ;;  %vm1478_vm3 = vcmask 23568  }
   0xd   :  { %v43_v11 = vld [vmem:[%s8497_s1 + $0x8] sm:$0xff]  ;;  %v48_v14 = vld [vmem:[%s8497_s1 + $0x30] sm:$0xff]  ;;  %v50_v15 = vld [vmem:[%s8497_s1 + $0x40] sm:$0xff]  ;;  %v157_v28 = vshrl.u32 %v156_v25, 7  ;;  %vm1856_vm4 = vcmask 31768   ;;  %vm2234_vm5 = vcmask 39968  }
   0xe   :  { %112 = vperm.xlu1 %4644, %v49_v6   ;;  %235 = vperm.xlu0 %4645, %v49_v6   ;;  %v52_v16 = vld [vmem:[%s8497_s1 + $0x50] sm:$0xff]  ;;  %v54_v17 = vld [vmem:[%s8497_s1 + $0x60] sm:$0xff]  ;;  %v61_v20 = vld [vmem:[%s8498_s2 + $0x18] sm:$0xff]  ;;  %vm2612_vm6 = vcmask 48168   ;;  %vm2990_vm7 = vcmask 56368   ;;  %vm3368_vm8 = vcmask 64568  }
   0xf   :  { %v56_v18 = vld [vmem:[%s8497_s1 + $0x70] sm:$0xff]  ;;  %v58_v19 = vld [vmem:[%s8498_s2] sm:$0xff]  ;;  %v63_v21 = vld [vmem:[%s8498_s2 + $0x28] sm:$0xff]  ;;  %v4823_v31 = vsub.s32 0, %v157_v28  ;;  %v4825_v32 = vsub.s32 4, %v157_v28  ;;  %v4827_v33 = vsub.s32 1, %v157_v28 }
  0x10   :  { %v59_v22 = vld [vmem:[%s8498_s2 + $0x8] sm:$0xff]  ;;  %v65_v23 = vld [vmem:[%s8498_s2 + $0x38] sm:$0xff]  ;;  %v60_v24 = vld [vmem:[%s8498_s2 + $0x10] sm:$0xff]  ;;  %v4829_v34 = vsub.s32 5, %v157_v28  ;;  %v4847_v43 = vsub.s32 2, %v157_v28  ;;  %v4849_v44 = vsub.s32 6, %v157_v28 }
  0x11   :  { %v67_v26 = vld [vmem:[%s8498_s2 + $0x48] sm:$0xff]  ;;  %v62_v27 = vld [vmem:[%s8498_s2 + $0x20] sm:$0xff]  ;;  %v69_v29 = vld [vmem:[%s8498_s2 + $0x58] sm:$0xff]  ;;  %8812 = vst [vmem:[#allocation6_spill] sm:$0xff] %v4823_v31 }
  0x12   :  { %122 = vperm.xlu1 %4644, %v51_v7   ;;  %243 = vperm.xlu0 %4645, %v51_v7   ;;  %v64_v30 = vld [vmem:[%s8498_s2 + $0x30] sm:$0xff]  ;;  %8813 = vst [vmem:[#allocation7_spill] sm:$0xff] %v4825_v32  ;;  %8814 = vst [vmem:[#allocation8_spill] sm:$0xff] %v4827_v33  ;;  %v74_v35 = vld [vmem:[%s8496_s0] sm:$0x77] }
  0x13   :  { %8815 = vst [vmem:[#allocation9_spill] sm:$0xff] %v4829_v34  ;;  %v4627_v36 = vld [vmem:[%s8496_s0 + $0x8] sm:$0x77]  ;;  %v66_v38 = vld [vmem:[%s8498_s2 + $0x40] sm:$0xff]  ;;  %v159_v39 = vrot.slane %v74_v35, %v4823_v31  ;;  %v163_v40 = vrot.slane %v74_v35, %v4825_v32  ;;  %v273_v41 = vrot.slane %v74_v35, %v4827_v33  ;;  %v277_v42 = vrot.slane %v74_v35, %v4829_v34  ;;  %v73_v47 = vld [vmem:[%s8498_s2 + $0x78] sm:$0xff] }
  0x14   :  { %v71_v37 = vld [vmem:[%s8498_s2 + $0x68] sm:$0xff]  ;;  %8816 = vst [vmem:[#allocation10_spill] sm:$0xff] %v4847_v43  ;;  %8817 = vst [vmem:[#allocation11_spill] sm:$0xff] %v4849_v44  ;;  %v745_v45 = vrot.slane %v4627_v36, %v4823_v31  ;;  %v749_v46 = vrot.slane %v4627_v36, %v4825_v32  ;;  %v795_v48 = vrot.slane %v4627_v36, %v4827_v33  ;;  %v4628_v50 = vld [vmem:[%s8496_s0 + $0x10] sm:$0x77] }
  0x15   :  { %v799_v49 = vrot.slane %v4627_v36, %v4829_v34  ;;  %v68_v51 = vld [vmem:[%s8498_s2 + $0x50] sm:$0xff]  ;;  %v4865_v52 = vrot.slane %v159_v39, %v4823_v31  ;;  %v4868_v53 = vrot.slane %v163_v40, %v4823_v31  ;;  %v4871_v54 = vrot.slane %v273_v41, %v4827_v33  ;;  %v4879_v56 = vld [vmem:[%s8496_s0 + $0x18] sm:$0x77] }
  0x16   :  { %132 = vperm.xlu1 %4644, %v53_v8   ;;  %251 = vperm.xlu0 %4645, %v53_v8   ;;  %v4874_v55 = vrot.slane %v277_v42, %v4827_v33  ;;  %v419_v57 = vrot.slane %v74_v35, %v4847_v43  ;;  %v423_v58 = vrot.slane %v74_v35, %v4849_v44 }
  0x17   :  { %v4884_v59 = vrot.slane %v745_v45, %v4823_v31  ;;  %v4887_v60 = vrot.slane %v749_v46, %v4823_v31  ;;  %v877_v61 = vrot.slane %v4627_v36, %v4847_v43  ;;  %v881_v62 = vrot.slane %v4627_v36, %v4849_v44 }
  0x18   :  { %v1123_v63 = vrot.slane %v4628_v50, %v4823_v31 }
  0x19   :  { %8818 = vst [vmem:[#allocation12_spill] sm:$0xff] %v4884_v59  ;;  %8819 = vst [vmem:[#allocation13_spill] sm:$0xff] %v4887_v60 }
  0x1a   :  { %142 = vperm.xlu1 %4644, %v55_v9   ;;  %259 = vperm.xlu0 %4645, %v55_v9  }
  0x1e   :  { %152 = vperm.xlu1 %4644, %v57_v10   ;;  %267 = vperm.xlu0 %4645, %v57_v10  }
  0x22   :  { %4646 = vset.pattern.permute.xlu1 %v8504_v2  ;;  %4648 = vset.pattern.permute.xlu0 %v8502_v12 }
  0x23   :  { %211 = vperm.xlu1 %4646, %v43_v11   ;;  %357 = vperm.xlu0 %4648, %v43_v11  }
  0x27   :  { %215 = vperm.xlu1 %4646, %v44_v0   ;;  %369 = vperm.xlu0 %4648, %v46_v13  }
  0x2b   :  { %223 = vperm.xlu1 %4646, %v46_v13   ;;  %377 = vperm.xlu0 %4648, %v48_v14  }
  0x2f   :  { %231 = vperm.xlu1 %4646, %v48_v14   ;;  %385 = vperm.xlu0 %4648, %v50_v15  }
  0x33   :  { %239 = vperm.xlu1 %4646, %v50_v15   ;;  %393 = vperm.xlu0 %4648, %v52_v16  }
  0x37   :  { %247 = vperm.xlu1 %4646, %v52_v16   ;;  %401 = vperm.xlu0 %4648, %v54_v17  }
  0x3b   :  { %255 = vperm.xlu1 %4646, %v54_v17   ;;  %409 = vperm.xlu0 %4648, %v56_v18  }
  0x3f   :  { %263 = vperm.xlu1 %4646, %v56_v18   ;;  %4649 = vset.pattern.permute.xlu0 %v4699_v3 }
  0x40   :  { %77 = vperm.xlu0 %4649, %v42_v1  }
  0x43   :  { %4647 = vset.pattern.permute.xlu1 %v8502_v12 }
  0x44   :  { %353 = vperm.xlu1 %4647, %v42_v1   ;;  %82 = vperm.xlu0 %4649, %v43_v11   ;;  %v1173_v1 = vrot.slane %v4628_v50, %v4827_v33  ;;  %v4909_v11 = vrot.slane %v419_v57, %v4847_v43 }
  0x48   :  { %361 = vperm.xlu1 %4647, %v44_v0   ;;  %97 = vperm.xlu0 %4649, %v46_v13   ;;  %v1127_v0 = vrot.slane %v4628_v50, %v4825_v32  ;;  %v4912_v13 = vrot.slane %v423_v58, %v4847_v43 }
  0x4c   :  { %365 = vperm.xlu1 %4647, %v45_v4   ;;  %107 = vperm.xlu0 %4649, %v48_v14   ;;  %v1501_v4 = vrot.slane %v4879_v56, %v4823_v31  ;;  %v4915_v14 = vrot.slane %v795_v48, %v4827_v33 }
  0x50   :  { %373 = vperm.xlu1 %4647, %v47_v5   ;;  %117 = vperm.xlu0 %4649, %v50_v15   ;;  %v1505_v5 = vrot.slane %v4879_v56, %v4825_v32  ;;  %v4918_v15 = vrot.slane %v799_v49, %v4827_v33 }
  0x52   :  { %v4946_v25 = vrot.slane %v1505_v5, %v4823_v31 }
  0x54   :  { %381 = vperm.xlu1 %4647, %v49_v6   ;;  %127 = vperm.xlu0 %4649, %v52_v16   ;;  %v70_v6 = vld [vmem:[%s8498_s2 + $0x60] sm:$0xff]  ;;  %v4921_v16 = vrot.slane %v877_v61, %v4847_v43  ;;  %8825 = vst [vmem:[#allocation19_spill] sm:$0xff] %v4946_v25 }
  0x58   :  { %389 = vperm.xlu1 %4647, %v51_v7   ;;  %137 = vperm.xlu0 %4649, %v54_v17   ;;  %v1255_v7 = vrot.slane %v4628_v50, %v4847_v43  ;;  %v4924_v17 = vrot.slane %v881_v62, %v4847_v43 }
  0x5c   :  { %397 = vperm.xlu1 %4647, %v53_v8   ;;  %147 = vperm.xlu0 %4649, %v56_v18   ;;  %v1259_v8 = vrot.slane %v4628_v50, %v4849_v44  ;;  %v4927_v18 = vrot.slane %v1123_v63, %v4823_v31 }
  0x5e   :  { %8820 = vst [vmem:[#allocation14_spill] sm:$0xff] %v4927_v18  ;;  %v4955_v28 = vrot.slane %v1259_v8, %v4847_v43 }
  0x60   :  { %405 = vperm.xlu1 %4647, %v55_v9   ;;  %500 = vperm.xlu0 %4649, %v58_v19   ;;  %v1551_v9 = vrot.slane %v4879_v56, %v4827_v33  ;;  %v4930_v19 = vrot.slane %v1127_v0, %v4823_v31  ;;  %8827 = vst [vmem:[#allocation21_spill] sm:$0xff] %v4955_v28 }
  0x62   :  { %8821 = vst [vmem:[#allocation15_spill] sm:$0xff] %v4930_v19 }
  0x64   :  { %413 = vperm.xlu1 %4647, %v57_v10   ;;  %515 = vperm.xlu0 %4649, %v61_v20   ;;  %v1555_v10 = vrot.slane %v4879_v56, %v4829_v34 }
  0x68   :  { %4650 = vset.pattern.permute.xlu1 %v4699_v3  ;;  %525 = vperm.xlu0 %4649, %v63_v21   ;;  %v1177_v3 = vrot.slane %v4628_v50, %v4829_v34 }
  0x69   :  { %505 = vperm.xlu1 %4650, %v59_v22   ;;  %v4937_v22 = vrot.slane %v1173_v1, %v4827_v33 }
  0x6c   :  { %535 = vperm.xlu0 %4649, %v65_v23   ;;  %v4940_v23 = vrot.slane %v1177_v3, %v4827_v33 }
  0x6d   :  { %510 = vperm.xlu1 %4650, %v60_v24   ;;  %v4943_v24 = vrot.slane %v1501_v4, %v4823_v31 }
  0x6f   :  { %8824 = vst [vmem:[#allocation18_spill] sm:$0xff] %v4943_v24 }
  0x70   :  { %545 = vperm.xlu0 %4649, %v67_v26   ;;  %v72_v26 = vld [vmem:[%s8498_s2 + $0x70] sm:$0xff] }
  0x71   :  { %520 = vperm.xlu1 %4650, %v62_v27   ;;  %v4952_v27 = vrot.slane %v1255_v7, %v4847_v43 }
  0x73   :  { %8826 = vst [vmem:[#allocation20_spill] sm:$0xff] %v4952_v27 }
  0x74   :  { %555 = vperm.xlu0 %4649, %v69_v29   ;;  %v4958_v29 = vrot.slane %v1551_v9, %v4827_v33 }
  0x75   :  { %530 = vperm.xlu1 %4650, %v64_v30   ;;  %v4961_v30 = vrot.slane %v1555_v10, %v4827_v33 }
  0x76   :  { %8828 = vst [vmem:[#allocation22_spill] sm:$0xff] %v4958_v29 }
  0x77   :  { %8829 = vst [vmem:[#allocation23_spill] sm:$0xff] %v4961_v30 }
  0x78   :  { %565 = vperm.xlu0 %4649, %v71_v37  }
  0x79   :  { %540 = vperm.xlu1 %4650, %v66_v38  }
  0x7c   :  { %575 = vperm.xlu0 %4649, %v73_v47  }
  0x7d   :  { %550 = vperm.xlu1 %4650, %v68_v51  }
  0x81   :  { %v4932_v20 = vpop.permute.xlu1 %87  ;;  %560 = vperm.xlu1 %4650, %v70_v6   ;;  %v4934_v21 = vpop.permute.xlu0 %207 }
  0x82   :  { %8822 = vst [vmem:[#allocation16_spill] sm:$0xff] %v4932_v20  ;;  %8823 = vst [vmem:[#allocation17_spill] sm:$0xff] %v4934_v21  ;;  %v4965_v35 = vmul.f32 %v4871_v54, %v4934_v21  ;;  %v4969_v36 = vmul.f32 %v4874_v55, %v4934_v21  ;;  %v4973_v37 = vmul.f32 %v4865_v52, %v4932_v20 }
  0x83   :  { %v4977_v38 = vmul.f32 %v4868_v53, %v4932_v20  ;;  %v4981_v39 = vmul.f32 %v4915_v14, %v4934_v21  ;;  %v4985_v40 = vmul.f32 %v4918_v15, %v4934_v21  ;;  %v4989_v41 = vmul.f32 %v4884_v59, %v4932_v20 }
  0x84   :  { %v4993_v42 = vmul.f32 %v4887_v60, %v4932_v20  ;;  %v5001_v47 = vmul.f32 %v4937_v22, %v4934_v21  ;;  %v5005_v48 = vmul.f32 %v4940_v23, %v4934_v21  ;;  %v5009_v49 = vmul.f32 %v4927_v18, %v4932_v20 }
  0x85   :  { %8830 = vst [vmem:[#allocation24_spill] sm:$0xff] %v4985_v40  ;;  %v4995_v45 = vpop.permute.xlu1 %92  ;;  %570 = vperm.xlu1 %4650, %v72_v26   ;;  %v4997_v46 = vpop.permute.xlu0 %219  ;;  %v5013_v50 = vmul.f32 %v4930_v19, %v4932_v20 }
  0x86   :  { %8831 = vst [vmem:[#allocation25_spill] sm:$0xff] %v4995_v45  ;;  %8832 = vst [vmem:[#allocation26_spill] sm:$0xff] %v4997_v46  ;;  %v180_v51 = vmul.f32 %v4865_v52, %v4995_v45  ;;  %v181_v57 = vmul.f32 %v4868_v53, %v4995_v45  ;;  %v294_v58 = vmul.f32 %v4871_v54, %v4997_v46 }
  0x87   :  { %8833 = vst [vmem:[#allocation27_spill] sm:$0xff] %v5001_v47  ;;  %8834 = vst [vmem:[#allocation28_spill] sm:$0xff] %v5005_v48  ;;  %v295_v61 = vmul.f32 %v4874_v55, %v4997_v46  ;;  %v766_v62 = vmul.f32 %v4884_v59, %v4995_v45  ;;  %v767_v63 = vmul.f32 %v4887_v60, %v4995_v45 }
  0x88   :  { %v816_v0 = vmul.f32 %v4915_v14, %v4997_v46  ;;  %v817_v1 = vmul.f32 %v4918_v15, %v4997_v46  ;;  %v5031_v3 = vadd.f32 %v294_v58, %v180_v51  ;;  %v1144_v5 = vmul.f32 %v4927_v18, %v4995_v45 }
  0x89   :  { %v5033_v4 = vadd.f32 %v295_v61, %v181_v57  ;;  %v1145_v6 = vmul.f32 %v4930_v19, %v4995_v45  ;;  %v5039_v7 = vpop.permute.xlu1 %102  ;;  %v5041_v8 = vpop.permute.xlu0 %227  ;;  %v1194_v26 = vmul.f32 %v4937_v22, %v4997_v46  ;;  %v1195_v51 = vmul.f32 %v4940_v23, %v4997_v46 }
  0x8a   :  { %8835 = vst [vmem:[#allocation29_spill] sm:$0xff] %v5031_v3  ;;  %8837 = vst [vmem:[#allocation31_spill] sm:$0xff] %v5039_v7  ;;  %v5043_v9 = vadd.f32 %v816_v0, %v766_v62  ;;  %v5045_v10 = vadd.f32 %v817_v1, %v767_v63  ;;  %v184_v57 = vmul.f32 %v4865_v52, %v5039_v7 }
  0x8b   :  { %8836 = vst [vmem:[#allocation30_spill] sm:$0xff] %v5033_v4  ;;  %8838 = vst [vmem:[#allocation32_spill] sm:$0xff] %v5041_v8  ;;  %v185_v58 = vmul.f32 %v4868_v53, %v5039_v7  ;;  %v298_v61 = vmul.f32 %v4871_v54, %v5041_v8  ;;  %v299_v62 = vmul.f32 %v4874_v55, %v5041_v8 }
  0x8c   :  { %8839 = vst [vmem:[#allocation33_spill] sm:$0xff] %v5043_v9  ;;  %8840 = vst [vmem:[#allocation34_spill] sm:$0xff] %v5045_v10  ;;  %v770_v63 = vmul.f32 %v4884_v59, %v5039_v7  ;;  %v771_v0 = vmul.f32 %v4887_v60, %v5039_v7  ;;  %v820_v1 = vmul.f32 %v4915_v14, %v5041_v8 }
  0x8d   :  { %v821_v12 = vmul.f32 %v4918_v15, %v5041_v8  ;;  %v5067_v2 = vadd.f32 %v298_v61, %v184_v57  ;;  %v5069_v34 = vadd.f32 %v299_v62, %v185_v58  ;;  %v5071_v33 = vadd.f32 %v1194_v26, %v1144_v5  ;;  %v5075_v31 = vpop.permute.xlu1 %112  ;;  %v5077_v20 = vpop.permute.xlu0 %235 }
  0x8e   :  { %v5073_v32 = vadd.f32 %v1195_v51, %v1145_v6  ;;  %8845 = vst [vmem:[#allocation39_spill] sm:$0xff] %v5075_v31  ;;  %8846 = vst [vmem:[#allocation40_spill] sm:$0xff] %v5077_v20  ;;  %v5079_v21 = vadd.f32 %v820_v1, %v770_v63  ;;  %v1148_v9 = vmul.f32 %v4927_v18, %v5039_v7 }
  0x8f   :  { %8841 = vst [vmem:[#allocation35_spill] sm:$0xff] %v5067_v2  ;;  %8842 = vst [vmem:[#allocation36_spill] sm:$0xff] %v5069_v34  ;;  %v5081_v10 = vadd.f32 %v821_v12, %v771_v0  ;;  %v1149_v57 = vmul.f32 %v4930_v19, %v5039_v7  ;;  %v188_v5 = vmul.f32 %v4865_v52, %v5075_v31 }
  0x90   :  { %8843 = vst [vmem:[#allocation37_spill] sm:$0xff] %v5071_v33  ;;  %8844 = vst [vmem:[#allocation38_spill] sm:$0xff] %v5073_v32  ;;  %v189_v6 = vmul.f32 %v4868_v53, %v5075_v31  ;;  %v302_v26 = vmul.f32 %v4871_v54, %v5077_v20  ;;  %v303_v51 = vmul.f32 %v4874_v55, %v5077_v20 }
  0x91   :  { %8847 = vst [vmem:[#allocation41_spill] sm:$0xff] %v5079_v21  ;;  %8848 = vst [vmem:[#allocation42_spill] sm:$0xff] %v5081_v10  ;;  %v774_v12 = vmul.f32 %v4884_v59, %v5075_v31  ;;  %v775_v58 = vmul.f32 %v4887_v60, %v5075_v31  ;;  %v824_v61 = vmul.f32 %v4915_v14, %v5077_v20  ;;  %v5111_v32 = vpop.permute.xlu1 %122  ;;  %v5113_v33 = vpop.permute.xlu0 %243 }
  0x92   :  { %v825_v62 = vmul.f32 %v4918_v15, %v5077_v20  ;;  %v5103_v63 = vadd.f32 %v302_v26, %v188_v5  ;;  %v5105_v0 = vadd.f32 %v303_v51, %v189_v6  ;;  %v1198_v1 = vmul.f32 %v4937_v22, %v5041_v8  ;;  %8851 = vst [vmem:[#allocation45_spill] sm:$0xff] %v5111_v32 }
  0x93   :  { %v1199_v7 = vmul.f32 %v4940_v23, %v5041_v8  ;;  %8852 = vst [vmem:[#allocation46_spill] sm:$0xff] %v5113_v33  ;;  %v5115_v10 = vadd.f32 %v824_v61, %v774_v12  ;;  %v1152_v5 = vmul.f32 %v4927_v18, %v5075_v31  ;;  %v1153_v6 = vmul.f32 %v4930_v19, %v5075_v31 }
  0x94   :  { %8849 = vst [vmem:[#allocation43_spill] sm:$0xff] %v5103_v63  ;;  %8850 = vst [vmem:[#allocation44_spill] sm:$0xff] %v5105_v0  ;;  %v5117_v21 = vadd.f32 %v825_v62, %v775_v58  ;;  %v192_v26 = vmul.f32 %v4865_v52, %v5111_v32  ;;  %v193_v51 = vmul.f32 %v4868_v53, %v5111_v32 }
  0x95   :  { %8853 = vst [vmem:[#allocation47_spill] sm:$0xff] %v5115_v10  ;;  %v306_v8 = vmul.f32 %v4871_v54, %v5113_v33  ;;  %v307_v12 = vmul.f32 %v4874_v55, %v5113_v33  ;;  %v778_v58 = vmul.f32 %v4884_v59, %v5111_v32  ;;  %v779_v61 = vmul.f32 %v4887_v60, %v5111_v32  ;;  %v5147_v34 = vpop.permute.xlu1 %132  ;;  %v5149_v2 = vpop.permute.xlu0 %251 }
  0x96   :  { %8854 = vst [vmem:[#allocation48_spill] sm:$0xff] %v5117_v21  ;;  %v828_v62 = vmul.f32 %v4915_v14, %v5113_v33  ;;  %v829_v31 = vmul.f32 %v4918_v15, %v5113_v33  ;;  %v5143_v0 = vadd.f32 %v1198_v1, %v1148_v9  ;;  %v5145_v63 = vadd.f32 %v1199_v7, %v1149_v57 }
  0x97   :  { %v5139_v21 = vadd.f32 %v306_v8, %v192_v26  ;;  %v5141_v10 = vadd.f32 %v307_v12, %v193_v51  ;;  %8859 = vst [vmem:[#allocation53_spill] sm:$0xff] %v5147_v34  ;;  %8860 = vst [vmem:[#allocation54_spill] sm:$0xff] %v5149_v2  ;;  %v1202_v48 = vmul.f32 %v4937_v22, %v5077_v20 }
  0x98   :  { %8857 = vst [vmem:[#allocation51_spill] sm:$0xff] %v5143_v0  ;;  %8858 = vst [vmem:[#allocation52_spill] sm:$0xff] %v5145_v63  ;;  %v5151_v4 = vadd.f32 %v828_v62, %v778_v58  ;;  %v5153_v3 = vadd.f32 %v829_v31, %v779_v61  ;;  %v1203_v8 = vmul.f32 %v4940_v23, %v5077_v20 }
  0x99   :  { %8855 = vst [vmem:[#allocation49_spill] sm:$0xff] %v5139_v21  ;;  %8856 = vst [vmem:[#allocation50_spill] sm:$0xff] %v5141_v10  ;;  %v196_v9 = vmul.f32 %v4865_v52, %v5147_v34  ;;  %v197_v7 = vmul.f32 %v4868_v53, %v5147_v34  ;;  %v310_v57 = vmul.f32 %v4871_v54, %v5149_v2  ;;  %v5183_v63 = vpop.permute.xlu1 %142  ;;  %v5185_v0 = vpop.permute.xlu0 %259 }
  0x9a   :  { %8861 = vst [vmem:[#allocation55_spill] sm:$0xff] %v5151_v4  ;;  %8862 = vst [vmem:[#allocation56_spill] sm:$0xff] %v5153_v3  ;;  %v311_v1 = vmul.f32 %v4874_v55, %v5149_v2  ;;  %v782_v31 = vmul.f32 %v4884_v59, %v5147_v34  ;;  %v783_v26 = vmul.f32 %v4887_v60, %v5147_v34 }
  0x9b   :  { %v832_v51 = vmul.f32 %v4915_v14, %v5149_v2  ;;  %v833_v12 = vmul.f32 %v4918_v15, %v5149_v2  ;;  %v5175_v58 = vadd.f32 %v310_v57, %v196_v9  ;;  %v5179_v62 = vadd.f32 %v1202_v48, %v1152_v5  ;;  %8867 = vst [vmem:[#allocation61_spill] sm:$0xff] %v5183_v63 }
  0x9c   :  { %v5177_v61 = vadd.f32 %v311_v1, %v197_v7  ;;  %v5181_v20 = vadd.f32 %v1203_v8, %v1153_v6  ;;  %8868 = vst [vmem:[#allocation62_spill] sm:$0xff] %v5185_v0  ;;  %v1156_v10 = vmul.f32 %v4927_v18, %v5111_v32  ;;  %v1157_v9 = vmul.f32 %v4930_v19, %v5111_v32 }
  0x9d   :  { %8863 = vst [vmem:[#allocation57_spill] sm:$0xff] %v5175_v58  ;;  %8865 = vst [vmem:[#allocation59_spill] sm:$0xff] %v5179_v62  ;;  %v5187_v3 = vadd.f32 %v832_v51, %v782_v31  ;;  %v5189_v4 = vadd.f32 %v833_v12, %v783_v26  ;;  %v200_v48 = vmul.f32 %v4865_v52, %v5183_v63  ;;  %v5221_v62 = vpop.permute.xlu0 %267 }
  0x9e   :  { %8864 = vst [vmem:[#allocation58_spill] sm:$0xff] %v5177_v61  ;;  %8866 = vst [vmem:[#allocation60_spill] sm:$0xff] %v5181_v20  ;;  %v201_v5 = vmul.f32 %v4868_v53, %v5183_v63  ;;  %v314_v6 = vmul.f32 %v4871_v54, %v5185_v0  ;;  %v315_v8 = vmul.f32 %v4874_v55, %v5185_v0  ;;  %v5219_v20 = vpop.permute.xlu1 %152 }
  0x9f   :  { %8869 = vst [vmem:[#allocation63_spill] sm:$0xff] %v5187_v3  ;;  %8870 = vst [vmem:[#allocation64_spill] sm:$0xff] %v5189_v4  ;;  %v786_v7 = vmul.f32 %v4884_v59, %v5183_v63  ;;  %v787_v57 = vmul.f32 %v4887_v60, %v5183_v63  ;;  %v836_v1 = vmul.f32 %v4915_v14, %v5185_v0 }
  0xa0   :  { %v837_v31 = vmul.f32 %v4918_v15, %v5185_v0  ;;  %v5211_v26 = vadd.f32 %v314_v6, %v200_v48  ;;  %v5213_v51 = vadd.f32 %v315_v8, %v201_v5  ;;  %v1206_v12 = vmul.f32 %v4937_v22, %v5113_v33  ;;  %8873 = vst [vmem:[#allocation67_spill] sm:$0xff] %v5219_v20 }
  0xa1   :  { %v1207_v32 = vmul.f32 %v4940_v23, %v5113_v33  ;;  %8874 = vst [vmem:[#allocation68_spill] sm:$0xff] %v5221_v62  ;;  %v5223_v4 = vadd.f32 %v836_v1, %v786_v7  ;;  %v1160_v48 = vmul.f32 %v4927_v18, %v5147_v34  ;;  %v1161_v5 = vmul.f32 %v4930_v19, %v5147_v34 }
  0xa2   :  { %8871 = vst [vmem:[#allocation65_spill] sm:$0xff] %v5211_v26  ;;  %8872 = vst [vmem:[#allocation66_spill] sm:$0xff] %v5213_v51  ;;  %v5225_v3 = vadd.f32 %v837_v31, %v787_v57  ;;  %v204_v6 = vmul.f32 %v4865_v52, %v5219_v20  ;;  %v205_v8 = vmul.f32 %v4868_v53, %v5219_v20  ;;  %v5263_v40 = vpop.permute.xlu1 %211 }
  0xa3   :  { %8875 = vst [vmem:[#allocation69_spill] sm:$0xff] %v5223_v4  ;;  %v318_v33 = vmul.f32 %v4871_v54, %v5221_v62  ;;  %v319_v7 = vmul.f32 %v4874_v55, %v5221_v62  ;;  %v790_v57 = vmul.f32 %v4884_v59, %v5219_v20  ;;  %v791_v1 = vmul.f32 %v4887_v60, %v5219_v20 }
  0xa4   :  { %8876 = vst [vmem:[#allocation70_spill] sm:$0xff] %v5225_v3  ;;  %v840_v31 = vmul.f32 %v4915_v14, %v5221_v62  ;;  %v841_v34 = vmul.f32 %v4918_v15, %v5221_v62  ;;  %v5251_v51 = vadd.f32 %v1206_v12, %v1156_v10  ;;  %v5253_v26 = vadd.f32 %v1207_v32, %v1157_v9 }
  0xa5   :  { %v5247_v3 = vadd.f32 %v318_v33, %v204_v6  ;;  %v5249_v4 = vadd.f32 %v319_v7, %v205_v8  ;;  %v1210_v21 = vmul.f32 %v4937_v22, %v5149_v2  ;;  %v1211_v47 = vmul.f32 %v4940_v23, %v5149_v2  ;;  %8883 = vst [vmem:[#allocation77_spill] sm:$0xff] %v5263_v40  ;;  %v5265_v33 = vpop.permute.xlu0 %357 }
  0xa6   :  { %8879 = vst [vmem:[#allocation73_spill] sm:$0xff] %v5251_v51  ;;  %8880 = vst [vmem:[#allocation74_spill] sm:$0xff] %v5253_v26  ;;  %v5255_v61 = vadd.f32 %v840_v31, %v790_v57  ;;  %v5257_v58 = vadd.f32 %v841_v34, %v791_v1  ;;  %v1164_v10 = vmul.f32 %v4927_v18, %v5183_v63 }
  0xa7   :  { %8877 = vst [vmem:[#allocation71_spill] sm:$0xff] %v5247_v3  ;;  %8878 = vst [vmem:[#allocation72_spill] sm:$0xff] %v5249_v4  ;;  %v1165_v32 = vmul.f32 %v4930_v19, %v5183_v63  ;;  %v1214_v34 = vmul.f32 %v4937_v22, %v5185_v0  ;;  %v1215_v9 = vmul.f32 %v4940_v23, %v5185_v0 }
  0xa8   :  { %8881 = vst [vmem:[#allocation75_spill] sm:$0xff] %v5255_v61  ;;  %8882 = vst [vmem:[#allocation76_spill] sm:$0xff] %v5257_v58  ;;  %v5277_v12 = vmul.f32 %v4871_v54, %v5263_v40  ;;  %v5281_v6 = vmul.f32 %v4874_v55, %v5263_v40  ;;  %v5285_v8 = vmul.f32 %v4909_v11, %v5265_v33  ;;  %v5323_v58 = vpop.permute.xlu1 %215 }
  0xa9   :  { %8884 = vst [vmem:[#allocation78_spill] sm:$0xff] %v5265_v33  ;;  %v5289_v7 = vmul.f32 %v4912_v13, %v5265_v33  ;;  %v5293_v57 = vmul.f32 %v4915_v14, %v5263_v40  ;;  %v5297_v1 = vmul.f32 %v4918_v15, %v5263_v40  ;;  %v5301_v31 = vmul.f32 %v4921_v16, %v5265_v33  ;;  %v5325_v61 = vpop.permute.xlu0 %369 }
  0xaa   :  { %v5305_v0 = vmul.f32 %v4924_v17, %v5265_v33  ;;  %v5309_v63 = vmul.f32 %v4937_v22, %v5263_v40  ;;  %v5313_v2 = vmul.f32 %v4940_v23, %v5263_v40  ;;  %v5317_v26 = vmul.f32 %v4952_v27, %v5265_v33  ;;  %8890 = vst [vmem:[#allocation84_spill] sm:$0xff] %v5323_v58 }
  0xab   :  { %v5321_v51 = vmul.f32 %v4955_v28, %v5265_v33  ;;  %8891 = vst [vmem:[#allocation85_spill] sm:$0xff] %v5325_v61  ;;  %v5327_v4 = vadd.f32 %v1210_v21, %v1160_v48  ;;  %v5329_v3 = vadd.f32 %v1211_v47, %v1161_v5  ;;  %v5345_v21 = vmul.f32 %v4912_v13, %v5325_v61 }
  0xac   :  { %8885 = vst [vmem:[#allocation79_spill] sm:$0xff] %v5305_v0  ;;  %8886 = vst [vmem:[#allocation80_spill] sm:$0xff] %v5309_v63  ;;  %v5331_v63 = vadd.f32 %v1214_v34, %v1164_v10  ;;  %v5333_v0 = vadd.f32 %v1215_v9, %v1165_v32  ;;  %v814_v47 = vmul.f32 %v4915_v14, %v5323_v58 }
  0xad   :  { %8887 = vst [vmem:[#allocation81_spill] sm:$0xff] %v5313_v2  ;;  %8888 = vst [vmem:[#allocation82_spill] sm:$0xff] %v5317_v26  ;;  %v292_v2 = vmul.f32 %v4871_v54, %v5323_v58  ;;  %v293_v26 = vmul.f32 %v4874_v55, %v5323_v58  ;;  %v815_v48 = vmul.f32 %v4918_v15, %v5323_v58 }
  0xae   :  { %8889 = vst [vmem:[#allocation83_spill] sm:$0xff] %v5321_v51  ;;  %8892 = vst [vmem:[#allocation86_spill] sm:$0xff] %v5327_v4  ;;  %v5341_v51 = vmul.f32 %v4909_v11, %v5325_v61  ;;  %v5353_v5 = vmul.f32 %v4921_v16, %v5325_v61  ;;  %v5357_v10 = vmul.f32 %v4924_v17, %v5325_v61 }
  0xaf   :  { %8893 = vst [vmem:[#allocation87_spill] sm:$0xff] %v5329_v3  ;;  %8894 = vst [vmem:[#allocation88_spill] sm:$0xff] %v5331_v63  ;;  %v5360_v32 = vadd.f32 %v292_v2, %v4973_v37  ;;  %v5363_v34 = vadd.f32 %v293_v26, %v4977_v38  ;;  %v1192_v9 = vmul.f32 %v4937_v22, %v5323_v58  ;;  %v5369_v63 = vpop.permute.xlu1 %223  ;;  %v5371_v3 = vpop.permute.xlu0 %377 }
  0xb0   :  { %8895 = vst [vmem:[#allocation89_spill] sm:$0xff] %v5333_v0  ;;  %8896 = vst [vmem:[#allocation90_spill] sm:$0xff] %v5353_v5  ;;  %v1193_v0 = vmul.f32 %v4940_v23, %v5323_v58  ;;  %v5374_v4 = vadd.f32 %v814_v47, %v4989_v41  ;;  %v5381_v2 = vmul.f32 %v4952_v27, %v5325_v61 }
  0xb1   :  { %8897 = vst [vmem:[#allocation91_spill] sm:$0xff] %v5357_v10  ;;  %8898 = vst [vmem:[#allocation92_spill] sm:$0xff] %v5369_v63  ;;  %v5377_v10 = vadd.f32 %v815_v48, %v4993_v42  ;;  %v5385_v37 = vmul.f32 %v4955_v28, %v5325_v61  ;;  %v5389_v38 = vmul.f32 %v4871_v54, %v5369_v63 }
  0xb2   :  { %8899 = vst [vmem:[#allocation93_spill] sm:$0xff] %v5371_v3  ;;  %8900 = vst [vmem:[#allocation94_spill] sm:$0xff] %v5381_v2  ;;  %v5393_v26 = vmul.f32 %v4874_v55, %v5369_v63  ;;  %v5397_v41 = vmul.f32 %v4909_v11, %v5371_v3  ;;  %v5401_v42 = vmul.f32 %v4912_v13, %v5371_v3 }
  0xb3   :  { %8901 = vst [vmem:[#allocation95_spill] sm:$0xff] %v5385_v37  ;;  %v5405_v47 = vmul.f32 %v4915_v14, %v5369_v63  ;;  %v5409_v48 = vmul.f32 %v4918_v15, %v5369_v63  ;;  %v5413_v61 = vmul.f32 %v4921_v16, %v5371_v3  ;;  %v5417_v58 = vmul.f32 %v4924_v17, %v5371_v3 }
  0xb4   :  { %v5420_v37 = vadd.f32 %v1192_v9, %v5009_v49  ;;  %v5423_v2 = vadd.f32 %v1193_v0, %v5013_v50  ;;  %v5427_v5 = vmul.f32 %v4937_v22, %v5369_v63  ;;  %v5443_v49 = vmul.f32 %v4955_v28, %v5371_v3 }
  0xb5   :  { %8902 = vst [vmem:[#allocation96_spill] sm:$0xff] %v5405_v47  ;;  %8903 = vst [vmem:[#allocation97_spill] sm:$0xff] %v5409_v48  ;;  %v5431_v48 = vmul.f32 %v4940_v23, %v5369_v63  ;;  %v5433_v47 = vpop.permute.xlu1 %231  ;;  %v1168_v50 = vmul.f32 %v4927_v18, %v5219_v20  ;;  %v1169_v0 = vmul.f32 %v4930_v19, %v5219_v20 }
  0xb6   :  { %8904 = vst [vmem:[#allocation98_spill] sm:$0xff] %v5413_v61  ;;  %8905 = vst [vmem:[#allocation99_spill] sm:$0xff] %v5417_v58  ;;  %v5435_v61 = vpop.permute.xlu0 %385  ;;  %v5439_v58 = vmul.f32 %v4952_v27, %v5371_v3  ;;  %v5451_v9 = vmul.f32 %v4871_v54, %v5433_v47  ;;  %v5455_v63 = vmul.f32 %v4874_v55, %v5433_v47 }
  0xb7   :  { %8906 = vst [vmem:[#allocation100_spill] sm:$0xff] %v5420_v37  ;;  %8907 = vst [vmem:[#allocation101_spill] sm:$0xff] %v5423_v2  ;;  %v5463_v3 = vmul.f32 %v4912_v13, %v5435_v61  ;;  %v5471_v20 = vmul.f32 %v4918_v15, %v5433_v47  ;;  %v5483_v2 = vmul.f32 %v4937_v22, %v5433_v47 }
  0xb8   :  { %8908 = vst [vmem:[#allocation102_spill] sm:$0xff] %v5427_v5  ;;  %8909 = vst [vmem:[#allocation103_spill] sm:$0xff] %v5431_v48  ;;  %v5475_v48 = vmul.f32 %v4921_v16, %v5435_v61  ;;  %v5479_v5 = vmul.f32 %v4924_v17, %v5435_v61  ;;  %v5487_v37 = vmul.f32 %v4940_v23, %v5433_v47 }
  0xb9   :  { %8910 = vst [vmem:[#allocation104_spill] sm:$0xff] %v5433_v47  ;;  %8911 = vst [vmem:[#allocation105_spill] sm:$0xff] %v5435_v61 }
  0xba   :  { %8912 = vst [vmem:[#allocation106_spill] sm:$0xff] %v5439_v58  ;;  %8913 = vst [vmem:[#allocation107_spill] sm:$0xff] %v5443_v49  ;;  %v5459_v58 = vmul.f32 %v4909_v11, %v5435_v61  ;;  %v5467_v49 = vmul.f32 %v4915_v14, %v5433_v47  ;;  %v5507_v47 = vmul.f32 %v4958_v29, %v5263_v40 }
  0xbb   :  { %8915 = vst [vmem:[#allocation109_spill] sm:$0xff] %v5463_v3  ;;  %8917 = vst [vmem:[#allocation111_spill] sm:$0xff] %v5471_v20  ;;  %v5495_v20 = vmul.f32 %v4955_v28, %v5435_v61  ;;  %v5499_v3 = vpop.permute.xlu0 %393 }
  0xbc   :  { %8914 = vst [vmem:[#allocation108_spill] sm:$0xff] %v5459_v58  ;;  %8916 = vst [vmem:[#allocation110_spill] sm:$0xff] %v5467_v49  ;;  %v5491_v49 = vmul.f32 %v4952_v27, %v5435_v61  ;;  %v5543_v58 = vmul.f32 %v4924_v17, %v5499_v3 }
  0xbd   :  { %8918 = vst [vmem:[#allocation112_spill] sm:$0xff] %v5475_v48  ;;  %8919 = vst [vmem:[#allocation113_spill] sm:$0xff] %v5479_v5  ;;  %v5497_v48 = vpop.permute.xlu1 %239  ;;  %v1218_v5 = vmul.f32 %v4937_v22, %v5221_v62 }
  0xbe   :  { %8920 = vst [vmem:[#allocation114_spill] sm:$0xff] %v5483_v2  ;;  %8921 = vst [vmem:[#allocation115_spill] sm:$0xff] %v5487_v37  ;;  %v1219_v2 = vmul.f32 %v4940_v23, %v5221_v62  ;;  %v5515_v61 = vmul.f32 %v4871_v54, %v5497_v48  ;;  %v5523_v37 = vmul.f32 %v4909_v11, %v5499_v3 }
  0xbf   :  { %8922 = vst [vmem:[#allocation116_spill] sm:$0xff] %v5491_v49  ;;  %8923 = vst [vmem:[#allocation117_spill] sm:$0xff] %v5495_v20  ;;  %v5511_v49 = vmul.f32 %v4961_v30, %v5263_v40  ;;  %v5519_v20 = vmul.f32 %v4874_v55, %v5497_v48  ;;  %v5527_v62 = vmul.f32 %v4912_v13, %v5499_v3 }
  0xc0   :  { %8924 = vst [vmem:[#allocation118_spill] sm:$0xff] %v5497_v48  ;;  %8925 = vst [vmem:[#allocation119_spill] sm:$0xff] %v5499_v3  ;;  %v5531_v40 = vmul.f32 %v4915_v14, %v5497_v48 }
  0xc1   :  { %8926 = vst [vmem:[#allocation120_spill] sm:$0xff] %v5507_v47  ;;  %8927 = vst [vmem:[#allocation121_spill] sm:$0xff] %v5511_v49  ;;  %v5535_v49 = vmul.f32 %v4918_v15, %v5497_v48  ;;  %v5539_v47 = vmul.f32 %v4921_v16, %v5499_v3 }
  0xc2   :  { %8928 = vst [vmem:[#allocation122_spill] sm:$0xff] %v5515_v61  ;;  %8929 = vst [vmem:[#allocation123_spill] sm:$0xff] %v5519_v20  ;;  %v5555_v20 = vadd.f32 %v1219_v2, %v1169_v0  ;;  %v5559_v61 = vpop.permute.xlu0 %401 }
  0xc3   :  { %8930 = vst [vmem:[#allocation124_spill] sm:$0xff] %v5523_v37  ;;  %8931 = vst [vmem:[#allocation125_spill] sm:$0xff] %v5527_v62  ;;  %v5547_v37 = vmul.f32 %v4937_v22, %v5497_v48  ;;  %v5551_v62 = vmul.f32 %v4940_v23, %v5497_v48  ;;  %v1633_v48 = vrot.slane %v4879_v56, %v4847_v43 }
  0xc4   :  { %8932 = vst [vmem:[#allocation126_spill] sm:$0xff] %v5531_v40  ;;  %8933 = vst [vmem:[#allocation127_spill] sm:$0xff] %v5535_v49  ;;  %v5553_v40 = vadd.f32 %v1218_v5, %v1168_v50  ;;  %v5557_v49 = vpop.permute.xlu1 %247  ;;  %v1637_v5 = vrot.slane %v4879_v56, %v4849_v44  ;;  %v5583_v0 = vmul.f32 %v4909_v11, %v5559_v61 }
  0xc5   :  { %8934 = vst [vmem:[#allocation128_spill] sm:$0xff] %v5539_v47  ;;  %8935 = vst [vmem:[#allocation129_spill] sm:$0xff] %v5543_v58  ;;  %v5563_v47 = vmul.f32 %v4952_v27, %v5499_v3  ;;  %v5567_v58 = vmul.f32 %v4955_v28, %v5499_v3  ;;  %v5575_v2 = vmul.f32 %v4871_v54, %v5557_v49 }
  0xc6   :  { %8936 = vst [vmem:[#allocation130_spill] sm:$0xff] %v5547_v37  ;;  %8937 = vst [vmem:[#allocation131_spill] sm:$0xff] %v5551_v62  ;;  %v5579_v50 = vmul.f32 %v4874_v55, %v5557_v49  ;;  %v5587_v3 = vmul.f32 %v4912_v13, %v5559_v61  ;;  %v5595_v56 = vmul.f32 %v4918_v15, %v5557_v49 }
  0xc7   :  { %8938 = vst [vmem:[#allocation132_spill] sm:$0xff] %v5553_v40  ;;  %8939 = vst [vmem:[#allocation133_spill] sm:$0xff] %v5555_v20  ;;  %v5599_v44 = vmul.f32 %v4921_v16, %v5559_v61  ;;  %v5607_v20 = vmul.f32 %v4937_v22, %v5557_v49  ;;  %v5611_v40 = vmul.f32 %v4940_v23, %v5557_v49 }
  0xc8   :  { %8940 = vst [vmem:[#allocation134_spill] sm:$0xff] %v5557_v49  ;;  %8941 = vst [vmem:[#allocation135_spill] sm:$0xff] %v5559_v61  ;;  %v5614_v62 = vrot.slane %v1633_v48, %v4847_v43  ;;  %v5617_v37 = vrot.slane %v1637_v5, %v4847_v43  ;;  %v1523_v48 = vmul.f32 %v4946_v25, %v4995_v45 }
  0xc9   :  { %8942 = vst [vmem:[#allocation136_spill] sm:$0xff] %v5563_v47  ;;  %8943 = vst [vmem:[#allocation137_spill] sm:$0xff] %v5567_v58  ;;  %v5591_v58 = vmul.f32 %v4915_v14, %v5557_v49  ;;  %v5603_v47 = vmul.f32 %v4924_v17, %v5559_v61  ;;  %v1522_v49 = vmul.f32 %v4943_v24, %v4995_v45 }
  0xca   :  { %8945 = vst [vmem:[#allocation139_spill] sm:$0xff] %v5595_v56  ;;  %8946 = vst [vmem:[#allocation140_spill] sm:$0xff] %v5599_v44  ;;  %v5619_v56 = vpop.permute.xlu1 %255  ;;  %v5621_v44 = vpop.permute.xlu0 %409 }
  0xcb   :  { %8944 = vst [vmem:[#allocation138_spill] sm:$0xff] %v5591_v58  ;;  %8947 = vst [vmem:[#allocation141_spill] sm:$0xff] %v5603_v47  ;;  %v5625_v47 = vmul.f32 %v4952_v27, %v5559_v61  ;;  %v5637_v5 = vmul.f32 %v4871_v54, %v5619_v56  ;;  %v5641_v43 = vmul.f32 %v4874_v55, %v5619_v56 }
  0xcc   :  { %8948 = vst [vmem:[#allocation142_spill] sm:$0xff] %v5607_v20  ;;  %8949 = vst [vmem:[#allocation143_spill] sm:$0xff] %v5611_v40  ;;  %v5629_v20 = vmul.f32 %v4955_v28, %v5559_v61  ;;  %v5649_v61 = vmul.f32 %v4912_v13, %v5621_v44  ;;  %v5657_v45 = vmul.f32 %v4918_v15, %v5619_v56 }
  0xcd   :  { %8950 = vst [vmem:[#allocation144_spill] sm:$0xff] %v5614_v62  ;;  %8951 = vst [vmem:[#allocation145_spill] sm:$0xff] %v5617_v37  ;;  %v5661_v25 = vmul.f32 %v4921_v16, %v5621_v44  ;;  %v5665_v24 = vmul.f32 %v4924_v17, %v5621_v44  ;;  %v5669_v40 = vmul.f32 %v5614_v62, %v5265_v33 }
  0xce   :  { %8952 = vst [vmem:[#allocation146_spill] sm:$0xff] %v5619_v56  ;;  %8953 = vst [vmem:[#allocation147_spill] sm:$0xff] %v5621_v44  ;;  %v5673_v58 = vmul.f32 %v5617_v37, %v5265_v33  ;;  %v1573_v62 = vmul.f32 %v4961_v30, %v4997_v46  ;;  %v5691_v33 = vmul.f32 %v4952_v27, %v5621_v44 }
  0xcf   :  { %8954 = vst [vmem:[#allocation148_spill] sm:$0xff] %v5625_v47  ;;  %8955 = vst [vmem:[#allocation149_spill] sm:$0xff] %v5629_v20  ;;  %v5645_v47 = vmul.f32 %v4909_v11, %v5621_v44  ;;  %v5653_v20 = vmul.f32 %v4915_v14, %v5619_v56  ;;  %v5695_v37 = vmul.f32 %v4955_v28, %v5621_v44 }
  0xd0   :  { %8957 = vst [vmem:[#allocation151_spill] sm:$0xff] %v5649_v61  ;;  %8959 = vst [vmem:[#allocation153_spill] sm:$0xff] %v5657_v45  ;;  %v5681_v45 = vmul.f32 %v4940_v23, %v5619_v56 }
  0xd1   :  { %8956 = vst [vmem:[#allocation150_spill] sm:$0xff] %v5645_v47  ;;  %8958 = vst [vmem:[#allocation152_spill] sm:$0xff] %v5653_v20  ;;  %v5677_v20 = vmul.f32 %v4937_v22, %v5619_v56 }
  0xd2   :  { %8960 = vst [vmem:[#allocation154_spill] sm:$0xff] %v5661_v25  ;;  %8961 = vst [vmem:[#allocation155_spill] sm:$0xff] %v5665_v24  ;;  %v5683_v25 = vpop.permute.xlu1 %263  ;;  %v1572_v24 = vmul.f32 %v4958_v29, %v4997_v46 }
  0xd3   :  { %8962 = vst [vmem:[#allocation156_spill] sm:$0xff] %v5669_v40  ;;  %8963 = vst [vmem:[#allocation157_spill] sm:$0xff] %v5673_v58  ;;  %v5697_v58 = vpop.permute.xlu0 %77  ;;  %v5701_v56 = vmul.f32 %v4871_v54, %v5683_v25  ;;  %v5705_v29 = vmul.f32 %v4874_v55, %v5683_v25  ;;  %v5709_v46 = vmul.f32 %v4915_v14, %v5683_v25 }
  0xd4   :  { %8964 = vst [vmem:[#allocation158_spill] sm:$0xff] %v5677_v20  ;;  %8965 = vst [vmem:[#allocation159_spill] sm:$0xff] %v5681_v45  ;;  %v5713_v30 = vmul.f32 %v4918_v15, %v5683_v25  ;;  %v174_v44 = vmul.f32 %v4865_v52, %v5697_v58  ;;  %v760_v54 = vmul.f32 %v4884_v59, %v5697_v58 }
  0xd5   :  { %8966 = vst [vmem:[#allocation160_spill] sm:$0xff] %v5683_v25  ;;  %8967 = vst [vmem:[#allocation161_spill] sm:$0xff] %v5691_v33  ;;  %v761_v55 = vmul.f32 %v4887_v60, %v5697_v58  ;;  %v1138_v14 = vmul.f32 %v4927_v18, %v5697_v58  ;;  %v1139_v33 = vmul.f32 %v4930_v19, %v5697_v58  ;;  %v8977_v18 = vld [vmem:[#allocation27_spill] sm:$0xff] }
  0xd6   :  { %8968 = vst [vmem:[#allocation162_spill] sm:$0xff] %v5695_v37  ;;  %8969 = vst [vmem:[#allocation163_spill] sm:$0xff] %v5697_v58  ;;  %v175_v37 = vmul.f32 %v4868_v53, %v5697_v58  ;;  %v5727_v15 = vadd.f32 %v1572_v24, %v1522_v49  ;;  %v5729_v45 = vadd.f32 %v1573_v62, %v1523_v48  ;;  %v5735_v27 = vpop.permute.xlu1 %353  ;;  %v8979_v58 = vld [vmem:[#allocation28_spill] sm:$0xff] }
  0xd7   :  { %8970 = vst [vmem:[#allocation164_spill] sm:$0xff] %v5709_v46  ;;  %8971 = vst [vmem:[#allocation165_spill] sm:$0xff] %v5713_v30  ;;  %v320_v40 = vadd.f32 %v4965_v35, %v174_v44  ;;  %v842_v30 = vadd.f32 %v4981_v39, %v760_v54  ;;  %v8974_v46 = vld [vmem:[#allocation24_spill] sm:$0xff]  ;;  %v5737_v61 = vpop.permute.xlu0 %82  ;;  %v5740_v47 = vadd.f32 %v8977_v18, %v1138_v14 }
  0xd8   :  { %8972 = vst [vmem:[#allocation166_spill] sm:$0xff] %v5727_v15  ;;  %8973 = vst [vmem:[#allocation167_spill] sm:$0xff] %v5729_v45  ;;  %v321_v20 = vadd.f32 %v4969_v36, %v175_v37  ;;  %v843_v28 = vadd.f32 %v8974_v46, %v761_v55  ;;  %v5743_v24 = vadd.f32 %v8979_v58, %v1139_v33  ;;  %v8993_v15 = vld [vmem:[#allocation34_spill] sm:$0xff] }
  0xd9   :  { %8975 = vst [vmem:[#allocation24_spill] sm:$0xff] %v5735_v27  ;;  %8976 = vst [vmem:[#allocation168_spill] sm:$0xff] %v5737_v61  ;;  %v5747_v62 = vmul.f32 %v4937_v22, %v5683_v25  ;;  %v5751_v44 = vmul.f32 %v4940_v23, %v5683_v25  ;;  %v434_v35 = vmul.f32 %v4909_v11, %v5735_v27 }
  0xda   :  { %8978 = vst [vmem:[#allocation27_spill] sm:$0xff] %v5740_v47  ;;  %8980 = vst [vmem:[#allocation28_spill] sm:$0xff] %v5743_v24  ;;  %v435_v36 = vmul.f32 %v4912_v13, %v5735_v27  ;;  %v176_v18 = vmul.f32 %v4865_v52, %v5737_v61  ;;  %v177_v39 = vmul.f32 %v4868_v53, %v5737_v61  ;;  %v5775_v54 = vpop.permute.xlu1 %361  ;;  %v9001_v47 = vld [vmem:[#allocation123_spill] sm:$0xff] }
  0xdb   :  { %8981 = vst [vmem:[#allocation169_spill] sm:$0xff] %v5747_v62  ;;  %8982 = vst [vmem:[#allocation170_spill] sm:$0xff] %v5751_v44  ;;  %v762_v22 = vmul.f32 %v4884_v59, %v5737_v61  ;;  %v763_v46 = vmul.f32 %v4887_v60, %v5737_v61  ;;  %v892_v23 = vmul.f32 %v4921_v16, %v5735_v27  ;;  %v5777_v55 = vpop.permute.xlu0 %97 }
  0xdc   :  { %v893_v58 = vmul.f32 %v4924_v17, %v5735_v27  ;;  %v5769_v33 = vadd.f32 %v434_v35, %v320_v40  ;;  %v5771_v37 = vadd.f32 %v435_v36, %v321_v20  ;;  %v322_v49 = vadd.f32 %v5277_v12, %v176_v18  ;;  %8983 = vst [vmem:[#allocation171_spill] sm:$0xff] %v5775_v54 }
  0xdd   :  { %v323_v48 = vadd.f32 %v5281_v6, %v177_v39  ;;  %8984 = vst [vmem:[#allocation172_spill] sm:$0xff] %v5777_v55  ;;  %v844_v14 = vadd.f32 %v5293_v57, %v762_v22  ;;  %v845_v25 = vadd.f32 %v5297_v1, %v763_v46  ;;  %v5781_v44 = vadd.f32 %v892_v23, %v842_v30 }
  0xde   :  { %v5783_v62 = vadd.f32 %v893_v58, %v843_v28  ;;  %v5786_v40 = vadd.f32 %v5285_v8, %v322_v49  ;;  %v438_v12 = vmul.f32 %v4909_v11, %v5775_v54  ;;  %v439_v6 = vmul.f32 %v4912_v13, %v5775_v54  ;;  %v8985_v8 = vld [vmem:[#allocation79_spill] sm:$0xff]  ;;  %v5815_v39 = vpop.permute.xlu1 %365 }
  0xdf   :  { %v5789_v20 = vadd.f32 %v5289_v7, %v323_v48  ;;  %v182_v57 = vmul.f32 %v4865_v52, %v5777_v55  ;;  %v183_v30 = vmul.f32 %v4868_v53, %v5777_v55  ;;  %v5800_v28 = vadd.f32 %v5301_v31, %v844_v14  ;;  %8986 = vst [vmem:[#allocation79_spill] sm:$0xff] %v5815_v39  ;;  %v5817_v22 = vpop.permute.xlu0 %107 }
  0xe0   :  { %v5803_v1 = vadd.f32 %v8985_v8, %v845_v25  ;;  %v5806_v7 = vadd.f32 %v438_v12, %v5360_v32  ;;  %v5809_v35 = vadd.f32 %v439_v6, %v5363_v34  ;;  %v896_v36 = vmul.f32 %v4921_v16, %v5775_v54  ;;  %8987 = vst [vmem:[#allocation173_spill] sm:$0xff] %v5817_v22  ;;  %v8988_v12 = vld [vmem:[#allocation29_spill] sm:$0xff] }
  0xe1   :  { %v897_v18 = vmul.f32 %v4924_v17, %v5775_v54  ;;  %v328_v31 = vadd.f32 %v5389_v38, %v182_v57  ;;  %v329_v25 = vadd.f32 %v5393_v26, %v183_v30  ;;  %v768_v32 = vmul.f32 %v4884_v59, %v5777_v55  ;;  %v8989_v57 = vld [vmem:[#allocation30_spill] sm:$0xff] }
  0xe2   :  { %v769_v34 = vmul.f32 %v4887_v60, %v5777_v55  ;;  %v440_v46 = vmul.f32 %v4909_v11, %v5815_v39  ;;  %v441_v23 = vmul.f32 %v4912_v13, %v5815_v39  ;;  %v186_v58 = vmul.f32 %v4865_v52, %v5817_v22  ;;  %v9000_v54 = vld [vmem:[#allocation122_spill] sm:$0xff] }
  0xe3   :  { %v187_v38 = vmul.f32 %v4868_v53, %v5817_v22  ;;  %v5834_v26 = vadd.f32 %v5341_v51, %v328_v31  ;;  %v5837_v49 = vadd.f32 %v5345_v21, %v329_v25  ;;  %v898_v48 = vmul.f32 %v4921_v16, %v5815_v39  ;;  %v5851_v31 = vpop.permute.xlu1 %373  ;;  %v5853_v21 = vpop.permute.xlu0 %117  ;;  %v8992_v25 = vld [vmem:[#allocation33_spill] sm:$0xff] }
  0xe4   :  { %v899_v14 = vmul.f32 %v4924_v17, %v5815_v39  ;;  %v5844_v6 = vadd.f32 %v440_v46, %v8988_v12  ;;  %v5847_v30 = vadd.f32 %v441_v23, %v8989_v57  ;;  %v332_v8 = vadd.f32 %v5451_v9, %v186_v58  ;;  %8990 = vst [vmem:[#allocation29_spill] sm:$0xff] %v5851_v31  ;;  %v8997_v57 = vld [vmem:[#allocation97_spill] sm:$0xff] }
  0xe5   :  { %v333_v51 = vadd.f32 %v5455_v63, %v187_v38  ;;  %8991 = vst [vmem:[#allocation30_spill] sm:$0xff] %v5853_v21  ;;  %v5856_v45 = vadd.f32 %v898_v48, %v8992_v25  ;;  %v5862_v46 = vadd.f32 %v896_v36, %v5374_v4  ;;  %v5865_v23 = vadd.f32 %v897_v18, %v5377_v10  ;;  %v8994_v18 = vld [vmem:[#allocation35_spill] sm:$0xff]  ;;  %v9002_v39 = vld [vmem:[#allocation41_spill] sm:$0xff] }
  0xe6   :  { %v5859_v55 = vadd.f32 %v899_v14, %v8993_v15  ;;  %v444_v9 = vmul.f32 %v4909_v11, %v5851_v31  ;;  %v445_v63 = vmul.f32 %v4912_v13, %v5851_v31  ;;  %v5872_v58 = vadd.f32 %v5397_v41, %v332_v8  ;;  %v8995_v41 = vld [vmem:[#allocation36_spill] sm:$0xff] }
  0xe7   :  { %v5875_v38 = vadd.f32 %v5401_v42, %v333_v51  ;;  %v190_v15 = vmul.f32 %v4865_v52, %v5853_v21  ;;  %v191_v4 = vmul.f32 %v4868_v53, %v5853_v21  ;;  %v902_v10 = vmul.f32 %v4921_v16, %v5851_v31  ;;  %v8996_v42 = vld [vmem:[#allocation96_spill] sm:$0xff]  ;;  %v5893_v51 = vpop.permute.xlu1 %381  ;;  %v5895_v25 = vpop.permute.xlu0 %127 }
  0xe8   :  { %v903_v36 = vmul.f32 %v4924_v17, %v5851_v31  ;;  %v5886_v48 = vadd.f32 %v444_v9, %v8994_v18  ;;  %v5889_v14 = vadd.f32 %v445_v63, %v8995_v41  ;;  %v850_v12 = vadd.f32 %v8996_v42, %v768_v32  ;;  %8998 = vst [vmem:[#allocation33_spill] sm:$0xff] %v5893_v51  ;;  %v9003_v9 = vld [vmem:[#allocation42_spill] sm:$0xff]  ;;  %v9006_v41 = vld [vmem:[#allocation43_spill] sm:$0xff] }
  0xe9   :  { %v851_v8 = vadd.f32 %v8997_v57, %v769_v34  ;;  %8999 = vst [vmem:[#allocation34_spill] sm:$0xff] %v5895_v25  ;;  %v336_v24 = vadd.f32 %v9000_v54, %v190_v15  ;;  %v337_v27 = vadd.f32 %v9001_v47, %v191_v4  ;;  %v5900_v31 = vadd.f32 %v902_v10, %v9002_v39  ;;  %v9004_v15 = vld [vmem:[#allocation108_spill] sm:$0xff]  ;;  %v9005_v39 = vld [vmem:[#allocation109_spill] sm:$0xff] }
  0xea   :  { %v5903_v18 = vadd.f32 %v903_v36, %v9003_v9  ;;  %v448_v63 = vmul.f32 %v4909_v11, %v5893_v51  ;;  %v449_v32 = vmul.f32 %v4912_v13, %v5893_v51  ;;  %v194_v34 = vmul.f32 %v4865_v52, %v5895_v25  ;;  %v9007_v57 = vld [vmem:[#allocation44_spill] sm:$0xff] }
  0xeb   :  { %v195_v54 = vmul.f32 %v4868_v53, %v5895_v25  ;;  %v5914_v47 = vadd.f32 %v9004_v15, %v336_v24  ;;  %v5917_v4 = vadd.f32 %v9005_v39, %v337_v27  ;;  %v906_v10 = vmul.f32 %v4921_v16, %v5893_v51  ;;  %v5931_v15 = vpop.permute.xlu1 %389  ;;  %v5933_v27 = vpop.permute.xlu0 %137  ;;  %v9010_v39 = vld [vmem:[#allocation47_spill] sm:$0xff]  ;;  %v9011_v25 = vld [vmem:[#allocation48_spill] sm:$0xff] }
  0xec   :  { %v907_v36 = vmul.f32 %v4924_v17, %v5893_v51  ;;  %v5924_v42 = vadd.f32 %v448_v63, %v9006_v41  ;;  %v5927_v9 = vadd.f32 %v449_v32, %v9007_v57  ;;  %v340_v19 = vadd.f32 %v5575_v2, %v194_v34  ;;  %9008 = vst [vmem:[#allocation35_spill] sm:$0xff] %v5931_v15  ;;  %v9012_v51 = vld [vmem:[#allocation90_spill] sm:$0xff]  ;;  %v9013_v41 = vld [vmem:[#allocation91_spill] sm:$0xff]  ;;  %v9014_v34 = vld [vmem:[#allocation124_spill] sm:$0xff] }
  0xed   :  { %v341_v24 = vadd.f32 %v5579_v50, %v195_v54  ;;  %9009 = vst [vmem:[#allocation36_spill] sm:$0xff] %v5933_v27  ;;  %v5936_v61 = vadd.f32 %v906_v10, %v9010_v39  ;;  %v5942_v63 = vadd.f32 %v9012_v51, %v850_v12  ;;  %v5945_v32 = vadd.f32 %v9013_v41, %v851_v8  ;;  %v9016_v10 = vld [vmem:[#allocation125_spill] sm:$0xff] }
  0xee   :  { %v5939_v21 = vadd.f32 %v907_v36, %v9011_v25  ;;  %v452_v2 = vmul.f32 %v4909_v11, %v5931_v15  ;;  %v453_v50 = vmul.f32 %v4912_v13, %v5931_v15  ;;  %v5952_v54 = vadd.f32 %v9014_v34, %v340_v19  ;;  %v9018_v36 = vld [vmem:[#allocation49_spill] sm:$0xff]  ;;  %v9019_v19 = vld [vmem:[#allocation50_spill] sm:$0xff] }
  0xef   :  { %v5955_v57 = vadd.f32 %v9016_v10, %v341_v24  ;;  %v198_v25 = vmul.f32 %v4865_v52, %v5933_v27  ;;  %v199_v12 = vmul.f32 %v4868_v53, %v5933_v27  ;;  %v910_v8 = vmul.f32 %v4921_v16, %v5931_v15  ;;  %v5975_v10 = vpop.permute.xlu1 %397  ;;  %v5977_v27 = vpop.permute.xlu0 %147 }
  0xf0   :  { %9015 = vst [vmem:[#allocation96_spill] sm:$0xff] %v5952_v54  ;;  %v911_v51 = vmul.f32 %v4924_v17, %v5931_v15  ;;  %v5966_v39 = vadd.f32 %v452_v2, %v9018_v36  ;;  %v5969_v41 = vadd.f32 %v453_v50, %v9019_v19  ;;  %v772_v24 = vmul.f32 %v4884_v59, %v5817_v22  ;;  %v9022_v54 = vld [vmem:[#allocation55_spill] sm:$0xff]  ;;  %v9023_v36 = vld [vmem:[#allocation56_spill] sm:$0xff] }
  0xf1   :  { %9017 = vst [vmem:[#allocation97_spill] sm:$0xff] %v5955_v57  ;;  %v773_v34 = vmul.f32 %v4887_v60, %v5817_v22  ;;  %9020 = vst [vmem:[#allocation122_spill] sm:$0xff] %v5975_v10  ;;  %v344_v57 = vadd.f32 %v5637_v5, %v198_v25  ;;  %v345_v15 = vadd.f32 %v5641_v43, %v199_v12  ;;  %v9031_v59 = vld [vmem:[#allocation64_spill] sm:$0xff] }
  0xf2   :  { %9021 = vst [vmem:[#allocation123_spill] sm:$0xff] %v5977_v27  ;;  %v5982_v2 = vadd.f32 %v910_v8, %v9022_v54  ;;  %v5985_v50 = vadd.f32 %v911_v51, %v9023_v36  ;;  %v456_v19 = vmul.f32 %v4909_v11, %v5975_v10  ;;  %v457_v22 = vmul.f32 %v4912_v13, %v5975_v10  ;;  %v9026_v8 = vld [vmem:[#allocation57_spill] sm:$0xff]  ;;  %v9027_v36 = vld [vmem:[#allocation58_spill] sm:$0xff] }
  0xf3   :  { %v202_v60 = vmul.f32 %v4865_v52, %v5977_v27  ;;  %v203_v5 = vmul.f32 %v4868_v53, %v5977_v27  ;;  %v5996_v43 = vadd.f32 %v5583_v0, %v344_v57  ;;  %v5999_v54 = vadd.f32 %v5587_v3, %v345_v15  ;;  %v6013_v57 = vpop.permute.xlu1 %405  ;;  %v6015_v3 = vpop.permute.xlu0 %500  ;;  %v9030_v15 = vld [vmem:[#allocation63_spill] sm:$0xff] }
  0xf4   :  { %v914_v25 = vmul.f32 %v4921_v16, %v5975_v10  ;;  %v915_v12 = vmul.f32 %v4924_v17, %v5975_v10  ;;  %v6006_v51 = vadd.f32 %v456_v19, %v9026_v8  ;;  %v6009_v52 = vadd.f32 %v457_v22, %v9027_v36  ;;  %9028 = vst [vmem:[#allocation108_spill] sm:$0xff] %v6013_v57  ;;  %v9033_v10 = vld [vmem:[#allocation110_spill] sm:$0xff]  ;;  %v9034_v8 = vld [vmem:[#allocation111_spill] sm:$0xff] }
  0xf5   :  { %9024 = vst [vmem:[#allocation41_spill] sm:$0xff] %v5996_v43  ;;  %9025 = vst [vmem:[#allocation42_spill] sm:$0xff] %v5999_v54  ;;  %v348_v53 = vadd.f32 %v5701_v56, %v202_v60  ;;  %v349_v0 = vadd.f32 %v5705_v29, %v203_v5  ;;  %v854_v19 = vadd.f32 %v9033_v10, %v772_v24  ;;  %v9035_v5 = vld [vmem:[#allocation150_spill] sm:$0xff]  ;;  %v9039_v10 = vld [vmem:[#allocation65_spill] sm:$0xff] }
  0xf6   :  { %9029 = vst [vmem:[#allocation109_spill] sm:$0xff] %v6015_v3  ;;  %v6018_v27 = vadd.f32 %v914_v25, %v9030_v15  ;;  %v6021_v54 = vadd.f32 %v915_v12, %v9031_v59  ;;  %v855_v43 = vadd.f32 %v9034_v8, %v773_v34  ;;  %v578_v22 = vadd.f32 %v6015_v3, %v5769_v33  ;;  %v9037_v59 = vld [vmem:[#allocation151_spill] sm:$0xff]  ;;  %v9040_v15 = vld [vmem:[#allocation66_spill] sm:$0xff] }
  0xf7   :  { %v579_v60 = vadd.f32 %v6015_v3, %v5771_v37  ;;  %v460_v29 = vmul.f32 %v4909_v11, %v6013_v57  ;;  %v461_v56 = vmul.f32 %v4912_v13, %v6013_v57  ;;  %v6034_v25 = vadd.f32 %v9035_v5, %v348_v53  ;;  %v6051_v53 = vpop.permute.xlu0 %515 }
  0xf8   :  { %9032 = vst [vmem:[#allocation43_spill] sm:$0xff] %v6021_v54  ;;  %v6037_v12 = vadd.f32 %v9037_v59, %v349_v0  ;;  %v956_v24 = vadd.f32 %v5781_v44, %v6015_v3  ;;  %v957_v33 = vadd.f32 %v5783_v62, %v6015_v3  ;;  %v610_v34 = vmax.f32 %v578_v22, 0.0  ;;  %v6049_v54 = vpop.permute.xlu1 %413  ;;  %v9042_v59 = vld [vmem:[#allocation98_spill] sm:$0xff]  ;;  %v9043_v44 = vld [vmem:[#allocation99_spill] sm:$0xff] }
  0xf9   :  { %9036 = vst [vmem:[#allocation44_spill] sm:$0xff] %v6034_v25  ;;  %v611_v37 = vmax.f32 %v579_v60, 0.0  ;;  %v6044_v36 = vadd.f32 %v460_v29, %v9039_v10  ;;  %v6047_v8 = vadd.f32 %v461_v56, %v9040_v15  ;;  %9041 = vst [vmem:[#allocation48_spill] sm:$0xff] %v6049_v54  ;;  %v6057_v25 = vadd.f32 %v9043_v44, %v855_v43 }
  0xfa   :  { %9038 = vst [vmem:[#allocation47_spill] sm:$0xff] %v6037_v12  ;;  %v988_v0 = vmax.f32 %v956_v24, 0.0  ;;  %v989_v5 = vmax.f32 %v957_v33, 0.0  ;;  %v6054_v12 = vadd.f32 %v9042_v59, %v854_v19  ;;  %v584_v22 = vadd.f32 %v6051_v53, %v5844_v6 }
  0xfb   :  { %v642_v62 = vadd.f32 %v611_v37, %v610_v34  ;;  %v585_v60 = vadd.f32 %v6051_v53, %v5847_v30  ;;  %v464_v29 = vmul.f32 %v4909_v11, %v6049_v54  ;;  %v465_v56 = vmul.f32 %v4912_v13, %v6049_v54  ;;  %v9044_v34 = vld [vmem:[#allocation71_spill] sm:$0xff]  ;;  %v6080_v30 = vpop.permute.xlu0 %525  ;;  %v9045_v13 = vld [vmem:[#allocation72_spill] sm:$0xff] }
  0xfc   :  { %v962_v19 = vadd.f32 %v5856_v45, %v6051_v53  ;;  %v963_v43 = vadd.f32 %v5859_v55, %v6051_v53  ;;  %v6071_v24 = vadd.f32 %v989_v5, %v988_v0  ;;  %v616_v33 = vmax.f32 %v584_v22, 0.0  ;;  %v6089_v0 = vpop.permute.xlu1 %505 }
  0xfd   :  { %643 = vadd.xlane.f32.xlu1 %v642_v62  ;;  %v617_v6 = vmax.f32 %v585_v60, 0.0  ;;  %v6074_v37 = vadd.f32 %v464_v29, %v9044_v34  ;;  %v6078_v11 = vmul.f32 %v4921_v16, %v6013_v57  ;;  %v6083_v10 = vadd.f32 %v465_v56, %v9045_v13  ;;  %9046 = vst [vmem:[#allocation90_spill] sm:$0xff] %v6089_v0 }
  0xfe   :  { %v994_v45 = vmax.f32 %v962_v19, 0.0  ;;  %v995_v15 = vmax.f32 %v963_v43, 0.0  ;;  %v6087_v55 = vmul.f32 %v4924_v17, %v6013_v57  ;;  %v588_v59 = vadd.f32 %v6080_v30, %v5886_v48 }
  0xff   :  { %v651_v5 = vadd.f32 %v617_v6, %v616_v33  ;;  %v589_v44 = vadd.f32 %v6080_v30, %v5889_v14  ;;  %v966_v62 = vadd.f32 %v5900_v31, %v6080_v30  ;;  %v580_v22 = vadd.f32 %v6089_v0, %v5786_v40  ;;  %v6109_v14 = vpop.permute.xlu0 %535 }
 0x100   :  { %v581_v60 = vadd.f32 %v6089_v0, %v5789_v20  ;;  %v958_v29 = vadd.f32 %v5800_v28, %v6089_v0  ;;  %v959_v56 = vadd.f32 %v5803_v1, %v6089_v0  ;;  %v620_v48 = vmax.f32 %v588_v59, 0.0  ;;  %9047 = vst [vmem:[#allocation91_spill] sm:$0xff] %v6109_v14  ;;  %v6111_v34 = vpop.permute.xlu1 %510 }
 0x101   :  { %652 = vadd.xlane.f32.xlu1 %v651_v5  ;;  %v621_v19 = vmax.f32 %v589_v44, 0.0  ;;  %v6105_v43 = vadd.f32 %v995_v15, %v994_v45  ;;  %v967_v31 = vadd.f32 %v5903_v18, %v6080_v30  ;;  %v612_v40 = vmax.f32 %v580_v22, 0.0  ;;  %9048 = vst [vmem:[#allocation124_spill] sm:$0xff] %v6111_v34 }
 0x102   :  { %v613_v33 = vmax.f32 %v581_v60, 0.0  ;;  %v990_v6 = vmax.f32 %v958_v29, 0.0  ;;  %v991_v20 = vmax.f32 %v959_v56, 0.0  ;;  %v592_v1 = vadd.f32 %v6109_v14, %v5924_v42 }
 0x103   :  { %v657_v28 = vadd.f32 %v621_v19, %v620_v48  ;;  %v593_v13 = vadd.f32 %v6109_v14, %v5927_v9  ;;  %v998_v45 = vmax.f32 %v966_v62, 0.0  ;;  %v582_v18 = vadd.f32 %v6111_v34, %v5806_v7  ;;  %v6125_v29 = vpop.permute.xlu0 %545 }
 0x104   :  { %v645_v15 = vadd.f32 %v613_v33, %v612_v40  ;;  %v583_v5 = vadd.f32 %v6111_v34, %v5809_v35  ;;  %v6121_v59 = vadd.f32 %v991_v20, %v990_v6  ;;  %v624_v44 = vmax.f32 %v592_v1, 0.0  ;;  %9049 = vst [vmem:[#allocation125_spill] sm:$0xff] %v6125_v29  ;;  %v6131_v56 = vpop.permute.xlu1 %520 }
 0x105   :  { %658 = vadd.xlane.f32.xlu1 %v657_v28  ;;  %v625_v22 = vmax.f32 %v593_v13, 0.0  ;;  %v999_v60 = vmax.f32 %v967_v31, 0.0  ;;  %v970_v42 = vadd.f32 %v5936_v61, %v6109_v14  ;;  %v614_v9 = vmax.f32 %v582_v18, 0.0  ;;  %9050 = vst [vmem:[#allocation49_spill] sm:$0xff] %v6131_v56 }
 0x106   :  { %646 = vadd.xlane.f32.xlu0 %v645_v15  ;;  %v615_v62 = vmax.f32 %v583_v5, 0.0  ;;  %v971_v7 = vadd.f32 %v5939_v21, %v6109_v14  ;;  %v960_v35 = vadd.f32 %v5862_v46, %v6111_v34  ;;  %v596_v19 = vadd.f32 %v6125_v29, %v5966_v39 }
 0x107   :  { %v663_v48 = vadd.f32 %v625_v22, %v624_v44  ;;  %v597_v61 = vadd.f32 %v6125_v29, %v5969_v41  ;;  %v6137_v31 = vadd.f32 %v999_v60, %v998_v45  ;;  %v586_v33 = vadd.f32 %v6131_v56, %v5834_v26  ;;  %v6145_v1 = vpop.permute.xlu0 %555 }
 0x108   :  { %v648_v40 = vadd.f32 %v615_v62, %v614_v9  ;;  %v587_v21 = vadd.f32 %v6131_v56, %v5837_v49  ;;  %v1002_v6 = vmax.f32 %v970_v42, 0.0  ;;  %v628_v46 = vmax.f32 %v596_v19, 0.0  ;;  %9051 = vst [vmem:[#allocation50_spill] sm:$0xff] %v6145_v1  ;;  %v6149_v15 = vpop.permute.xlu1 %530 }
 0x109   :  { %664 = vadd.xlane.f32.xlu1 %v663_v48  ;;  %v629_v20 = vmax.f32 %v597_v61, 0.0  ;;  %v1003_v28 = vmax.f32 %v971_v7, 0.0  ;;  %v961_v39 = vadd.f32 %v5865_v23, %v6111_v34  ;;  %v618_v41 = vmax.f32 %v586_v33, 0.0  ;;  %9052 = vst [vmem:[#allocation55_spill] sm:$0xff] %v6149_v15 }
 0x10a   :  { %649 = vadd.xlane.f32.xlu0 %v648_v40  ;;  %v619_v13 = vmax.f32 %v587_v21, 0.0  ;;  %v992_v45 = vmax.f32 %v960_v35, 0.0  ;;  %v974_v26 = vadd.f32 %v5982_v2, %v6125_v29  ;;  %v600_v18 = vadd.f32 %v6145_v1, %v6006_v51 }
 0x10b   :  { %v669_v49 = vadd.f32 %v629_v20, %v628_v46  ;;  %v601_v5 = vadd.f32 %v6145_v1, %v6009_v52  ;;  %v6155_v44 = vadd.f32 %v1003_v28, %v1002_v6  ;;  %v590_v22 = vadd.f32 %v6149_v15, %v5872_v58  ;;  %v6163_v7 = vpop.permute.xlu0 %565 }
 0x10c   :  { %v654_v23 = vadd.f32 %v619_v13, %v618_v41  ;;  %v591_v60 = vadd.f32 %v6149_v15, %v5875_v38  ;;  %v993_v42 = vmax.f32 %v961_v39, 0.0  ;;  %v632_v2 = vmax.f32 %v600_v18, 0.0  ;;  %9053 = vst [vmem:[#allocation56_spill] sm:$0xff] %v6163_v7  ;;  %v6169_v19 = vpop.permute.xlu1 %540 }
 0x10d   :  { %670 = vadd.xlane.f32.xlu1 %v669_v49  ;;  %v633_v9 = vmax.f32 %v601_v5, 0.0  ;;  %v975_v62 = vadd.f32 %v5985_v50, %v6125_v29  ;;  %v1006_v51 = vmax.f32 %v974_v26, 0.0  ;;  %v622_v52 = vmax.f32 %v590_v22, 0.0  ;;  %9054 = vst [vmem:[#allocation57_spill] sm:$0xff] %v6169_v19  ;;  %v9057_v49 = vld [vmem:[#allocation43_spill] sm:$0xff] }
 0x10e   :  { %655 = vadd.xlane.f32.xlu0 %v654_v23  ;;  %v623_v35 = vmax.f32 %v591_v60, 0.0  ;;  %v6165_v48 = vadd.f32 %v993_v42, %v992_v45  ;;  %v964_v58 = vadd.f32 %v5942_v63, %v6131_v56  ;;  %v604_v61 = vadd.f32 %v6163_v7, %v6044_v36  ;;  %v9058_v23 = vld [vmem:[#allocation96_spill] sm:$0xff]  ;;  %v9059_v60 = vld [vmem:[#allocation97_spill] sm:$0xff] }
 0x10f   :  { %v675_v38 = vadd.f32 %v633_v9, %v632_v2  ;;  %v605_v50 = vadd.f32 %v6163_v7, %v6047_v8  ;;  %v1007_v40 = vmax.f32 %v975_v62, 0.0  ;;  %v594_v21 = vadd.f32 %v6169_v19, %v5914_v47  ;;  %v6183_v39 = vpop.permute.xlu0 %575 }
 0x110   :  { %v660_v33 = vadd.f32 %v623_v35, %v622_v52  ;;  %v595_v6 = vadd.f32 %v6169_v19, %v5917_v4  ;;  %v965_v63 = vadd.f32 %v5945_v32, %v6131_v56  ;;  %v636_v46 = vmax.f32 %v604_v61, 0.0  ;;  %9055 = vst [vmem:[#allocation58_spill] sm:$0xff] %v6183_v39  ;;  %v6187_v45 = vpop.permute.xlu1 %550 }
 0x111   :  { %676 = vadd.xlane.f32.xlu1 %v675_v38  ;;  %v637_v20 = vmax.f32 %v605_v50, 0.0  ;;  %v6181_v28 = vadd.f32 %v1007_v40, %v1006_v51  ;;  %v996_v36 = vmax.f32 %v964_v58, 0.0  ;;  %v626_v8 = vmax.f32 %v594_v21, 0.0  ;;  %9056 = vst [vmem:[#allocation63_spill] sm:$0xff] %v6187_v45  ;;  %v9060_v50 = vld [vmem:[#allocation69_spill] sm:$0xff] }
 0x112   :  { %661 = vadd.xlane.f32.xlu0 %v660_v33  ;;  %v627_v41 = vmax.f32 %v595_v6, 0.0  ;;  %v997_v13 = vmax.f32 %v965_v63, 0.0  ;;  %v978_v47 = vadd.f32 %v6018_v27, %v6145_v1  ;;  %v608_v32 = vadd.f32 %v6183_v39, %v6074_v37  ;;  %v9061_v33 = vld [vmem:[#allocation70_spill] sm:$0xff]  ;;  %v9062_v63 = vld [vmem:[#allocation41_spill] sm:$0xff] }
 0x113   :  { %v681_v4 = vadd.f32 %v637_v20, %v636_v46  ;;  %v609_v26 = vadd.f32 %v6183_v39, %v6083_v10  ;;  %v979_v18 = vadd.f32 %v9057_v49, %v6145_v1  ;;  %v598_v22 = vadd.f32 %v6187_v45, %v9058_v23  ;;  %v9063_v20 = vld [vmem:[#allocation42_spill] sm:$0xff] }
 0x114   :  { %v666_v5 = vadd.f32 %v627_v41, %v626_v8  ;;  %v599_v42 = vadd.f32 %v6187_v45, %v9059_v60  ;;  %v6199_v27 = vadd.f32 %v997_v13, %v996_v36  ;;  %v640_v2 = vmax.f32 %v608_v32, 0.0  ;;  %v6205_v58 = vpop.permute.xlu1 %560  ;;  %v9064_v13 = vld [vmem:[#allocation30_spill] sm:$0xff]  ;;  %v9066_v32 = vld [vmem:[#allocation13_spill] sm:$0xff] }
 0x115   :  { %682 = vadd.xlane.f32.xlu1 %v681_v4  ;;  %v641_v9 = vmax.f32 %v609_v26, 0.0  ;;  %v1010_v62 = vmax.f32 %v978_v47, 0.0  ;;  %v1011_v37 = vmax.f32 %v979_v18, 0.0  ;;  %v630_v51 = vmax.f32 %v598_v22, 0.0  ;;  %v9065_v47 = vld [vmem:[#allocation12_spill] sm:$0xff]  ;;  %v9068_v60 = vld [vmem:[#allocation126_spill] sm:$0xff] }
 0x116   :  { %667 = vadd.xlane.f32.xlu0 %v666_v5  ;;  %v631_v10 = vmax.f32 %v599_v42, 0.0  ;;  %v968_v52 = vadd.f32 %v6054_v12, %v6149_v15  ;;  %v969_v35 = vadd.f32 %v6057_v25, %v6149_v15  ;;  %v950_v40 = vadd.f32 %v6078_v11, %v9060_v50 }
 0x117   :  { %v687_v38 = vadd.f32 %v641_v9, %v640_v2  ;;  %v6207_v61 = vadd.f32 %v1011_v37, %v1010_v62  ;;  %v951_v21 = vadd.f32 %v6087_v55, %v9061_v33  ;;  %v602_v46 = vadd.f32 %v6205_v58, %v9062_v63  ;;  %v9069_v9 = vld [vmem:[#allocation44_spill] sm:$0xff]  ;;  %v9070_v37 = vld [vmem:[#allocation47_spill] sm:$0xff]  ;;  %v9074_v63 = vld [vmem:[#allocation113_spill] sm:$0xff] }
 0x118   :  { %v672_v6 = vadd.f32 %v631_v10, %v630_v51  ;;  %v603_v12 = vadd.f32 %v6205_v58, %v9063_v20  ;;  %v1000_v36 = vmax.f32 %v968_v52, 0.0  ;;  %v1001_v25 = vmax.f32 %v969_v35, 0.0  ;;  %v6225_v18 = vpop.permute.xlu1 %570  ;;  %v9071_v10 = vld [vmem:[#allocation127_spill] sm:$0xff]  ;;  %v9072_v35 = vld [vmem:[#allocation112_spill] sm:$0xff]  ;;  %v9075_v20 = vld [vmem:[#allocation34_spill] sm:$0xff] }
 0x119   :  { %688 = vadd.xlane.f32.xlu1 %v687_v38  ;;  %v982_v8 = vadd.f32 %v950_v40, %v6163_v7  ;;  %v983_v41 = vadd.f32 %v951_v21, %v6163_v7  ;;  %v776_v11 = vmul.f32 %v9065_v47, %v9064_v13  ;;  %v634_v4 = vmax.f32 %v602_v46, 0.0  ;;  %9067 = vst [vmem:[#allocation64_spill] sm:$0xff] %v6225_v18  ;;  %v9073_v40 = vld [vmem:[#allocation75_spill] sm:$0xff] }
 0x11a   :  { %673 = vadd.xlane.f32.xlu0 %v672_v6  ;;  %v635_v55 = vmax.f32 %v603_v12, 0.0  ;;  %v777_v26 = vmul.f32 %v9066_v32, %v9064_v13  ;;  %v922_v49 = vmul.f32 %v4921_v16, %v6049_v54  ;;  %v6227_v5 = vadd.f32 %v1001_v25, %v1000_v36 }
 0x11b   :  { %v1014_v23 = vmax.f32 %v982_v8, 0.0  ;;  %v1015_v22 = vmax.f32 %v983_v41, 0.0  ;;  %v858_v42 = vadd.f32 %v9068_v60, %v776_v11  ;;  %v606_v62 = vadd.f32 %v6225_v18, %v9069_v9 }
 0x11c   :  { %v678_v2 = vadd.f32 %v635_v55, %v634_v4  ;;  %v607_v51 = vadd.f32 %v6225_v18, %v9070_v37  ;;  %v859_v52 = vadd.f32 %v9071_v10, %v777_v26  ;;  %v923_v50 = vmul.f32 %v4924_v17, %v6049_v54  ;;  %v9077_v4 = vld [vmem:[#allocation138_spill] sm:$0xff]  ;;  %v9078_v26 = vld [vmem:[#allocation168_spill] sm:$0xff]  ;;  %v9082_v10 = vld [vmem:[#allocation15_spill] sm:$0xff] }
 0x11d   :  { %1024 = vadd.xlane.f32.xlu1 %v6121_v59  ;;  %v6236_v16 = vadd.f32 %v1015_v22, %v1014_v23  ;;  %v940_v38 = vadd.f32 %v9072_v35, %v858_v42  ;;  %v954_v33 = vadd.f32 %v922_v49, %v9073_v40  ;;  %v638_v21 = vmax.f32 %v606_v62, 0.0  ;;  %v9076_v59 = vld [vmem:[#allocation76_spill] sm:$0xff]  ;;  %v9079_v49 = vld [vmem:[#allocation14_spill] sm:$0xff]  ;;  %v9084_v40 = vld [vmem:[#allocation129_spill] sm:$0xff] }
 0x11e   :  { %679 = vadd.xlane.f32.xlu0 %v678_v2  ;;  %v639_v6 = vmax.f32 %v607_v51, 0.0  ;;  %v941_v46 = vadd.f32 %v9074_v63, %v859_v52  ;;  %v780_v12 = vmul.f32 %v9065_v47, %v9075_v20  ;;  %v955_v25 = vadd.f32 %v923_v50, %v9076_v59  ;;  %v9080_v2 = vld [vmem:[#allocation139_spill] sm:$0xff]  ;;  %v9081_v37 = vld [vmem:[#allocation128_spill] sm:$0xff]  ;;  %v9087_v59 = vld [vmem:[#allocation82_spill] sm:$0xff] }
 0x11f   :  { %v972_v36 = vadd.f32 %v940_v38, %v6169_v19  ;;  %v986_v8 = vadd.f32 %v954_v33, %v6183_v39  ;;  %v781_v41 = vmul.f32 %v9066_v32, %v9075_v20  ;;  %v1140_v23 = vmul.f32 %v9079_v49, %v9078_v26  ;;  %v9083_v35 = vld [vmem:[#allocation80_spill] sm:$0xff] }
 0x120   :  { %v684_v17 = vadd.f32 %v639_v6, %v638_v21  ;;  %v973_v11 = vadd.f32 %v941_v46, %v6169_v19  ;;  %v862_v55 = vadd.f32 %v9077_v4, %v780_v12  ;;  %v987_v60 = vadd.f32 %v955_v25, %v6183_v39  ;;  %v9085_v21 = vld [vmem:[#allocation36_spill] sm:$0xff]  ;;  %v9086_v12 = vld [vmem:[#allocation81_spill] sm:$0xff] }
 0x121   :  { %1030 = vadd.xlane.f32.xlu1 %v6105_v43  ;;  %v1004_v22 = vmax.f32 %v972_v36, 0.0  ;;  %v1018_v42 = vmax.f32 %v986_v8, 0.0  ;;  %v863_v9 = vadd.f32 %v9080_v2, %v781_v41  ;;  %v1141_v52 = vmul.f32 %v9082_v10, %v9078_v26  ;;  %v9089_v4 = vld [vmem:[#allocation153_spill] sm:$0xff] }
 0x122   :  { %685 = vadd.xlane.f32.xlu0 %v684_v17  ;;  %v1005_v62 = vmax.f32 %v973_v11, 0.0  ;;  %v944_v51 = vadd.f32 %v9081_v37, %v862_v55  ;;  %v1222_v38 = vadd.f32 %v9083_v35, %v1140_v23  ;;  %v1019_v50 = vmax.f32 %v987_v60, 0.0  ;;  %v9088_v17 = vld [vmem:[#allocation152_spill] sm:$0xff] }
 0x123   :  { %v945_v33 = vadd.f32 %v9084_v40, %v863_v9  ;;  %v784_v43 = vmul.f32 %v9065_v47, %v9085_v21  ;;  %v785_v6 = vmul.f32 %v9066_v32, %v9085_v21  ;;  %v1223_v36 = vadd.f32 %v9086_v12, %v1141_v52  ;;  %v9091_v9 = vld [vmem:[#allocation79_spill] sm:$0xff]  ;;  %v9094_v52 = vld [vmem:[#allocation141_spill] sm:$0xff] }
 0x124   :  { %v6266_v63 = vadd.f32 %v1005_v62, %v1004_v22  ;;  %v976_v46 = vadd.f32 %v944_v51, %v6187_v45  ;;  %v1304_v25 = vadd.f32 %v9087_v59, %v1222_v38  ;;  %v6272_v8 = vadd.f32 %v1019_v50, %v1018_v42  ;;  %v9090_v22 = vld [vmem:[#allocation83_spill] sm:$0xff]  ;;  %v9092_v62 = vld [vmem:[#allocation20_spill] sm:$0xff]  ;;  %v9095_v38 = vld [vmem:[#allocation21_spill] sm:$0xff] }
 0x125   :  { %1036 = vadd.xlane.f32.xlu1 %v6137_v31  ;;  %v977_v41 = vadd.f32 %v945_v33, %v6187_v45  ;;  %v866_v11 = vadd.f32 %v9088_v17, %v784_v43  ;;  %v867_v55 = vadd.f32 %v9089_v4, %v785_v6  ;;  %v1305_v60 = vadd.f32 %v9090_v22, %v1223_v36  ;;  %v9093_v31 = vld [vmem:[#allocation140_spill] sm:$0xff]  ;;  %v9097_v6 = vld [vmem:[#allocation123_spill] sm:$0xff] }
 0x126   :  { %1021 = vadd.xlane.f32.xlu0 %v6071_v24  ;;  %v1008_v23 = vmax.f32 %v976_v46, 0.0  ;;  %v1336_v2 = vadd.f32 %v1304_v25, %v6089_v0  ;;  %v1276_v37 = vmul.f32 %v9092_v62, %v9091_v9  ;;  %v1277_v50 = vmul.f32 %v9095_v38, %v9091_v9  ;;  %v9096_v24 = vld [vmem:[#allocation37_spill] sm:$0xff]  ;;  %v9098_v25 = vld [vmem:[#allocation38_spill] sm:$0xff] }
 0x127   :  { %v1009_v51 = vmax.f32 %v977_v41, 0.0  ;;  %v948_v42 = vadd.f32 %v9093_v31, %v866_v11  ;;  %v949_v35 = vadd.f32 %v9094_v52, %v867_v55  ;;  %v1337_v40 = vadd.f32 %v1305_v60, %v6089_v0  ;;  %v9099_v55 = vld [vmem:[#allocation164_spill] sm:$0xff]  ;;  %v9100_v60 = vld [vmem:[#allocation29_spill] sm:$0xff] }
 0x128   :  { %v1368_v33 = vmax.f32 %v1336_v2, 0.0  ;;  %v1308_v43 = vadd.f32 %v1276_v37, %v9096_v24  ;;  %v788_v46 = vmul.f32 %v9065_v47, %v9097_v6  ;;  %v1309_v41 = vadd.f32 %v1277_v50, %v9098_v25  ;;  %v9101_v31 = vld [vmem:[#allocation165_spill] sm:$0xff] }
 0x129   :  { %1042 = vadd.xlane.f32.xlu1 %v6155_v44  ;;  %v6291_v12 = vadd.f32 %v1009_v51, %v1008_v23  ;;  %v980_v36 = vadd.f32 %v948_v42, %v6205_v58  ;;  %v981_v59 = vadd.f32 %v949_v35, %v6205_v58  ;;  %v1369_v17 = vmax.f32 %v1337_v40, 0.0  ;;  %v9102_v42 = vld [vmem:[#allocation154_spill] sm:$0xff]  ;;  %v9103_v40 = vld [vmem:[#allocation51_spill] sm:$0xff] }
 0x12a   :  { %1027 = vadd.xlane.f32.xlu0 %v6165_v48  ;;  %v1340_v11 = vadd.f32 %v1308_v43, %v6051_v53  ;;  %v789_v4 = vmul.f32 %v9066_v32, %v9097_v6  ;;  %v870_v47 = vadd.f32 %v9099_v55, %v788_v46  ;;  %v1341_v23 = vadd.f32 %v1309_v41, %v6051_v53  ;;  %v9104_v43 = vld [vmem:[#allocation155_spill] sm:$0xff]  ;;  %v9106_v41 = vld [vmem:[#allocation52_spill] sm:$0xff] }
 0x12b   :  { %v1012_v22 = vmax.f32 %v980_v36, 0.0  ;;  %v1013_v44 = vmax.f32 %v981_v59, 0.0  ;;  %v1280_v2 = vmul.f32 %v9092_v62, %v9100_v60  ;;  %v6304_v37 = vadd.f32 %v1369_v17, %v1368_v33  ;;  %v9105_v36 = vld [vmem:[#allocation24_spill] sm:$0xff] }
 0x12c   :  { %v1372_v51 = vmax.f32 %v1340_v11, 0.0  ;;  %v871_v48 = vadd.f32 %v9101_v31, %v789_v4  ;;  %v952_v52 = vadd.f32 %v9102_v42, %v870_v47  ;;  %v1373_v32 = vmax.f32 %v1341_v23, 0.0  ;;  %v9107_v4 = vld [vmem:[#allocation33_spill] sm:$0xff]  ;;  %v9109_v23 = vld [vmem:[#allocation28_spill] sm:$0xff]  ;;  %v9110_v42 = vld [vmem:[#allocation59_spill] sm:$0xff] }
 0x12d   :  { %1048 = vadd.xlane.f32.xlu1 %v6181_v28  ;;  %v6309_v35 = vadd.f32 %v1013_v44, %v1012_v22  ;;  %v1281_v50 = vmul.f32 %v9095_v38, %v9100_v60  ;;  %v1312_v24 = vadd.f32 %v1280_v2, %v9103_v40  ;;  %v1270_v59 = vmul.f32 %v9092_v62, %v9105_v36  ;;  %v9108_v22 = vld [vmem:[#allocation27_spill] sm:$0xff] }
 0x12e   :  { %1033 = vadd.xlane.f32.xlu0 %v6199_v27  ;;  %v953_v33 = vadd.f32 %v9104_v43, %v871_v48  ;;  %v984_v46 = vadd.f32 %v952_v52, %v6225_v18  ;;  %v1271_v28 = vmul.f32 %v9095_v38, %v9105_v36  ;;  %v6321_v25 = vadd.f32 %v1373_v32, %v1372_v51 }
 0x12f   :  { %v1313_v17 = vadd.f32 %v1281_v50, %v9106_v41  ;;  %v1344_v11 = vadd.f32 %v1312_v24, %v6080_v30  ;;  %v1284_v55 = vmul.f32 %v9092_v62, %v9107_v4  ;;  %v1302_v44 = vadd.f32 %v1270_v59, %v9108_v22  ;;  %v9111_v24 = vld [vmem:[#allocation171_spill] sm:$0xff] }
 0x130   :  { %v985_v27 = vadd.f32 %v953_v33, %v6225_v18  ;;  %v1016_v47 = vmax.f32 %v984_v46, 0.0  ;;  %v1303_v2 = vadd.f32 %v1271_v28, %v9109_v23  ;;  %v1285_v48 = vmul.f32 %v9095_v38, %v9107_v4  ;;  %v9114_v23 = vld [vmem:[#allocation101_spill] sm:$0xff] }
 0x131   :  { %1054 = vadd.xlane.f32.xlu1 %v6207_v61  ;;  %v1345_v31 = vadd.f32 %v1313_v17, %v6080_v30  ;;  %v1376_v51 = vmax.f32 %v1344_v11, 0.0  ;;  %v1316_v52 = vadd.f32 %v1284_v55, %v9110_v42  ;;  %v1334_v50 = vadd.f32 %v1302_v44, %v6015_v3  ;;  %v9112_v61 = vld [vmem:[#allocation60_spill] sm:$0xff] }
 0x132   :  { %1039 = vadd.xlane.f32.xlu0 %v6227_v5  ;;  %v1017_v32 = vmax.f32 %v985_v27, 0.0  ;;  %v1335_v40 = vadd.f32 %v1303_v2, %v6015_v3  ;;  %v1274_v43 = vmul.f32 %v9092_v62, %v9111_v24  ;;  %v1317_v46 = vadd.f32 %v1285_v48, %v9112_v61  ;;  %v9113_v11 = vld [vmem:[#allocation100_spill] sm:$0xff]  ;;  %v9115_v48 = vld [vmem:[#allocation35_spill] sm:$0xff]  ;;  %v9118_v61 = vld [vmem:[#allocation74_spill] sm:$0xff] }
 0x133   :  { %v1377_v33 = vmax.f32 %v1345_v31, 0.0  ;;  %v1348_v59 = vadd.f32 %v1316_v52, %v6109_v14  ;;  %v1275_v28 = vmul.f32 %v9095_v38, %v9111_v24  ;;  %v1366_v17 = vmax.f32 %v1334_v50, 0.0 }
 0x134   :  { %v6344_v41 = vadd.f32 %v1017_v32, %v1016_v47  ;;  %v1367_v5 = vmax.f32 %v1335_v40, 0.0  ;;  %v1306_v55 = vadd.f32 %v1274_v43, %v9113_v11  ;;  %v1349_v22 = vadd.f32 %v1317_v46, %v6109_v14  ;;  %v9116_v32 = vld [vmem:[#allocation172_spill] sm:$0xff]  ;;  %v9117_v43 = vld [vmem:[#allocation73_spill] sm:$0xff]  ;;  %v9120_v11 = vld [vmem:[#allocation102_spill] sm:$0xff] }
 0x135   :  { %1060 = vadd.xlane.f32.xlu1 %v6236_v16  ;;  %v6348_v27 = vadd.f32 %v1377_v33, %v1376_v51  ;;  %v1380_v44 = vmax.f32 %v1348_v59, 0.0  ;;  %v1307_v2 = vadd.f32 %v1275_v28, %v9114_v23  ;;  %v1288_v42 = vmul.f32 %v9092_v62, %v9115_v48  ;;  %v9119_v59 = vld [vmem:[#allocation122_spill] sm:$0xff] }
 0x136   :  { %1045 = vadd.xlane.f32.xlu0 %v6266_v63  ;;  %v6353_v31 = vadd.f32 %v1367_v5, %v1366_v17  ;;  %v1338_v47 = vadd.f32 %v1306_v55, %v6111_v34  ;;  %v1289_v52 = vmul.f32 %v9095_v38, %v9115_v48  ;;  %v1381_v16 = vmax.f32 %v1349_v22, 0.0  ;;  %v9121_v22 = vld [vmem:[#allocation103_spill] sm:$0xff] }
 0x137   :  { %v1339_v51 = vadd.f32 %v1307_v2, %v6111_v34  ;;  %v1146_v50 = vmul.f32 %v9079_v49, %v9116_v32  ;;  %v1147_v40 = vmul.f32 %v9082_v10, %v9116_v32  ;;  %v1320_v33 = vadd.f32 %v1288_v42, %v9117_v43 }
 0x138   :  { %v1370_v63 = vmax.f32 %v1338_v47, 0.0  ;;  %v1321_v46 = vadd.f32 %v1289_v52, %v9118_v61  ;;  %v1292_v28 = vmul.f32 %v9092_v62, %v9119_v59  ;;  %v6370_v17 = vadd.f32 %v1381_v16, %v1380_v44  ;;  %v9122_v52 = vld [vmem:[#allocation86_spill] sm:$0xff]  ;;  %v9124_v16 = vld [vmem:[#allocation95_spill] sm:$0xff] }
 0x139   :  { %1066 = vadd.xlane.f32.xlu1 %v6272_v8  ;;  %v1371_v5 = vmax.f32 %v1339_v51, 0.0  ;;  %v1228_v55 = vadd.f32 %v9120_v11, %v1146_v50  ;;  %v1229_v23 = vadd.f32 %v9121_v22, %v1147_v40  ;;  %v1352_v2 = vadd.f32 %v1320_v33, %v6125_v29  ;;  %v9123_v8 = vld [vmem:[#allocation94_spill] sm:$0xff]  ;;  %v9125_v50 = vld [vmem:[#allocation173_spill] sm:$0xff]  ;;  %v9126_v22 = vld [vmem:[#allocation87_spill] sm:$0xff] }
 0x13a   :  { %1051 = vadd.xlane.f32.xlu0 %v6291_v12  ;;  %v1353_v47 = vadd.f32 %v1321_v46, %v6125_v29  ;;  %v1293_v42 = vmul.f32 %v9095_v38, %v9119_v59  ;;  %v1324_v43 = vadd.f32 %v1292_v28, %v9122_v52  ;;  %v1150_v40 = vmul.f32 %v9079_v49, %v9125_v50 }
 0x13b   :  { %v6380_v61 = vadd.f32 %v1371_v5, %v1370_v63  ;;  %v1310_v44 = vadd.f32 %v9123_v8, %v1228_v55  ;;  %v1311_v51 = vadd.f32 %v9124_v16, %v1229_v23  ;;  %v1384_v11 = vmax.f32 %v1352_v2, 0.0  ;;  %v9127_v5 = vld [vmem:[#allocation114_spill] sm:$0xff] }
 0x13c   :  { %v1385_v12 = vmax.f32 %v1353_v47, 0.0  ;;  %v1325_v33 = vadd.f32 %v1293_v42, %v9126_v22  ;;  %v1356_v46 = vadd.f32 %v1324_v43, %v6145_v1  ;;  %v1151_v28 = vmul.f32 %v9082_v10, %v9125_v50  ;;  %v9128_v43 = vld [vmem:[#allocation115_spill] sm:$0xff]  ;;  %v9130_v22 = vld [vmem:[#allocation88_spill] sm:$0xff] }
 0x13d   :  { %1402 = vadd.xlane.f32.xlu1 %v6304_v37  ;;  %v1342_v59 = vadd.f32 %v1310_v44, %v6131_v56  ;;  %v1343_v63 = vadd.f32 %v1311_v51, %v6131_v56  ;;  %v1232_v55 = vadd.f32 %v9127_v5, %v1150_v40  ;;  %v1296_v42 = vmul.f32 %v9092_v62, %v6013_v57  ;;  %v9129_v44 = vld [vmem:[#allocation106_spill] sm:$0xff]  ;;  %v9132_v5 = vld [vmem:[#allocation89_spill] sm:$0xff] }
 0x13e   :  { %1057 = vadd.xlane.f32.xlu0 %v6309_v35  ;;  %v6395_v23 = vadd.f32 %v1385_v12, %v1384_v11  ;;  %v1357_v2 = vadd.f32 %v1325_v33, %v6145_v1  ;;  %v1388_v47 = vmax.f32 %v1356_v46, 0.0  ;;  %v1233_v8 = vadd.f32 %v9128_v43, %v1151_v28  ;;  %v9131_v33 = vld [vmem:[#allocation107_spill] sm:$0xff] }
 0x13f   :  { %v1374_v37 = vmax.f32 %v1342_v59, 0.0  ;;  %v1375_v52 = vmax.f32 %v1343_v63, 0.0  ;;  %v1314_v16 = vadd.f32 %v9129_v44, %v1232_v55  ;;  %v1297_v40 = vmul.f32 %v9095_v38, %v6013_v57 }
 0x140   :  { %v1389_v51 = vmax.f32 %v1357_v2, 0.0  ;;  %v1328_v35 = vadd.f32 %v1296_v42, %v9130_v22  ;;  %v1154_v11 = vmul.f32 %v9079_v49, %v9064_v13  ;;  %v1315_v46 = vadd.f32 %v9131_v33, %v1233_v8  ;;  %v9133_v42 = vld [vmem:[#allocation130_spill] sm:$0xff]  ;;  %v9137_v33 = vld [vmem:[#allocation132_spill] sm:$0xff] }
 0x141   :  { %1408 = vadd.xlane.f32.xlu1 %v6321_v25  ;;  %v1410_v12 = vadd.f32 %v1375_v52, %v1374_v37  ;;  %v1346_v59 = vadd.f32 %v1314_v16, %v6149_v15  ;;  %v1155_v63 = vmul.f32 %v9082_v10, %v9064_v13  ;;  %v1329_v55 = vadd.f32 %v1297_v40, %v9132_v5  ;;  %v9134_v52 = vld [vmem:[#allocation131_spill] sm:$0xff]  ;;  %v9138_v5 = vld [vmem:[#allocation133_spill] sm:$0xff] }
 0x142   :  { %1063 = vadd.xlane.f32.xlu0 %v6344_v41  ;;  %v6413_v28 = vadd.f32 %v1389_v51, %v1388_v47  ;;  %v1360_v2 = vadd.f32 %v1328_v35, %v6163_v7  ;;  %v1236_v43 = vadd.f32 %v9133_v42, %v1154_v11  ;;  %v1347_v25 = vadd.f32 %v1315_v46, %v6149_v15  ;;  %v9135_v41 = vld [vmem:[#allocation116_spill] sm:$0xff]  ;;  %v9136_v35 = vld [vmem:[#allocation117_spill] sm:$0xff] }
 0x143   :  { %v1378_v37 = vmax.f32 %v1346_v59, 0.0  ;;  %v1237_v8 = vadd.f32 %v9134_v52, %v1155_v63  ;;  %v1300_v44 = vmul.f32 %v9092_v62, %v6049_v54  ;;  %v1361_v16 = vadd.f32 %v1329_v55, %v6163_v7 }
 0x144   :  { %v1392_v22 = vmax.f32 %v1360_v2, 0.0  ;;  %v1318_v47 = vadd.f32 %v9135_v41, %v1236_v43  ;;  %v1301_v51 = vmul.f32 %v9095_v38, %v6049_v54  ;;  %v1379_v40 = vmax.f32 %v1347_v25, 0.0  ;;  %v9139_v43 = vld [vmem:[#allocation142_spill] sm:$0xff] }
 0x145   :  { %1414 = vadd.xlane.f32.xlu1 %v6348_v27  ;;  %v1319_v11 = vadd.f32 %v9136_v35, %v1237_v8  ;;  %v1332_v46 = vadd.f32 %v1300_v44, %v9137_v33  ;;  %v1158_v59 = vmul.f32 %v9079_v49, %v9075_v20  ;;  %v1393_v62 = vmax.f32 %v1361_v16, 0.0  ;;  %v9143_v33 = vld [vmem:[#allocation137_spill] sm:$0xff] }
 0x146   :  { %1399 = vadd.xlane.f32.xlu0 %v6353_v31  ;;  %v1350_v63 = vadd.f32 %v1318_v47, %v6169_v19  ;;  %v1333_v55 = vadd.f32 %v1301_v51, %v9138_v5  ;;  %v1159_v38 = vmul.f32 %v9082_v10, %v9075_v20  ;;  %v1416_v2 = vadd.f32 %v1379_v40, %v1378_v37  ;;  %v9140_v31 = vld [vmem:[#allocation143_spill] sm:$0xff]  ;;  %v9141_v51 = vld [vmem:[#allocation136_spill] sm:$0xff]  ;;  %v9142_v37 = vld [vmem:[#allocation18_spill] sm:$0xff] }
 0x147   :  { %v1351_v27 = vadd.f32 %v1319_v11, %v6169_v19  ;;  %v1364_v42 = vadd.f32 %v1332_v46, %v6183_v39  ;;  %v1240_v25 = vadd.f32 %v9139_v43, %v1158_v59  ;;  %v1437_v52 = vadd.f32 %v1393_v62, %v1392_v22  ;;  %v9144_v22 = vld [vmem:[#allocation19_spill] sm:$0xff]  ;;  %v9145_v5 = vld [vmem:[#allocation120_spill] sm:$0xff] }
 0x148   :  { %v1382_v8 = vmax.f32 %v1350_v63, 0.0  ;;  %v1365_v44 = vadd.f32 %v1333_v55, %v6183_v39  ;;  %v1241_v16 = vadd.f32 %v9140_v31, %v1159_v38  ;;  %v1518_v40 = vmul.f32 %v9142_v37, %v9078_v26 }
 0x149   :  { %1420 = vadd.xlane.f32.xlu1 %v6370_v17  ;;  %v1383_v41 = vmax.f32 %v1351_v27, 0.0  ;;  %v1396_v47 = vmax.f32 %v1364_v42, 0.0  ;;  %v1322_v35 = vadd.f32 %v9141_v51, %v1240_v25  ;;  %v1519_v59 = vmul.f32 %v9144_v22, %v9078_v26  ;;  %v9146_v42 = vld [vmem:[#allocation121_spill] sm:$0xff]  ;;  %v9147_v25 = vld [vmem:[#allocation158_spill] sm:$0xff] }
 0x14a   :  { %1405 = vadd.xlane.f32.xlu0 %v6380_v61  ;;  %v1397_v11 = vmax.f32 %v1365_v44, 0.0  ;;  %v1323_v46 = vadd.f32 %v9143_v33, %v1241_v16  ;;  %v1162_v62 = vmul.f32 %v9079_v49, %v9085_v21  ;;  %v1600_v55 = vadd.f32 %v9145_v5, %v1518_v40  ;;  %v9148_v16 = vld [vmem:[#allocation156_spill] sm:$0xff]  ;;  %v9151_v5 = vld [vmem:[#allocation157_spill] sm:$0xff] }
 0x14b   :  { %v1422_v63 = vadd.f32 %v1383_v41, %v1382_v8  ;;  %v1354_v17 = vadd.f32 %v1322_v35, %v6187_v45  ;;  %v1163_v38 = vmul.f32 %v9082_v10, %v9085_v21  ;;  %v1601_v43 = vadd.f32 %v9146_v42, %v1519_v59  ;;  %v9149_v8 = vld [vmem:[#allocation159_spill] sm:$0xff]  ;;  %v9150_v35 = vld [vmem:[#allocation144_spill] sm:$0xff]  ;;  %v9153_v59 = vld [vmem:[#allocation145_spill] sm:$0xff] }
 0x14c   :  { %v1443_v27 = vadd.f32 %v1397_v11, %v1396_v47  ;;  %v1355_v61 = vadd.f32 %v1323_v46, %v6187_v45  ;;  %v1244_v44 = vadd.f32 %v9147_v25, %v1162_v62  ;;  %v1682_v51 = vadd.f32 %v9148_v16, %v1600_v55  ;;  %v9152_v11 = vld [vmem:[#allocation148_spill] sm:$0xff]  ;;  %v9155_v25 = vld [vmem:[#allocation166_spill] sm:$0xff] }
 0x14d   :  { %1426 = vadd.xlane.f32.xlu1 %v6395_v23  ;;  %v1386_v31 = vmax.f32 %v1354_v17, 0.0  ;;  %v1245_v41 = vadd.f32 %v9149_v8, %v1163_v38  ;;  %v1654_v40 = vmul.f32 %v9150_v35, %v9091_v9  ;;  %v1683_v47 = vadd.f32 %v9151_v5, %v1601_v43  ;;  %v9154_v23 = vld [vmem:[#allocation149_spill] sm:$0xff]  ;;  %v9156_v43 = vld [vmem:[#allocation167_spill] sm:$0xff] }
 0x14e   :  { %1411 = vadd.xlane.f32.xlu0 %v1410_v12  ;;  %v1387_v33 = vmax.f32 %v1355_v61, 0.0  ;;  %v1326_v46 = vadd.f32 %v9152_v11, %v1244_v44  ;;  %v1655_v42 = vmul.f32 %v9153_v59, %v9091_v9  ;;  %v1714_v62 = vadd.f32 %v1682_v51, %v6089_v0 }
 0x14f   :  { %v1327_v17 = vadd.f32 %v9154_v23, %v1245_v41  ;;  %v1686_v55 = vadd.f32 %v1654_v40, %v9155_v25  ;;  %v1166_v38 = vmul.f32 %v9079_v49, %v9097_v6  ;;  %v1715_v12 = vadd.f32 %v1683_v47, %v6089_v0 }
 0x150   :  { %v1428_v16 = vadd.f32 %v1387_v33, %v1386_v31  ;;  %v1358_v61 = vadd.f32 %v1326_v46, %v6205_v58  ;;  %v1687_v8 = vadd.f32 %v1655_v42, %v9156_v43  ;;  %v1746_v44 = vmax.f32 %v1714_v62, 0.0  ;;  %v9157_v33 = vld [vmem:[#allocation169_spill] sm:$0xff]  ;;  %v9158_v42 = vld [vmem:[#allocation170_spill] sm:$0xff] }
 0x151   :  { %1432 = vadd.xlane.f32.xlu1 %v6413_v28  ;;  %v1359_v5 = vadd.f32 %v1327_v17, %v6205_v58  ;;  %v1718_v51 = vadd.f32 %v1686_v55, %v6051_v53  ;;  %v1167_v41 = vmul.f32 %v9082_v10, %v9097_v6  ;;  %v1747_v40 = vmax.f32 %v1715_v12, 0.0  ;;  %v9159_v28 = vld [vmem:[#allocation31_spill] sm:$0xff]  ;;  %v9160_v55 = vld [vmem:[#allocation161_spill] sm:$0xff]  ;;  %v9161_v12 = vld [vmem:[#allocation162_spill] sm:$0xff] }
 0x152   :  { %1417 = vadd.xlane.f32.xlu0 %v1416_v2  ;;  %v1390_v49 = vmax.f32 %v1358_v61, 0.0  ;;  %v1719_v31 = vadd.f32 %v1687_v8, %v6051_v53  ;;  %v1248_v47 = vadd.f32 %v9157_v33, %v1166_v38  ;;  %v1526_v62 = vmul.f32 %v9142_v37, %v9159_v28  ;;  %v9162_v8 = vld [vmem:[#allocation32_spill] sm:$0xff]  ;;  %v9163_v38 = vld [vmem:[#allocation22_spill] sm:$0xff] }
 0x153   :  { %v1391_v11 = vmax.f32 %v1359_v5, 0.0  ;;  %v1750_v46 = vmax.f32 %v1718_v51, 0.0  ;;  %v1249_v23 = vadd.f32 %v9158_v42, %v1167_v41  ;;  %v1779_v17 = vadd.f32 %v1747_v40, %v1746_v44  ;;  %v9164_v51 = vld [vmem:[#allocation23_spill] sm:$0xff] }
 0x154   :  { %v1751_v25 = vmax.f32 %v1719_v31, 0.0  ;;  %v1330_v43 = vadd.f32 %v9160_v55, %v1248_v47  ;;  %v1527_v10 = vmul.f32 %v9144_v22, %v9159_v28  ;;  %v1576_v5 = vmul.f32 %v9163_v38, %v9162_v8 }
 0x155   :  { %1438 = vadd.xlane.f32.xlu1 %v1437_v52  ;;  %v1434_v2 = vadd.f32 %v1391_v11, %v1390_v49  ;;  %v1331_v61 = vadd.f32 %v9161_v12, %v1249_v23  ;;  %v1577_v41 = vmul.f32 %v9164_v51, %v9162_v8  ;;  %v1658_v40 = vmul.f32 %v9150_v35, %v9100_v60  ;;  %v9165_v11 = vld [vmem:[#allocation163_spill] sm:$0xff] }
 0x156   :  { %1423 = vadd.xlane.f32.xlu0 %v1422_v63  ;;  %v1785_v33 = vadd.f32 %v1751_v25, %v1750_v46  ;;  %v1362_v44 = vadd.f32 %v1330_v43, %v6225_v18  ;;  %v1659_v31 = vmul.f32 %v9153_v59, %v9100_v60  ;;  %v1608_v49 = vadd.f32 %v1576_v5, %v1526_v62  ;;  %v9166_v46 = vld [vmem:[#allocation17_spill] sm:$0xff] }
 0x157   :  { %v1363_v52 = vadd.f32 %v1331_v61, %v6225_v18  ;;  %v1609_v47 = vadd.f32 %v1577_v41, %v1527_v10  ;;  %v1516_v42 = vmul.f32 %v9142_v37, %v9165_v11  ;;  %v1517_v63 = vmul.f32 %v9144_v22, %v9165_v11  ;;  %v9167_v41 = vld [vmem:[#allocation39_spill] sm:$0xff] }
 0x158   :  { %v1394_v23 = vmax.f32 %v1362_v44, 0.0  ;;  %v1566_v25 = vmul.f32 %v9163_v38, %v9166_v46  ;;  %v1567_v55 = vmul.f32 %v9164_v51, %v9166_v46  ;;  %v1690_v12 = vadd.f32 %v1658_v40, %v1608_v49  ;;  %v9168_v49 = vld [vmem:[#allocation40_spill] sm:$0xff] }
 0x159   :  { %1444 = vadd.xlane.f32.xlu1 %v1443_v27  ;;  %v1395_v43 = vmax.f32 %v1363_v52, 0.0  ;;  %v1691_v60 = vadd.f32 %v1659_v31, %v1609_v47  ;;  %v1648_v62 = vmul.f32 %v9150_v35, %v9105_v36  ;;  %v1649_v5 = vmul.f32 %v9153_v59, %v9105_v36 }
 0x15a   :  { %1429 = vadd.xlane.f32.xlu0 %v1428_v16  ;;  %v1598_v10 = vadd.f32 %v1566_v25, %v1516_v42  ;;  %v1599_v61 = vadd.f32 %v1567_v55, %v1517_v63  ;;  %v1530_v44 = vmul.f32 %v9142_v37, %v9167_v41  ;;  %v1722_v11 = vadd.f32 %v1690_v12, %v6080_v30 }
 0x15b   :  { %v1440_v18 = vadd.f32 %v1395_v43, %v1394_v23  ;;  %v1723_v27 = vadd.f32 %v1691_v60, %v6080_v30  ;;  %v1531_v40 = vmul.f32 %v9144_v22, %v9167_v41  ;;  %v1580_v16 = vmul.f32 %v9163_v38, %v9168_v49 }
 0x15c   :  { %v1680_v31 = vadd.f32 %v1648_v62, %v1598_v10  ;;  %v1681_v52 = vadd.f32 %v1649_v5, %v1599_v61  ;;  %v1581_v47 = vmul.f32 %v9164_v51, %v9168_v49  ;;  %v1754_v42 = vmax.f32 %v1722_v11, 0.0  ;;  %v9169_v10 = vld [vmem:[#allocation16_spill] sm:$0xff] }
 0x15d   :  { %1780 = vadd.xlane.f32.xlu1 %v1779_v17  ;;  %v1755_v63 = vmax.f32 %v1723_v27, 0.0  ;;  %v1662_v23 = vmul.f32 %v9150_v35, %v9107_v4  ;;  %v1663_v60 = vmul.f32 %v9153_v59, %v9107_v4  ;;  %v1612_v43 = vadd.f32 %v1580_v16, %v1530_v44  ;;  %v9170_v11 = vld [vmem:[#allocation84_spill] sm:$0xff] }
 0x15e   :  { %1435 = vadd.xlane.f32.xlu0 %v1434_v2  ;;  %v1712_v25 = vadd.f32 %v1680_v31, %v6015_v3  ;;  %v1713_v55 = vadd.f32 %v1681_v52, %v6015_v3  ;;  %v1613_v12 = vadd.f32 %v1581_v47, %v1531_v40  ;;  %v1520_v61 = vmul.f32 %v9142_v37, %v9169_v10 }
 0x15f   :  { %v1791_v62 = vadd.f32 %v1755_v63, %v1754_v42  ;;  %v1521_v17 = vmul.f32 %v9144_v22, %v9169_v10  ;;  %v1570_v5 = vmul.f32 %v9163_v38, %v9170_v11  ;;  %v1694_v4 = vadd.f32 %v1662_v23, %v1612_v43  ;;  %v9171_v63 = vld [vmem:[#allocation45_spill] sm:$0xff] }
 0x160   :  { %v1744_v27 = vmax.f32 %v1712_v25, 0.0  ;;  %v1745_v49 = vmax.f32 %v1713_v55, 0.0  ;;  %v1695_v2 = vadd.f32 %v1663_v60, %v1613_v12  ;;  %v1571_v31 = vmul.f32 %v9164_v51, %v9170_v11  ;;  %v9172_v55 = vld [vmem:[#allocation46_spill] sm:$0xff] }
 0x161   :  { %1786 = vadd.xlane.f32.xlu1 %v1785_v33  ;;  %v1602_v44 = vadd.f32 %v1570_v5, %v1520_v61  ;;  %v1652_v40 = vmul.f32 %v9150_v35, %v9111_v24  ;;  %v1653_v52 = vmul.f32 %v9153_v59, %v9111_v24  ;;  %v1726_v47 = vadd.f32 %v1694_v4, %v6109_v14 }
 0x162   :  { %1441 = vadd.xlane.f32.xlu0 %v1440_v18  ;;  %v1776_v16 = vadd.f32 %v1745_v49, %v1744_v27  ;;  %v1727_v42 = vadd.f32 %v1695_v2, %v6109_v14  ;;  %v1534_v23 = vmul.f32 %v9142_v37, %v9171_v63  ;;  %v1603_v33 = vadd.f32 %v1571_v31, %v1521_v17 }
 0x163   :  { %v1684_v60 = vadd.f32 %v1652_v40, %v1602_v44  ;;  %v1535_v25 = vmul.f32 %v9144_v22, %v9171_v63  ;;  %v1584_v43 = vmul.f32 %v9163_v38, %v9172_v55  ;;  %v1758_v12 = vmax.f32 %v1726_v47, 0.0 }
 0x164   :  { %v1759_v61 = vmax.f32 %v1727_v42, 0.0  ;;  %v1585_v18 = vmul.f32 %v9164_v51, %v9172_v55  ;;  %v1666_v4 = vmul.f32 %v9150_v35, %v9115_v48  ;;  %v1685_v49 = vadd.f32 %v1653_v52, %v1603_v33  ;;  %v9173_v52 = vld [vmem:[#allocation92_spill] sm:$0xff] }
 0x165   :  { %1792 = vadd.xlane.f32.xlu1 %v1791_v62  ;;  %v1716_v5 = vadd.f32 %v1684_v60, %v6111_v34  ;;  %v1616_v17 = vadd.f32 %v1584_v43, %v1534_v23  ;;  %v1667_v27 = vmul.f32 %v9153_v59, %v9115_v48  ;;  %v1524_v44 = vmul.f32 %v9142_v37, %v9116_v32 }
 0x166   :  { %1777 = vadd.xlane.f32.xlu0 %v1776_v16  ;;  %v1797_v2 = vadd.f32 %v1759_v61, %v1758_v12  ;;  %v1617_v31 = vadd.f32 %v1585_v18, %v1535_v25  ;;  %v1525_v40 = vmul.f32 %v9144_v22, %v9116_v32  ;;  %v1717_v47 = vadd.f32 %v1685_v49, %v6111_v34  ;;  %v9174_v16 = vld [vmem:[#allocation85_spill] sm:$0xff] }
 0x167   :  { %v1748_v42 = vmax.f32 %v1716_v5, 0.0  ;;  %v1698_v62 = vadd.f32 %v1666_v4, %v1616_v17  ;;  %v1574_v33 = vmul.f32 %v9163_v38, %v9173_v52  ;;  %v1575_v60 = vmul.f32 %v9164_v51, %v9173_v52  ;;  %v9175_v49 = vld [vmem:[#allocation53_spill] sm:$0xff] }
 0x168   :  { %v1699_v23 = vadd.f32 %v1667_v27, %v1617_v31  ;;  %v1656_v25 = vmul.f32 %v9150_v35, %v9174_v16  ;;  %v1657_v43 = vmul.f32 %v9153_v59, %v9174_v16  ;;  %v1749_v12 = vmax.f32 %v1717_v47, 0.0  ;;  %v9176_v31 = vld [vmem:[#allocation54_spill] sm:$0xff] }
 0x169   :  { %1798 = vadd.xlane.f32.xlu1 %v1797_v2  ;;  %v1730_v61 = vadd.f32 %v1698_v62, %v6125_v29  ;;  %v1606_v18 = vadd.f32 %v1574_v33, %v1524_v44  ;;  %v1538_v4 = vmul.f32 %v9142_v37, %v9175_v49  ;;  %v1607_v17 = vadd.f32 %v1575_v60, %v1525_v40  ;;  %v9177_v33 = vld [vmem:[#allocation122_spill] sm:$0xff] }
 0x16a   :  { %v1731_v5 = vadd.f32 %v1699_v23, %v6125_v29  ;;  %v1539_v27 = vmul.f32 %v9144_v22, %v9175_v49  ;;  %v1588_v52 = vmul.f32 %v9163_v38, %v9176_v31  ;;  %v1782_v34 = vadd.f32 %v1749_v12, %v1748_v42 }
 0x16b   :  { %v1762_v32 = vmax.f32 %v1730_v61, 0.0  ;;  %v1688_v16 = vadd.f32 %v1656_v25, %v1606_v18  ;;  %v1589_v2 = vmul.f32 %v9164_v51, %v9176_v31  ;;  %v1689_v44 = vadd.f32 %v1657_v43, %v1607_v17 }
 0x16c   :  { %v1763_v47 = vmax.f32 %v1731_v5, 0.0  ;;  %v1620_v62 = vadd.f32 %v1588_v52, %v1538_v4  ;;  %v1670_v48 = vmul.f32 %v9150_v35, %v9177_v33  ;;  %1783 = vadd.xlane.f32.xlu0 %v1782_v34  ;;  %v1671_v60 = vmul.f32 %v9153_v59, %v9177_v33  ;;  %v9178_v4 = vld [vmem:[#allocation104_spill] sm:$0xff] }
 0x16d   :  { %v1720_v40 = vadd.f32 %v1688_v16, %v6131_v56  ;;  %v1621_v23 = vadd.f32 %v1589_v2, %v1539_v27  ;;  %v1528_v42 = vmul.f32 %v9142_v37, %v9125_v50  ;;  %v1721_v12 = vadd.f32 %v1689_v44, %v6131_v56  ;;  %v9179_v27 = vld [vmem:[#allocation93_spill] sm:$0xff] }
 0x16e   :  { %v1803_v25 = vadd.f32 %v1763_v47, %v1762_v32  ;;  %v1702_v61 = vadd.f32 %v1670_v48, %v1620_v62  ;;  %v1529_v52 = vmul.f32 %v9144_v22, %v9125_v50  ;;  %v1578_v34 = vmul.f32 %v9163_v38, %v9178_v4  ;;  %v9180_v62 = vld [vmem:[#allocation61_spill] sm:$0xff] }
 0x16f   :  { %v1752_v43 = vmax.f32 %v1720_v40, 0.0  ;;  %v1703_v18 = vadd.f32 %v1671_v60, %v1621_v23  ;;  %v1579_v16 = vmul.f32 %v9164_v51, %v9178_v4  ;;  %v1753_v5 = vmax.f32 %v1721_v12, 0.0  ;;  %v9181_v12 = vld [vmem:[#allocation62_spill] sm:$0xff] }
 0x170   :  { %1804 = vadd.xlane.f32.xlu1 %v1803_v25  ;;  %v1734_v17 = vadd.f32 %v1702_v61, %v6145_v1  ;;  %v1660_v32 = vmul.f32 %v9150_v35, %v9179_v27  ;;  %v1661_v48 = vmul.f32 %v9153_v59, %v9179_v27  ;;  %v1610_v47 = vadd.f32 %v1578_v34, %v1528_v42 }
 0x171   :  { %v1735_v2 = vadd.f32 %v1703_v18, %v6145_v1  ;;  %v1611_v44 = vadd.f32 %v1579_v16, %v1529_v52  ;;  %v1542_v40 = vmul.f32 %v9142_v37, %v9180_v62  ;;  %v1788_v23 = vadd.f32 %v1753_v5, %v1752_v43 }
 0x172   :  { %v1766_v60 = vmax.f32 %v1734_v17, 0.0  ;;  %v1543_v25 = vmul.f32 %v9144_v22, %v9180_v62  ;;  %v1592_v61 = vmul.f32 %v9163_v38, %v9181_v12  ;;  %v1692_v50 = vadd.f32 %v1660_v32, %v1610_v47 }
 0x173   :  { %v1767_v4 = vmax.f32 %v1735_v2, 0.0  ;;  %v1693_v56 = vadd.f32 %v1661_v48, %v1611_v44  ;;  %v1593_v27 = vmul.f32 %v9164_v51, %v9181_v12  ;;  %1789 = vadd.xlane.f32.xlu0 %v1788_v23  ;;  %v1674_v52 = vmul.f32 %v9150_v35, %v6013_v57  ;;  %v9182_v2 = vld [vmem:[#allocation118_spill] sm:$0xff] }
 0x174   :  { %v1624_v42 = vadd.f32 %v1592_v61, %v1542_v40  ;;  %v1675_v43 = vmul.f32 %v9153_v59, %v6013_v57  ;;  %v1532_v18 = vmul.f32 %v9142_v37, %v9064_v13  ;;  %v1724_v16 = vadd.f32 %v1692_v50, %v6149_v15 }
 0x175   :  { %v1809_v34 = vadd.f32 %v1767_v4, %v1766_v60  ;;  %v1725_v5 = vadd.f32 %v1693_v56, %v6149_v15  ;;  %v1625_v17 = vadd.f32 %v1593_v27, %v1543_v25  ;;  %v1533_v48 = vmul.f32 %v9144_v22, %v9064_v13  ;;  %v9183_v4 = vld [vmem:[#allocation105_spill] sm:$0xff]  ;;  %v9184_v13 = vld [vmem:[#allocation67_spill] sm:$0xff] }
 0x176   :  { %v1706_v32 = vadd.f32 %v1674_v52, %v1624_v42  ;;  %v1582_v47 = vmul.f32 %v9163_v38, %v9182_v2  ;;  %v1583_v44 = vmul.f32 %v9164_v51, %v9182_v2  ;;  %v1756_v40 = vmax.f32 %v1724_v16, 0.0 }
 0x177   :  { %1810 = vadd.xlane.f32.xlu1 %v1809_v34  ;;  %v1757_v23 = vmax.f32 %v1725_v5, 0.0  ;;  %v1707_v61 = vadd.f32 %v1675_v43, %v1625_v17  ;;  %v1664_v50 = vmul.f32 %v9150_v35, %v9183_v4  ;;  %v1665_v25 = vmul.f32 %v9153_v59, %v9183_v4  ;;  %v9185_v17 = vld [vmem:[#allocation68_spill] sm:$0xff] }
 0x178   :  { %v1738_v56 = vadd.f32 %v1706_v32, %v6163_v7  ;;  %v1614_v27 = vadd.f32 %v1582_v47, %v1532_v18  ;;  %v1615_v60 = vadd.f32 %v1583_v44, %v1533_v48  ;;  %v1546_v2 = vmul.f32 %v9142_v37, %v9184_v13 }
 0x179   :  { %v1794_v42 = vadd.f32 %v1757_v23, %v1756_v40  ;;  %v1739_v52 = vadd.f32 %v1707_v61, %v6163_v7  ;;  %v1547_v34 = vmul.f32 %v9144_v22, %v9184_v13  ;;  %v1596_v32 = vmul.f32 %v9163_v38, %v9185_v17  ;;  %v9188_v13 = vld [vmem:[#allocation6_spill] sm:$0xff] }
 0x17a   :  { %v1770_v43 = vmax.f32 %v1738_v56, 0.0  ;;  %v1696_v16 = vadd.f32 %v1664_v50, %v1614_v27  ;;  %v1697_v5 = vadd.f32 %v1665_v25, %v1615_v60  ;;  %v1597_v48 = vmul.f32 %v9164_v51, %v9185_v17  ;;  %v9186_v25 = vld [vmem:[#allocation134_spill] sm:$0xff] }
 0x17b   :  { %1795 = vadd.xlane.f32.xlu0 %v1794_v42  ;;  %v1771_v18 = vmax.f32 %v1739_v52, 0.0  ;;  %v1678_v47 = vmul.f32 %v9150_v35, %v6049_v54  ;;  %v1679_v44 = vmul.f32 %v9153_v59, %v6049_v54  ;;  %v1628_v61 = vadd.f32 %v1596_v32, %v1546_v2  ;;  %v4630_v52 = vld [vmem:[%s8496_s0 + $0x20] sm:$0x77] }
 0x17c   :  { %v1728_v40 = vadd.f32 %v1696_v16, %v6169_v19  ;;  %v1729_v23 = vadd.f32 %v1697_v5, %v6169_v19  ;;  %v1536_v50 = vmul.f32 %v9142_v37, %v9075_v20  ;;  %v1629_v27 = vadd.f32 %v1597_v48, %v1547_v34  ;;  %v9187_v34 = vld [vmem:[#allocation119_spill] sm:$0xff] }
 0x17d   :  { %v1815_v56 = vadd.f32 %v1771_v18, %v1770_v43  ;;  %v1537_v60 = vmul.f32 %v9144_v22, %v9075_v20  ;;  %v1586_v42 = vmul.f32 %v9163_v38, %v9186_v25  ;;  %v1710_v17 = vadd.f32 %v1678_v47, %v1628_v61  ;;  %v9189_v61 = vld [vmem:[#allocation7_spill] sm:$0xff] }
 0x17e   :  { %v1760_v54 = vmax.f32 %v1728_v40, 0.0  ;;  %v1761_v16 = vmax.f32 %v1729_v23, 0.0  ;;  %v1587_v2 = vmul.f32 %v9164_v51, %v9186_v25  ;;  %v1711_v5 = vadd.f32 %v1679_v44, %v1629_v27 }
 0x17f   :  { %1816 = vadd.xlane.f32.xlu1 %v1815_v56  ;;  %v1618_v43 = vadd.f32 %v1586_v42, %v1536_v50  ;;  %v1668_v32 = vmul.f32 %v9150_v35, %v9187_v34  ;;  %v1669_v18 = vmul.f32 %v9153_v59, %v9187_v34  ;;  %v1742_v20 = vadd.f32 %v1710_v17, %v6183_v39  ;;  %v9190_v56 = vld [vmem:[#allocation8_spill] sm:$0xff]  ;;  %v9191_v34 = vld [vmem:[#allocation9_spill] sm:$0xff] }
 0x180   :  { %v1800_v48 = vadd.f32 %v1761_v16, %v1760_v54  ;;  %v1619_v19 = vadd.f32 %v1587_v2, %v1537_v60  ;;  %v1879_v40 = vrot.slane %v4630_v52, %v9188_v13  ;;  %v1743_v47 = vadd.f32 %v1711_v5, %v6183_v39 }
 0x181   :  { %v1700_v23 = vadd.f32 %v1668_v32, %v1618_v43  ;;  %v1883_v25 = vrot.slane %v4630_v52, %v9189_v61  ;;  %v1929_v44 = vrot.slane %v4630_v52, %v9190_v56  ;;  %v1774_v50 = vmax.f32 %v1742_v20, 0.0  ;;  %v9192_v43 = vld [vmem:[#allocation10_spill] sm:$0xff] }
 0x182   :  { %1801 = vadd.xlane.f32.xlu0 %v1800_v48  ;;  %v1701_v27 = vadd.f32 %v1669_v18, %v1619_v19  ;;  %v6660_v42 = vrot.slane %v1879_v40, %v9188_v13  ;;  %v1933_v54 = vrot.slane %v4630_v52, %v9191_v34  ;;  %v1775_v16 = vmax.f32 %v1743_v47, 0.0 }
 0x183   :  { %v1732_v17 = vadd.f32 %v1700_v23, %v6187_v45  ;;  %v6665_v60 = vrot.slane %v1883_v25, %v9188_v13  ;;  %v6668_v2 = vrot.slane %v1929_v44, %v9190_v56  ;;  %v2011_v32 = vrot.slane %v4630_v52, %v9192_v43  ;;  %v9193_v25 = vld [vmem:[#allocation77_spill] sm:$0xff] }
 0x184   :  { %v1733_v5 = vadd.f32 %v1701_v27, %v6187_v45  ;;  %v1896_v20 = vmul.f32 %v6660_v42, %v9078_v26  ;;  %v6674_v19 = vrot.slane %v1933_v54, %v9190_v56  ;;  %v1821_v18 = vadd.f32 %v1775_v16, %v1774_v50  ;;  %v9194_v27 = vld [vmem:[#allocation11_spill] sm:$0xff] }
 0x185   :  { %v1764_v48 = vmax.f32 %v1732_v17, 0.0  ;;  %v1897_v40 = vmul.f32 %v6665_v60, %v9078_v26  ;;  %v1946_v47 = vmul.f32 %v6668_v2, %v9193_v25  ;;  %v2015_v45 = vrot.slane %v4630_v52, %v9194_v27  ;;  %v9195_v17 = vld [vmem:[#allocation146_spill] sm:$0xff] }
 0x186   :  { %v1765_v23 = vmax.f32 %v1733_v5, 0.0  ;;  %v1947_v44 = vmul.f32 %v6674_v19, %v9193_v25  ;;  %v6685_v34 = vrot.slane %v2011_v32, %v9192_v43  ;;  %1822 = vadd.xlane.f32.xlu1 %v1821_v18  ;;  %v1540_v50 = vmul.f32 %v9142_v37, %v9085_v21  ;;  %v9196_v52 = vld [vmem:[#allocation78_spill] sm:$0xff] }
 0x187   :  { %v1978_v54 = vadd.f32 %v1946_v47, %v1896_v20  ;;  %v1541_v16 = vmul.f32 %v9144_v22, %v9085_v21  ;;  %v1590_v26 = vmul.f32 %v9163_v38, %v9195_v17  ;;  %v6694_v25 = vrot.slane %v2015_v45, %v9192_v43  ;;  %v9197_v47 = vld [vmem:[#allocation135_spill] sm:$0xff]  ;;  %v9198_v45 = vld [vmem:[#allocation25_spill] sm:$0xff] }
 0x188   :  { %v1806_v5 = vadd.f32 %v1765_v23, %v1764_v48  ;;  %v1979_v56 = vadd.f32 %v1947_v44, %v1897_v40  ;;  %v2028_v32 = vmul.f32 %v6685_v34, %v9196_v52  ;;  %v1591_v20 = vmul.f32 %v9164_v51, %v9195_v17  ;;  %v9199_v17 = vld [vmem:[#allocation26_spill] sm:$0xff] }
 0x189   :  { %v1622_v18 = vadd.f32 %v1590_v26, %v1540_v50  ;;  %v1672_v27 = vmul.f32 %v9150_v35, %v9197_v47  ;;  %v1673_v21 = vmul.f32 %v9153_v59, %v9197_v47  ;;  %v2029_v48 = vmul.f32 %v6694_v25, %v9196_v52 }
 0x18a   :  { %1807 = vadd.xlane.f32.xlu0 %v1806_v5  ;;  %v2060_v40 = vadd.f32 %v2028_v32, %v1978_v54  ;;  %v1900_v23 = vmul.f32 %v6660_v42, %v9198_v45  ;;  %v1901_v44 = vmul.f32 %v6665_v60, %v9198_v45  ;;  %v6710_v43 = vpop.xlane.xlu1 %643  ;;  %v1623_v26 = vadd.f32 %v1591_v20, %v1541_v16 }
 0x18b   :  { %v1704_v50 = vadd.f32 %v1672_v27, %v1622_v18  ;;  %v1950_v61 = vmul.f32 %v6668_v2, %v9199_v17  ;;  %v1951_v5 = vmul.f32 %v6674_v19, %v9199_v17  ;;  %v2061_v47 = vadd.f32 %v2029_v48, %v1979_v56 }
 0x18c   :  { %v2092_v52 = vadd.f32 %v2060_v40, %v6089_v0  ;;  %v2032_v54 = vmul.f32 %v6685_v34, %v9091_v9  ;;  %v2033_v32 = vmul.f32 %v6694_v25, %v9091_v9  ;;  %v1705_v45 = vadd.f32 %v1673_v21, %v1623_v26 }
 0x18d   :  { %v1736_v13 = vadd.f32 %v1704_v50, %v6205_v58  ;;  %v1982_v16 = vadd.f32 %v1950_v61, %v1900_v23  ;;  %v1983_v27 = vadd.f32 %v1951_v5, %v1901_v44  ;;  %v2093_v20 = vadd.f32 %v2061_v47, %v6089_v0  ;;  %v9200_v50 = vld [vmem:[#allocation160_spill] sm:$0xff]  ;;  %v9201_v47 = vld [vmem:[#allocation147_spill] sm:$0xff] }
 0x18e   :  { %v2124_v18 = vmax.f32 %v2092_v52, 0.0  ;;  %v1544_v17 = vmul.f32 %v9142_v37, %v9097_v6  ;;  %v1545_v56 = vmul.f32 %v9144_v22, %v9097_v6  ;;  %v6727_v48 = vpop.xlane.xlu1 %652  ;;  %v1737_v40 = vadd.f32 %v1705_v45, %v6205_v58 }
 0x18f   :  { %v1768_v39 = vmax.f32 %v1736_v13, 0.0  ;;  %v2064_v9 = vadd.f32 %v2032_v54, %v1982_v16  ;;  %v2065_v21 = vadd.f32 %v2033_v32, %v1983_v27  ;;  %v2125_v26 = vmax.f32 %v2093_v20, 0.0 }
 0x190   :  { %v1594_v61 = vmul.f32 %v9163_v38, %v9200_v50  ;;  %v1595_v52 = vmul.f32 %v9164_v51, %v9200_v50  ;;  %v1676_v37 = vmul.f32 %v9150_v35, %v9201_v47  ;;  %v1769_v23 = vmax.f32 %v1737_v40, 0.0  ;;  %v9202_v40 = vld [vmem:[#allocation29_spill] sm:$0xff] }
 0x191   :  { %v2096_v22 = vadd.f32 %v2064_v9, %v6051_v53  ;;  %v2097_v44 = vadd.f32 %v2065_v21, %v6051_v53  ;;  %v1677_v13 = vmul.f32 %v9153_v59, %v9201_v47  ;;  %v2157_v45 = vadd.f32 %v2125_v26, %v2124_v18  ;;  %v9203_v26 = vld [vmem:[#allocation163_spill] sm:$0xff] }
 0x192   :  { %v1626_v5 = vadd.f32 %v1594_v61, %v1544_v17  ;;  %v1627_v54 = vadd.f32 %v1595_v52, %v1545_v56  ;;  %v1904_v38 = vmul.f32 %v6660_v42, %v9159_v28  ;;  %v6742_v32 = vpop.xlane.xlu1 %658  ;;  %v1812_v51 = vadd.f32 %v1769_v23, %v1768_v39  ;;  %v9204_v52 = vld [vmem:[#allocation64_spill] sm:$0xff] }
 0x193   :  { %v2128_v16 = vmax.f32 %v2096_v22, 0.0  ;;  %v2129_v27 = vmax.f32 %v2097_v44, 0.0  ;;  %v1905_v35 = vmul.f32 %v6665_v60, %v9159_v28  ;;  %2158 = vadd.xlane.f32.xlu1 %v2157_v45  ;;  %v1954_v59 = vmul.f32 %v6668_v2, %v9162_v8  ;;  %v6750_v18 = vpop.xlane.xlu0 %646 }
 0x194   :  { %v1708_v9 = vadd.f32 %v1676_v37, %v1626_v5  ;;  %v1709_v20 = vadd.f32 %v1677_v13, %v1627_v54  ;;  %v1955_v17 = vmul.f32 %v6674_v19, %v9162_v8  ;;  %1813 = vadd.xlane.f32.xlu0 %v1812_v51  ;;  %v2036_v39 = vmul.f32 %v6685_v34, %v9202_v40 }
 0x195   :  { %v2163_v56 = vadd.f32 %v2129_v27, %v2128_v16  ;;  %v2037_v21 = vmul.f32 %v6694_v25, %v9202_v40  ;;  %v1894_v61 = vmul.f32 %v6660_v42, %v9203_v26  ;;  %v1986_v22 = vadd.f32 %v1954_v59, %v1904_v38 }
 0x196   :  { %v1740_v37 = vadd.f32 %v1708_v9, %v9204_v52  ;;  %v1741_v23 = vadd.f32 %v1709_v20, %v9204_v52  ;;  %v1987_v44 = vadd.f32 %v1955_v17, %v1905_v35  ;;  %v1895_v13 = vmul.f32 %v6665_v60, %v9203_v26  ;;  %v6768_v20 = vpop.xlane.xlu1 %664 }
 0x197   :  { %v1944_v45 = vmul.f32 %v6668_v2, %v9166_v46  ;;  %v1945_v5 = vmul.f32 %v6674_v19, %v9166_v46  ;;  %v2026_v54 = vmul.f32 %v6685_v34, %v9105_v36  ;;  %2164 = vadd.xlane.f32.xlu1 %v2163_v56  ;;  %v2068_v27 = vadd.f32 %v2036_v39, %v1986_v22  ;;  %v6778_v39 = vpop.xlane.xlu0 %649 }
 0x198   :  { %v1772_v51 = vmax.f32 %v1740_v37, 0.0  ;;  %v1773_v16 = vmax.f32 %v1741_v23, 0.0  ;;  %v2069_v9 = vadd.f32 %v2037_v21, %v1987_v44  ;;  %v2027_v59 = vmul.f32 %v6694_v25, %v9105_v36 }
 0x199   :  { %v1976_v38 = vadd.f32 %v1944_v45, %v1894_v61  ;;  %v1977_v35 = vadd.f32 %v1945_v5, %v1895_v13  ;;  %v1908_v17 = vmul.f32 %v6660_v42, %v9167_v41  ;;  %v2100_v46 = vadd.f32 %v2068_v27, %v6080_v30  ;;  %v9205_v61 = vld [vmem:[#allocation40_spill] sm:$0xff]  ;;  %v9206_v45 = vld [vmem:[#allocation33_spill] sm:$0xff] }
 0x19a   :  { %v1818_v26 = vadd.f32 %v1773_v16, %v1772_v51  ;;  %v2101_v52 = vadd.f32 %v2069_v9, %v6080_v30  ;;  %v1909_v56 = vmul.f32 %v6665_v60, %v9167_v41  ;;  %v1958_v23 = vmul.f32 %v6668_v2, %v9205_v61 }
 0x19b   :  { %v2058_v21 = vadd.f32 %v2026_v54, %v1976_v38  ;;  %v2059_v37 = vadd.f32 %v2027_v59, %v1977_v35  ;;  %v1959_v22 = vmul.f32 %v6674_v19, %v9205_v61  ;;  %v2132_v44 = vmax.f32 %v2100_v46, 0.0  ;;  %v6790_v35 = vpop.xlane.xlu1 %670 }
 0x19c   :  { %1819 = vadd.xlane.f32.xlu0 %v1818_v26  ;;  %v2133_v13 = vmax.f32 %v2101_v52, 0.0  ;;  %v2040_v5 = vmul.f32 %v6685_v34, %v9206_v45  ;;  %v2041_v51 = vmul.f32 %v6694_v25, %v9206_v45  ;;  %v1990_v27 = vadd.f32 %v1958_v23, %v1908_v17  ;;  %v6816_v23 = vpop.xlane.xlu0 %655 }
 0x19d   :  { %v2090_v16 = vadd.f32 %v2058_v21, %v6015_v3  ;;  %v2091_v54 = vadd.f32 %v2059_v37, %v6015_v3  ;;  %v1991_v9 = vadd.f32 %v1959_v22, %v1909_v56  ;;  %v4701_v61 = vmov 0.0  }
 0x19e   :  { %v2169_v38 = vadd.f32 %v2133_v13, %v2132_v44  ;;  %v2072_v52 = vadd.f32 %v2040_v5, %v1990_v27  ;;  %26 = vst.msk [vmem:[#allocation2] sm:$0xff] %vm25_vm1, %v4701_v61  ;;  %27 = vst.msk [vmem:[#allocation2 + $0x8] sm:$0xff] %vm25_vm1, %v4701_v61  ;;  %v1898_v17 = vmul.f32 %v6660_v42, %v9169_v10 }
 0x19f   :  { %v2122_v26 = vmax.f32 %v2090_v16, 0.0  ;;  %v2123_v46 = vmax.f32 %v2091_v54, 0.0  ;;  %v2073_v59 = vadd.f32 %v2041_v51, %v1991_v9  ;;  %28 = vst.msk [vmem:[#allocation2 + $0x10] sm:$0xff] %vm25_vm1, %v4701_v61  ;;  %29 = vst.msk [vmem:[#allocation2 + $0x18] sm:$0xff] %vm25_vm1, %v4701_v61  ;;  %v1899_v56 = vmul.f32 %v6665_v60, %v9169_v10 }
 0x1a0   :  { %30 = vst.msk [vmem:[#allocation2 + $0x20] sm:$0xff] %vm25_vm1, %v4701_v61  ;;  %31 = vst.msk [vmem:[#allocation2 + $0x28] sm:$0xff] %vm25_vm1, %v4701_v61  ;;  %2170 = vadd.xlane.f32.xlu1 %v2169_v38  ;;  %v1948_v21 = vmul.f32 %v6668_v2, %v9170_v11  ;;  %v1949_v37 = vmul.f32 %v6674_v19, %v9170_v11  ;;  %v2104_v44 = vadd.f32 %v2072_v52, %v6109_v14 }
 0x1a1   :  { %32 = vst.msk [vmem:[#allocation2 + $0x30] sm:$0xff] %vm25_vm1, %v4701_v61  ;;  %33 = vst.msk [vmem:[#allocation2 + $0x38] sm:$0xff] %vm25_vm1, %v4701_v61  ;;  %v2154_v22 = vadd.f32 %v2123_v46, %v2122_v26  ;;  %v2030_v13 = vmul.f32 %v6685_v34, %v9111_v24  ;;  %v2031_v16 = vmul.f32 %v6694_v25, %v9111_v24  ;;  %v9209_v24 = vld [vmem:[#allocation124_spill] sm:$0xff] }
 0x1a2   :  { %34 = vst.msk [vmem:[#allocation2 + $0x40] sm:$0xff] %vm25_vm1, %v4701_v61  ;;  %35 = vst.msk [vmem:[#allocation2 + $0x48] sm:$0xff] %vm25_vm1, %v4701_v61  ;;  %v1980_v5 = vadd.f32 %v1948_v21, %v1898_v17  ;;  %v1981_v51 = vadd.f32 %v1949_v37, %v1899_v56  ;;  %v1912_v54 = vmul.f32 %v6660_v42, %v9171_v63  ;;  %v2136_v27 = vmax.f32 %v2104_v44, 0.0  ;;  %v9207_v17 = vld [vmem:[#allocation35_spill] sm:$0xff]  ;;  %v6834_v21 = vpop.xlane.xlu1 %676 }
 0x1a3   :  { %36 = vst.msk [vmem:[#allocation2 + $0x50] sm:$0xff] %vm25_vm1, %v4701_v61  ;;  %37 = vst.msk [vmem:[#allocation2 + $0x58] sm:$0xff] %vm25_vm1, %v4701_v61  ;;  %2155 = vadd.xlane.f32.xlu0 %v2154_v22  ;;  %v1913_v38 = vmul.f32 %v6665_v60, %v9171_v63  ;;  %v1962_v26 = vmul.f32 %v6668_v2, %v9172_v55  ;;  %v2044_v56 = vmul.f32 %v6685_v34, %v9207_v17 }
 0x1a4   :  { %38 = vst.msk [vmem:[#allocation2 + $0x60] sm:$0xff] %vm25_vm1, %v4701_v61  ;;  %39 = vst.msk [vmem:[#allocation2 + $0x68] sm:$0xff] %vm25_vm1, %v4701_v61  ;;  %v2062_v46 = vadd.f32 %v2030_v13, %v1980_v5  ;;  %v2063_v52 = vadd.f32 %v2031_v16, %v1981_v51  ;;  %v2045_v44 = vmul.f32 %v6694_v25, %v9207_v17 }
 0x1a5   :  { %40 = vst.msk [vmem:[#allocation2 + $0x70] sm:$0xff] %vm25_vm1, %v4701_v61  ;;  %41 = vst.msk [vmem:[#allocation2 + $0x78] sm:$0xff] %vm25_vm1, %v4701_v61  ;;  %v2105_v61 = vadd.f32 %v2073_v59, %v6109_v14  ;;  %v1963_v59 = vmul.f32 %v6674_v19, %v9172_v55  ;;  %v1994_v22 = vadd.f32 %v1962_v26, %v1912_v54  ;;  %v690_v14 = vld [vmem:[#allocation2] sm:$0xff]  ;;  %v6844_v55 = vpop.xlane.xlu0 %661 }
 0x1a6   :  { %v2094_v13 = vadd.f32 %v2062_v46, %v9209_v24  ;;  %v2095_v5 = vadd.f32 %v2063_v52, %v9209_v24  ;;  %v706_v54 = vadd.f32 %v690_v14, %v6710_v43  ;;  %v693_v11 = vld [vmem:[#allocation2 + $0x18] sm:$0xff] }
 0x1a7   :  { %v2137_v9 = vmax.f32 %v2105_v61, 0.0  ;;  %v9208_v61 = vld [vmem:[#allocation172_spill] sm:$0xff]  ;;  %v1995_v51 = vadd.f32 %v1963_v59, %v1913_v38  ;;  %v9211_v38 = vld [vmem:[#allocation85_spill] sm:$0xff] }
 0x1a8   :  { %v1902_v63 = vmul.f32 %v6660_v42, %v9208_v61  ;;  %v1903_v16 = vmul.f32 %v6665_v60, %v9208_v61  ;;  %v2126_v46 = vmax.f32 %v2094_v13, 0.0  ;;  %v2127_v10 = vmax.f32 %v2095_v5, 0.0  ;;  %723 = vst.msk [vmem:[#allocation2] sm:$0xff] %vm722_vm0, %v706_v54  ;;  %v6861_v13 = vpop.xlane.xlu1 %682 }
 0x1a9   :  { %v2175_v37 = vadd.f32 %v2137_v9, %v2136_v27  ;;  %v2076_v27 = vadd.f32 %v2044_v56, %v1994_v22  ;;  %v9210_v9 = vld [vmem:[#allocation92_spill] sm:$0xff]  ;;  %v2077_v52 = vadd.f32 %v2045_v44, %v1995_v51  ;;  %v2034_v59 = vmul.f32 %v6685_v34, %v9211_v38 }
 0x1aa   :  { %v1952_v26 = vmul.f32 %v6668_v2, %v9210_v9  ;;  %v1953_v17 = vmul.f32 %v6674_v19, %v9210_v9  ;;  %v2035_v43 = vmul.f32 %v6694_v25, %v9211_v38  ;;  %v2160_v56 = vadd.f32 %v2127_v10, %v2126_v46  ;;  %v9215_v38 = vld [vmem:[#allocation93_spill] sm:$0xff] }
 0x1ab   :  { %2176 = vadd.xlane.f32.xlu1 %v2175_v37  ;;  %v2108_v37 = vadd.f32 %v2076_v27, %v6125_v29  ;;  %v2109_v22 = vadd.f32 %v2077_v52, %v6125_v29  ;;  %v709_v9 = vadd.f32 %v693_v11, %v6727_v48  ;;  %v1916_v44 = vmul.f32 %v6660_v42, %v9175_v49  ;;  %v9213_v52 = vld [vmem:[#allocation173_spill] sm:$0xff] }
 0x1ac   :  { %v1984_v61 = vadd.f32 %v1952_v26, %v1902_v63  ;;  %v1985_v14 = vadd.f32 %v1953_v17, %v1903_v16  ;;  %v1917_v63 = vmul.f32 %v6665_v60, %v9175_v49  ;;  %2161 = vadd.xlane.f32.xlu0 %v2160_v56  ;;  %v1966_v10 = vmul.f32 %v6668_v2, %v9176_v31  ;;  %v6872_v16 = vpop.xlane.xlu0 %667  ;;  %v695_v56 = vld [vmem:[#allocation2 + $0x28] sm:$0xff]  ;;  %v9214_v49 = vld [vmem:[#allocation104_spill] sm:$0xff] }
 0x1ad   :  { %v2140_v5 = vmax.f32 %v2108_v37, 0.0  ;;  %v2141_v17 = vmax.f32 %v2109_v22, 0.0  ;;  %726 = vst.msk [vmem:[#allocation2 + $0x18] sm:$0xff] %vm722_vm0, %v709_v9  ;;  %v1967_v11 = vmul.f32 %v6674_v19, %v9176_v31  ;;  %v2048_v48 = vmul.f32 %v6685_v34, %v9177_v33 }
 0x1ae   :  { %v2066_v51 = vadd.f32 %v2034_v59, %v1984_v61  ;;  %v2067_v54 = vadd.f32 %v2035_v43, %v1985_v14  ;;  %v9212_v61 = vld [vmem:[#allocation49_spill] sm:$0xff]  ;;  %v2049_v46 = vmul.f32 %v6694_v25, %v9177_v33  ;;  %v1906_v9 = vmul.f32 %v6660_v42, %v9213_v52 }
 0x1af   :  { %v2181_v59 = vadd.f32 %v2141_v17, %v2140_v5  ;;  %v1998_v37 = vadd.f32 %v1966_v10, %v1916_v44  ;;  %v1999_v14 = vadd.f32 %v1967_v11, %v1917_v63  ;;  %v1907_v43 = vmul.f32 %v6665_v60, %v9213_v52  ;;  %v6890_v63 = vpop.xlane.xlu1 %688 }
 0x1b0   :  { %v2098_v27 = vadd.f32 %v2066_v51, %v9212_v61  ;;  %v2099_v26 = vadd.f32 %v2067_v54, %v9212_v61  ;;  %v1956_v51 = vmul.f32 %v6668_v2, %v9214_v49  ;;  %v1957_v54 = vmul.f32 %v6674_v19, %v9214_v49  ;;  %v691_v61 = vld [vmem:[#allocation2 + $0x8] sm:$0xff] }
 0x1b1   :  { %2182 = vadd.xlane.f32.xlu1 %v2181_v59  ;;  %v2080_v33 = vadd.f32 %v2048_v48, %v1998_v37  ;;  %v2081_v29 = vadd.f32 %v2049_v46, %v1999_v14  ;;  %v2038_v44 = vmul.f32 %v6685_v34, %v9215_v38  ;;  %v2039_v5 = vmul.f32 %v6694_v25, %v9215_v38  ;;  %v6898_v59 = vpop.xlane.xlu0 %673 }
 0x1b2   :  { %v2130_v22 = vmax.f32 %v2098_v27, 0.0  ;;  %v2131_v31 = vmax.f32 %v2099_v26, 0.0  ;;  %v1988_v10 = vadd.f32 %v1956_v51, %v1906_v9  ;;  %v1989_v11 = vadd.f32 %v1957_v54, %v1907_v43 }
 0x1b3   :  { %v711_v27 = vadd.f32 %v695_v56, %v6742_v32  ;;  %v2112_v26 = vadd.f32 %v2080_v33, %v6145_v1  ;;  %v2113_v49 = vadd.f32 %v2081_v29, %v6145_v1  ;;  %v707_v48 = vadd.f32 %v691_v61, %v6750_v18 }
 0x1b4   :  { %v2166_v17 = vadd.f32 %v2131_v31, %v2130_v22  ;;  %v1920_v46 = vmul.f32 %v6660_v42, %v9180_v62  ;;  %v2070_v37 = vadd.f32 %v2038_v44, %v1988_v10  ;;  %v2071_v14 = vadd.f32 %v2039_v5, %v1989_v11  ;;  %v9216_v44 = vld [vmem:[#allocation30_spill] sm:$0xff]  ;;  %v6918_v10 = vpop.xlane.xlu1 %1024 }
 0x1b5   :  { %728 = vst.msk [vmem:[#allocation2 + $0x28] sm:$0xff] %vm722_vm0, %v711_v27  ;;  %v1921_v31 = vmul.f32 %v6665_v60, %v9180_v62  ;;  %v1970_v33 = vmul.f32 %v6668_v2, %v9181_v12  ;;  %v2144_v32 = vmax.f32 %v2112_v26, 0.0  ;;  %v2145_v29 = vmax.f32 %v2113_v49, 0.0  ;;  %724 = vst.msk [vmem:[#allocation2 + $0x8] sm:$0xff] %vm722_vm0, %v707_v48  ;;  %v9217_v48 = vld [vmem:[#allocation118_spill] sm:$0xff] }
 0x1b6   :  { %2167 = vadd.xlane.f32.xlu0 %v2166_v17  ;;  %v1971_v18 = vmul.f32 %v6674_v19, %v9181_v12  ;;  %v2052_v61 = vmul.f32 %v6685_v34, %v6013_v57  ;;  %v2102_v9 = vadd.f32 %v2070_v37, %v6149_v15  ;;  %v2103_v43 = vadd.f32 %v2071_v14, %v6149_v15  ;;  %v697_v17 = vld [vmem:[#allocation2 + $0x38] sm:$0xff]  ;;  %v692_v37 = vld [vmem:[#allocation2 + $0x10] sm:$0xff] }
 0x1b7   :  { %v2002_v56 = vadd.f32 %v1970_v33, %v1920_v46  ;;  %v2053_v22 = vmul.f32 %v6694_v25, %v6013_v57  ;;  %v2187_v51 = vadd.f32 %v2145_v29, %v2144_v32  ;;  %v1910_v49 = vmul.f32 %v6660_v42, %v9216_v44  ;;  %v6928_v29 = vpop.xlane.xlu0 %679 }
 0x1b8   :  { %v2003_v54 = vadd.f32 %v1971_v18, %v1921_v31  ;;  %v1911_v5 = vmul.f32 %v6665_v60, %v9216_v44  ;;  %v2134_v11 = vmax.f32 %v2102_v9, 0.0  ;;  %v2135_v27 = vmax.f32 %v2103_v43, 0.0 }
 0x1b9   :  { %v2084_v26 = vadd.f32 %v2052_v61, %v2002_v56  ;;  %v1960_v46 = vmul.f32 %v6668_v2, %v9217_v48  ;;  %2188 = vadd.xlane.f32.xlu1 %v2187_v51  ;;  %v1961_v31 = vmul.f32 %v6674_v19, %v9217_v48  ;;  %v2042_v33 = vmul.f32 %v6685_v34, %v9183_v4 }
 0x1ba   :  { %v2085_v14 = vadd.f32 %v2053_v22, %v2003_v54  ;;  %v2043_v32 = vmul.f32 %v6694_v25, %v9183_v4  ;;  %v2172_v18 = vadd.f32 %v2135_v27, %v2134_v11  ;;  %v713_v43 = vadd.f32 %v697_v17, %v6768_v20  ;;  %v9218_v54 = vld [vmem:[#allocation67_spill] sm:$0xff]  ;;  %v9219_v27 = vld [vmem:[#allocation68_spill] sm:$0xff] }
 0x1bb   :  { %v2116_v61 = vadd.f32 %v2084_v26, %v6163_v7  ;;  %v1992_v9 = vadd.f32 %v1960_v46, %v1910_v49  ;;  %v1993_v22 = vadd.f32 %v1961_v31, %v1911_v5  ;;  %v708_v51 = vadd.f32 %v692_v37, %v6778_v39  ;;  %v9220_v5 = vld [vmem:[#allocation48_spill] sm:$0xff]  ;;  %v6946_v46 = vpop.xlane.xlu1 %1030  ;;  %v9221_v37 = vld [vmem:[#allocation57_spill] sm:$0xff] }
 0x1bc   :  { %v2117_v56 = vadd.f32 %v2085_v14, %v6163_v7  ;;  %v1924_v48 = vmul.f32 %v6660_v42, %v9218_v54  ;;  %2173 = vadd.xlane.f32.xlu0 %v2172_v18  ;;  %730 = vst.msk [vmem:[#allocation2 + $0x38] sm:$0xff] %vm722_vm0, %v713_v43  ;;  %v1925_v11 = vmul.f32 %v6665_v60, %v9218_v54  ;;  %v9222_v18 = vld [vmem:[#allocation34_spill] sm:$0xff] }
 0x1bd   :  { %v2148_v44 = vmax.f32 %v2116_v61, 0.0  ;;  %v2074_v57 = vadd.f32 %v2042_v33, %v1992_v9  ;;  %v1974_v49 = vmul.f32 %v6668_v2, %v9219_v27  ;;  %v2075_v17 = vadd.f32 %v2043_v32, %v1993_v22  ;;  %725 = vst.msk [vmem:[#allocation2 + $0x10] sm:$0xff] %vm722_vm0, %v708_v51  ;;  %v699_v22 = vld [vmem:[#allocation2 + $0x48] sm:$0xff]  ;;  %v6956_v51 = vpop.xlane.xlu0 %685 }
 0x1be   :  { %v2149_v20 = vmax.f32 %v2117_v56, 0.0  ;;  %v1975_v39 = vmul.f32 %v6674_v19, %v9219_v27  ;;  %v2056_v26 = vmul.f32 %v6685_v34, %v9220_v5  ;;  %v2057_v33 = vmul.f32 %v6694_v25, %v9220_v5  ;;  %v694_v5 = vld [vmem:[#allocation2 + $0x20] sm:$0xff] }
 0x1bf   :  { %v2106_v14 = vadd.f32 %v2074_v57, %v9221_v37  ;;  %v2006_v31 = vadd.f32 %v1974_v49, %v1924_v48  ;;  %v1914_v61 = vmul.f32 %v6660_v42, %v9222_v18  ;;  %v2107_v9 = vadd.f32 %v2075_v17, %v9221_v37  ;;  %v9223_v57 = vld [vmem:[#allocation134_spill] sm:$0xff]  ;;  %v9224_v17 = vld [vmem:[#allocation119_spill] sm:$0xff] }
 0x1c0   :  { %v2193_v32 = vadd.f32 %v2149_v20, %v2148_v44  ;;  %v2007_v43 = vadd.f32 %v1975_v39, %v1925_v11  ;;  %v1915_v56 = vmul.f32 %v6665_v60, %v9222_v18  ;;  %v1964_v48 = vmul.f32 %v6668_v2, %v9223_v57  ;;  %v4631_v44 = vld [vmem:[%s8496_s0 + $0x28] sm:$0x77] }
 0x1c1   :  { %v2138_v27 = vmax.f32 %v2106_v14, 0.0  ;;  %v2088_v54 = vadd.f32 %v2056_v26, %v2006_v31  ;;  %v1965_v49 = vmul.f32 %v6674_v19, %v9223_v57  ;;  %v2139_v11 = vmax.f32 %v2107_v9, 0.0  ;;  %v9225_v14 = vld [vmem:[#allocation58_spill] sm:$0xff] }
 0x1c2   :  { %2194 = vadd.xlane.f32.xlu1 %v2193_v32  ;;  %v2089_v20 = vadd.f32 %v2057_v33, %v2007_v43  ;;  %v2046_v39 = vmul.f32 %v6685_v34, %v9224_v17  ;;  %v2047_v26 = vmul.f32 %v6694_v25, %v9224_v17  ;;  %v1996_v18 = vadd.f32 %v1964_v48, %v1914_v61  ;;  %v9226_v32 = vld [vmem:[#allocation6_spill] sm:$0xff]  ;;  %v6974_v33 = vpop.xlane.xlu1 %1036  ;;  %v9227_v17 = vld [vmem:[#allocation7_spill] sm:$0xff] }
 0x1c3   :  { %v2120_v31 = vadd.f32 %v2088_v54, %v9225_v14  ;;  %v1997_v37 = vadd.f32 %v1965_v49, %v1915_v56  ;;  %v715_v57 = vadd.f32 %v699_v22, %v6790_v35  ;;  %v2178_v7 = vadd.f32 %v2139_v11, %v2138_v27  ;;  %v9228_v27 = vld [vmem:[#allocation8_spill] sm:$0xff]  ;;  %v6984_v22 = vpop.xlane.xlu0 %1021  ;;  %v9231_v48 = vld [vmem:[#allocation63_spill] sm:$0xff] }
 0x1c4   :  { %v2121_v4 = vadd.f32 %v2089_v20, %v9225_v14  ;;  %v710_v15 = vadd.f32 %v694_v5, %v6816_v23  ;;  %v2257_v9 = vrot.slane %v4631_v44, %v9226_v32  ;;  %v2078_v12 = vadd.f32 %v2046_v39, %v1996_v18  ;;  %v9229_v5 = vld [vmem:[#allocation9_spill] sm:$0xff]  ;;  %9230 = vst [vmem:[#allocation110_spill] sm:$0xff] %v6984_v22 }
 0x1c5   :  { %v2152_v43 = vmax.f32 %v2120_v31, 0.0  ;;  %v2079_v62 = vadd.f32 %v2047_v26, %v1997_v37  ;;  %732 = vst.msk [vmem:[#allocation2 + $0x48] sm:$0xff] %vm722_vm0, %v715_v57  ;;  %v2261_v54 = vrot.slane %v4631_v44, %v9227_v17  ;;  %2179 = vadd.xlane.f32.xlu0 %v2178_v7  ;;  %v2307_v23 = vrot.slane %v4631_v44, %v9228_v27  ;;  %v9232_v7 = vld [vmem:[#allocation10_spill] sm:$0xff] }
 0x1c6   :  { %v2153_v61 = vmax.f32 %v2121_v4, 0.0  ;;  %727 = vst.msk [vmem:[#allocation2 + $0x20] sm:$0xff] %vm722_vm0, %v710_v15  ;;  %v6980_v35 = vrot.slane %v2257_v9, %v9226_v32  ;;  %v2311_v56 = vrot.slane %v4631_v44, %v9229_v5  ;;  %v2110_v18 = vadd.f32 %v2078_v12, %v9231_v48  ;;  %v9233_v15 = vld [vmem:[#allocation168_spill] sm:$0xff]  ;;  %v9234_v12 = vld [vmem:[#allocation11_spill] sm:$0xff]  ;;  %v9239_v17 = vld [vmem:[#allocation78_spill] sm:$0xff] }
 0x1c7   :  { %v2111_v37 = vadd.f32 %v2079_v62, %v9231_v48  ;;  %v6989_v57 = vrot.slane %v2261_v54, %v9226_v32  ;;  %v2389_v4 = vrot.slane %v4631_v44, %v9232_v7  ;;  %v6995_v20 = vrot.slane %v2307_v23, %v9228_v27  ;;  %v9235_v54 = vld [vmem:[#allocation77_spill] sm:$0xff]  ;;  %v9236_v48 = vld [vmem:[#allocation36_spill] sm:$0xff] }
 0x1c8   :  { %v2199_v49 = vadd.f32 %v2153_v61, %v2152_v43  ;;  %v2274_v11 = vmul.f32 %v6980_v35, %v9233_v15  ;;  %v6998_v39 = vrot.slane %v2311_v56, %v9228_v27  ;;  %v2142_v26 = vmax.f32 %v2110_v18, 0.0  ;;  %v7012_v18 = vpop.xlane.xlu1 %1042  ;;  %v701_v5 = vld [vmem:[#allocation2 + $0x58] sm:$0xff] }
 0x1c9   :  { %v2143_v31 = vmax.f32 %v2111_v37, 0.0  ;;  %v2275_v62 = vmul.f32 %v6989_v57, %v9233_v15  ;;  %v2393_v9 = vrot.slane %v4631_v44, %v9234_v12  ;;  %v2324_v43 = vmul.f32 %v6995_v20, %v9235_v54  ;;  %9237 = vst [vmem:[#allocation111_spill] sm:$0xff] %v7012_v18 }
 0x1ca   :  { %2200 = vadd.xlane.f32.xlu1 %v2199_v49  ;;  %v2325_v61 = vmul.f32 %v6998_v39, %v9235_v54  ;;  %v7008_v23 = vrot.slane %v2389_v4, %v9232_v7  ;;  %v1918_v56 = vmul.f32 %v6660_v42, %v9236_v48  ;;  %v1919_v44 = vmul.f32 %v6665_v60, %v9236_v48  ;;  %v9238_v49 = vld [vmem:[#allocation146_spill] sm:$0xff]  ;;  %v696_v54 = vld [vmem:[#allocation2 + $0x30] sm:$0xff] }
 0x1cb   :  { %v2184_v37 = vadd.f32 %v2143_v31, %v2142_v26  ;;  %v7015_v15 = vrot.slane %v2393_v9, %v9232_v7  ;;  %v1968_v12 = vmul.f32 %v6668_v2, %v9238_v49  ;;  %v2356_v27 = vadd.f32 %v2324_v43, %v2274_v11  ;;  %v7025_v26 = vpop.xlane.xlu0 %1027  ;;  %v9241_v48 = vld [vmem:[#allocation135_spill] sm:$0xff] }
 0x1cc   :  { %v2357_v4 = vadd.f32 %v2325_v61, %v2275_v62  ;;  %v2406_v32 = vmul.f32 %v7008_v23, %v9239_v17  ;;  %v1969_v14 = vmul.f32 %v6674_v19, %v9238_v49  ;;  %9240 = vst [vmem:[#allocation150_spill] sm:$0xff] %v7025_v26  ;;  %v2050_v7 = vmul.f32 %v6685_v34, %v9241_v48  ;;  %v9242_v26 = vld [vmem:[#allocation25_spill] sm:$0xff] }
 0x1cd   :  { %2185 = vadd.xlane.f32.xlu0 %v2184_v37  ;;  %v2407_v31 = vmul.f32 %v7015_v15, %v9239_v17  ;;  %v2000_v9 = vadd.f32 %v1968_v12, %v1918_v56  ;;  %v2051_v11 = vmul.f32 %v6694_v25, %v9241_v48  ;;  %v717_v61 = vadd.f32 %v701_v5, %v6834_v21 }
 0x1ce   :  { %v2438_v62 = vadd.f32 %v2406_v32, %v2356_v27  ;;  %v2001_v43 = vadd.f32 %v1969_v14, %v1919_v44  ;;  %v712_v18 = vadd.f32 %v696_v54, %v6844_v55  ;;  %v2278_v37 = vmul.f32 %v6980_v35, %v9242_v26  ;;  %v9243_v14 = vld [vmem:[#allocation26_spill] sm:$0xff]  ;;  %v7046_v32 = vpop.xlane.xlu1 %1048 }
 0x1cf   :  { %v2439_v49 = vadd.f32 %v2407_v31, %v2357_v4  ;;  %v2082_v22 = vadd.f32 %v2050_v7, %v2000_v9  ;;  %v2279_v12 = vmul.f32 %v6989_v57, %v9242_v26  ;;  %734 = vst.msk [vmem:[#allocation2 + $0x58] sm:$0xff] %vm722_vm0, %v717_v61  ;;  %v2328_v21 = vmul.f32 %v6995_v20, %v9243_v14  ;;  %v9244_v7 = vld [vmem:[#allocation79_spill] sm:$0xff] }
 0x1d0   :  { %v2470_v56 = vadd.f32 %v2438_v62, %v6089_v0  ;;  %v2083_v17 = vadd.f32 %v2051_v11, %v2001_v43  ;;  %729 = vst.msk [vmem:[#allocation2 + $0x30] sm:$0xff] %vm722_vm0, %v712_v18  ;;  %v2329_v55 = vmul.f32 %v6998_v39, %v9243_v14  ;;  %v2410_v54 = vmul.f32 %v7008_v23, %v9244_v7  ;;  %v7055_v11 = vpop.xlane.xlu0 %1033 }
 0x1d1   :  { %v2471_v27 = vadd.f32 %v2439_v49, %v6089_v0  ;;  %v2114_v5 = vadd.f32 %v2082_v22, %v6205_v58  ;;  %v2411_v44 = vmul.f32 %v7015_v15, %v9244_v7  ;;  %v2360_v31 = vadd.f32 %v2328_v21, %v2278_v37  ;;  %v703_v7 = vld [vmem:[#allocation2 + $0x68] sm:$0xff] }
 0x1d2   :  { %v2502_v4 = vmax.f32 %v2470_v56, 0.0  ;;  %v2115_v18 = vadd.f32 %v2083_v17, %v6205_v58  ;;  %v2361_v9 = vadd.f32 %v2329_v55, %v2279_v12  ;;  %v1922_v49 = vmul.f32 %v6660_v42, %v9097_v6  ;;  %v698_v17 = vld [vmem:[#allocation2 + $0x40] sm:$0xff] }
 0x1d3   :  { %v2503_v62 = vmax.f32 %v2471_v27, 0.0  ;;  %v2146_v43 = vmax.f32 %v2114_v5, 0.0  ;;  %v1923_v22 = vmul.f32 %v6665_v60, %v9097_v6  ;;  %v2442_v14 = vadd.f32 %v2410_v54, %v2360_v31  ;;  %v7071_v54 = vpop.xlane.xlu1 %1054 }
 0x1d4   :  { %v2147_v61 = vmax.f32 %v2115_v18, 0.0  ;;  %v2443_v0 = vadd.f32 %v2411_v44, %v2361_v9  ;;  %v1972_v56 = vmul.f32 %v6668_v2, %v9200_v50  ;;  %v1973_v12 = vmul.f32 %v6674_v19, %v9200_v50 }
 0x1d5   :  { %v2535_v37 = vadd.f32 %v2503_v62, %v2502_v4  ;;  %v2054_v21 = vmul.f32 %v6685_v34, %v9201_v47  ;;  %v2055_v42 = vmul.f32 %v6694_v25, %v9201_v47  ;;  %v2474_v60 = vadd.f32 %v2442_v14, %v6051_v53  ;;  %v9245_v62 = vld [vmem:[#allocation64_spill] sm:$0xff] }
 0x1d6   :  { %v2190_v55 = vadd.f32 %v2147_v61, %v2146_v43  ;;  %v2475_v27 = vadd.f32 %v2443_v0, %v6051_v53  ;;  %v2004_v5 = vadd.f32 %v1972_v56, %v1922_v49  ;;  %v2005_v2 = vadd.f32 %v1973_v12, %v1923_v22  ;;  %v7079_v0 = vpop.xlane.xlu0 %1039  ;;  %v9246_v22 = vld [vmem:[#allocation163_spill] sm:$0xff] }
 0x1d7   :  { %2536 = vadd.xlane.f32.xlu1 %v2535_v37  ;;  %v719_v44 = vadd.f32 %v703_v7, %v6861_v13  ;;  %v714_v19 = vadd.f32 %v698_v17, %v6872_v16  ;;  %v2282_v34 = vmul.f32 %v6980_v35, %v9159_v28  ;;  %v2506_v4 = vmax.f32 %v2474_v60, 0.0  ;;  %v9247_v60 = vld [vmem:[#allocation17_spill] sm:$0xff] }
 0x1d8   :  { %2191 = vadd.xlane.f32.xlu0 %v2190_v55  ;;  %v2507_v25 = vmax.f32 %v2475_v27, 0.0  ;;  %v2086_v18 = vadd.f32 %v2054_v21, %v2004_v5  ;;  %v2283_v14 = vmul.f32 %v6989_v57, %v9159_v28  ;;  %v2087_v31 = vadd.f32 %v2055_v42, %v2005_v2  ;;  %v705_v21 = vld [vmem:[#allocation2 + $0x78] sm:$0xff]  ;;  %v700_v42 = vld [vmem:[#allocation2 + $0x50] sm:$0xff] }
 0x1d9   :  { %736 = vst.msk [vmem:[#allocation2 + $0x68] sm:$0xff] %vm722_vm0, %v719_v44  ;;  %731 = vst.msk [vmem:[#allocation2 + $0x40] sm:$0xff] %vm722_vm0, %v714_v19  ;;  %v2332_v13 = vmul.f32 %v6995_v20, %v9162_v8  ;;  %v2333_v16 = vmul.f32 %v6998_v39, %v9162_v8  ;;  %v2414_v7 = vmul.f32 %v7008_v23, %v9202_v40  ;;  %v7103_v44 = vpop.xlane.xlu1 %1060 }
 0x1da   :  { %v2541_v9 = vadd.f32 %v2507_v25, %v2506_v4  ;;  %v2118_v43 = vadd.f32 %v2086_v18, %v9245_v62  ;;  %v2415_v49 = vmul.f32 %v7015_v15, %v9202_v40  ;;  %v2272_v61 = vmul.f32 %v6980_v35, %v9246_v22 }
 0x1db   :  { %v2119_v56 = vadd.f32 %v2087_v31, %v9245_v62  ;;  %v2364_v17 = vadd.f32 %v2332_v13, %v2282_v34  ;;  %v2365_v37 = vadd.f32 %v2333_v16, %v2283_v14  ;;  %v2273_v12 = vmul.f32 %v6989_v57, %v9246_v22  ;;  %v7109_v16 = vpop.xlane.xlu0 %1045 }
 0x1dc   :  { %2542 = vadd.xlane.f32.xlu1 %v2541_v9  ;;  %v2150_v55 = vmax.f32 %v2118_v43, 0.0  ;;  %v2322_v27 = vmul.f32 %v6995_v20, %v9247_v60  ;;  %v2323_v5 = vmul.f32 %v6998_v39, %v9247_v60  ;;  %v2404_v2 = vmul.f32 %v7008_v23, %v9105_v36 }
 0x1dd   :  { %v2151_v19 = vmax.f32 %v2119_v56, 0.0  ;;  %v2446_v34 = vadd.f32 %v2414_v7, %v2364_v17  ;;  %v2447_v4 = vadd.f32 %v2415_v49, %v2365_v37  ;;  %v2405_v25 = vmul.f32 %v7015_v15, %v9105_v36 }
 0x1de   :  { %v2354_v18 = vadd.f32 %v2322_v27, %v2272_v61  ;;  %v2355_v14 = vadd.f32 %v2323_v5, %v2273_v12  ;;  %v721_v31 = vadd.f32 %v705_v21, %v6890_v63  ;;  %v716_v13 = vadd.f32 %v700_v42, %v6898_v59  ;;  %v9248_v59 = vld [vmem:[#allocation40_spill] sm:$0xff] }
 0x1df   :  { %v2196_v9 = vadd.f32 %v2151_v19, %v2150_v55  ;;  %v2478_v43 = vadd.f32 %v2446_v34, %v6080_v30  ;;  %v2479_v60 = vadd.f32 %v2447_v4, %v6080_v30  ;;  %v2286_v7 = vmul.f32 %v6980_v35, %v9167_v41  ;;  %v9249_v4 = vld [vmem:[#allocation16_spill] sm:$0xff] }
 0x1e0   :  { %v2436_v49 = vadd.f32 %v2404_v2, %v2354_v18  ;;  %v2437_v56 = vadd.f32 %v2405_v25, %v2355_v14  ;;  %738 = vst.msk [vmem:[#allocation2 + $0x78] sm:$0xff] %vm722_vm0, %v721_v31  ;;  %733 = vst.msk [vmem:[#allocation2 + $0x50] sm:$0xff] %vm722_vm0, %v716_v13  ;;  %v2287_v63 = vmul.f32 %v6989_v57, %v9167_v41  ;;  %v7129_v2 = vpop.xlane.xlu1 %1066  ;;  %v9250_v13 = vld [vmem:[#allocation84_spill] sm:$0xff] }
 0x1e1   :  { %v2336_v61 = vmul.f32 %v6995_v20, %v9248_v59  ;;  %2197 = vadd.xlane.f32.xlu0 %v2196_v9  ;;  %v2510_v17 = vmax.f32 %v2478_v43, 0.0  ;;  %v2511_v37 = vmax.f32 %v2479_v60, 0.0  ;;  %v2337_v12 = vmul.f32 %v6998_v39, %v9248_v59  ;;  %v702_v43 = vld [vmem:[#allocation2 + $0x60] sm:$0xff] }
 0x1e2   :  { %v2418_v21 = vmul.f32 %v7008_v23, %v9206_v45  ;;  %v2468_v42 = vadd.f32 %v2436_v49, %v6015_v3  ;;  %v2469_v55 = vadd.f32 %v2437_v56, %v6015_v3  ;;  %v2419_v5 = vmul.f32 %v7015_v15, %v9206_v45  ;;  %v9253_v45 = vld [vmem:[#allocation45_spill] sm:$0xff] }
 0x1e3   :  { %v2368_v27 = vadd.f32 %v2336_v61, %v2286_v7  ;;  %v2547_v19 = vadd.f32 %v2511_v37, %v2510_v17  ;;  %v2369_v34 = vadd.f32 %v2337_v12, %v2287_v63  ;;  %v2276_v60 = vmul.f32 %v6980_v35, %v9249_v4  ;;  %v7137_v7 = vpop.xlane.xlu0 %1051  ;;  %v9251_v63 = vld [vmem:[#allocation171_spill] sm:$0xff] }
 0x1e4   :  { %v2277_v25 = vmul.f32 %v6989_v57, %v9249_v4  ;;  %v2500_v18 = vmax.f32 %v2468_v42, 0.0  ;;  %v2501_v14 = vmax.f32 %v2469_v55, 0.0  ;;  %v2326_v9 = vmul.f32 %v6995_v20, %v9250_v13  ;;  %v9252_v12 = vld [vmem:[#allocation91_spill] sm:$0xff]  ;;  %v1069_v55 = vld [vmem:[#allocation2 + $0x8] sm:$0xff] }
 0x1e5   :  { %v2450_v31 = vadd.f32 %v2418_v21, %v2368_v27  ;;  %2548 = vadd.xlane.f32.xlu1 %v2547_v19  ;;  %v2451_v49 = vadd.f32 %v2419_v5, %v2369_v34  ;;  %v2327_v56 = vmul.f32 %v6998_v39, %v9250_v13  ;;  %v2408_v61 = vmul.f32 %v7008_v23, %v9251_v63 }
 0x1e6   :  { %v2409_v17 = vmul.f32 %v7015_v15, %v9251_v63  ;;  %v2532_v37 = vadd.f32 %v2501_v14, %v2500_v18  ;;  %v2358_v42 = vadd.f32 %v2326_v9, %v2276_v60  ;;  %v1085_v5 = vadd.f32 %v1069_v55, %v6918_v10  ;;  %v7153_v14 = vpop.xlane.xlu1 %1402  ;;  %v9254_v10 = vld [vmem:[#allocation46_spill] sm:$0xff] }
 0x1e7   :  { %v2482_v21 = vadd.f32 %v2450_v31, %v9252_v12  ;;  %v2483_v27 = vadd.f32 %v2451_v49, %v9252_v12  ;;  %v2359_v4 = vadd.f32 %v2327_v56, %v2277_v25  ;;  %v718_v19 = vadd.f32 %v702_v43, %v6928_v29  ;;  %v9255_v43 = vld [vmem:[#allocation35_spill] sm:$0xff] }
 0x1e8   :  { %2533 = vadd.xlane.f32.xlu0 %v2532_v37  ;;  %v2440_v13 = vadd.f32 %v2408_v61, %v2358_v42  ;;  %v2290_v3 = vmul.f32 %v6980_v35, %v9253_v45  ;;  %v2291_v18 = vmul.f32 %v6989_v57, %v9253_v45  ;;  %1102 = vst.msk [vmem:[#allocation2 + $0x8] sm:$0xff] %vm1100_vm2, %v1085_v5  ;;  %v9256_v61 = vld [vmem:[#allocation172_spill] sm:$0xff] }
 0x1e9   :  { %v2514_v34 = vmax.f32 %v2482_v21, 0.0  ;;  %v2515_v60 = vmax.f32 %v2483_v27, 0.0  ;;  %v2441_v31 = vadd.f32 %v2409_v17, %v2359_v4  ;;  %735 = vst.msk [vmem:[#allocation2 + $0x60] sm:$0xff] %vm722_vm0, %v718_v19  ;;  %v2340_v29 = vmul.f32 %v6995_v20, %v9254_v10  ;;  %v7168_v17 = vpop.xlane.xlu0 %1057  ;;  %v9258_v5 = vld [vmem:[#allocation92_spill] sm:$0xff] }
 0x1ea   :  { %v2341_v25 = vmul.f32 %v6998_v39, %v9254_v10  ;;  %v2472_v9 = vadd.f32 %v2440_v13, %v9209_v24  ;;  %v2422_v49 = vmul.f32 %v7008_v23, %v9255_v43  ;;  %v2423_v56 = vmul.f32 %v7015_v15, %v9255_v43  ;;  %9257 = vst [vmem:[#allocation151_spill] sm:$0xff] %v7168_v17  ;;  %v704_v10 = vld [vmem:[#allocation2 + $0x70] sm:$0xff] }
 0x1eb   :  { %v2280_v4 = vmul.f32 %v6980_v35, %v9256_v61  ;;  %v2553_v37 = vadd.f32 %v2515_v60, %v2514_v34  ;;  %v2473_v21 = vadd.f32 %v2441_v31, %v9209_v24  ;;  %v2372_v42 = vadd.f32 %v2340_v29, %v2290_v3  ;;  %v9259_v34 = vld [vmem:[#allocation85_spill] sm:$0xff]  ;;  %v1071_v3 = vld [vmem:[#allocation2 + $0x18] sm:$0xff] }
 0x1ec   :  { %v2373_v55 = vadd.f32 %v2341_v25, %v2291_v18  ;;  %v2504_v27 = vmax.f32 %v2472_v9, 0.0  ;;  %v2281_v13 = vmul.f32 %v6989_v57, %v9256_v61  ;;  %v2330_v19 = vmul.f32 %v6995_v20, %v9258_v5  ;;  %v7182_v9 = vpop.xlane.xlu1 %1408 }
 0x1ed   :  { %v2331_v43 = vmul.f32 %v6998_v39, %v9258_v5  ;;  %2554 = vadd.xlane.f32.xlu1 %v2553_v37  ;;  %v2505_v45 = vmax.f32 %v2473_v21, 0.0  ;;  %v2454_v63 = vadd.f32 %v2422_v49, %v2372_v42  ;;  %v2412_v60 = vmul.f32 %v7008_v23, %v9259_v34  ;;  %v9260_v5 = vld [vmem:[#allocation125_spill] sm:$0xff] }
 0x1ee   :  { %v2455_v17 = vadd.f32 %v2423_v56, %v2373_v55  ;;  %v2362_v18 = vadd.f32 %v2330_v19, %v2280_v4  ;;  %v2413_v29 = vmul.f32 %v7015_v15, %v9259_v34  ;;  %v1087_v25 = vadd.f32 %v1071_v3, %v6946_v46  ;;  %v9261_v4 = vld [vmem:[#allocation53_spill] sm:$0xff]  ;;  %v7192_v46 = vpop.xlane.xlu0 %1063  ;;  %v9264_v19 = vld [vmem:[#allocation122_spill] sm:$0xff] }
 0x1ef   :  { %v2363_v31 = vadd.f32 %v2331_v43, %v2281_v13  ;;  %v2538_v61 = vadd.f32 %v2505_v45, %v2504_v27  ;;  %v2486_v24 = vadd.f32 %v2454_v63, %v9260_v5  ;;  %v720_v49 = vadd.f32 %v704_v10, %v6956_v51  ;;  %v9262_v63 = vld [vmem:[#allocation54_spill] sm:$0xff] }
 0x1f0   :  { %v2487_v37 = vadd.f32 %v2455_v17, %v9260_v5  ;;  %v2444_v56 = vadd.f32 %v2412_v60, %v2362_v18  ;;  %1104 = vst.msk [vmem:[#allocation2 + $0x18] sm:$0xff] %vm1100_vm2, %v1087_v25  ;;  %v2294_v43 = vmul.f32 %v6980_v35, %v9261_v4  ;;  %v2295_v42 = vmul.f32 %v6989_v57, %v9261_v4  ;;  %v9263_v17 = vld [vmem:[#allocation49_spill] sm:$0xff] }
 0x1f1   :  { %v2445_v21 = vadd.f32 %v2413_v29, %v2363_v31  ;;  %2539 = vadd.xlane.f32.xlu0 %v2538_v61  ;;  %v2518_v45 = vmax.f32 %v2486_v24, 0.0  ;;  %737 = vst.msk [vmem:[#allocation2 + $0x70] sm:$0xff] %vm722_vm0, %v720_v49  ;;  %v2344_v51 = vmul.f32 %v6995_v20, %v9262_v63  ;;  %v2345_v10 = vmul.f32 %v6998_v39, %v9262_v63  ;;  %v9265_v49 = vld [vmem:[#allocation104_spill] sm:$0xff] }
 0x1f2   :  { %v2519_v55 = vmax.f32 %v2487_v37, 0.0  ;;  %v2476_v27 = vadd.f32 %v2444_v56, %v9263_v17  ;;  %v2426_v60 = vmul.f32 %v7008_v23, %v9264_v19  ;;  %v2427_v61 = vmul.f32 %v7015_v15, %v9264_v19 }
 0x1f3   :  { %v2477_v13 = vadd.f32 %v2445_v21, %v9263_v17  ;;  %v2376_v3 = vadd.f32 %v2344_v51, %v2294_v43  ;;  %v2377_v18 = vadd.f32 %v2345_v10, %v2295_v42  ;;  %v2284_v31 = vmul.f32 %v6980_v35, %v9213_v52  ;;  %v7211_v21 = vpop.xlane.xlu1 %1414 }
 0x1f4   :  { %v2559_v24 = vadd.f32 %v2519_v55, %v2518_v45  ;;  %v2508_v29 = vmax.f32 %v2476_v27, 0.0  ;;  %v2285_v37 = vmul.f32 %v6989_v57, %v9213_v52  ;;  %v2334_v56 = vmul.f32 %v6995_v20, %v9265_v49  ;;  %9266 = vst [vmem:[#allocation65_spill] sm:$0xff] %v7211_v21  ;;  %v1073_v45 = vld [vmem:[#allocation2 + $0x28] sm:$0xff]  ;;  %v7220_v52 = vpop.xlane.xlu0 %1399  ;;  %v9281_v21 = vld [vmem:[#allocation67_spill] sm:$0xff] }
 0x1f5   :  { %v2509_v25 = vmax.f32 %v2477_v13, 0.0  ;;  %v2458_v17 = vadd.f32 %v2426_v60, %v2376_v3  ;;  %v2459_v63 = vadd.f32 %v2427_v61, %v2377_v18  ;;  %v2335_v43 = vmul.f32 %v6998_v39, %v9265_v49  ;;  %v1068_v13 = vld [vmem:[#allocation2] sm:$0xff]  ;;  %9267 = vst [vmem:[#allocation66_spill] sm:$0xff] %v7220_v52  ;;  %v9268_v3 = vld [vmem:[#allocation110_spill] sm:$0xff] }
 0x1f6   :  { %2560 = vadd.xlane.f32.xlu1 %v2559_v24  ;;  %v2416_v42 = vmul.f32 %v7008_v23, %v9215_v38  ;;  %v2366_v51 = vadd.f32 %v2334_v56, %v2284_v31  ;;  %v2417_v10 = vmul.f32 %v7015_v15, %v9215_v38  ;;  %v1089_v27 = vadd.f32 %v1073_v45, %v6974_v33  ;;  %v9269_v31 = vld [vmem:[#allocation61_spill] sm:$0xff] }
 0x1f7   :  { %v2544_v55 = vadd.f32 %v2509_v25, %v2508_v29  ;;  %v2490_v60 = vadd.f32 %v2458_v17, %v6145_v1  ;;  %v2491_v61 = vadd.f32 %v2459_v63, %v6145_v1  ;;  %v2367_v24 = vadd.f32 %v2335_v43, %v2285_v37  ;;  %v9270_v25 = vld [vmem:[#allocation62_spill] sm:$0xff]  ;;  %v9271_v37 = vld [vmem:[#allocation55_spill] sm:$0xff] }
 0x1f8   :  { %v1084_v18 = vadd.f32 %v1068_v13, %v9268_v3  ;;  %v2448_v49 = vadd.f32 %v2416_v42, %v2366_v51  ;;  %1106 = vst.msk [vmem:[#allocation2 + $0x28] sm:$0xff] %vm1100_vm2, %v1089_v27  ;;  %v2298_v29 = vmul.f32 %v6980_v35, %v9269_v31  ;;  %v2299_v33 = vmul.f32 %v6989_v57, %v9269_v31  ;;  %v7240_v13 = vpop.xlane.xlu1 %1420  ;;  %v7249_v31 = vpop.xlane.xlu0 %1405  ;;  %v1070_v1 = vld [vmem:[#allocation2 + $0x10] sm:$0xff] }
 0x1f9   :  { %2545 = vadd.xlane.f32.xlu0 %v2544_v55  ;;  %v2348_v56 = vmul.f32 %v6995_v20, %v9270_v25  ;;  %v2522_v45 = vmax.f32 %v2490_v60, 0.0  ;;  %v2523_v17 = vmax.f32 %v2491_v61, 0.0  ;;  %v2449_v52 = vadd.f32 %v2417_v10, %v2367_v24  ;;  %v9272_v55 = vld [vmem:[#allocation108_spill] sm:$0xff]  ;;  %9273 = vst [vmem:[#allocation98_spill] sm:$0xff] %v7240_v13  ;;  %v9274_v61 = vld [vmem:[#allocation30_spill] sm:$0xff]  ;;  %9276 = vst [vmem:[#allocation99_spill] sm:$0xff] %v7249_v31 }
 0x1fa   :  { %1101 = vst.msk [vmem:[#allocation2] sm:$0xff] %vm1100_vm2, %v1084_v18  ;;  %v2349_v63 = vmul.f32 %v6998_v39, %v9270_v25  ;;  %v2480_v43 = vadd.f32 %v2448_v49, %v9271_v37  ;;  %v2430_v51 = vmul.f32 %v7008_v23, %v9272_v55  ;;  %v2431_v27 = vmul.f32 %v7015_v15, %v9272_v55 }
 0x1fb   :  { %v2380_v42 = vadd.f32 %v2348_v56, %v2298_v29  ;;  %v2565_v3 = vadd.f32 %v2523_v17, %v2522_v45  ;;  %v2481_v60 = vadd.f32 %v2449_v52, %v9271_v37  ;;  %v2288_v24 = vmul.f32 %v6980_v35, %v9274_v61  ;;  %v9275_v29 = vld [vmem:[#allocation118_spill] sm:$0xff]  ;;  %v1075_v17 = vld [vmem:[#allocation2 + $0x38] sm:$0xff] }
 0x1fc   :  { %v2381_v10 = vadd.f32 %v2349_v63, %v2299_v33  ;;  %v2512_v18 = vmax.f32 %v2480_v43, 0.0  ;;  %v2289_v49 = vmul.f32 %v6989_v57, %v9274_v61  ;;  %v2338_v56 = vmul.f32 %v6995_v20, %v9275_v29  ;;  %v9277_v33 = vld [vmem:[#allocation105_spill] sm:$0xff]  ;;  %v9278_v63 = vld [vmem:[#allocation56_spill] sm:$0xff]  ;;  %v9279_v61 = vld [vmem:[#allocation111_spill] sm:$0xff] }
 0x1fd   :  { %v2462_v25 = vadd.f32 %v2430_v51, %v2380_v42  ;;  %2566 = vadd.xlane.f32.xlu1 %v2565_v3  ;;  %v2513_v55 = vmax.f32 %v2481_v60, 0.0  ;;  %v2339_v52 = vmul.f32 %v6998_v39, %v9275_v29  ;;  %v2420_v45 = vmul.f32 %v7008_v23, %v9277_v33  ;;  %v9280_v60 = vld [vmem:[#allocation150_spill] sm:$0xff] }
 0x1fe   :  { %v2463_v13 = vadd.f32 %v2431_v27, %v2381_v10  ;;  %v2370_v42 = vadd.f32 %v2338_v56, %v2288_v24  ;;  %v2421_v51 = vmul.f32 %v7015_v15, %v9277_v33  ;;  %v1091_v37 = vadd.f32 %v1075_v17, %v9279_v61  ;;  %v7266_v56 = vpop.xlane.xlu1 %1426 }
 0x1ff   :  { %v2494_v43 = vadd.f32 %v2462_v25, %v9278_v63  ;;  %v2550_v31 = vadd.f32 %v2513_v55, %v2512_v18  ;;  %v2371_v27 = vadd.f32 %v2339_v52, %v2289_v49  ;;  %v1086_v10 = vadd.f32 %v1070_v1, %v9280_v60  ;;  %9282 = vst [vmem:[#allocation71_spill] sm:$0xff] %v7266_v56  ;;  %v9285_v52 = vld [vmem:[#allocation48_spill] sm:$0xff]  ;;  %v9288_v56 = vld [vmem:[#allocation134_spill] sm:$0xff] }
 0x200   :  { %v2495_v3 = vadd.f32 %v2463_v13, %v9278_v63  ;;  %v2452_v38 = vadd.f32 %v2420_v45, %v2370_v42  ;;  %1108 = vst.msk [vmem:[#allocation2 + $0x38] sm:$0xff] %vm1100_vm2, %v1091_v37  ;;  %v2302_v25 = vmul.f32 %v6980_v35, %v9281_v21  ;;  %v2303_v24 = vmul.f32 %v6989_v57, %v9281_v21  ;;  %v9283_v13 = vld [vmem:[#allocation68_spill] sm:$0xff]  ;;  %v9284_v37 = vld [vmem:[#allocation57_spill] sm:$0xff]  ;;  %v7280_v42 = vpop.xlane.xlu0 %1411 }
 0x201   :  { %v2526_v29 = vmax.f32 %v2494_v43, 0.0  ;;  %2551 = vadd.xlane.f32.xlu0 %v2550_v31  ;;  %v2453_v55 = vadd.f32 %v2421_v51, %v2371_v27  ;;  %1103 = vst.msk [vmem:[#allocation2 + $0x10] sm:$0xff] %vm1100_vm2, %v1086_v10  ;;  %v2352_v1 = vmul.f32 %v6995_v20, %v9283_v13  ;;  %v2353_v18 = vmul.f32 %v6998_v39, %v9283_v13  ;;  %v9286_v43 = vld [vmem:[#allocation34_spill] sm:$0xff] }
 0x202   :  { %v2527_v61 = vmax.f32 %v2495_v3, 0.0  ;;  %v2484_v49 = vadd.f32 %v2452_v38, %v9284_v37  ;;  %v2434_v45 = vmul.f32 %v7008_v23, %v9285_v52  ;;  %v2435_v17 = vmul.f32 %v7015_v15, %v9285_v52  ;;  %9287 = vst [vmem:[#allocation72_spill] sm:$0xff] %v7280_v42  ;;  %v9289_v42 = vld [vmem:[#allocation119_spill] sm:$0xff] }
 0x203   :  { %v2292_v31 = vmul.f32 %v6980_v35, %v9286_v43  ;;  %v2485_v3 = vadd.f32 %v2453_v55, %v9284_v37  ;;  %v2384_v27 = vadd.f32 %v2352_v1, %v2302_v25  ;;  %v2385_v60 = vadd.f32 %v2353_v18, %v2303_v24  ;;  %v4632_v25 = vld [vmem:[%s8496_s0 + $0x30] sm:$0x77] }
 0x204   :  { %v2571_v51 = vadd.f32 %v2527_v61, %v2526_v29  ;;  %v2516_v10 = vmax.f32 %v2484_v49, 0.0  ;;  %v2293_v38 = vmul.f32 %v6989_v57, %v9286_v43  ;;  %v2342_v13 = vmul.f32 %v6995_v20, %v9288_v56  ;;  %v1077_v61 = vld [vmem:[#allocation2 + $0x48] sm:$0xff]  ;;  %v1072_v49 = vld [vmem:[#allocation2 + $0x20] sm:$0xff] }
 0x205   :  { %v2343_v52 = vmul.f32 %v6998_v39, %v9288_v56  ;;  %v2517_v21 = vmax.f32 %v2485_v3, 0.0  ;;  %v2466_v33 = vadd.f32 %v2434_v45, %v2384_v27  ;;  %v2467_v63 = vadd.f32 %v2435_v17, %v2385_v60  ;;  %v9291_v17 = vld [vmem:[#allocation58_spill] sm:$0xff] }
 0x206   :  { %2572 = vadd.xlane.f32.xlu1 %v2571_v51  ;;  %v2424_v29 = vmul.f32 %v7008_v23, %v9289_v42  ;;  %v2374_v24 = vadd.f32 %v2342_v13, %v2292_v31  ;;  %v2425_v1 = vmul.f32 %v7015_v15, %v9289_v42  ;;  %v1093_v18 = vadd.f32 %v1077_v61, %v7046_v32  ;;  %v7297_v51 = vpop.xlane.xlu1 %1432  ;;  %v9292_v13 = vld [vmem:[#allocation6_spill] sm:$0xff]  ;;  %v9293_v31 = vld [vmem:[#allocation7_spill] sm:$0xff]  ;;  %v7305_v42 = vpop.xlane.xlu0 %1417 }
 0x207   :  { %v2375_v55 = vadd.f32 %v2343_v52, %v2293_v38  ;;  %9290 = vst [vmem:[#allocation43_spill] sm:$0xff] %v7297_v51  ;;  %v2556_v45 = vadd.f32 %v2517_v21, %v2516_v10  ;;  %v2498_v3 = vadd.f32 %v2466_v33, %v9291_v17  ;;  %v2499_v27 = vadd.f32 %v2467_v63, %v9291_v17  ;;  %v9295_v21 = vld [vmem:[#allocation8_spill] sm:$0xff]  ;;  %v9296_v63 = vld [vmem:[#allocation9_spill] sm:$0xff]  ;;  %v9308_v17 = vld [vmem:[#allocation90_spill] sm:$0xff] }
 0x208   :  { %v1088_v60 = vadd.f32 %v1072_v49, %v7055_v11  ;;  %v2456_v56 = vadd.f32 %v2424_v29, %v2374_v24  ;;  %1110 = vst.msk [vmem:[#allocation2 + $0x48] sm:$0xff] %vm1100_vm2, %v1093_v18  ;;  %v2635_v52 = vrot.slane %v4632_v25, %v9292_v13  ;;  %v2639_v38 = vrot.slane %v4632_v25, %v9293_v31  ;;  %v9297_v11 = vld [vmem:[#allocation63_spill] sm:$0xff] }
 0x209   :  { %v2457_v43 = vadd.f32 %v2425_v1, %v2375_v55  ;;  %9294 = vst [vmem:[#allocation96_spill] sm:$0xff] %v7305_v42  ;;  %2557 = vadd.xlane.f32.xlu0 %v2556_v45  ;;  %v2530_v32 = vmax.f32 %v2498_v3, 0.0  ;;  %v2531_v61 = vmax.f32 %v2499_v27, 0.0  ;;  %v2685_v33 = vrot.slane %v4632_v25, %v9295_v21  ;;  %v9298_v3 = vld [vmem:[#allocation10_spill] sm:$0xff] }
 0x20a   :  { %1105 = vst.msk [vmem:[#allocation2 + $0x20] sm:$0xff] %vm1100_vm2, %v1088_v60  ;;  %v2689_v10 = vrot.slane %v4632_v25, %v9296_v63  ;;  %v2488_v29 = vadd.f32 %v2456_v56, %v9297_v11  ;;  %v7313_v55 = vrot.slane %v2635_v52, %v9292_v13  ;;  %v7316_v1 = vrot.slane %v2639_v38, %v9292_v13  ;;  %v9299_v56 = vld [vmem:[#allocation168_spill] sm:$0xff]  ;;  %v7329_v51 = vpop.xlane.xlu1 %1438  ;;  %v9301_v38 = vld [vmem:[#allocation77_spill] sm:$0xff] }
 0x20b   :  { %v2489_v24 = vadd.f32 %v2457_v43, %v9297_v11  ;;  %v2577_v18 = vadd.f32 %v2531_v61, %v2530_v32  ;;  %v7319_v49 = vrot.slane %v2685_v33, %v9295_v21  ;;  %v2767_v27 = vrot.slane %v4632_v25, %v9298_v3  ;;  %9300 = vst [vmem:[#allocation97_spill] sm:$0xff] %v7329_v51  ;;  %v9302_v33 = vld [vmem:[#allocation11_spill] sm:$0xff]  ;;  %v9303_v63 = vld [vmem:[#allocation36_spill] sm:$0xff]  ;;  %v9304_v51 = vld [vmem:[#allocation146_spill] sm:$0xff] }
 0x20c   :  { %v7322_v45 = vrot.slane %v2689_v10, %v9295_v21  ;;  %v2520_v60 = vmax.f32 %v2488_v29, 0.0  ;;  %v2652_v43 = vmul.f32 %v7313_v55, %v9299_v56  ;;  %v2653_v52 = vmul.f32 %v7316_v1, %v9299_v56  ;;  %v7345_v21 = vpop.xlane.xlu0 %1423 }
 0x20d   :  { %v2521_v42 = vmax.f32 %v2489_v24, 0.0  ;;  %2578 = vadd.xlane.f32.xlu1 %v2577_v18  ;;  %v2702_v32 = vmul.f32 %v7319_v49, %v9301_v38  ;;  %v2771_v10 = vrot.slane %v4632_v25, %v9302_v33  ;;  %v7337_v29 = vrot.slane %v2767_v27, %v9298_v3  ;;  %9305 = vst [vmem:[#allocation69_spill] sm:$0xff] %v7345_v21  ;;  %v9306_v25 = vld [vmem:[#allocation78_spill] sm:$0xff]  ;;  %v1079_v21 = vld [vmem:[#allocation2 + $0x58] sm:$0xff] }
 0x20e   :  { %v2703_v61 = vmul.f32 %v7322_v45, %v9301_v38  ;;  %v2296_v11 = vmul.f32 %v6980_v35, %v9303_v63  ;;  %v2297_v56 = vmul.f32 %v6989_v57, %v9303_v63  ;;  %v2346_v18 = vmul.f32 %v6995_v20, %v9304_v51 }
 0x20f   :  { %v2562_v24 = vadd.f32 %v2521_v42, %v2520_v60  ;;  %v2734_v31 = vadd.f32 %v2702_v32, %v2652_v43  ;;  %v7348_v38 = vrot.slane %v2771_v10, %v9298_v3  ;;  %v2784_v27 = vmul.f32 %v7337_v29, %v9306_v25  ;;  %v1074_v43 = vld [vmem:[#allocation2 + $0x30] sm:$0xff] }
 0x210   :  { %v2735_v13 = vadd.f32 %v2703_v61, %v2653_v52  ;;  %v2347_v42 = vmul.f32 %v6998_v39, %v9304_v51  ;;  %v2378_v60 = vadd.f32 %v2346_v18, %v2296_v11  ;;  %v2428_v63 = vmul.f32 %v7008_v23, %v9241_v48  ;;  %v7366_v51 = vpop.xlane.xlu1 %1444 }
 0x211   :  { %2563 = vadd.xlane.f32.xlu0 %v2562_v24  ;;  %v2429_v33 = vmul.f32 %v7015_v15, %v9241_v48  ;;  %v2785_v52 = vmul.f32 %v7348_v38, %v9306_v25  ;;  %v2816_v32 = vadd.f32 %v2784_v27, %v2734_v31  ;;  %v1095_v61 = vadd.f32 %v1079_v21, %v7071_v54  ;;  %v9309_v54 = vld [vmem:[#allocation26_spill] sm:$0xff] }
 0x212   :  { %v1090_v10 = vadd.f32 %v1074_v43, %v7079_v0  ;;  %v2379_v24 = vadd.f32 %v2347_v42, %v2297_v56  ;;  %v2460_v3 = vadd.f32 %v2428_v63, %v2378_v60  ;;  %v2656_v11 = vmul.f32 %v7313_v55, %v9242_v26  ;;  %9307 = vst [vmem:[#allocation70_spill] sm:$0xff] %v7366_v51  ;;  %v9310_v56 = vld [vmem:[#allocation79_spill] sm:$0xff]  ;;  %v7380_v42 = vpop.xlane.xlu0 %1429 }
 0x213   :  { %v2657_v18 = vmul.f32 %v7316_v1, %v9242_v26  ;;  %v2817_v48 = vadd.f32 %v2785_v52, %v2735_v13  ;;  %v2848_v37 = vadd.f32 %v2816_v32, %v9308_v17  ;;  %1112 = vst.msk [vmem:[#allocation2 + $0x58] sm:$0xff] %vm1100_vm2, %v1095_v61  ;;  %v2706_v0 = vmul.f32 %v7319_v49, %v9309_v54 }
 0x214   :  { %1107 = vst.msk [vmem:[#allocation2 + $0x30] sm:$0xff] %vm1100_vm2, %v1090_v10  ;;  %v2707_v31 = vmul.f32 %v7322_v45, %v9309_v54  ;;  %v2461_v21 = vadd.f32 %v2429_v33, %v2379_v24  ;;  %v2492_v63 = vadd.f32 %v2460_v3, %v6205_v58  ;;  %v2788_v27 = vmul.f32 %v7337_v29, %v9310_v56 }
 0x215   :  { %v2789_v13 = vmul.f32 %v7348_v38, %v9310_v56  ;;  %9311 = vst [vmem:[#allocation41_spill] sm:$0xff] %v7380_v42  ;;  %v2849_v60 = vadd.f32 %v2817_v48, %v9308_v17  ;;  %v2880_v43 = vmax.f32 %v2848_v37, 0.0  ;;  %v2738_v52 = vadd.f32 %v2706_v0, %v2656_v11 }
 0x216   :  { %v2739_v32 = vadd.f32 %v2707_v31, %v2657_v18  ;;  %v2493_v61 = vadd.f32 %v2461_v21, %v6205_v58  ;;  %v2524_v10 = vmax.f32 %v2492_v63, 0.0  ;;  %v2300_v33 = vmul.f32 %v6980_v35, %v9097_v6  ;;  %v7396_v35 = vpop.xlane.xlu1 %1780  ;;  %v1081_v21 = vld [vmem:[#allocation2 + $0x68] sm:$0xff] }
 0x217   :  { %v2301_v3 = vmul.f32 %v6989_v57, %v9097_v6  ;;  %v2881_v24 = vmax.f32 %v2849_v60, 0.0  ;;  %v2820_v51 = vadd.f32 %v2788_v27, %v2738_v52  ;;  %v2350_v42 = vmul.f32 %v6995_v20, %v9200_v50  ;;  %v1076_v20 = vld [vmem:[#allocation2 + $0x40] sm:$0xff] }
 0x218   :  { %v2821_v54 = vadd.f32 %v2789_v13, %v2739_v32  ;;  %v2525_v56 = vmax.f32 %v2493_v61, 0.0  ;;  %v2351_v48 = vmul.f32 %v6998_v39, %v9200_v50  ;;  %v2432_v37 = vmul.f32 %v7008_v23, %v9201_v47  ;;  %v7402_v23 = vpop.xlane.xlu0 %1435 }
 0x219   :  { %v2433_v11 = vmul.f32 %v7015_v15, %v9201_v47  ;;  %v2913_v18 = vadd.f32 %v2881_v24, %v2880_v43  ;;  %v2852_v57 = vadd.f32 %v2820_v51, %v6051_v53  ;;  %v2382_v31 = vadd.f32 %v2350_v42, %v2300_v33 }
 0x21a   :  { %v2853_v0 = vadd.f32 %v2821_v54, %v6051_v53  ;;  %v2568_v63 = vadd.f32 %v2525_v56, %v2524_v10  ;;  %v2383_v27 = vadd.f32 %v2351_v48, %v2301_v3  ;;  %v1097_v39 = vadd.f32 %v1081_v21, %v7103_v44  ;;  %v1083_v10 = vld [vmem:[#allocation2 + $0x78] sm:$0xff] }
 0x21b   :  { %v1092_v13 = vadd.f32 %v1076_v20, %v7109_v16  ;;  %2914 = vadd.xlane.f32.xlu1 %v2913_v18  ;;  %v2884_v15 = vmax.f32 %v2852_v57, 0.0  ;;  %v2464_v52 = vadd.f32 %v2432_v37, %v2382_v31  ;;  %v2660_v51 = vmul.f32 %v7313_v55, %v9159_v28  ;;  %v7421_v37 = vpop.xlane.xlu1 %1786 }
 0x21c   :  { %v2885_v60 = vmax.f32 %v2853_v0, 0.0  ;;  %2569 = vadd.xlane.f32.xlu0 %v2568_v63  ;;  %v2465_v54 = vadd.f32 %v2433_v11, %v2383_v27  ;;  %1114 = vst.msk [vmem:[#allocation2 + $0x68] sm:$0xff] %vm1100_vm2, %v1097_v39  ;;  %v2661_v44 = vmul.f32 %v7316_v1, %v9159_v28  ;;  %v2710_v16 = vmul.f32 %v7319_v49, %v9162_v8  ;;  %v9313_v0 = vld [vmem:[#allocation17_spill] sm:$0xff]  ;;  %v1078_v27 = vld [vmem:[#allocation2 + $0x50] sm:$0xff]  ;;  %v7432_v39 = vpop.xlane.xlu0 %1441 }
 0x21d   :  { %1109 = vst.msk [vmem:[#allocation2 + $0x40] sm:$0xff] %vm1100_vm2, %v1092_v13  ;;  %v2711_v56 = vmul.f32 %v7322_v45, %v9162_v8  ;;  %v2496_v43 = vadd.f32 %v2464_v52, %v9245_v62  ;;  %v2792_v32 = vmul.f32 %v7337_v29, %v9202_v40  ;;  %v2793_v61 = vmul.f32 %v7348_v38, %v9202_v40 }
 0x21e   :  { %v2919_v42 = vadd.f32 %v2885_v60, %v2884_v15  ;;  %v2497_v33 = vadd.f32 %v2465_v54, %v9245_v62  ;;  %v2742_v3 = vadd.f32 %v2710_v16, %v2660_v51  ;;  %v1099_v48 = vadd.f32 %v1083_v10, %v7129_v2  ;;  %9312 = vst [vmem:[#allocation42_spill] sm:$0xff] %v7421_v37 }
 0x21f   :  { %v2743_v24 = vadd.f32 %v2711_v56, %v2661_v44  ;;  %v2528_v11 = vmax.f32 %v2496_v43, 0.0  ;;  %v2650_v18 = vmul.f32 %v7313_v55, %v9246_v22  ;;  %v2651_v57 = vmul.f32 %v7316_v1, %v9246_v22  ;;  %9314 = vst [vmem:[#allocation12_spill] sm:$0xff] %v7432_v39  ;;  %v9329_v39 = vld [vmem:[#allocation172_spill] sm:$0xff] }
 0x220   :  { %2920 = vadd.xlane.f32.xlu1 %v2919_v42  ;;  %v2700_v31 = vmul.f32 %v7319_v49, %v9313_v0  ;;  %v2529_v21 = vmax.f32 %v2497_v33, 0.0  ;;  %v2824_v20 = vadd.f32 %v2792_v32, %v2742_v3  ;;  %1116 = vst.msk [vmem:[#allocation2 + $0x78] sm:$0xff] %vm1100_vm2, %v1099_v48  ;;  %v2701_v2 = vmul.f32 %v7322_v45, %v9313_v0  ;;  %v7450_v3 = vpop.xlane.xlu1 %1792 }
 0x221   :  { %v2825_v63 = vadd.f32 %v2793_v61, %v2743_v24  ;;  %v2782_v15 = vmul.f32 %v7337_v29, %v9105_v36  ;;  %v2783_v60 = vmul.f32 %v7348_v38, %v9105_v36  ;;  %v1094_v52 = vadd.f32 %v1078_v27, %v7137_v7  ;;  %9315 = vst [vmem:[#allocation13_spill] sm:$0xff] %v7450_v3  ;;  %v9316_v24 = vld [vmem:[#allocation109_spill] sm:$0xff]  ;;  %v7458_v27 = vpop.xlane.xlu0 %1777 }
 0x222   :  { %v2732_v13 = vadd.f32 %v2700_v31, %v2650_v18  ;;  %v2574_v51 = vadd.f32 %v2529_v21, %v2528_v11  ;;  %v2856_v54 = vadd.f32 %v2824_v20, %v6080_v30  ;;  %v2733_v16 = vadd.f32 %v2701_v2, %v2651_v57  ;;  %v9317_v18 = vld [vmem:[#allocation33_spill] sm:$0xff]  ;;  %v1447_v2 = vld [vmem:[#allocation2 + $0x8] sm:$0xff]  ;;  %9318 = vst [vmem:[#allocation126_spill] sm:$0xff] %v7458_v27 }
 0x223   :  { %v2857_v44 = vadd.f32 %v2825_v63, %v6080_v30  ;;  %1111 = vst.msk [vmem:[#allocation2 + $0x50] sm:$0xff] %vm1100_vm2, %v1094_v52  ;;  %v2664_v42 = vmul.f32 %v7313_v55, %v9167_v41  ;;  %v2665_v43 = vmul.f32 %v7316_v1, %v9167_v41  ;;  %v2714_v32 = vmul.f32 %v7319_v49, %v9248_v59  ;;  %v9319_v52 = vld [vmem:[#allocation16_spill] sm:$0xff] }
 0x224   :  { %v2814_v56 = vadd.f32 %v2782_v15, %v2732_v13  ;;  %2575 = vadd.xlane.f32.xlu0 %v2574_v51  ;;  %v2888_v7 = vmax.f32 %v2856_v54, 0.0  ;;  %v2815_v10 = vadd.f32 %v2783_v60, %v2733_v16  ;;  %v2715_v33 = vmul.f32 %v7322_v45, %v9248_v59 }
 0x225   :  { %v2889_v61 = vmax.f32 %v2857_v44, 0.0  ;;  %v2746_v11 = vadd.f32 %v2714_v32, %v2664_v42  ;;  %v2796_v57 = vmul.f32 %v7337_v29, %v9317_v18  ;;  %v2797_v31 = vmul.f32 %v7348_v38, %v9317_v18 }
 0x226   :  { %v2846_v48 = vadd.f32 %v2814_v56, %v9316_v24  ;;  %v2847_v20 = vadd.f32 %v2815_v10, %v9316_v24  ;;  %v2747_v63 = vadd.f32 %v2715_v33, %v2665_v43  ;;  %v1463_v60 = vadd.f32 %v1447_v2, %v7153_v14  ;;  %v9320_v56 = vld [vmem:[#allocation84_spill] sm:$0xff]  ;;  %v9321_v14 = vld [vmem:[#allocation171_spill] sm:$0xff]  ;;  %v1080_v10 = vld [vmem:[#allocation2 + $0x60] sm:$0xff] }
 0x227   :  { %v2925_v21 = vadd.f32 %v2889_v61, %v2888_v7  ;;  %v2828_v15 = vadd.f32 %v2796_v57, %v2746_v11  ;;  %v2654_v51 = vmul.f32 %v7313_v55, %v9319_v52  ;;  %v2655_v16 = vmul.f32 %v7316_v1, %v9319_v52  ;;  %v9322_v57 = vld [vmem:[#allocation151_spill] sm:$0xff]  ;;  %v9324_v2 = vld [vmem:[#allocation45_spill] sm:$0xff] }
 0x228   :  { %v2878_v13 = vmax.f32 %v2846_v48, 0.0  ;;  %v2879_v54 = vmax.f32 %v2847_v20, 0.0  ;;  %v2829_v44 = vadd.f32 %v2797_v31, %v2747_v63  ;;  %v2704_v42 = vmul.f32 %v7319_v49, %v9320_v56  ;;  %1480 = vst.msk [vmem:[#allocation2 + $0x8] sm:$0xff] %vm1478_vm3, %v1463_v60 }
 0x229   :  { %2926 = vadd.xlane.f32.xlu1 %v2925_v21  ;;  %v2860_v43 = vadd.f32 %v2828_v15, %v9252_v12  ;;  %v2705_v32 = vmul.f32 %v7322_v45, %v9320_v56  ;;  %v2786_v7 = vmul.f32 %v7337_v29, %v9321_v14  ;;  %v2787_v61 = vmul.f32 %v7348_v38, %v9321_v14  ;;  %v7477_v21 = vpop.xlane.xlu1 %1798 }
 0x22a   :  { %v2910_v33 = vadd.f32 %v2879_v54, %v2878_v13  ;;  %v2861_v48 = vadd.f32 %v2829_v44, %v9252_v12  ;;  %v2736_v11 = vadd.f32 %v2704_v42, %v2654_v51  ;;  %v1096_v31 = vadd.f32 %v1080_v10, %v9322_v57  ;;  %9323 = vst [vmem:[#allocation44_spill] sm:$0xff] %v7477_v21  ;;  %v9325_v13 = vld [vmem:[#allocation46_spill] sm:$0xff]  ;;  %v1449_v44 = vld [vmem:[#allocation2 + $0x18] sm:$0xff]  ;;  %v7488_v42 = vpop.xlane.xlu0 %1783 }
 0x22b   :  { %v2892_v20 = vmax.f32 %v2860_v43, 0.0  ;;  %v2737_v63 = vadd.f32 %v2705_v32, %v2655_v16  ;;  %v2668_v15 = vmul.f32 %v7313_v55, %v9324_v2  ;;  %v2669_v60 = vmul.f32 %v7316_v1, %v9324_v2  ;;  %9326 = vst [vmem:[#allocation47_spill] sm:$0xff] %v7488_v42  ;;  %v9327_v43 = vld [vmem:[#allocation35_spill] sm:$0xff]  ;;  %v9330_v42 = vld [vmem:[#allocation92_spill] sm:$0xff] }
 0x22c   :  { %2911 = vadd.xlane.f32.xlu0 %v2910_v33  ;;  %v2893_v27 = vmax.f32 %v2861_v48, 0.0  ;;  %v2818_v3 = vadd.f32 %v2786_v7, %v2736_v11  ;;  %1113 = vst.msk [vmem:[#allocation2 + $0x60] sm:$0xff] %vm1100_vm2, %v1096_v31  ;;  %v2718_v51 = vmul.f32 %v7319_v49, %v9325_v13  ;;  %v2719_v54 = vmul.f32 %v7322_v45, %v9325_v13  ;;  %v9328_v48 = vld [vmem:[#allocation124_spill] sm:$0xff] }
 0x22d   :  { %v2819_v16 = vadd.f32 %v2787_v61, %v2737_v63  ;;  %v2800_v32 = vmul.f32 %v7337_v29, %v9327_v43  ;;  %v2801_v10 = vmul.f32 %v7348_v38, %v9327_v43  ;;  %v1465_v7 = vadd.f32 %v1449_v44, %v7182_v9 }
 0x22e   :  { %v2931_v33 = vadd.f32 %v2893_v27, %v2892_v20  ;;  %v2850_v11 = vadd.f32 %v2818_v3, %v9328_v48  ;;  %v2750_v57 = vadd.f32 %v2718_v51, %v2668_v15  ;;  %v2751_v31 = vadd.f32 %v2719_v54, %v2669_v60  ;;  %v7506_v15 = vpop.xlane.xlu1 %1804 }
 0x22f   :  { %v2851_v21 = vadd.f32 %v2819_v16, %v9328_v48  ;;  %1482 = vst.msk [vmem:[#allocation2 + $0x18] sm:$0xff] %vm1478_vm3, %v1465_v7  ;;  %v2658_v61 = vmul.f32 %v7313_v55, %v9329_v39  ;;  %v2659_v63 = vmul.f32 %v7316_v1, %v9329_v39  ;;  %v2708_v37 = vmul.f32 %v7319_v49, %v9330_v42  ;;  %v1082_v16 = vld [vmem:[#allocation2 + $0x70] sm:$0xff] }
 0x230   :  { %2932 = vadd.xlane.f32.xlu1 %v2931_v33  ;;  %v2882_v9 = vmax.f32 %v2850_v11, 0.0  ;;  %v2832_v27 = vadd.f32 %v2800_v32, %v2750_v57  ;;  %v2833_v20 = vadd.f32 %v2801_v10, %v2751_v31  ;;  %v2709_v3 = vmul.f32 %v7322_v45, %v9330_v42  ;;  %9331 = vst [vmem:[#allocation127_spill] sm:$0xff] %v7506_v15  ;;  %v7515_v11 = vpop.xlane.xlu0 %1789 }
 0x231   :  { %v2883_v60 = vmax.f32 %v2851_v21, 0.0  ;;  %v2740_v51 = vadd.f32 %v2708_v37, %v2658_v61  ;;  %v2790_v54 = vmul.f32 %v7337_v29, %v9259_v34  ;;  %v2791_v44 = vmul.f32 %v7348_v38, %v9259_v34  ;;  %9332 = vst [vmem:[#allocation112_spill] sm:$0xff] %v7515_v11 }
 0x232   :  { %v2864_v7 = vadd.f32 %v2832_v27, %v9260_v5  ;;  %v2865_v33 = vadd.f32 %v2833_v20, %v9260_v5  ;;  %v2741_v32 = vadd.f32 %v2709_v3, %v2659_v63  ;;  %v1098_v10 = vadd.f32 %v1082_v16, %v7192_v46  ;;  %v9333_v27 = vld [vmem:[#allocation54_spill] sm:$0xff]  ;;  %v9334_v46 = vld [vmem:[#allocation49_spill] sm:$0xff] }
 0x233   :  { %v2916_v57 = vadd.f32 %v2883_v60, %v2882_v9  ;;  %v2822_v31 = vadd.f32 %v2790_v54, %v2740_v51  ;;  %v2672_v37 = vmul.f32 %v7313_v55, %v9261_v4  ;;  %v2673_v21 = vmul.f32 %v7316_v1, %v9261_v4  ;;  %v1451_v51 = vld [vmem:[#allocation2 + $0x28] sm:$0xff] }
 0x234   :  { %v2896_v61 = vmax.f32 %v2864_v7, 0.0  ;;  %v2897_v15 = vmax.f32 %v2865_v33, 0.0  ;;  %v2823_v34 = vadd.f32 %v2791_v44, %v2741_v32  ;;  %1115 = vst.msk [vmem:[#allocation2 + $0x70] sm:$0xff] %vm1100_vm2, %v1098_v10  ;;  %v2722_v63 = vmul.f32 %v7319_v49, %v9333_v27  ;;  %v9335_v7 = vld [vmem:[#allocation65_spill] sm:$0xff]  ;;  %v7533_v32 = vpop.xlane.xlu1 %1810 }
 0x235   :  { %2917 = vadd.xlane.f32.xlu0 %v2916_v57  ;;  %v2854_v20 = vadd.f32 %v2822_v31, %v9334_v46  ;;  %v2723_v9 = vmul.f32 %v7322_v45, %v9333_v27  ;;  %v2804_v3 = vmul.f32 %v7337_v29, %v9264_v19  ;;  %v2805_v60 = vmul.f32 %v7348_v38, %v9264_v19  ;;  %v9337_v31 = vld [vmem:[#allocation173_spill] sm:$0xff] }
 0x236   :  { %v2937_v54 = vadd.f32 %v2897_v15, %v2896_v61  ;;  %v2855_v44 = vadd.f32 %v2823_v34, %v9334_v46  ;;  %v2754_v16 = vadd.f32 %v2722_v63, %v2672_v37  ;;  %v1467_v33 = vadd.f32 %v1451_v51, %v9335_v7  ;;  %9336 = vst [vmem:[#allocation75_spill] sm:$0xff] %v7533_v32  ;;  %v9338_v15 = vld [vmem:[#allocation104_spill] sm:$0xff]  ;;  %v1446_v61 = vld [vmem:[#allocation2] sm:$0xff]  ;;  %v7544_v63 = vpop.xlane.xlu0 %1795 }
 0x237   :  { %v2886_v10 = vmax.f32 %v2854_v20, 0.0  ;;  %v2755_v57 = vadd.f32 %v2723_v9, %v2673_v21  ;;  %v2662_v11 = vmul.f32 %v7313_v55, %v9337_v31  ;;  %v2663_v27 = vmul.f32 %v7316_v1, %v9337_v31  ;;  %9339 = vst [vmem:[#allocation113_spill] sm:$0xff] %v7544_v63  ;;  %v9340_v20 = vld [vmem:[#allocation93_spill] sm:$0xff]  ;;  %v9344_v63 = vld [vmem:[#allocation62_spill] sm:$0xff] }
 0x238   :  { %2938 = vadd.xlane.f32.xlu1 %v2937_v54  ;;  %v2887_v4 = vmax.f32 %v2855_v44, 0.0  ;;  %v2836_v19 = vadd.f32 %v2804_v3, %v2754_v16  ;;  %1484 = vst.msk [vmem:[#allocation2 + $0x28] sm:$0xff] %vm1478_vm3, %v1467_v33  ;;  %v2712_v34 = vmul.f32 %v7319_v49, %v9338_v15  ;;  %v2713_v37 = vmul.f32 %v7322_v45, %v9338_v15  ;;  %v9341_v54 = vld [vmem:[#allocation66_spill] sm:$0xff]  ;;  %v9343_v15 = vld [vmem:[#allocation61_spill] sm:$0xff] }
 0x239   :  { %v2837_v21 = vadd.f32 %v2805_v60, %v2755_v57  ;;  %v2794_v9 = vmul.f32 %v7337_v29, %v9340_v20  ;;  %v2795_v51 = vmul.f32 %v7348_v38, %v9340_v20  ;;  %v1462_v3 = vadd.f32 %v1446_v61, %v9341_v54  ;;  %v9342_v16 = vld [vmem:[#allocation50_spill] sm:$0xff] }
 0x23a   :  { %v2922_v44 = vadd.f32 %v2887_v4, %v2886_v10  ;;  %v2868_v7 = vadd.f32 %v2836_v19, %v9342_v16  ;;  %v2744_v33 = vadd.f32 %v2712_v34, %v2662_v11  ;;  %v2745_v32 = vadd.f32 %v2713_v37, %v2663_v27  ;;  %v7562_v11 = vpop.xlane.xlu1 %1816  ;;  %v9346_v37 = vld [vmem:[#allocation108_spill] sm:$0xff] }
 0x23b   :  { %v2869_v31 = vadd.f32 %v2837_v21, %v9342_v16  ;;  %1479 = vst.msk [vmem:[#allocation2] sm:$0xff] %vm1478_vm3, %v1462_v3  ;;  %v2676_v60 = vmul.f32 %v7313_v55, %v9343_v15  ;;  %v2677_v57 = vmul.f32 %v7316_v1, %v9343_v15  ;;  %v2726_v20 = vmul.f32 %v7319_v49, %v9344_v63  ;;  %v1453_v3 = vld [vmem:[#allocation2 + $0x38] sm:$0xff]  ;;  %v9347_v15 = vld [vmem:[#allocation55_spill] sm:$0xff] }
 0x23c   :  { %2923 = vadd.xlane.f32.xlu0 %v2922_v44  ;;  %v2900_v61 = vmax.f32 %v2868_v7, 0.0  ;;  %v2826_v4 = vadd.f32 %v2794_v9, %v2744_v33  ;;  %v2827_v10 = vadd.f32 %v2795_v51, %v2745_v32  ;;  %v2727_v19 = vmul.f32 %v7322_v45, %v9344_v63  ;;  %9345 = vst [vmem:[#allocation76_spill] sm:$0xff] %v7562_v11  ;;  %v9348_v32 = vld [vmem:[#allocation98_spill] sm:$0xff]  ;;  %v7571_v7 = vpop.xlane.xlu0 %1801 }
 0x23d   :  { %v2901_v27 = vmax.f32 %v2869_v31, 0.0  ;;  %v2758_v34 = vadd.f32 %v2726_v20, %v2676_v60  ;;  %v2808_v21 = vmul.f32 %v7337_v29, %v9346_v37  ;;  %v2809_v54 = vmul.f32 %v7348_v38, %v9346_v37  ;;  %9349 = vst [vmem:[#allocation138_spill] sm:$0xff] %v7571_v7  ;;  %v9350_v31 = vld [vmem:[#allocation30_spill] sm:$0xff]  ;;  %v9356_v7 = vld [vmem:[#allocation67_spill] sm:$0xff] }
 0x23e   :  { %v2858_v16 = vadd.f32 %v2826_v4, %v9347_v15  ;;  %v2859_v44 = vadd.f32 %v2827_v10, %v9347_v15  ;;  %v2759_v9 = vadd.f32 %v2727_v19, %v2677_v57  ;;  %v1469_v51 = vadd.f32 %v1453_v3, %v9348_v32  ;;  %v9351_v4 = vld [vmem:[#allocation118_spill] sm:$0xff]  ;;  %v9352_v10 = vld [vmem:[#allocation56_spill] sm:$0xff] }
 0x23f   :  { %v2943_v33 = vadd.f32 %v2901_v27, %v2900_v61  ;;  %v2840_v11 = vadd.f32 %v2808_v21, %v2758_v34  ;;  %v2666_v20 = vmul.f32 %v7313_v55, %v9350_v31  ;;  %v2667_v60 = vmul.f32 %v7316_v1, %v9350_v31  ;;  %v9353_v27 = vld [vmem:[#allocation105_spill] sm:$0xff] }
 0x240   :  { %v2890_v63 = vmax.f32 %v2858_v16, 0.0  ;;  %v2891_v37 = vmax.f32 %v2859_v44, 0.0  ;;  %v2841_v46 = vadd.f32 %v2809_v54, %v2759_v9  ;;  %1486 = vst.msk [vmem:[#allocation2 + $0x38] sm:$0xff] %vm1478_vm3, %v1469_v51  ;;  %v2716_v57 = vmul.f32 %v7319_v49, %v9351_v4  ;;  %v1448_v16 = vld [vmem:[#allocation2 + $0x10] sm:$0xff]  ;;  %v7589_v51 = vpop.xlane.xlu1 %1822 }
 0x241   :  { %2944 = vadd.xlane.f32.xlu1 %v2943_v33  ;;  %v2872_v19 = vadd.f32 %v2840_v11, %v9352_v10  ;;  %v2717_v61 = vmul.f32 %v7322_v45, %v9351_v4  ;;  %v2798_v34 = vmul.f32 %v7337_v29, %v9353_v27  ;;  %v2799_v21 = vmul.f32 %v7348_v38, %v9353_v27  ;;  %v9354_v9 = vld [vmem:[#allocation99_spill] sm:$0xff] }
 0x242   :  { %v2928_v3 = vadd.f32 %v2891_v37, %v2890_v63  ;;  %v2873_v54 = vadd.f32 %v2841_v46, %v9352_v10  ;;  %v2748_v44 = vadd.f32 %v2716_v57, %v2666_v20  ;;  %v1464_v32 = vadd.f32 %v1448_v16, %v9354_v9  ;;  %9355 = vst [vmem:[#allocation14_spill] sm:$0xff] %v7589_v51  ;;  %v9357_v63 = vld [vmem:[#allocation68_spill] sm:$0xff]  ;;  %v1455_v20 = vld [vmem:[#allocation2 + $0x48] sm:$0xff]  ;;  %v7600_v57 = vpop.xlane.xlu0 %1807 }
 0x243   :  { %v2904_v33 = vmax.f32 %v2872_v19, 0.0  ;;  %v2749_v11 = vadd.f32 %v2717_v61, %v2667_v60  ;;  %v2680_v4 = vmul.f32 %v7313_v55, %v9356_v7  ;;  %v2681_v31 = vmul.f32 %v7316_v1, %v9356_v7  ;;  %9358 = vst [vmem:[#allocation139_spill] sm:$0xff] %v7600_v57  ;;  %v9359_v19 = vld [vmem:[#allocation48_spill] sm:$0xff]  ;;  %v9363_v57 = vld [vmem:[#allocation134_spill] sm:$0xff] }
 0x244   :  { %2929 = vadd.xlane.f32.xlu0 %v2928_v3  ;;  %v2905_v15 = vmax.f32 %v2873_v54, 0.0  ;;  %v2830_v27 = vadd.f32 %v2798_v34, %v2748_v44  ;;  %1481 = vst.msk [vmem:[#allocation2 + $0x10] sm:$0xff] %vm1478_vm3, %v1464_v32  ;;  %v2730_v46 = vmul.f32 %v7319_v49, %v9357_v63  ;;  %v2731_v37 = vmul.f32 %v7322_v45, %v9357_v63  ;;  %v9360_v3 = vld [vmem:[#allocation71_spill] sm:$0xff]  ;;  %v9361_v44 = vld [vmem:[#allocation57_spill] sm:$0xff]  ;;  %v9362_v63 = vld [vmem:[#allocation34_spill] sm:$0xff] }
 0x245   :  { %v2831_v60 = vadd.f32 %v2799_v21, %v2749_v11  ;;  %v2812_v61 = vmul.f32 %v7337_v29, %v9359_v19  ;;  %v2813_v16 = vmul.f32 %v7348_v38, %v9359_v19  ;;  %v1471_v34 = vadd.f32 %v1455_v20, %v9360_v3 }
 0x246   :  { %v2949_v54 = vadd.f32 %v2905_v15, %v2904_v33  ;;  %v2862_v9 = vadd.f32 %v2830_v27, %v9361_v44  ;;  %v2762_v32 = vadd.f32 %v2730_v46, %v2680_v4  ;;  %v2763_v51 = vadd.f32 %v2731_v37, %v2681_v31  ;;  %v4633_v4 = vld [vmem:[%s8496_s0 + $0x38] sm:$0x77]  ;;  %v7621_v27 = vpop.xlane.xlu1 %2158 }
 0x247   :  { %v2863_v7 = vadd.f32 %v2831_v60, %v9361_v44  ;;  %1488 = vst.msk [vmem:[#allocation2 + $0x48] sm:$0xff] %vm1478_vm3, %v1471_v34  ;;  %v2670_v21 = vmul.f32 %v7313_v55, %v9362_v63  ;;  %v2671_v11 = vmul.f32 %v7316_v1, %v9362_v63  ;;  %v2720_v19 = vmul.f32 %v7319_v49, %v9363_v57  ;;  %v9365_v60 = vld [vmem:[#allocation119_spill] sm:$0xff]  ;;  %v7630_v63 = vpop.xlane.xlu0 %1813 }
 0x248   :  { %2950 = vadd.xlane.f32.xlu1 %v2949_v54  ;;  %v2894_v20 = vmax.f32 %v2862_v9, 0.0  ;;  %v2844_v15 = vadd.f32 %v2812_v61, %v2762_v32  ;;  %v2845_v33 = vadd.f32 %v2813_v16, %v2763_v51  ;;  %v2721_v31 = vmul.f32 %v7322_v45, %v9363_v57  ;;  %9364 = vst [vmem:[#allocation128_spill] sm:$0xff] %v7621_v27  ;;  %v1450_v54 = vld [vmem:[#allocation2 + $0x20] sm:$0xff]  ;;  %v9366_v61 = vld [vmem:[#allocation58_spill] sm:$0xff]  ;;  %v9367_v32 = vld [vmem:[#allocation72_spill] sm:$0xff] }
 0x249   :  { %v2895_v46 = vmax.f32 %v2863_v7, 0.0  ;;  %v2752_v37 = vadd.f32 %v2720_v19, %v2670_v21  ;;  %v2802_v3 = vmul.f32 %v7337_v29, %v9365_v60  ;;  %v2803_v34 = vmul.f32 %v7348_v38, %v9365_v60  ;;  %9368 = vst [vmem:[#allocation15_spill] sm:$0xff] %v7630_v63  ;;  %v9369_v7 = vld [vmem:[#allocation6_spill] sm:$0xff]  ;;  %v9370_v21 = vld [vmem:[#allocation7_spill] sm:$0xff]  ;;  %v9371_v60 = vld [vmem:[#allocation8_spill] sm:$0xff] }
 0x24a   :  { %v2876_v51 = vadd.f32 %v2844_v15, %v9366_v61  ;;  %v2877_v16 = vadd.f32 %v2845_v33, %v9366_v61  ;;  %v2753_v9 = vadd.f32 %v2721_v31, %v2671_v11  ;;  %v1466_v57 = vadd.f32 %v1450_v54, %v9367_v32  ;;  %v9372_v33 = vld [vmem:[#allocation63_spill] sm:$0xff] }
 0x24b   :  { %v2934_v44 = vadd.f32 %v2895_v46, %v2894_v20  ;;  %v2834_v27 = vadd.f32 %v2802_v3, %v2752_v37  ;;  %v3013_v19 = vrot.slane %v4633_v4, %v9369_v7  ;;  %v3017_v10 = vrot.slane %v4633_v4, %v9370_v21  ;;  %v9373_v46 = vld [vmem:[#allocation9_spill] sm:$0xff] }
 0x24c   :  { %v2908_v5 = vmax.f32 %v2876_v51, 0.0  ;;  %v2909_v42 = vmax.f32 %v2877_v16, 0.0  ;;  %v2835_v39 = vadd.f32 %v2803_v34, %v2753_v9  ;;  %1483 = vst.msk [vmem:[#allocation2 + $0x20] sm:$0xff] %vm1478_vm3, %v1466_v57  ;;  %v3063_v15 = vrot.slane %v4633_v4, %v9371_v60  ;;  %v9374_v57 = vld [vmem:[#allocation10_spill] sm:$0xff]  ;;  %v7649_v16 = vpop.xlane.xlu1 %2164 }
 0x24d   :  { %2935 = vadd.xlane.f32.xlu0 %v2934_v44  ;;  %v2866_v11 = vadd.f32 %v2834_v27, %v9372_v33  ;;  %v7638_v31 = vrot.slane %v3013_v19, %v9369_v7  ;;  %v7641_v20 = vrot.slane %v3017_v10, %v9369_v7  ;;  %v3067_v37 = vrot.slane %v4633_v4, %v9373_v46  ;;  %v9376_v27 = vld [vmem:[#allocation168_spill] sm:$0xff]  ;;  %v9378_v7 = vld [vmem:[#allocation11_spill] sm:$0xff] }
 0x24e   :  { %v2955_v3 = vadd.f32 %v2909_v42, %v2908_v5  ;;  %v2867_v54 = vadd.f32 %v2835_v39, %v9372_v33  ;;  %v7646_v34 = vrot.slane %v3063_v15, %v9371_v60  ;;  %v3145_v51 = vrot.slane %v4633_v4, %v9374_v57  ;;  %9375 = vst [vmem:[#allocation80_spill] sm:$0xff] %v7649_v16  ;;  %v9377_v39 = vld [vmem:[#allocation77_spill] sm:$0xff]  ;;  %v1457_v15 = vld [vmem:[#allocation2 + $0x58] sm:$0xff] }
 0x24f   :  { %v2898_v44 = vmax.f32 %v2866_v11, 0.0  ;;  %v3030_v9 = vmul.f32 %v7638_v31, %v9376_v27  ;;  %v3031_v10 = vmul.f32 %v7641_v20, %v9376_v27  ;;  %v7656_v32 = vrot.slane %v3067_v37, %v9371_v60  ;;  %v7664_v11 = vpop.xlane.xlu0 %1819  ;;  %v9380_v27 = vld [vmem:[#allocation43_spill] sm:$0xff]  ;;  %v9381_v60 = vld [vmem:[#allocation36_spill] sm:$0xff] }
 0x250   :  { %2956 = vadd.xlane.f32.xlu1 %v2955_v3  ;;  %v2899_v5 = vmax.f32 %v2867_v54, 0.0  ;;  %v3080_v42 = vmul.f32 %v7646_v34, %v9377_v39  ;;  %v3149_v19 = vrot.slane %v4633_v4, %v9378_v7  ;;  %v7662_v21 = vrot.slane %v3145_v51, %v9374_v57  ;;  %9379 = vst [vmem:[#allocation129_spill] sm:$0xff] %v7664_v11  ;;  %v9383_v11 = vld [vmem:[#allocation135_spill] sm:$0xff] }
 0x251   :  { %v3081_v46 = vmul.f32 %v7656_v32, %v9377_v39  ;;  %v1473_v16 = vadd.f32 %v1457_v15, %v9380_v27  ;;  %v2674_v37 = vmul.f32 %v7313_v55, %v9381_v60  ;;  %v2675_v3 = vmul.f32 %v7316_v1, %v9381_v60  ;;  %v9382_v39 = vld [vmem:[#allocation146_spill] sm:$0xff] }
 0x252   :  { %v2940_v54 = vadd.f32 %v2899_v5, %v2898_v44  ;;  %v3112_v63 = vadd.f32 %v3080_v42, %v3030_v9  ;;  %v7674_v4 = vrot.slane %v3149_v19, %v9374_v57  ;;  %v3162_v51 = vmul.f32 %v7662_v21, %v9306_v25  ;;  %v1452_v44 = vld [vmem:[#allocation2 + $0x30] sm:$0xff]  ;;  %v9384_v5 = vld [vmem:[#allocation96_spill] sm:$0xff]  ;;  %v7690_v42 = vpop.xlane.xlu1 %2170 }
 0x253   :  { %v3113_v7 = vadd.f32 %v3081_v46, %v3031_v10  ;;  %1490 = vst.msk [vmem:[#allocation2 + $0x58] sm:$0xff] %vm1478_vm3, %v1473_v16  ;;  %v2724_v15 = vmul.f32 %v7319_v49, %v9382_v39  ;;  %v2725_v27 = vmul.f32 %v7322_v45, %v9382_v39  ;;  %v2806_v33 = vmul.f32 %v7337_v29, %v9383_v11 }
 0x254   :  { %2941 = vadd.xlane.f32.xlu0 %v2940_v54  ;;  %v3163_v57 = vmul.f32 %v7674_v4, %v9306_v25  ;;  %v3194_v9 = vadd.f32 %v3162_v51, %v3112_v63  ;;  %v2807_v10 = vmul.f32 %v7348_v38, %v9383_v11  ;;  %v1468_v16 = vadd.f32 %v1452_v44, %v9384_v5  ;;  %v9386_v25 = vld [vmem:[#allocation26_spill] sm:$0xff]  ;;  %v7702_v44 = vpop.xlane.xlu0 %2155  ;;  %v9389_v11 = vld [vmem:[#allocation97_spill] sm:$0xff] }
 0x255   :  { %9385 = vst [vmem:[#allocation81_spill] sm:$0xff] %v7690_v42  ;;  %v2756_v19 = vadd.f32 %v2724_v15, %v2674_v37  ;;  %v2757_v46 = vadd.f32 %v2725_v27, %v2675_v3  ;;  %v3034_v39 = vmul.f32 %v7638_v31, %v9242_v26  ;;  %v3035_v60 = vmul.f32 %v7641_v20, %v9242_v26  ;;  %v9388_v15 = vld [vmem:[#allocation79_spill] sm:$0xff] }
 0x256   :  { %v3195_v54 = vadd.f32 %v3163_v57, %v3113_v7  ;;  %v3226_v61 = vadd.f32 %v3194_v9, %v9308_v17  ;;  %1485 = vst.msk [vmem:[#allocation2 + $0x30] sm:$0xff] %vm1478_vm3, %v1468_v16  ;;  %v3084_v63 = vmul.f32 %v7646_v34, %v9386_v25  ;;  %v3085_v51 = vmul.f32 %v7656_v32, %v9386_v25  ;;  %v1459_v16 = vld [vmem:[#allocation2 + $0x68] sm:$0xff] }
 0x257   :  { %9387 = vst [vmem:[#allocation82_spill] sm:$0xff] %v7702_v44  ;;  %v2838_v37 = vadd.f32 %v2806_v33, %v2756_v19  ;;  %v2839_v3 = vadd.f32 %v2807_v10, %v2757_v46  ;;  %v3166_v27 = vmul.f32 %v7662_v21, %v9388_v15  ;;  %v3167_v26 = vmul.f32 %v7674_v4, %v9388_v15 }
 0x258   :  { %v3227_v7 = vadd.f32 %v3195_v54, %v9308_v17  ;;  %v3258_v57 = vmax.f32 %v3226_v61, 0.0  ;;  %v3116_v9 = vadd.f32 %v3084_v63, %v3034_v39  ;;  %v3117_v5 = vadd.f32 %v3085_v51, %v3035_v60  ;;  %v7716_v17 = vpop.xlane.xlu1 %2176  ;;  %v7727_v51 = vpop.xlane.xlu0 %2161 }
 0x259   :  { %v2870_v42 = vadd.f32 %v2838_v37, %v6205_v58  ;;  %v2871_v25 = vadd.f32 %v2839_v3, %v6205_v58  ;;  %v1475_v44 = vadd.f32 %v1459_v16, %v9389_v11  ;;  %v2678_v33 = vmul.f32 %v7313_v55, %v9097_v6 }
 0x25a   :  { %v3259_v10 = vmax.f32 %v3227_v7, 0.0  ;;  %v3198_v19 = vadd.f32 %v3166_v27, %v3116_v9  ;;  %v3199_v46 = vadd.f32 %v3167_v26, %v3117_v5  ;;  %v2679_v15 = vmul.f32 %v7316_v1, %v9097_v6  ;;  %v9390_v26 = vld [vmem:[#allocation69_spill] sm:$0xff] }
 0x25b   :  { %v2902_v61 = vmax.f32 %v2870_v42, 0.0  ;;  %v2903_v60 = vmax.f32 %v2871_v25, 0.0  ;;  %1492 = vst.msk [vmem:[#allocation2 + $0x68] sm:$0xff] %vm1478_vm3, %v1475_v44  ;;  %v2728_v39 = vmul.f32 %v7319_v49, %v9200_v50  ;;  %v2729_v11 = vmul.f32 %v7322_v45, %v9200_v50  ;;  %v1454_v49 = vld [vmem:[#allocation2 + $0x40] sm:$0xff] }
 0x25c   :  { %v3291_v54 = vadd.f32 %v3259_v10, %v3258_v57  ;;  %v3230_v55 = vadd.f32 %v3198_v19, %v6051_v53  ;;  %v3231_v63 = vadd.f32 %v3199_v46, %v6051_v53  ;;  %v2810_v1 = vmul.f32 %v7337_v29, %v9201_v47  ;;  %v1461_v10 = vld [vmem:[#allocation2 + $0x78] sm:$0xff]  ;;  %v7745_v19 = vpop.xlane.xlu1 %2182 }
 0x25d   :  { %v2946_v42 = vadd.f32 %v2903_v60, %v2902_v61  ;;  %v2760_v37 = vadd.f32 %v2728_v39, %v2678_v33  ;;  %v2761_v3 = vadd.f32 %v2729_v11, %v2679_v15  ;;  %v2811_v44 = vmul.f32 %v7348_v38, %v9201_v47  ;;  %v9391_v61 = vld [vmem:[#allocation70_spill] sm:$0xff] }
 0x25e   :  { %3292 = vadd.xlane.f32.xlu1 %v3291_v54  ;;  %v3262_v27 = vmax.f32 %v3230_v55, 0.0  ;;  %v3263_v45 = vmax.f32 %v3231_v63, 0.0  ;;  %v1470_v7 = vadd.f32 %v1454_v49, %v9390_v26  ;;  %v3038_v53 = vmul.f32 %v7638_v31, %v9159_v28  ;;  %v7756_v54 = vpop.xlane.xlu0 %2167  ;;  %v1456_v49 = vld [vmem:[#allocation2 + $0x50] sm:$0xff] }
 0x25f   :  { %2947 = vadd.xlane.f32.xlu0 %v2946_v42  ;;  %v2842_v57 = vadd.f32 %v2810_v1, %v2760_v37  ;;  %v2843_v29 = vadd.f32 %v2811_v44, %v2761_v3  ;;  %v3039_v9 = vmul.f32 %v7641_v20, %v9159_v28  ;;  %v3088_v5 = vmul.f32 %v7646_v34, %v9162_v8 }
 0x260   :  { %v3297_v16 = vadd.f32 %v3263_v45, %v3262_v27  ;;  %1487 = vst.msk [vmem:[#allocation2 + $0x40] sm:$0xff] %vm1478_vm3, %v1470_v7  ;;  %v3089_v38 = vmul.f32 %v7656_v32, %v9162_v8  ;;  %v3170_v25 = vmul.f32 %v7662_v21, %v9202_v40  ;;  %v3171_v33 = vmul.f32 %v7674_v4, %v9202_v40  ;;  %v9392_v7 = vld [vmem:[#allocation41_spill] sm:$0xff] }
 0x261   :  { %v2874_v28 = vadd.f32 %v2842_v57, %v9245_v62  ;;  %v2875_v46 = vadd.f32 %v2843_v29, %v9245_v62  ;;  %v3120_v15 = vadd.f32 %v3088_v5, %v3038_v53  ;;  %v1477_v60 = vadd.f32 %v1461_v10, %v9391_v61  ;;  %v7772_v5 = vpop.xlane.xlu1 %2188 }
 0x262   :  { %3298 = vadd.xlane.f32.xlu1 %v3297_v16  ;;  %v3121_v39 = vadd.f32 %v3089_v38, %v3039_v9  ;;  %v3028_v8 = vmul.f32 %v7638_v31, %v9246_v22  ;;  %v3029_v11 = vmul.f32 %v7641_v20, %v9246_v22  ;;  %v3078_v40 = vmul.f32 %v7646_v34, %v9313_v0 }
 0x263   :  { %v2906_v55 = vmax.f32 %v2874_v28, 0.0  ;;  %v2907_v63 = vmax.f32 %v2875_v46, 0.0  ;;  %v3202_v1 = vadd.f32 %v3170_v25, %v3120_v15  ;;  %1494 = vst.msk [vmem:[#allocation2 + $0x78] sm:$0xff] %vm1478_vm3, %v1477_v60  ;;  %v3079_v42 = vmul.f32 %v7656_v32, %v9313_v0  ;;  %v7784_v28 = vpop.xlane.xlu0 %2173  ;;  %v1825_v60 = vld [vmem:[#allocation2 + $0x8] sm:$0xff] }
 0x264   :  { %v3203_v37 = vadd.f32 %v3171_v33, %v3121_v39  ;;  %v3110_v3 = vadd.f32 %v3078_v40, %v3028_v8  ;;  %v3160_v44 = vmul.f32 %v7662_v21, %v9105_v36  ;;  %v3161_v22 = vmul.f32 %v7674_v4, %v9105_v36 }
 0x265   :  { %v2952_v27 = vadd.f32 %v2907_v63, %v2906_v55  ;;  %v3234_v45 = vadd.f32 %v3202_v1, %v6080_v30  ;;  %v3111_v26 = vadd.f32 %v3079_v42, %v3029_v11  ;;  %v1472_v53 = vadd.f32 %v1456_v49, %v9392_v7 }
 0x266   :  { %v3235_v57 = vadd.f32 %v3203_v37, %v6080_v30  ;;  %v3192_v29 = vadd.f32 %v3160_v44, %v3110_v3  ;;  %v3042_v0 = vmul.f32 %v7638_v31, %v9167_v41  ;;  %v3043_v9 = vmul.f32 %v7641_v20, %v9167_v41  ;;  %v1458_v37 = vld [vmem:[#allocation2 + $0x60] sm:$0xff]  ;;  %v7801_v3 = vpop.xlane.xlu1 %2194 }
 0x267   :  { %2953 = vadd.xlane.f32.xlu0 %v2952_v27  ;;  %v3266_v36 = vmax.f32 %v3234_v45, 0.0  ;;  %v3193_v16 = vadd.f32 %v3161_v22, %v3111_v26  ;;  %1489 = vst.msk [vmem:[#allocation2 + $0x50] sm:$0xff] %vm1478_vm3, %v1472_v53  ;;  %v3092_v38 = vmul.f32 %v7646_v34, %v9248_v59  ;;  %v3093_v30 = vmul.f32 %v7656_v32, %v9248_v59  ;;  %v7810_v7 = vpop.xlane.xlu0 %2179 }
 0x268   :  { %v3267_v25 = vmax.f32 %v3235_v57, 0.0  ;;  %v3224_v33 = vadd.f32 %v3192_v29, %v9316_v24  ;;  %v3174_v10 = vmul.f32 %v7662_v21, %v9317_v18  ;;  %v3175_v41 = vmul.f32 %v7674_v4, %v9317_v18 }
 0x269   :  { %v3225_v46 = vadd.f32 %v3193_v16, %v9316_v24  ;;  %v3124_v15 = vadd.f32 %v3092_v38, %v3042_v0  ;;  %v3125_v61 = vadd.f32 %v3093_v30, %v3043_v9  ;;  %v1841_v59 = vadd.f32 %v1825_v60, %v7396_v35  ;;  %v1827_v9 = vld [vmem:[#allocation2 + $0x18] sm:$0xff]  ;;  %v9393_v30 = vld [vmem:[#allocation42_spill] sm:$0xff] }
 0x26a   :  { %v3303_v39 = vadd.f32 %v3267_v25, %v3266_v36  ;;  %v3256_v8 = vmax.f32 %v3224_v33, 0.0  ;;  %v3032_v11 = vmul.f32 %v7638_v31, %v9319_v52  ;;  %v3033_v18 = vmul.f32 %v7641_v20, %v9319_v52  ;;  %v9395_v60 = vld [vmem:[#allocation92_spill] sm:$0xff] }
 0x26b   :  { %v3257_v40 = vmax.f32 %v3225_v46, 0.0  ;;  %v3206_v55 = vadd.f32 %v3174_v10, %v3124_v15  ;;  %v3207_v63 = vadd.f32 %v3175_v41, %v3125_v61  ;;  %1858 = vst.msk [vmem:[#allocation2 + $0x8] sm:$0xff] %vm1856_vm4, %v1841_v59  ;;  %v3082_v24 = vmul.f32 %v7646_v34, %v9320_v56  ;;  %v9394_v41 = vld [vmem:[#allocation172_spill] sm:$0xff]  ;;  %v7828_v15 = vpop.xlane.xlu1 %2200 }
 0x26c   :  { %3304 = vadd.xlane.f32.xlu1 %v3303_v39  ;;  %v3083_v1 = vmul.f32 %v7656_v32, %v9320_v56  ;;  %v3164_v35 = vmul.f32 %v7662_v21, %v9321_v14  ;;  %v3165_v42 = vmul.f32 %v7674_v4, %v9321_v14  ;;  %v1474_v49 = vadd.f32 %v1458_v37, %v7402_v23  ;;  %v1460_v37 = vld [vmem:[#allocation2 + $0x70] sm:$0xff] }
 0x26d   :  { %v3288_v44 = vadd.f32 %v3257_v40, %v3256_v8  ;;  %v3238_v52 = vadd.f32 %v3206_v55, %v9252_v12  ;;  %v3239_v22 = vadd.f32 %v3207_v63, %v9252_v12  ;;  %v3114_v27 = vadd.f32 %v3082_v24, %v3032_v11  ;;  %v9396_v11 = vld [vmem:[#allocation85_spill] sm:$0xff]  ;;  %v7839_v63 = vpop.xlane.xlu0 %2185 }
 0x26e   :  { %v3115_v45 = vadd.f32 %v3083_v1, %v3033_v18  ;;  %v3046_v56 = vmul.f32 %v7638_v31, %v9324_v2  ;;  %v3047_v26 = vmul.f32 %v7641_v20, %v9324_v2  ;;  %1491 = vst.msk [vmem:[#allocation2 + $0x60] sm:$0xff] %vm1478_vm3, %v1474_v49  ;;  %v3096_v12 = vmul.f32 %v7646_v34, %v9325_v13  ;;  %v9397_v18 = vld [vmem:[#allocation125_spill] sm:$0xff] }
 0x26f   :  { %3289 = vadd.xlane.f32.xlu0 %v3288_v44  ;;  %v3270_v14 = vmax.f32 %v3238_v52, 0.0  ;;  %v3271_v53 = vmax.f32 %v3239_v22, 0.0  ;;  %v3097_v23 = vmul.f32 %v7656_v32, %v9325_v13  ;;  %v3196_v57 = vadd.f32 %v3164_v35, %v3114_v27  ;;  %v9398_v52 = vld [vmem:[#allocation12_spill] sm:$0xff]  ;;  %v9399_v49 = vld [vmem:[#allocation53_spill] sm:$0xff] }
 0x270   :  { %v3197_v29 = vadd.f32 %v3165_v42, %v3115_v45  ;;  %v3178_v0 = vmul.f32 %v7662_v21, %v9327_v43  ;;  %v3179_v2 = vmul.f32 %v7674_v4, %v9327_v43  ;;  %v3128_v16 = vadd.f32 %v3096_v12, %v3046_v56  ;;  %v9400_v12 = vld [vmem:[#allocation54_spill] sm:$0xff] }
 0x271   :  { %v3309_v36 = vadd.f32 %v3271_v53, %v3270_v14  ;;  %v3129_v38 = vadd.f32 %v3097_v23, %v3047_v26  ;;  %v1843_v25 = vadd.f32 %v1827_v9, %v9393_v30  ;;  %v3228_v33 = vadd.f32 %v3196_v57, %v9328_v48  ;;  %v1829_v9 = vld [vmem:[#allocation2 + $0x28] sm:$0xff] }
 0x272   :  { %v3229_v10 = vadd.f32 %v3197_v29, %v9328_v48  ;;  %v3036_v13 = vmul.f32 %v7638_v31, %v9394_v41  ;;  %v3037_v46 = vmul.f32 %v7641_v20, %v9394_v41  ;;  %v3210_v43 = vadd.f32 %v3178_v0, %v3128_v16  ;;  %v9401_v29 = vld [vmem:[#allocation122_spill] sm:$0xff] }
 0x273   :  { %3310 = vadd.xlane.f32.xlu1 %v3309_v36  ;;  %v3211_v61 = vadd.f32 %v3179_v2, %v3129_v38  ;;  %1860 = vst.msk [vmem:[#allocation2 + $0x18] sm:$0xff] %vm1856_vm4, %v1843_v25  ;;  %v3086_v39 = vmul.f32 %v7646_v34, %v9395_v60  ;;  %v3087_v8 = vmul.f32 %v7656_v32, %v9395_v60  ;;  %v3260_v48 = vmax.f32 %v3228_v33, 0.0  ;;  %v7857_v36 = vpop.xlane.xlu1 %2536  ;;  %v9402_v38 = vld [vmem:[#allocation49_spill] sm:$0xff]  ;;  %v7866_v60 = vpop.xlane.xlu0 %2191 }
 0x274   :  { %v3261_v59 = vmax.f32 %v3229_v10, 0.0  ;;  %v3168_v40 = vmul.f32 %v7662_v21, %v9396_v11  ;;  %v3169_v55 = vmul.f32 %v7674_v4, %v9396_v11  ;;  %v3242_v24 = vadd.f32 %v3210_v43, %v9397_v18  ;;  %v9403_v33 = vld [vmem:[#allocation13_spill] sm:$0xff] }
 0x275   :  { %v3243_v1 = vadd.f32 %v3211_v61, %v9397_v18  ;;  %v3118_v35 = vadd.f32 %v3086_v39, %v3036_v13  ;;  %v3119_v42 = vadd.f32 %v3087_v8, %v3037_v46  ;;  %v1476_v22 = vadd.f32 %v1460_v37, %v9398_v52  ;;  %v9404_v46 = vld [vmem:[#allocation173_spill] sm:$0xff]  ;;  %v9407_v52 = vld [vmem:[#allocation126_spill] sm:$0xff] }
 0x276   :  { %v3294_v44 = vadd.f32 %v3261_v59, %v3260_v48  ;;  %v3050_v27 = vmul.f32 %v7638_v31, %v9399_v49  ;;  %v3051_v45 = vmul.f32 %v7641_v20, %v9399_v49  ;;  %v3274_v56 = vmax.f32 %v3242_v24, 0.0  ;;  %v9405_v48 = vld [vmem:[#allocation104_spill] sm:$0xff]  ;;  %v9406_v18 = vld [vmem:[#allocation93_spill] sm:$0xff]  ;;  %v9408_v49 = vld [vmem:[#allocation50_spill] sm:$0xff] }
 0x277   :  { %v3275_v26 = vmax.f32 %v3243_v1, 0.0  ;;  %v3200_v14 = vadd.f32 %v3168_v40, %v3118_v35  ;;  %v3201_v53 = vadd.f32 %v3169_v55, %v3119_v42  ;;  %1493 = vst.msk [vmem:[#allocation2 + $0x70] sm:$0xff] %vm1478_vm3, %v1476_v22  ;;  %v3100_v23 = vmul.f32 %v7646_v34, %v9400_v12  ;;  %v1824_v35 = vld [vmem:[#allocation2] sm:$0xff] }
 0x278   :  { %3295 = vadd.xlane.f32.xlu0 %v3294_v44  ;;  %v3101_v57 = vmul.f32 %v7656_v32, %v9400_v12  ;;  %v3182_v0 = vmul.f32 %v7662_v21, %v9401_v29  ;;  %v3183_v2 = vmul.f32 %v7674_v4, %v9401_v29  ;;  %v1845_v10 = vadd.f32 %v1829_v9, %v9403_v33  ;;  %v9412_v33 = vld [vmem:[#allocation55_spill] sm:$0xff] }
 0x279   :  { %v3315_v16 = vadd.f32 %v3275_v26, %v3274_v56  ;;  %v3232_v30 = vadd.f32 %v3200_v14, %v9402_v38  ;;  %v3233_v25 = vadd.f32 %v3201_v53, %v9402_v38  ;;  %v3132_v41 = vadd.f32 %v3100_v23, %v3050_v27  ;;  %v9409_v56 = vld [vmem:[#allocation61_spill] sm:$0xff]  ;;  %v7884_v53 = vpop.xlane.xlu1 %2542 }
 0x27a   :  { %v3133_v13 = vadd.f32 %v3101_v57, %v3051_v45  ;;  %v3040_v43 = vmul.f32 %v7638_v31, %v9404_v46  ;;  %v3041_v61 = vmul.f32 %v7641_v20, %v9404_v46  ;;  %1862 = vst.msk [vmem:[#allocation2 + $0x28] sm:$0xff] %vm1856_vm4, %v1845_v10  ;;  %v3090_v59 = vmul.f32 %v7646_v34, %v9405_v48  ;;  %v9410_v57 = vld [vmem:[#allocation62_spill] sm:$0xff] }
 0x27b   :  { %3316 = vadd.xlane.f32.xlu1 %v3315_v16  ;;  %v3264_v39 = vmax.f32 %v3232_v30, 0.0  ;;  %v3265_v8 = vmax.f32 %v3233_v25, 0.0  ;;  %v3091_v11 = vmul.f32 %v7656_v32, %v9405_v48  ;;  %v3214_v40 = vadd.f32 %v3182_v0, %v3132_v41  ;;  %v9411_v16 = vld [vmem:[#allocation108_spill] sm:$0xff]  ;;  %v7895_v25 = vpop.xlane.xlu0 %2197  ;;  %v9414_v48 = vld [vmem:[#allocation30_spill] sm:$0xff] }
 0x27c   :  { %v3215_v55 = vadd.f32 %v3183_v2, %v3133_v13  ;;  %v3172_v24 = vmul.f32 %v7662_v21, %v9406_v18  ;;  %v3173_v1 = vmul.f32 %v7674_v4, %v9406_v18  ;;  %v3122_v37 = vadd.f32 %v3090_v59, %v3040_v43  ;;  %v1831_v43 = vld [vmem:[#allocation2 + $0x38] sm:$0xff] }
 0x27d   :  { %v3300_v42 = vadd.f32 %v3265_v8, %v3264_v39  ;;  %v3123_v44 = vadd.f32 %v3091_v11, %v3041_v61  ;;  %v1840_v22 = vadd.f32 %v1824_v35, %v9407_v52  ;;  %v3246_v27 = vadd.f32 %v3214_v40, %v9408_v49  ;;  %v9413_v39 = vld [vmem:[#allocation44_spill] sm:$0xff] }
 0x27e   :  { %v3247_v45 = vadd.f32 %v3215_v55, %v9408_v49  ;;  %v3054_v26 = vmul.f32 %v7638_v31, %v9409_v56  ;;  %v3055_v14 = vmul.f32 %v7641_v20, %v9409_v56  ;;  %v3204_v12 = vadd.f32 %v3172_v24, %v3122_v37  ;;  %v9416_v37 = vld [vmem:[#allocation105_spill] sm:$0xff]  ;;  %v7913_v49 = vpop.xlane.xlu1 %2548 }
 0x27f   :  { %3301 = vadd.xlane.f32.xlu0 %v3300_v42  ;;  %v3205_v23 = vadd.f32 %v3173_v1, %v3123_v44  ;;  %1857 = vst.msk [vmem:[#allocation2] sm:$0xff] %vm1856_vm4, %v1840_v22  ;;  %v3104_v29 = vmul.f32 %v7646_v34, %v9410_v57  ;;  %v3105_v0 = vmul.f32 %v7656_v32, %v9410_v57  ;;  %v3278_v2 = vmax.f32 %v3246_v27, 0.0  ;;  %v9415_v1 = vld [vmem:[#allocation118_spill] sm:$0xff]  ;;  %v1826_v22 = vld [vmem:[#allocation2 + $0x10] sm:$0xff] }
 0x280   :  { %v3279_v9 = vmax.f32 %v3247_v45, 0.0  ;;  %v3186_v38 = vmul.f32 %v7662_v21, %v9411_v16  ;;  %v3187_v30 = vmul.f32 %v7674_v4, %v9411_v16  ;;  %v3236_v10 = vadd.f32 %v3204_v12, %v9412_v33  ;;  %v9417_v45 = vld [vmem:[#allocation56_spill] sm:$0xff] }
 0x281   :  { %v3237_v41 = vadd.f32 %v3205_v23, %v9412_v33  ;;  %v3136_v13 = vadd.f32 %v3104_v29, %v3054_v26  ;;  %v3137_v46 = vadd.f32 %v3105_v0, %v3055_v14  ;;  %v1847_v8 = vadd.f32 %v1831_v43, %v9413_v39  ;;  %v9418_v14 = vld [vmem:[#allocation47_spill] sm:$0xff]  ;;  %v1833_v39 = vld [vmem:[#allocation2 + $0x48] sm:$0xff] }
 0x282   :  { %v3321_v61 = vadd.f32 %v3279_v9, %v3278_v2  ;;  %v3044_v59 = vmul.f32 %v7638_v31, %v9414_v48  ;;  %v3045_v11 = vmul.f32 %v7641_v20, %v9414_v48  ;;  %v3268_v40 = vmax.f32 %v3236_v10, 0.0  ;;  %v9419_v29 = vld [vmem:[#allocation67_spill] sm:$0xff]  ;;  %v7922_v9 = vpop.xlane.xlu0 %2533 }
 0x283   :  { %v3269_v55 = vmax.f32 %v3237_v41, 0.0  ;;  %v3218_v18 = vadd.f32 %v3186_v38, %v3136_v13  ;;  %v3219_v24 = vadd.f32 %v3187_v30, %v3137_v46  ;;  %1864 = vst.msk [vmem:[#allocation2 + $0x38] sm:$0xff] %vm1856_vm4, %v1847_v8  ;;  %v3094_v35 = vmul.f32 %v7646_v34, %v9415_v1  ;;  %v9420_v30 = vld [vmem:[#allocation68_spill] sm:$0xff] }
 0x284   :  { %3322 = vadd.xlane.f32.xlu1 %v3321_v61  ;;  %v3095_v42 = vmul.f32 %v7656_v32, %v9415_v1  ;;  %v3176_v44 = vmul.f32 %v7662_v21, %v9416_v37  ;;  %v3177_v52 = vmul.f32 %v7674_v4, %v9416_v37  ;;  %v1842_v12 = vadd.f32 %v1826_v22, %v9418_v14  ;;  %v9421_v46 = vld [vmem:[#allocation48_spill] sm:$0xff]  ;;  %v9424_v1 = vld [vmem:[#allocation34_spill] sm:$0xff]  ;;  %v7940_v37 = vpop.xlane.xlu1 %2554  ;;  %v9426_v14 = vld [vmem:[#allocation119_spill] sm:$0xff] }
 0x285   :  { %v3306_v27 = vadd.f32 %v3269_v55, %v3268_v40  ;;  %v3250_v56 = vadd.f32 %v3218_v18, %v9417_v45  ;;  %v3251_v26 = vadd.f32 %v3219_v24, %v9417_v45  ;;  %v3126_v23 = vadd.f32 %v3094_v35, %v3044_v59  ;;  %v9423_v55 = vld [vmem:[#allocation57_spill] sm:$0xff]  ;;  %v9425_v22 = vld [vmem:[#allocation134_spill] sm:$0xff] }
 0x286   :  { %v3127_v57 = vadd.f32 %v3095_v42, %v3045_v11  ;;  %v3058_v0 = vmul.f32 %v7638_v31, %v9419_v29  ;;  %v3059_v2 = vmul.f32 %v7641_v20, %v9419_v29  ;;  %1859 = vst.msk [vmem:[#allocation2 + $0x10] sm:$0xff] %vm1856_vm4, %v1842_v12  ;;  %v3108_v33 = vmul.f32 %v7646_v34, %v9420_v30  ;;  %v9422_v11 = vld [vmem:[#allocation127_spill] sm:$0xff]  ;;  %v9427_v29 = vld [vmem:[#allocation58_spill] sm:$0xff] }
 0x287   :  { %3307 = vadd.xlane.f32.xlu0 %v3306_v27  ;;  %v3282_v16 = vmax.f32 %v3250_v56, 0.0  ;;  %v3283_v38 = vmax.f32 %v3251_v26, 0.0  ;;  %v3109_v10 = vmul.f32 %v7656_v32, %v9420_v30  ;;  %v3208_v41 = vadd.f32 %v3176_v44, %v3126_v23  ;;  %v1828_v30 = vld [vmem:[#allocation2 + $0x20] sm:$0xff] }
 0x288   :  { %v3209_v13 = vadd.f32 %v3177_v52, %v3127_v57  ;;  %v3190_v43 = vmul.f32 %v7662_v21, %v9421_v46  ;;  %v3191_v61 = vmul.f32 %v7674_v4, %v9421_v46  ;;  %v3140_v48 = vadd.f32 %v3108_v33, %v3058_v0  ;;  %v7951_v57 = vpop.xlane.xlu0 %2539  ;;  %v1835_v33 = vld [vmem:[#allocation2 + $0x58] sm:$0xff]  ;;  %v9429_v46 = vld [vmem:[#allocation75_spill] sm:$0xff] }
 0x289   :  { %v3327_v8 = vadd.f32 %v3283_v38, %v3282_v16  ;;  %v3141_v59 = vadd.f32 %v3109_v10, %v3059_v2  ;;  %v1849_v40 = vadd.f32 %v1833_v39, %v9422_v11  ;;  %v3240_v18 = vadd.f32 %v3208_v41, %v9423_v55  ;;  %v9428_v41 = vld [vmem:[#allocation112_spill] sm:$0xff] }
 0x28a   :  { %v3241_v24 = vadd.f32 %v3209_v13, %v9423_v55  ;;  %v3048_v35 = vmul.f32 %v7638_v31, %v9424_v1  ;;  %v3049_v42 = vmul.f32 %v7641_v20, %v9424_v1  ;;  %v3222_v44 = vadd.f32 %v3190_v43, %v3140_v48  ;;  %v9431_v55 = vld [vmem:[#allocation146_spill] sm:$0xff]  ;;  %v9432_v1 = vld [vmem:[#allocation135_spill] sm:$0xff] }
 0x28b   :  { %3328 = vadd.xlane.f32.xlu1 %v3327_v8  ;;  %v3223_v52 = vadd.f32 %v3191_v61, %v3141_v59  ;;  %1866 = vst.msk [vmem:[#allocation2 + $0x48] sm:$0xff] %vm1856_vm4, %v1849_v40  ;;  %v3098_v27 = vmul.f32 %v7646_v34, %v9425_v22  ;;  %v3099_v45 = vmul.f32 %v7656_v32, %v9425_v22  ;;  %v3272_v56 = vmax.f32 %v3240_v18, 0.0  ;;  %v9430_v61 = vld [vmem:[#allocation36_spill] sm:$0xff] }
 0x28c   :  { %v3273_v26 = vmax.f32 %v3241_v24, 0.0  ;;  %v3180_v12 = vmul.f32 %v7662_v21, %v9426_v14  ;;  %v3181_v23 = vmul.f32 %v7674_v4, %v9426_v14  ;;  %v3254_v0 = vadd.f32 %v3222_v44, %v9427_v29 }
 0x28d   :  { %v3255_v2 = vadd.f32 %v3223_v52, %v9427_v29  ;;  %v3130_v16 = vadd.f32 %v3098_v27, %v3048_v35  ;;  %v3131_v38 = vadd.f32 %v3099_v45, %v3049_v42  ;;  %v1844_v13 = vadd.f32 %v1828_v30, %v9428_v41  ;;  %v7969_v42 = vpop.xlane.xlu1 %2560  ;;  %v9433_v52 = vld [vmem:[#allocation63_spill] sm:$0xff] }
 0x28e   :  { %v3312_v10 = vadd.f32 %v3273_v26, %v3272_v56  ;;  %v1851_v43 = vadd.f32 %v1835_v33, %v9429_v46  ;;  %v3052_v39 = vmul.f32 %v7638_v31, %v9430_v61  ;;  %v3286_v8 = vmax.f32 %v3254_v0, 0.0  ;;  %v1830_v56 = vld [vmem:[#allocation2 + $0x30] sm:$0xff]  ;;  %v1837_v26 = vld [vmem:[#allocation2 + $0x68] sm:$0xff]  ;;  %v9435_v0 = vld [vmem:[#allocation76_spill] sm:$0xff] }
 0x28f   :  { %v3287_v48 = vmax.f32 %v3255_v2, 0.0  ;;  %v3212_v59 = vadd.f32 %v3180_v12, %v3130_v16  ;;  %v3213_v11 = vadd.f32 %v3181_v23, %v3131_v38  ;;  %1861 = vst.msk [vmem:[#allocation2 + $0x20] sm:$0xff] %vm1856_vm4, %v1844_v13  ;;  %v3053_v40 = vmul.f32 %v7641_v20, %v9430_v61  ;;  %v9434_v23 = vld [vmem:[#allocation113_spill] sm:$0xff]  ;;  %v7977_v16 = vpop.xlane.xlu0 %2545 }
 0x290   :  { %3313 = vadd.xlane.f32.xlu0 %v3312_v10  ;;  %1868 = vst.msk [vmem:[#allocation2 + $0x58] sm:$0xff] %vm1856_vm4, %v1851_v43  ;;  %v3102_v18 = vmul.f32 %v7646_v34, %v9431_v55  ;;  %v3103_v24 = vmul.f32 %v7656_v32, %v9431_v55  ;;  %v3184_v35 = vmul.f32 %v7662_v21, %v9432_v1  ;;  %v1832_v61 = vld [vmem:[#allocation2 + $0x40] sm:$0xff]  ;;  %v1834_v55 = vld [vmem:[#allocation2 + $0x50] sm:$0xff] }
 0x291   :  { %v3333_v44 = vadd.f32 %v3287_v48, %v3286_v8  ;;  %v3244_v22 = vadd.f32 %v3212_v59, %v9433_v52  ;;  %v3245_v27 = vadd.f32 %v3213_v11, %v9433_v52  ;;  %v3185_v45 = vmul.f32 %v7674_v4, %v9432_v1 }
 0x292   :  { %v3134_v14 = vadd.f32 %v3102_v18, %v3052_v39  ;;  %v3135_v12 = vadd.f32 %v3103_v24, %v3053_v40  ;;  %v1846_v29 = vadd.f32 %v1830_v56, %v9434_v23  ;;  %v1853_v2 = vadd.f32 %v1837_v26, %v9435_v0  ;;  %v2203_v18 = vld [vmem:[#allocation2 + $0x8] sm:$0xff]  ;;  %v9438_v24 = vld [vmem:[#allocation139_spill] sm:$0xff]  ;;  %v9441_v23 = vld [vmem:[#allocation80_spill] sm:$0xff] }
 0x293   :  { %3334 = vadd.xlane.f32.xlu1 %v3333_v44  ;;  %v3276_v38 = vmax.f32 %v3244_v22, 0.0  ;;  %v3277_v30 = vmax.f32 %v3245_v27, 0.0  ;;  %v3056_v33 = vmul.f32 %v7638_v31, %v9097_v6  ;;  %v3057_v10 = vmul.f32 %v7641_v20, %v9097_v6  ;;  %v9436_v20 = vld [vmem:[#allocation138_spill] sm:$0xff]  ;;  %v2205_v27 = vld [vmem:[#allocation2 + $0x18] sm:$0xff]  ;;  %v8002_v26 = vpop.xlane.xlu0 %2551  ;;  %v9442_v0 = vld [vmem:[#allocation129_spill] sm:$0xff] }
 0x294   :  { %v3216_v41 = vadd.f32 %v3184_v35, %v3134_v14  ;;  %v3217_v13 = vadd.f32 %v3185_v45, %v3135_v12  ;;  %1863 = vst.msk [vmem:[#allocation2 + $0x30] sm:$0xff] %vm1856_vm4, %v1846_v29  ;;  %1870 = vst.msk [vmem:[#allocation2 + $0x68] sm:$0xff] %vm1856_vm4, %v1853_v2  ;;  %v3106_v46 = vmul.f32 %v7646_v34, %v9200_v50  ;;  %v1839_v34 = vld [vmem:[#allocation2 + $0x78] sm:$0xff]  ;;  %v1836_v35 = vld [vmem:[#allocation2 + $0x60] sm:$0xff] }
 0x295   :  { %v3107_v43 = vmul.f32 %v7656_v32, %v9200_v50  ;;  %v3318_v39 = vadd.f32 %v3277_v30, %v3276_v38  ;;  %v3188_v31 = vmul.f32 %v7662_v21, %v9201_v47  ;;  %v3189_v6 = vmul.f32 %v7674_v4, %v9201_v47  ;;  %v7996_v50 = vpop.xlane.xlu1 %2566  ;;  %v9437_v32 = vld [vmem:[#allocation14_spill] sm:$0xff]  ;;  %v9439_v4 = vld [vmem:[#allocation128_spill] sm:$0xff]  ;;  %v1838_v45 = vld [vmem:[#allocation2 + $0x70] sm:$0xff] }
 0x296   :  { %v1848_v8 = vadd.f32 %v1832_v61, %v9436_v20  ;;  %v3248_v48 = vadd.f32 %v3216_v41, %v6205_v58  ;;  %v3249_v59 = vadd.f32 %v3217_v13, %v6205_v58  ;;  %v3138_v11 = vadd.f32 %v3106_v46, %v3056_v33  ;;  %v2207_v56 = vld [vmem:[#allocation2 + $0x28] sm:$0xff]  ;;  %v9440_v14 = vld [vmem:[#allocation15_spill] sm:$0xff]  ;;  %v9443_v38 = vld [vmem:[#allocation81_spill] sm:$0xff] }
 0x297   :  { %v3139_v40 = vadd.f32 %v3107_v43, %v3057_v10  ;;  %3319 = vadd.xlane.f32.xlu0 %v3318_v39  ;;  %v1855_v21 = vadd.f32 %v1839_v34, %v9437_v32  ;;  %v1850_v47 = vadd.f32 %v1834_v55, %v9438_v24  ;;  %v2219_v1 = vadd.f32 %v2203_v18, %v9439_v4  ;;  %v2202_v33 = vld [vmem:[#allocation2] sm:$0xff]  ;;  %v2209_v10 = vld [vmem:[#allocation2 + $0x38] sm:$0xff]  ;;  %v9444_v43 = vld [vmem:[#allocation82_spill] sm:$0xff] }
 0x298   :  { %1865 = vst.msk [vmem:[#allocation2 + $0x40] sm:$0xff] %vm1856_vm4, %v1848_v8  ;;  %v3280_v44 = vmax.f32 %v3248_v48, 0.0  ;;  %v3281_v58 = vmax.f32 %v3249_v59, 0.0  ;;  %v3220_v52 = vadd.f32 %v3188_v31, %v3138_v11  ;;  %v1852_v12 = vadd.f32 %v1836_v35, %v9440_v14  ;;  %v2204_v39 = vld [vmem:[#allocation2 + $0x10] sm:$0xff]  ;;  %v2211_v31 = vld [vmem:[#allocation2 + $0x48] sm:$0xff]  ;;  %v2213_v59 = vld [vmem:[#allocation2 + $0x58] sm:$0xff] }
 0x299   :  { %v3221_v22 = vadd.f32 %v3189_v6, %v3139_v40  ;;  %1872 = vst.msk [vmem:[#allocation2 + $0x78] sm:$0xff] %vm1856_vm4, %v1855_v21  ;;  %1867 = vst.msk [vmem:[#allocation2 + $0x50] sm:$0xff] %vm1856_vm4, %v1850_v47  ;;  %v2221_v29 = vadd.f32 %v2205_v27, %v9441_v23  ;;  %v1854_v2 = vadd.f32 %v1838_v45, %v9442_v0  ;;  %v2206_v6 = vld [vmem:[#allocation2 + $0x20] sm:$0xff]  ;;  %v2573_v21 = vpop.xlane.xlu1 %2572 }
 0x29a   :  { %2236 = vst.msk [vmem:[#allocation2 + $0x8] sm:$0xff] %vm2234_vm5, %v2219_v1  ;;  %v2223_v30 = vadd.f32 %v2207_v56, %v9443_v38  ;;  %v3324_v41 = vadd.f32 %v3281_v58, %v3280_v44  ;;  %v3252_v13 = vadd.f32 %v3220_v52, %v9245_v62  ;;  %v2218_v61 = vadd.f32 %v2202_v33, %v9444_v43 }
 0x29b   :  { %v3253_v46 = vadd.f32 %v3221_v22, %v9245_v62  ;;  %1869 = vst.msk [vmem:[#allocation2 + $0x60] sm:$0xff] %vm1856_vm4, %v1852_v12  ;;  %1871 = vst.msk [vmem:[#allocation2 + $0x70] sm:$0xff] %vm1856_vm4, %v1854_v2  ;;  %v2225_v20 = vadd.f32 %v2209_v10, %v7716_v17  ;;  %v2220_v8 = vadd.f32 %v2204_v39, %v7727_v51  ;;  %v2208_v11 = vld [vmem:[#allocation2 + $0x30] sm:$0xff]  ;;  %v2215_v32 = vld [vmem:[#allocation2 + $0x68] sm:$0xff] }
 0x29c   :  { %2238 = vst.msk [vmem:[#allocation2 + $0x18] sm:$0xff] %vm2234_vm5, %v2221_v29  ;;  %2240 = vst.msk [vmem:[#allocation2 + $0x28] sm:$0xff] %vm2234_vm5, %v2223_v30  ;;  %v2227_v48 = vadd.f32 %v2211_v31, %v7745_v19  ;;  %v2222_v62 = vadd.f32 %v2206_v6, %v7756_v54  ;;  %3325 = vadd.xlane.f32.xlu0 %v3324_v41  ;;  %v3284_v40 = vmax.f32 %v3252_v13, 0.0  ;;  %v2558_v54 = vpop.xlane.xlu0 %2557 }
 0x29d   :  { %v3285_v34 = vmax.f32 %v3253_v46, 0.0  ;;  %2235 = vst.msk [vmem:[#allocation2] sm:$0xff] %vm2234_vm5, %v2218_v61  ;;  %v2229_v55 = vadd.f32 %v2213_v59, %v7772_v5  ;;  %v2224_v18 = vadd.f32 %v2208_v11, %v7784_v28  ;;  %2242 = vst.msk [vmem:[#allocation2 + $0x38] sm:$0xff] %vm2234_vm5, %v2225_v20  ;;  %v2231_v17 = vadd.f32 %v2215_v32, %v7801_v3  ;;  %v2579_v52 = vpop.xlane.xlu1 %2578 }
 0x29e   :  { %2237 = vst.msk [vmem:[#allocation2 + $0x10] sm:$0xff] %vm2234_vm5, %v2220_v8  ;;  %2244 = vst.msk [vmem:[#allocation2 + $0x48] sm:$0xff] %vm2234_vm5, %v2227_v48 }
 0x29f   :  { %2239 = vst.msk [vmem:[#allocation2 + $0x20] sm:$0xff] %vm2234_vm5, %v2222_v62  ;;  %v3330_v51 = vadd.f32 %v3285_v34, %v3284_v40  ;;  %2246 = vst.msk [vmem:[#allocation2 + $0x58] sm:$0xff] %vm2234_vm5, %v2229_v55  ;;  %v2210_v19 = vld [vmem:[#allocation2 + $0x40] sm:$0xff] }
 0x2a0   :  { %2241 = vst.msk [vmem:[#allocation2 + $0x30] sm:$0xff] %vm2234_vm5, %v2224_v18  ;;  %2248 = vst.msk [vmem:[#allocation2 + $0x68] sm:$0xff] %vm2234_vm5, %v2231_v17  ;;  %v2226_v5 = vadd.f32 %v2210_v19, %v7810_v7  ;;  %v2217_v28 = vld [vmem:[#allocation2 + $0x78] sm:$0xff]  ;;  %v2212_v24 = vld [vmem:[#allocation2 + $0x50] sm:$0xff]  ;;  %v2564_v23 = vpop.xlane.xlu0 %2563 }
 0x2a1   :  { %3331 = vadd.xlane.f32.xlu0 %v3330_v51  ;;  %v2581_v47 = vld [vmem:[#allocation2 + $0x8] sm:$0xff]  ;;  %v2233_v3 = vadd.f32 %v2217_v28, %v7828_v15  ;;  %v2228_v4 = vadd.f32 %v2212_v24, %v7839_v63 }
 0x2a2   :  { %2243 = vst.msk [vmem:[#allocation2 + $0x40] sm:$0xff] %vm2234_vm5, %v2226_v5  ;;  %v2597_v1 = vadd.f32 %v2581_v47, %v7857_v36  ;;  %v2214_v35 = vld [vmem:[#allocation2 + $0x60] sm:$0xff]  ;;  %v2216_v58 = vld [vmem:[#allocation2 + $0x70] sm:$0xff] }
 0x2a3   :  { %v2583_v44 = vld [vmem:[#allocation2 + $0x18] sm:$0xff]  ;;  %2250 = vst.msk [vmem:[#allocation2 + $0x78] sm:$0xff] %vm2234_vm5, %v2233_v3  ;;  %2245 = vst.msk [vmem:[#allocation2 + $0x50] sm:$0xff] %vm2234_vm5, %v2228_v4  ;;  %v2230_v7 = vadd.f32 %v2214_v35, %v7866_v60  ;;  %v2232_v15 = vadd.f32 %v2216_v58, %v7895_v25  ;;  %v2585_v27 = vld [vmem:[#allocation2 + $0x28] sm:$0xff] }
 0x2a4   :  { %2614 = vst.msk [vmem:[#allocation2 + $0x8] sm:$0xff] %vm2612_vm6, %v2597_v1  ;;  %v2599_v22 = vadd.f32 %v2583_v44, %v7884_v53  ;;  %v2580_v63 = vld [vmem:[#allocation2] sm:$0xff]  ;;  %v2601_v36 = vadd.f32 %v2585_v27, %v7913_v49  ;;  %v2587_v56 = vld [vmem:[#allocation2 + $0x38] sm:$0xff] }
 0x2a5   :  { %v2596_v45 = vadd.f32 %v2580_v63, %v7922_v9  ;;  %v2582_v14 = vld [vmem:[#allocation2 + $0x10] sm:$0xff]  ;;  %v2589_v12 = vld [vmem:[#allocation2 + $0x48] sm:$0xff]  ;;  %2247 = vst.msk [vmem:[#allocation2 + $0x60] sm:$0xff] %vm2234_vm5, %v2230_v7  ;;  %2249 = vst.msk [vmem:[#allocation2 + $0x70] sm:$0xff] %vm2234_vm5, %v2232_v15  ;;  %v2603_v60 = vadd.f32 %v2587_v56, %v7940_v37 }
 0x2a6   :  { %2616 = vst.msk [vmem:[#allocation2 + $0x18] sm:$0xff] %vm2612_vm6, %v2599_v22  ;;  %v2598_v53 = vadd.f32 %v2582_v14, %v7951_v57  ;;  %v2605_v25 = vadd.f32 %v2589_v12, %v7969_v42  ;;  %v2584_v29 = vld [vmem:[#allocation2 + $0x20] sm:$0xff]  ;;  %v2591_v49 = vld [vmem:[#allocation2 + $0x58] sm:$0xff]  ;;  %2618 = vst.msk [vmem:[#allocation2 + $0x28] sm:$0xff] %vm2612_vm6, %v2601_v36 }
 0x2a7   :  { %v2586_v0 = vld [vmem:[#allocation2 + $0x30] sm:$0xff]  ;;  %2613 = vst.msk [vmem:[#allocation2] sm:$0xff] %vm2612_vm6, %v2596_v45  ;;  %v2600_v9 = vadd.f32 %v2584_v29, %v7977_v16  ;;  %v2607_v2 = vadd.f32 %v2591_v49, %v7996_v50  ;;  %v2593_v30 = vld [vmem:[#allocation2 + $0x68] sm:$0xff]  ;;  %2620 = vst.msk [vmem:[#allocation2 + $0x38] sm:$0xff] %vm2612_vm6, %v2603_v60 }
 0x2a8   :  { %v2602_v38 = vadd.f32 %v2586_v0, %v8002_v26  ;;  %2615 = vst.msk [vmem:[#allocation2 + $0x10] sm:$0xff] %vm2612_vm6, %v2598_v53  ;;  %2622 = vst.msk [vmem:[#allocation2 + $0x48] sm:$0xff] %vm2612_vm6, %v2605_v25  ;;  %v2609_v37 = vadd.f32 %v2593_v30, %v2573_v21  ;;  %v2915_v42 = vpop.xlane.xlu1 %2914 }
 0x2a9   :  { %2617 = vst.msk [vmem:[#allocation2 + $0x20] sm:$0xff] %vm2612_vm6, %v2600_v9  ;;  %2624 = vst.msk [vmem:[#allocation2 + $0x58] sm:$0xff] %vm2612_vm6, %v2607_v2  ;;  %v2588_v57 = vld [vmem:[#allocation2 + $0x40] sm:$0xff]  ;;  %v2570_v10 = vpop.xlane.xlu0 %2569 }
 0x2aa   :  { %2619 = vst.msk [vmem:[#allocation2 + $0x30] sm:$0xff] %vm2612_vm6, %v2602_v38  ;;  %2626 = vst.msk [vmem:[#allocation2 + $0x68] sm:$0xff] %vm2612_vm6, %v2609_v37  ;;  %v2604_v16 = vadd.f32 %v2588_v57, %v2558_v54  ;;  %v2595_v50 = vld [vmem:[#allocation2 + $0x78] sm:$0xff]  ;;  %v2590_v26 = vld [vmem:[#allocation2 + $0x50] sm:$0xff] }
 0x2ab   :  { %v2959_v33 = vld [vmem:[#allocation2 + $0x8] sm:$0xff]  ;;  %v2611_v41 = vadd.f32 %v2595_v50, %v2579_v52  ;;  %v2606_v13 = vadd.f32 %v2590_v26, %v2564_v23 }
 0x2ac   :  { %2621 = vst.msk [vmem:[#allocation2 + $0x40] sm:$0xff] %vm2612_vm6, %v2604_v16  ;;  %v2975_v46 = vadd.f32 %v2959_v33, %v2915_v42  ;;  %v2592_v43 = vld [vmem:[#allocation2 + $0x60] sm:$0xff]  ;;  %v2594_v8 = vld [vmem:[#allocation2 + $0x70] sm:$0xff] }
 0x2ad   :  { %v2921_v61 = vpop.xlane.xlu1 %2920  ;;  %v2961_v39 = vld [vmem:[#allocation2 + $0x18] sm:$0xff]  ;;  %2628 = vst.msk [vmem:[#allocation2 + $0x78] sm:$0xff] %vm2612_vm6, %v2611_v41  ;;  %2623 = vst.msk [vmem:[#allocation2 + $0x50] sm:$0xff] %vm2612_vm6, %v2606_v13  ;;  %v2608_v31 = vadd.f32 %v2592_v43, %v2570_v10  ;;  %v2963_v59 = vld [vmem:[#allocation2 + $0x28] sm:$0xff] }
 0x2ae   :  { %2992 = vst.msk [vmem:[#allocation2 + $0x8] sm:$0xff] %vm2990_vm7, %v2975_v46  ;;  %v2977_v6 = vadd.f32 %v2961_v39, %v2921_v61  ;;  %v2958_v34 = vld [vmem:[#allocation2] sm:$0xff]  ;;  %v2965_v32 = vld [vmem:[#allocation2 + $0x38] sm:$0xff] }
 0x2af   :  { %2625 = vst.msk [vmem:[#allocation2 + $0x60] sm:$0xff] %vm2612_vm6, %v2608_v31  ;;  %v2960_v51 = vld [vmem:[#allocation2 + $0x10] sm:$0xff]  ;;  %v2967_v5 = vld [vmem:[#allocation2 + $0x48] sm:$0xff] }
 0x2b0   :  { %2994 = vst.msk [vmem:[#allocation2 + $0x18] sm:$0xff] %vm2990_vm7, %v2977_v6  ;;  %v2962_v47 = vld [vmem:[#allocation2 + $0x20] sm:$0xff]  ;;  %v2969_v1 = vld [vmem:[#allocation2 + $0x58] sm:$0xff] }
 0x2b1   :  { %v2576_v20 = vpop.xlane.xlu0 %2575  ;;  %v2964_v58 = vld [vmem:[#allocation2 + $0x30] sm:$0xff]  ;;  %v2971_v22 = vld [vmem:[#allocation2 + $0x68] sm:$0xff] }
 0x2b2   :  { %v2610_v48 = vadd.f32 %v2594_v8, %v2576_v20 }
 0x2b3   :  { %v2966_v63 = vld [vmem:[#allocation2 + $0x40] sm:$0xff] }
 0x2b4   :  { %2627 = vst.msk [vmem:[#allocation2 + $0x70] sm:$0xff] %vm2612_vm6, %v2610_v48  ;;  %v2973_v56 = vld [vmem:[#allocation2 + $0x78] sm:$0xff]  ;;  %v2968_v23 = vld [vmem:[#allocation2 + $0x50] sm:$0xff] }
 0x2b5   :  { %v3337_v25 = vld [vmem:[#allocation2 + $0x8] sm:$0xff] }
 0x2b6   :  { %v2927_v62 = vpop.xlane.xlu1 %2926  ;;  %v2970_v0 = vld [vmem:[#allocation2 + $0x60] sm:$0xff] }
 0x2b7   :  { %v2979_v11 = vadd.f32 %v2963_v59, %v2927_v62  ;;  %v3339_v38 = vld [vmem:[#allocation2 + $0x18] sm:$0xff] }
 0x2b9   :  { %2996 = vst.msk [vmem:[#allocation2 + $0x28] sm:$0xff] %vm2990_vm7, %v2979_v11  ;;  %v2912_v40 = vpop.xlane.xlu0 %2911 }
 0x2ba   :  { %v2974_v55 = vadd.f32 %v2958_v34, %v2912_v40 }
 0x2bb   :  { %v2972_v57 = vld [vmem:[#allocation2 + $0x70] sm:$0xff] }
 0x2bc   :  { %2991 = vst.msk [vmem:[#allocation2] sm:$0xff] %vm2990_vm7, %v2974_v55 }
 0x2bd   :  { %v2933_v18 = vpop.xlane.xlu1 %2932 }
 0x2be   :  { %v2981_v21 = vadd.f32 %v2965_v32, %v2933_v18 }
 0x2c0   :  { %2998 = vst.msk [vmem:[#allocation2 + $0x38] sm:$0xff] %vm2990_vm7, %v2981_v21  ;;  %v3341_v33 = vld [vmem:[#allocation2 + $0x28] sm:$0xff] }
 0x2c2   :  { %v2918_v17 = vpop.xlane.xlu0 %2917 }
 0x2c3   :  { %v2976_v19 = vadd.f32 %v2960_v51, %v2918_v17  ;;  %v3336_v13 = vld [vmem:[#allocation2] sm:$0xff] }
 0x2c5   :  { %2993 = vst.msk [vmem:[#allocation2 + $0x10] sm:$0xff] %vm2990_vm7, %v2976_v19  ;;  %v2939_v54 = vpop.xlane.xlu1 %2938 }
 0x2c6   :  { %v2983_v28 = vadd.f32 %v2967_v5, %v2939_v54 }
 0x2c7   :  { %v3343_v61 = vld [vmem:[#allocation2 + $0x38] sm:$0xff] }
 0x2c8   :  { %3000 = vst.msk [vmem:[#allocation2 + $0x48] sm:$0xff] %vm2990_vm7, %v2983_v28 }
 0x2c9   :  { %v2924_v24 = vpop.xlane.xlu0 %2923 }
 0x2ca   :  { %v2978_v3 = vadd.f32 %v2962_v47, %v2924_v24 }
 0x2cc   :  { %2995 = vst.msk [vmem:[#allocation2 + $0x20] sm:$0xff] %vm2990_vm7, %v2978_v3  ;;  %v3338_v6 = vld [vmem:[#allocation2 + $0x10] sm:$0xff] }
 0x2ce   :  { %v2945_v4 = vpop.xlane.xlu1 %2944 }
 0x2cf   :  { %v2985_v35 = vadd.f32 %v2969_v1, %v2945_v4  ;;  %v3345_v59 = vld [vmem:[#allocation2 + $0x48] sm:$0xff] }
 0x2d1   :  { %3002 = vst.msk [vmem:[#allocation2 + $0x58] sm:$0xff] %vm2990_vm7, %v2985_v35  ;;  %v2930_v44 = vpop.xlane.xlu0 %2929 }
 0x2d2   :  { %v2980_v52 = vadd.f32 %v2964_v58, %v2930_v44 }
 0x2d3   :  { %v3340_v18 = vld [vmem:[#allocation2 + $0x20] sm:$0xff] }
 0x2d4   :  { %2997 = vst.msk [vmem:[#allocation2 + $0x30] sm:$0xff] %vm2990_vm7, %v2980_v52 }
 0x2d5   :  { %v2951_v7 = vpop.xlane.xlu1 %2950 }
 0x2d6   :  { %v2987_v15 = vadd.f32 %v2971_v22, %v2951_v7 }
 0x2d8   :  { %3004 = vst.msk [vmem:[#allocation2 + $0x68] sm:$0xff] %vm2990_vm7, %v2987_v15  ;;  %v3347_v28 = vld [vmem:[#allocation2 + $0x58] sm:$0xff] }
 0x2da   :  { %v2936_v27 = vpop.xlane.xlu0 %2935 }
 0x2db   :  { %v2982_v36 = vadd.f32 %v2966_v63, %v2936_v27  ;;  %v3342_v4 = vld [vmem:[#allocation2 + $0x30] sm:$0xff] }
 0x2dd   :  { %2999 = vst.msk [vmem:[#allocation2 + $0x40] sm:$0xff] %vm2990_vm7, %v2982_v36  ;;  %v2957_v45 = vpop.xlane.xlu1 %2956 }
 0x2de   :  { %v2989_v14 = vadd.f32 %v2973_v56, %v2957_v45 }
 0x2df   :  { %v3349_v22 = vld [vmem:[#allocation2 + $0x68] sm:$0xff] }
 0x2e0   :  { %3006 = vst.msk [vmem:[#allocation2 + $0x78] sm:$0xff] %vm2990_vm7, %v2989_v14 }
 0x2e1   :  { %v2942_v12 = vpop.xlane.xlu0 %2941 }
 0x2e2   :  { %v2984_v60 = vadd.f32 %v2968_v23, %v2942_v12 }
 0x2e4   :  { %3001 = vst.msk [vmem:[#allocation2 + $0x50] sm:$0xff] %vm2990_vm7, %v2984_v60  ;;  %v3344_v45 = vld [vmem:[#allocation2 + $0x40] sm:$0xff] }
 0x2e7   :  { %v3351_v60 = vld [vmem:[#allocation2 + $0x78] sm:$0xff] }
 0x2eb   :  { %v3293_v53 = vpop.xlane.xlu1 %3292 }
 0x2ec   :  { %v3353_v29 = vadd.f32 %v3337_v25, %v3293_v53  ;;  %v2948_v49 = vpop.xlane.xlu0 %2947 }
 0x2ed   :  { %v2986_v9 = vadd.f32 %v2970_v0, %v2948_v49  ;;  %v3346_v0 = vld [vmem:[#allocation2 + $0x50] sm:$0xff] }
 0x2ee   :  { %3370 = vst.msk [vmem:[#allocation2 + $0x8] sm:$0xff] %vm3368_vm8, %v3353_v29 }
 0x2ef   :  { %3003 = vst.msk [vmem:[#allocation2 + $0x60] sm:$0xff] %vm2990_vm7, %v2986_v9  ;;  %v3299_v2 = vpop.xlane.xlu1 %3298 }
 0x2f0   :  { %v3355_v30 = vadd.f32 %v3339_v38, %v3299_v2 }
 0x2f2   :  { %3372 = vst.msk [vmem:[#allocation2 + $0x18] sm:$0xff] %vm3368_vm8, %v3355_v30 }
 0x2f4   :  { %v2954_v37 = vpop.xlane.xlu0 %2953 }
 0x2f5   :  { %v2988_v42 = vadd.f32 %v2972_v57, %v2954_v37  ;;  %v3406_v16 = vld [vmem:[#allocation2 + $0x8] sm:$0xff] }
 0x2f6   :  { %v8086_v50 = vmul.f32 0.00390625, %v3406_v16  ;;  %v3348_v37 = vld [vmem:[#allocation2 + $0x60] sm:$0xff] }
 0x2f7   :  { %3005 = vst.msk [vmem:[#allocation2 + $0x70] sm:$0xff] %vm2990_vm7, %v2988_v42 }
 0x2f8   :  { %3444 = vperm.xlu1 %4650, %v8086_v50  }
 0x2f9   :  { %v3305_v26 = vpop.xlane.xlu1 %3304  ;;  %v3408_v11 = vld [vmem:[#allocation2 + $0x18] sm:$0xff] }
 0x2fa   :  { %v3357_v10 = vadd.f32 %v3341_v33, %v3305_v26  ;;  %v8098_v34 = vmul.f32 0.00390625, %v3408_v11 }
 0x2fc   :  { %3374 = vst.msk [vmem:[#allocation2 + $0x28] sm:$0xff] %vm3368_vm8, %v3357_v10  ;;  %v3290_v41 = vpop.xlane.xlu0 %3289 }
 0x2fd   :  { %v3352_v46 = vadd.f32 %v3336_v13, %v3290_v41 }
 0x2fe   :  { %v3350_v33 = vld [vmem:[#allocation2 + $0x70] sm:$0xff] }
 0x2ff   :  { %3369 = vst.msk [vmem:[#allocation2] sm:$0xff] %vm3368_vm8, %v3352_v46  ;;  %v9445_v46 = vmov 1  }
 0x300   :  { %v3311_v43 = vpop.xlane.xlu1 %3310 }
 0x301   :  { %v3359_v39 = vadd.f32 %v3343_v61, %v3311_v43 }
 0x303   :  { %3376 = vst.msk [vmem:[#allocation2 + $0x38] sm:$0xff] %vm3368_vm8, %v3359_v39  ;;  %v3410_v32 = vld [vmem:[#allocation2 + $0x28] sm:$0xff] }
 0x304   :  { %v8102_v51 = vmul.f32 0.00390625, %v3410_v32  ;;  %v8210_v32 = vld [vmem:[%s8499_s3 + $0x10] sm:$0xff] }
 0x305   :  { %v3296_v31 = vpop.xlane.xlu0 %3295 }
 0x306   :  { %v3354_v20 = vadd.f32 %v3338_v6, %v3296_v31  ;;  %v3405_v8 = vld [vmem:[#allocation2] sm:$0xff]  ;;  %v9446_v6 = vmov 2  }
 0x307   :  { %v8093_v48 = vmul.f32 0.00390625, %v3405_v8 }
 0x308   :  { %3371 = vst.msk [vmem:[#allocation2 + $0x10] sm:$0xff] %vm3368_vm8, %v3354_v20  ;;  %v3317_v62 = vpop.xlane.xlu1 %3316  ;;  %v4702_v20 = vmov 3  }
 0x309   :  { %v3361_v40 = vadd.f32 %v3345_v59, %v3317_v62  ;;  %3439 = vperm.xlu0 %4649, %v8093_v48   ;;  %v8197_v62 = vld [vmem:[%s8499_s3] sm:$0xff]  ;;  %v4703_v59 = vmov 4  }
 0x30a   :  { %v3412_v54 = vld [vmem:[#allocation2 + $0x38] sm:$0xff] }
 0x30b   :  { %3378 = vst.msk [vmem:[#allocation2 + $0x48] sm:$0xff] %vm3368_vm8, %v3361_v40  ;;  %v8108_v47 = vmul.f32 0.00390625, %v3412_v54  ;;  %v8203_v40 = vld [vmem:[%s8499_s3 + $0x8] sm:$0xff] }
 0x30c   :  { %v3302_v55 = vpop.xlane.xlu0 %3301 }
 0x30d   :  { %v3356_v21 = vadd.f32 %v3340_v18, %v3302_v55  ;;  %3454 = vperm.xlu0 %4649, %v8098_v34  }
 0x30f   :  { %3373 = vst.msk [vmem:[#allocation2 + $0x20] sm:$0xff] %vm3368_vm8, %v3356_v21  ;;  %v3407_v17 = vld [vmem:[#allocation2 + $0x10] sm:$0xff] }
 0x310   :  { %v8104_v19 = vmul.f32 0.00390625, %v3407_v17 }
 0x311   :  { %v3323_v5 = vpop.xlane.xlu1 %3322  ;;  %3464 = vperm.xlu0 %4649, %v8102_v51  }
 0x312   :  { %v3363_v24 = vadd.f32 %v3347_v28, %v3323_v5  ;;  %3449 = vperm.xlu1 %4650, %v8104_v19   ;;  %v3414_v1 = vld [vmem:[#allocation2 + $0x48] sm:$0xff] }
 0x313   :  { %v8115_v52 = vmul.f32 0.00390625, %v3414_v1 }
 0x314   :  { %3380 = vst.msk [vmem:[#allocation2 + $0x58] sm:$0xff] %vm3368_vm8, %v3363_v24  ;;  %v3308_v3 = vpop.xlane.xlu0 %3307  ;;  %v8219_v24 = vld [vmem:[%s8499_s3 + $0x18] sm:$0xff] }
 0x315   :  { %v3358_v35 = vadd.f32 %v3342_v4, %v3308_v3  ;;  %3474 = vperm.xlu0 %4649, %v8108_v47  }
 0x316   :  { %v3409_v44 = vld [vmem:[#allocation2 + $0x20] sm:$0xff] }
 0x317   :  { %3375 = vst.msk [vmem:[#allocation2 + $0x30] sm:$0xff] %vm3368_vm8, %v3358_v35  ;;  %v8113_v58 = vmul.f32 0.00390625, %v3409_v44  ;;  %v8227_v35 = vld [vmem:[%s8499_s3 + $0x20] sm:$0xff] }
 0x318   :  { %v3329_v7 = vpop.xlane.xlu1 %3328 }
 0x319   :  { %v3365_v15 = vadd.f32 %v3349_v22, %v3329_v7  ;;  %3459 = vperm.xlu1 %4650, %v8113_v58   ;;  %3484 = vperm.xlu0 %4649, %v8115_v52  }
 0x31b   :  { %3382 = vst.msk [vmem:[#allocation2 + $0x68] sm:$0xff] %vm3368_vm8, %v3365_v15  ;;  %v3416_v27 = vld [vmem:[#allocation2 + $0x58] sm:$0xff] }
 0x31c   :  { %v8120_v63 = vmul.f32 0.00390625, %v3416_v27  ;;  %v8235_v27 = vld [vmem:[%s8499_s3 + $0x28] sm:$0xff] }
 0x31d   :  { %v3314_v36 = vpop.xlane.xlu0 %3313 }
 0x31e   :  { %v3360_v56 = vadd.f32 %v3344_v45, %v3314_v36  ;;  %v3411_v14 = vld [vmem:[#allocation2 + $0x30] sm:$0xff]  ;;  %3494 = vperm.xlu0 %4649, %v8120_v63  }
 0x31f   :  { %v8123_v12 = vmul.f32 0.00390625, %v3411_v14 }
 0x320   :  { %3377 = vst.msk [vmem:[#allocation2 + $0x40] sm:$0xff] %vm3368_vm8, %v3360_v56  ;;  %v3335_v23 = vpop.xlane.xlu1 %3334  ;;  %v8243_v56 = vld [vmem:[%s8499_s3 + $0x30] sm:$0xff] }
 0x321   :  { %v3367_v53 = vadd.f32 %v3351_v60, %v3335_v23  ;;  %3469 = vperm.xlu1 %4650, %v8123_v12  }
 0x322   :  { %v3418_v25 = vld [vmem:[#allocation2 + $0x68] sm:$0xff] }
 0x323   :  { %3384 = vst.msk [vmem:[#allocation2 + $0x78] sm:$0xff] %vm3368_vm8, %v3367_v53  ;;  %v8128_v29 = vmul.f32 0.00390625, %v3418_v25  ;;  %v8251_v25 = vld [vmem:[%s8499_s3 + $0x38] sm:$0xff] }
 0x324   :  { %v3320_v49 = vpop.xlane.xlu0 %3319 }
 0x325   :  { %v3362_v9 = vadd.f32 %v3346_v0, %v3320_v49  ;;  %3504 = vperm.xlu0 %4649, %v8128_v29  }
 0x327   :  { %3379 = vst.msk [vmem:[#allocation2 + $0x50] sm:$0xff] %vm3368_vm8, %v3362_v9  ;;  %v3413_v2 = vld [vmem:[#allocation2 + $0x40] sm:$0xff] }
 0x328   :  { %v8132_v38 = vmul.f32 0.00390625, %v3413_v2  ;;  %v8259_v2 = vld [vmem:[%s8499_s3 + $0x40] sm:$0xff] }
 0x329   :  { %v3326_v30 = vpop.xlane.xlu0 %3325 }
 0x32a   :  { %v3364_v57 = vadd.f32 %v3348_v37, %v3326_v30  ;;  %3479 = vperm.xlu1 %4650, %v8132_v38   ;;  %v3420_v42 = vld [vmem:[#allocation2 + $0x78] sm:$0xff] }
 0x32b   :  { %v8135_v16 = vmul.f32 0.00390625, %v3420_v42  ;;  %v8267_v42 = vld [vmem:[%s8499_s3 + $0x48] sm:$0xff] }
 0x32c   :  { %3381 = vst.msk [vmem:[#allocation2 + $0x60] sm:$0xff] %vm3368_vm8, %v3364_v57 }
 0x32d   :  { %3514 = vperm.xlu0 %4649, %v8135_v16  }
 0x32e   :  { %v3332_v26 = vpop.xlane.xlu0 %3331  ;;  %v3415_v41 = vld [vmem:[#allocation2 + $0x50] sm:$0xff] }
 0x32f   :  { %v3366_v10 = vadd.f32 %v3350_v33, %v3332_v26  ;;  %v8139_v13 = vmul.f32 0.00390625, %v3415_v41  ;;  %v4704_v41 = vmov 5  }
 0x331   :  { %3383 = vst.msk [vmem:[#allocation2 + $0x70] sm:$0xff] %vm3368_vm8, %v3366_v10  ;;  %3489 = vperm.xlu1 %4650, %v8139_v13   ;;  %4652 = vset.pattern.permute.xlu0 %v9445_v46 }
 0x332   :  { %3595 = vperm.xlu0 %4652, %v8086_v50  }
 0x333   :  { %v3417_v43 = vld [vmem:[#allocation2 + $0x60] sm:$0xff] }
 0x334   :  { %v8145_v61 = vmul.f32 0.00390625, %v3417_v43 }
 0x336   :  { %3499 = vperm.xlu1 %4650, %v8145_v61   ;;  %3610 = vperm.xlu0 %4652, %v8113_v58  }
 0x338   :  { %v3419_v39 = vld [vmem:[#allocation2 + $0x70] sm:$0xff] }
 0x339   :  { %v8149_v31 = vmul.f32 0.00390625, %v3419_v39 }
 0x33a   :  { %3620 = vperm.xlu0 %4652, %v8123_v12  }
 0x33b   :  { %3509 = vperm.xlu1 %4650, %v8149_v31  }
 0x33e   :  { %3630 = vperm.xlu0 %4652, %v8132_v38  }
 0x33f   :  { %4651 = vset.pattern.permute.xlu1 %v9445_v46  ;;  %v8275_v46 = vld [vmem:[%s8499_s3 + $0x50] sm:$0xff] }
 0x340   :  { %3590 = vperm.xlu1 %4651, %v8093_v48  }
 0x342   :  { %3640 = vperm.xlu0 %4652, %v8139_v13  }
 0x344   :  { %3600 = vperm.xlu1 %4651, %v8104_v19  }
 0x346   :  { %3650 = vperm.xlu0 %4652, %v8145_v61  }
 0x348   :  { %3605 = vperm.xlu1 %4651, %v8098_v34  }
 0x34a   :  { %3660 = vperm.xlu0 %4652, %v8149_v31  }
 0x34c   :  { %3615 = vperm.xlu1 %4651, %v8102_v51  }
 0x34e   :  { %4653 = vset.pattern.permute.xlu0 %v9446_v6 }
 0x34f   :  { %3741 = vperm.xlu0 %4653, %v8093_v48  }
 0x350   :  { %3625 = vperm.xlu1 %4651, %v8108_v47  }
 0x353   :  { %3756 = vperm.xlu0 %4653, %v8098_v34  }
 0x354   :  { %3635 = vperm.xlu1 %4651, %v8115_v52  }
 0x357   :  { %3766 = vperm.xlu0 %4653, %v8102_v51  }
 0x358   :  { %3645 = vperm.xlu1 %4651, %v8120_v63  }
 0x35b   :  { %3776 = vperm.xlu0 %4653, %v8108_v47  }
 0x35c   :  { %3655 = vperm.xlu1 %4651, %v8128_v29  }
 0x35f   :  { %3786 = vperm.xlu0 %4653, %v8115_v52  }
 0x360   :  { %3665 = vperm.xlu1 %4651, %v8135_v16  }
 0x363   :  { %3796 = vperm.xlu0 %4653, %v8120_v63  }
 0x364   :  { %4654 = vset.pattern.permute.xlu1 %v9446_v6  ;;  %v8281_v6 = vld [vmem:[%s8499_s3 + $0x58] sm:$0xff] }
 0x365   :  { %3746 = vperm.xlu1 %4654, %v8086_v50  }
 0x367   :  { %3806 = vperm.xlu0 %4653, %v8128_v29  }
 0x369   :  { %3751 = vperm.xlu1 %4654, %v8104_v19  }
 0x36b   :  { %3816 = vperm.xlu0 %4653, %v8135_v16  }
 0x36d   :  { %3761 = vperm.xlu1 %4654, %v8113_v58  }
 0x36f   :  { %4656 = vset.pattern.permute.xlu0 %v4702_v20 }
 0x370   :  { %3897 = vperm.xlu0 %4656, %v8086_v50  }
 0x371   :  { %3771 = vperm.xlu1 %4654, %v8123_v12  }
 0x374   :  { %3912 = vperm.xlu0 %4656, %v8113_v58  }
 0x375   :  { %3781 = vperm.xlu1 %4654, %v8132_v38  }
 0x377   :  { %v3445_v55 = vpop.permute.xlu1 %3444 }
 0x378   :  { %3922 = vperm.xlu0 %4656, %v8123_v12   ;;  %v3518_v21 = vmul.f32 %v3445_v55, %v8203_v40  ;;  %v8290_v55 = vld [vmem:[%s8499_s3 + $0x60] sm:$0xff] }
 0x379   :  { %3791 = vperm.xlu1 %4654, %v8139_v13  }
 0x37c   :  { %3932 = vperm.xlu0 %4656, %v8132_v38  }
 0x37d   :  { %3801 = vperm.xlu1 %4654, %v8145_v61  }
 0x380   :  { %3942 = vperm.xlu0 %4656, %v8139_v13  }
 0x381   :  { %3811 = vperm.xlu1 %4654, %v8149_v31  }
 0x384   :  { %3952 = vperm.xlu0 %4656, %v8145_v61  }
 0x385   :  { %4655 = vset.pattern.permute.xlu1 %v4702_v20 }
 0x386   :  { %3892 = vperm.xlu1 %4655, %v8093_v48  }
 0x388   :  { %3962 = vperm.xlu0 %4656, %v8149_v31   ;;  %v3440_v8 = vpop.permute.xlu0 %3439 }
 0x389   :  { %v3517_v18 = vmul.f32 %v3440_v8, %v8197_v62 }
 0x38a   :  { %3902 = vperm.xlu1 %4655, %v8104_v19  }
 0x38b   :  { %v3533_v5 = vadd.f32 %v3518_v21, %v3517_v18 }
 0x38c   :  { %4657 = vset.pattern.permute.xlu0 %v4703_v59  ;;  %v3455_v11 = vpop.permute.xlu0 %3454 }
 0x38d   :  { %4043 = vperm.xlu0 %4657, %v8093_v48   ;;  %v3520_v1 = vmul.f32 %v3455_v11, %v8219_v24 }
 0x38e   :  { %3907 = vperm.xlu1 %4655, %v8098_v34  }
 0x390   :  { %v3465_v17 = vpop.permute.xlu0 %3464 }
 0x391   :  { %4058 = vperm.xlu0 %4657, %v8098_v34   ;;  %v3450_v54 = vpop.permute.xlu1 %3449  ;;  %v3522_v45 = vmul.f32 %v3465_v17, %v8235_v27  ;;  %v8295_v17 = vld [vmem:[%s8499_s3 + $0x68] sm:$0xff] }
 0x392   :  { %3917 = vperm.xlu1 %4655, %v8102_v51   ;;  %v3519_v28 = vmul.f32 %v3450_v54, %v8210_v32 }
 0x394   :  { %v3534_v3 = vadd.f32 %v3533_v5, %v3519_v28  ;;  %v3475_v4 = vpop.permute.xlu0 %3474  ;;  %v8303_v28 = vld [vmem:[%s8499_s3 + $0x70] sm:$0xff] }
 0x395   :  { %4068 = vperm.xlu0 %4657, %v8102_v51   ;;  %v3524_v0 = vmul.f32 %v3475_v4, %v8251_v25 }
 0x396   :  { %3927 = vperm.xlu1 %4655, %v8108_v47   ;;  %v3535_v44 = vadd.f32 %v3534_v3, %v3520_v1 }
 0x398   :  { %v3460_v7 = vpop.permute.xlu1 %3459  ;;  %v3485_v15 = vpop.permute.xlu0 %3484 }
 0x399   :  { %v3521_v22 = vmul.f32 %v3460_v7, %v8227_v35  ;;  %4078 = vperm.xlu0 %4657, %v8108_v47   ;;  %v3526_v10 = vmul.f32 %v3485_v15, %v8267_v42 }
 0x39a   :  { %3937 = vperm.xlu1 %4655, %v8115_v52  }
 0x39b   :  { %v3536_v36 = vadd.f32 %v3535_v44, %v3521_v22  ;;  %v8309_v44 = vld [vmem:[%s8499_s3 + $0x78] sm:$0xff] }
 0x39d   :  { %4088 = vperm.xlu0 %4657, %v8115_v52   ;;  %v3537_v14 = vadd.f32 %v3536_v36, %v3522_v45  ;;  %v3495_v60 = vpop.permute.xlu0 %3494 }
 0x39e   :  { %3947 = vperm.xlu1 %4655, %v8120_v63   ;;  %v3528_v11 = vmul.f32 %v3495_v60, %v8281_v6 }
 0x3a0   :  { %v3470_v23 = vpop.permute.xlu1 %3469 }
 0x3a1   :  { %v3523_v53 = vmul.f32 %v3470_v23, %v8243_v56  ;;  %4098 = vperm.xlu0 %4657, %v8120_v63  }
 0x3a2   :  { %3957 = vperm.xlu1 %4655, %v8128_v29  }
 0x3a3   :  { %v3538_v49 = vadd.f32 %v3537_v14, %v3523_v53 }
 0x3a4   :  { %v3505_v9 = vpop.permute.xlu0 %3504 }
 0x3a5   :  { %4108 = vperm.xlu0 %4657, %v8128_v29   ;;  %v3539_v30 = vadd.f32 %v3538_v49, %v3524_v0  ;;  %v3530_v4 = vmul.f32 %v3505_v9, %v8295_v17 }
 0x3a6   :  { %3967 = vperm.xlu1 %4655, %v8135_v16  }
 0x3a9   :  { %v3480_v37 = vpop.permute.xlu1 %3479  ;;  %4118 = vperm.xlu0 %4657, %v8135_v16  }
 0x3aa   :  { %4658 = vset.pattern.permute.xlu1 %v4703_v59  ;;  %v3525_v57 = vmul.f32 %v3480_v37, %v8259_v2 }
 0x3ab   :  { %4048 = vperm.xlu1 %4658, %v8086_v50  }
 0x3ac   :  { %v3540_v26 = vadd.f32 %v3539_v30, %v3525_v57  ;;  %v3515_v33 = vpop.permute.xlu0 %3514 }
 0x3ad   :  { %4660 = vset.pattern.permute.xlu0 %v4704_v41  ;;  %v3532_v36 = vmul.f32 %v3515_v33, %v8309_v44 }
 0x3ae   :  { %4199 = vperm.xlu0 %4660, %v8086_v50   ;;  %v3541_v43 = vadd.f32 %v3540_v26, %v3526_v10 }
 0x3af   :  { %4053 = vperm.xlu1 %4658, %v8104_v19  }
 0x3b0   :  { %v3490_v39 = vpop.permute.xlu1 %3489 }
 0x3b1   :  { %v3527_v20 = vmul.f32 %v3490_v39, %v8275_v46  ;;  %v3596_v8 = vpop.permute.xlu0 %3595 }
 0x3b2   :  { %4214 = vperm.xlu0 %4660, %v8113_v58   ;;  %v3669_v49 = vmul.f32 %v3596_v8, %v8203_v40 }
 0x3b3   :  { %4063 = vperm.xlu1 %4658, %v8113_v58   ;;  %v3542_v59 = vadd.f32 %v3541_v43, %v3527_v20 }
 0x3b5   :  { %v3543_v18 = vadd.f32 %v3542_v59, %v3528_v11  ;;  %v3500_v21 = vpop.permute.xlu1 %3499  ;;  %v3611_v54 = vpop.permute.xlu0 %3610  ;;  %v8328_v59 = vld [vmem:[%s8500_s4] sm:$0x1]  ;;  %s4707_s4 = smov [#allocation3]  }
 0x3b6   :  { %v3529_v5 = vmul.f32 %v3500_v21, %v8290_v55  ;;  %4224 = vperm.xlu0 %4660, %v8123_v12   ;;  %s4619_s24 = sshll.u32 %s4707_s4, 4  ;;  %s4620_s24 = int_to_ptr.vmem [resolvable:$true] %s4619_s24 }
 0x3b7   :  { %4073 = vperm.xlu1 %4658, %v8123_v12   ;;  %s4674_s1 = scalar_lea.vmem %s4620_s24, 128  ;;  %p4679_p1 = scmp.lt.s32.totalorder %s4620_s24, %s4620_s24 }
 0x3b8   :  { %v3544_v3 = vadd.f32 %v3543_v18, %v3529_v5  ;;  %p4675_p0 = scmp.ne.s32.totalorder %s4620_s24, %s4674_s1  ;;  %p4680_p2 = scmp.lt.s32.totalorder %s4674_s1, %s4674_s1 }
 0x3b9   :  { %v3621_v7 = vpop.permute.xlu0 %3620 }
 0x3ba   :  { %v3510_v1 = vpop.permute.xlu1 %3509  ;;  %v3545_v22 = vadd.f32 %v3544_v3, %v3530_v4  ;;  %4234 = vperm.xlu0 %4660, %v8132_v38   ;;  %v4705_v3 = vmov 7   ;;  %p4681_p3 = por %p4680_p2, %p4679_p1 }
 0x3bb   :  { %v3531_v15 = vmul.f32 %v3510_v1, %v8303_v28  ;;  %4083 = vperm.xlu1 %4658, %v8132_v38  }
 0x3bc   :  { %p4682_p4 = pnand %p4681_p3, %p4675_p0 }
 0x3bd   :  { %v3546_v12 = vadd.f32 %v3545_v22, %v3531_v15  ;;  %v3631_v45 = vpop.permute.xlu0 %3630 }
 0x3be   :  { %4244 = vperm.xlu0 %4660, %v8139_v13  }
 0x3bf   :  { %v3547_v14 = vadd.f32 %v3546_v12, %v3532_v36  ;;  %4093 = vperm.xlu1 %4658, %v8139_v13   ;;  %v3591_v23 = vpop.permute.xlu1 %3590 }
 0x3c0   :  { %v3668_v53 = vmul.f32 %v3591_v23, %v8197_v62  ;;  %v3676_v23 = vmul.f32 %v3631_v45, %v8259_v2 }
 0x3c1   :  { %v3548_v60 = vrot.slane %v3547_v14, 4  ;;  %v3641_v0 = vpop.permute.xlu0 %3640 }
 0x3c2   :  { %4254 = vperm.xlu0 %4660, %v8145_v61   ;;  %v3684_v26 = vadd.f32 %v3669_v49, %v3668_v53 }
 0x3c3   :  { %v3549_v9 = vadd.f32 %v3548_v60, %v3547_v14  ;;  %4103 = vperm.xlu1 %4658, %v8145_v61   ;;  %v3601_v30 = vpop.permute.xlu1 %3600  ;;  %v3672_v61 = vmul.f32 %v3611_v54, %v8227_v35  ;;  %v3674_v54 = vmul.f32 %v3621_v7, %v8243_v56  ;;  %v3678_v7 = vmul.f32 %v3641_v0, %v8275_v46 }
 0x3c4   :  { %v3670_v37 = vmul.f32 %v3601_v30, %v8210_v32  ;;  %v4706_v0 = vmov 6  }
 0x3c5   :  { %v3550_v57 = vrot.slane %v3549_v9, 2  ;;  %v3651_v33 = vpop.permute.xlu0 %3650 }
 0x3c6   :  { %4264 = vperm.xlu0 %4660, %v8149_v31   ;;  %v3685_v39 = vadd.f32 %v3684_v26, %v3670_v37  ;;  %v3680_v45 = vmul.f32 %v3651_v33, %v8290_v55 }
 0x3c7   :  { %v3551_v10 = vadd.f32 %v3550_v57, %v3549_v9  ;;  %4113 = vperm.xlu1 %4658, %v8149_v31   ;;  %v3606_v43 = vpop.permute.xlu1 %3605 }
 0x3c8   :  { %v3671_v20 = vmul.f32 %v3606_v43, %v8219_v24 }
 0x3c9   :  { %v3552_v8 = vrot.slane %v3551_v10, 1  ;;  %v3661_v18 = vpop.permute.xlu0 %3660 }
 0x3ca   :  { %v3686_v11 = vadd.f32 %v3685_v39, %v3671_v20  ;;  %4663 = vset.pattern.permute.xlu0 %v4705_v3 }
 0x3cb   :  { %v3553_v21 = vadd.f32 %v3552_v8, %v3551_v10  ;;  %4659 = vset.pattern.permute.xlu1 %v4704_v41  ;;  %v3616_v5 = vpop.permute.xlu1 %3615  ;;  %4501 = vperm.xlu0 %4663, %v8086_v50  }
 0x3cc   :  { %v3673_v4 = vmul.f32 %v3616_v5, %v8235_v27  ;;  %v3687_v1 = vadd.f32 %v3686_v11, %v3672_v61  ;;  %4194 = vperm.xlu1 %4659, %v8093_v48   ;;  %v3682_v61 = vmul.f32 %v3661_v18, %v8303_v28 }
 0x3cd   :  { %v3554_v22 = vadd.f32 %v3553_v21, %v8328_v59 }
 0x3ce   :  { %v3688_v15 = vadd.f32 %v3687_v1, %v3673_v4  ;;  %v3742_v36 = vpop.permute.xlu0 %3741 }
 0x3cf   :  { %3555 = vst [vmem:[#allocation3] sm:$0x1] %v3554_v22  ;;  %v3626_v12 = vpop.permute.xlu1 %3625  ;;  %4521 = vperm.xlu0 %4663, %v8102_v51  }
 0x3d0   :  { %v3675_v41 = vmul.f32 %v3626_v12, %v8251_v25  ;;  %v3689_v14 = vadd.f32 %v3688_v15, %v3674_v54  ;;  %4204 = vperm.xlu1 %4659, %v8104_v19   ;;  %v3819_v15 = vmul.f32 %v3742_v36, %v8197_v62  ;;  %v4312_v36 = vld [vmem:[#allocation2 + $0x8] sm:$0xff] }
 0x3d2   :  { %v3690_v60 = vadd.f32 %v3689_v14, %v3675_v41  ;;  %v3757_v50 = vpop.permute.xlu0 %3756 }
 0x3d3   :  { %v3636_v53 = vpop.permute.xlu1 %3635  ;;  %4536 = vperm.xlu0 %4663, %v8132_v38  }
 0x3d4   :  { %v3677_v49 = vmul.f32 %v3636_v53, %v8267_v42  ;;  %v3691_v9 = vadd.f32 %v3690_v60, %v3676_v23  ;;  %4209 = vperm.xlu1 %4659, %v8098_v34  }
 0x3d6   :  { %v3692_v30 = vadd.f32 %v3691_v9, %v3677_v49  ;;  %v3767_v57 = vpop.permute.xlu0 %3766 }
 0x3d7   :  { %v3646_v37 = vpop.permute.xlu1 %3645  ;;  %4551 = vperm.xlu0 %4663, %v8120_v63  }
 0x3d8   :  { %v3679_v26 = vmul.f32 %v3646_v37, %v8281_v6  ;;  %v3693_v10 = vadd.f32 %v3692_v30, %v3678_v7  ;;  %4219 = vperm.xlu1 %4659, %v8102_v51   ;;  %v3824_v37 = vmul.f32 %v3767_v57, %v8235_v27 }
 0x3da   :  { %v3694_v43 = vadd.f32 %v3693_v10, %v3679_v26  ;;  %v3777_v20 = vpop.permute.xlu0 %3776 }
 0x3db   :  { %v3656_v39 = vpop.permute.xlu1 %3655  ;;  %4669 = vset.pattern.permute.xlu0 %v4706_v0 }
 0x3dc   :  { %v3681_v8 = vmul.f32 %v3656_v39, %v8295_v17  ;;  %v3695_v38 = vadd.f32 %v3694_v43, %v3680_v45  ;;  %4229 = vperm.xlu1 %4659, %v8108_v47   ;;  %4345 = vperm.xlu0 %4669, %v8093_v48  }
 0x3de   :  { %v3696_v51 = vadd.f32 %v3695_v38, %v3681_v8  ;;  %v3787_v21 = vpop.permute.xlu0 %3786 }
 0x3df   :  { %v3666_v11 = vpop.permute.xlu1 %3665 }
 0x3e0   :  { %v3683_v33 = vmul.f32 %v3666_v11, %v8309_v44  ;;  %v3697_v5 = vadd.f32 %v3696_v51, %v3682_v61  ;;  %4239 = vperm.xlu1 %4659, %v8115_v52   ;;  %4360 = vperm.xlu0 %4669, %v8098_v34   ;;  %v4462_v51 = vld [vmem:[#allocation2] sm:$0xff]  ;;  %v3828_v11 = vmul.f32 %v3787_v21, %v8267_v42 }
 0x3e2   :  { %v3698_v4 = vadd.f32 %v3697_v5, %v3683_v33  ;;  %v3797_v1 = vpop.permute.xlu0 %3796  ;;  %v4478_v5 = vmul.f32 0.00390625, %v4462_v51 }
 0x3e4   :  { %v3699_v22 = vrot.slane %v3698_v4, 4  ;;  %4249 = vperm.xlu1 %4659, %v8120_v63   ;;  %v3747_v54 = vpop.permute.xlu1 %3746  ;;  %4365 = vperm.xlu0 %4669, %v8113_v58   ;;  %v3822_v63 = vmul.f32 %v3757_v50, %v8219_v24 }
 0x3e5   :  { %v3820_v48 = vmul.f32 %v3747_v54, %v8203_v40  ;;  %v4464_v54 = vld [vmem:[#allocation2 + $0x10] sm:$0xff] }
 0x3e6   :  { %v3700_v18 = vadd.f32 %v3699_v22, %v3698_v4  ;;  %v3807_v12 = vpop.permute.xlu0 %3806 }
 0x3e7   :  { %v3835_v14 = vadd.f32 %v3820_v48, %v3819_v15  ;;  %v4480_v15 = vmul.f32 0.00390625, %v4464_v54 }
 0x3e8   :  { %v3701_v41 = vrot.slane %v3700_v18, 2  ;;  %4259 = vperm.xlu1 %4659, %v8128_v29   ;;  %v3752_v52 = vpop.permute.xlu1 %3751  ;;  %4380 = vperm.xlu0 %4669, %v8108_v47   ;;  %v4328_v47 = vmul.f32 0.00390625, %v4312_v36 }
 0x3e9   :  { %v3821_v34 = vmul.f32 %v3752_v52, %v8210_v32  ;;  %v4465_v52 = vld [vmem:[#allocation2 + $0x18] sm:$0xff] }
 0x3ea   :  { %v3702_v23 = vadd.f32 %v3701_v41, %v3700_v18  ;;  %v3817_v53 = vpop.permute.xlu0 %3816 }
 0x3eb   :  { %v3836_v60 = vadd.f32 %v3835_v14, %v3821_v34  ;;  %v3832_v14 = vmul.f32 %v3807_v12, %v8295_v17 }
 0x3ec   :  { %v3703_v49 = vrot.slane %v3702_v23, 1  ;;  %4269 = vperm.xlu1 %4659, %v8135_v16   ;;  %v3762_v58 = vpop.permute.xlu1 %3761  ;;  %4395 = vperm.xlu0 %4669, %v8139_v13   ;;  %v3826_v13 = vmul.f32 %v3777_v20, %v8251_v25 }
 0x3ed   :  { %v3823_v9 = vmul.f32 %v3762_v58, %v8227_v35  ;;  %v3837_v7 = vadd.f32 %v3836_v60, %v3822_v63  ;;  %v4481_v63 = vmul.f32 0.00390625, %v4465_v52  ;;  %v4466_v58 = vld [vmem:[#allocation2 + $0x20] sm:$0xff] }
 0x3ee   :  { %v3704_v30 = vadd.f32 %v3703_v49, %v3702_v23 }
 0x3ef   :  { %v3838_v26 = vadd.f32 %v3837_v7, %v3823_v9  ;;  %v3898_v45 = vpop.permute.xlu0 %3897  ;;  %v4482_v7 = vmul.f32 0.00390625, %v4466_v58  ;;  %v4319_v58 = vld [vmem:[#allocation2 + $0x40] sm:$0xff] }
 0x3f0   :  { %v3705_v10 = vadd.f32 %v3704_v30, %v8328_v59  ;;  %4661 = vset.pattern.permute.xlu1 %v4706_v0  ;;  %v3772_v50 = vpop.permute.xlu1 %3771  ;;  %4410 = vperm.xlu0 %4669, %v8128_v29  }
 0x3f1   :  { %v3825_v16 = vmul.f32 %v3772_v50, %v8243_v56  ;;  %v3839_v43 = vadd.f32 %v3838_v26, %v3824_v37  ;;  %4350 = vperm.xlu1 %4661, %v4328_v47   ;;  %v4316_v26 = vld [vmem:[#allocation2 + $0x28] sm:$0xff] }
 0x3f2   :  { %3706 = vst [vmem:[#allocation3 + $0x1] sm:$0x1] %v3705_v10 }
 0x3f3   :  { %v3840_v39 = vadd.f32 %v3839_v43, %v3825_v16  ;;  %v8375_v57 = vpop.permute.xlu0 %3912  ;;  %v4332_v43 = vmul.f32 0.00390625, %v4316_v26 }
 0x3f4   :  { %v3782_v8 = vpop.permute.xlu1 %3781  ;;  %4672 = vset.pattern.permute.xlu0 %v4705_v3 }
 0x3f5   :  { %v3827_v38 = vmul.f32 %v3782_v8, %v8259_v2  ;;  %v3841_v61 = vadd.f32 %v3840_v39, %v3826_v13  ;;  %4355 = vperm.xlu1 %4661, %v8104_v19   ;;  %4566 = vperm.xlu0 %4672, %v8149_v31   ;;  %v3830_v19 = vmul.f32 %v3797_v1, %v8281_v6 }
 0x3f6   :  { %v3834_v1 = vmul.f32 %v3817_v53, %v8309_v44  ;;  %v3971_v13 = vmul.f32 %v3898_v45, %v8203_v40  ;;  %v4317_v53 = vld [vmem:[#allocation2 + $0x30] sm:$0xff]  ;;  %v3974_v45 = vmul.f32 %v8375_v57, %v8227_v35 }
 0x3f7   :  { %v3842_v29 = vadd.f32 %v3841_v61, %v3827_v38  ;;  %v3923_v20 = vpop.permute.xlu0 %3922 }
 0x3f8   :  { %v3792_v33 = vpop.permute.xlu1 %3791  ;;  %v3976_v52 = vmul.f32 %v3923_v20, %v8243_v56 }
 0x3f9   :  { %v3829_v4 = vmul.f32 %v3792_v33, %v8275_v46  ;;  %v3843_v22 = vadd.f32 %v3842_v29, %v3828_v11  ;;  %4662 = vset.pattern.permute.xlu1 %v4705_v3  ;;  %v4333_v11 = vmul.f32 0.00390625, %v4317_v53 }
 0x3fa   :  { %4496 = vperm.xlu1 %4662, %v4478_v5  }
 0x3fb   :  { %v3844_v48 = vadd.f32 %v3843_v22, %v3829_v4  ;;  %v3933_v41 = vpop.permute.xlu0 %3932 }
 0x3fc   :  { %v3802_v18 = vpop.permute.xlu1 %3801 }
 0x3fd   :  { %v3831_v31 = vmul.f32 %v3802_v18, %v8290_v55  ;;  %v3845_v21 = vadd.f32 %v3844_v48, %v3830_v19 }
 0x3fe   :  { %4506 = vperm.xlu1 %4662, %v4480_v15  }
 0x3ff   :  { %v3846_v34 = vadd.f32 %v3845_v21, %v3831_v31  ;;  %v3943_v36 = vpop.permute.xlu0 %3942  ;;  %v4469_v31 = vld [vmem:[#allocation2 + $0x38] sm:$0xff] }
 0x400   :  { %v3812_v23 = vpop.permute.xlu1 %3811  ;;  %v3980_v20 = vmul.f32 %v3943_v36, %v8275_v46 }
 0x401   :  { %v3833_v60 = vmul.f32 %v3812_v23, %v8303_v28  ;;  %v3847_v49 = vadd.f32 %v3846_v34, %v3832_v14 }
 0x402   :  { %4511 = vperm.xlu1 %4662, %v4481_v63   ;;  %v4485_v63 = vmul.f32 0.00390625, %v4469_v31 }
 0x403   :  { %v3848_v9 = vadd.f32 %v3847_v49, %v3833_v60  ;;  %v3953_v10 = vpop.permute.xlu0 %3952  ;;  %v3978_v60 = vmul.f32 %v3933_v41, %v8259_v2 }
 0x405   :  { %v3849_v30 = vadd.f32 %v3848_v9, %v3834_v1  ;;  %v3893_v37 = vpop.permute.xlu1 %3892 }
 0x406   :  { %4516 = vperm.xlu1 %4662, %v4482_v7   ;;  %v3970_v12 = vmul.f32 %v3893_v37, %v8197_v62  ;;  %v4335_v37 = vmul.f32 0.00390625, %v4319_v58 }
 0x407   :  { %v3850_v47 = vrot.slane %v3849_v30, 4  ;;  %v3963_v29 = vpop.permute.xlu0 %3962 }
 0x408   :  { %v3986_v38 = vadd.f32 %v3971_v13, %v3970_v12  ;;  %v3982_v13 = vmul.f32 %v3953_v10, %v8290_v55  ;;  %v3984_v36 = vmul.f32 %v3963_v29, %v8303_v28 }
 0x409   :  { %v3851_v50 = vadd.f32 %v3850_v47, %v3849_v30  ;;  %v3903_v16 = vpop.permute.xlu1 %3902  ;;  %v4320_v47 = vld [vmem:[#allocation2 + $0x48] sm:$0xff] }
 0x40a   :  { %v3972_v39 = vmul.f32 %v3903_v16, %v8210_v32  ;;  %4664 = vset.pattern.permute.xlu1 %v4706_v0  ;;  %v4336_v16 = vmul.f32 0.00390625, %v4320_v47 }
 0x40b   :  { %v3852_v8 = vrot.slane %v3851_v50, 2  ;;  %4370 = vperm.xlu1 %4664, %v4332_v43  }
 0x40c   :  { %v3987_v33 = vadd.f32 %v3986_v38, %v3972_v39  ;;  %v4044_v21 = vpop.permute.xlu0 %4043 }
 0x40d   :  { %v3853_v61 = vadd.f32 %v3852_v8, %v3851_v50  ;;  %v3908_v51 = vpop.permute.xlu1 %3907 }
 0x40e   :  { %v3973_v5 = vmul.f32 %v3908_v51, %v8219_v24 }
 0x40f   :  { %v3854_v4 = vrot.slane %v3853_v61, 1  ;;  %4375 = vperm.xlu1 %4664, %v4333_v11  }
 0x410   :  { %v3988_v22 = vadd.f32 %v3987_v33, %v3973_v5  ;;  %v4059_v9 = vpop.permute.xlu0 %4058  ;;  %v4472_v33 = vld [vmem:[#allocation2 + $0x50] sm:$0xff] }
 0x411   :  { %v3855_v54 = vadd.f32 %v3854_v4, %v3853_v61  ;;  %v3918_v19 = vpop.permute.xlu1 %3917  ;;  %v4488_v10 = vmul.f32 0.00390625, %v4472_v33 }
 0x412   :  { %v3975_v48 = vmul.f32 %v3918_v19, %v8235_v27  ;;  %v3989_v18 = vadd.f32 %v3988_v22, %v3974_v45  ;;  %v4322_v19 = vld [vmem:[#allocation2 + $0x58] sm:$0xff] }
 0x413   :  { %v3856_v15 = vadd.f32 %v3855_v54, %v8328_v59  ;;  %4665 = vset.pattern.permute.xlu1 %v4705_v3  ;;  %v4338_v31 = vmul.f32 0.00390625, %v4322_v19 }
 0x414   :  { %v3990_v14 = vadd.f32 %v3989_v18, %v3975_v48  ;;  %4526 = vperm.xlu1 %4665, %v4333_v11   ;;  %v4069_v43 = vpop.permute.xlu0 %4068 }
 0x415   :  { %3857 = vst [vmem:[#allocation3 + $0x2] sm:$0x1] %v3856_v15  ;;  %v3928_v34 = vpop.permute.xlu1 %3927  ;;  %v4121_v15 = vmul.f32 %v4044_v21, %v8197_v62 }
 0x416   :  { %v3977_v57 = vmul.f32 %v3928_v34, %v8251_v25  ;;  %v3991_v23 = vadd.f32 %v3990_v14, %v3976_v52  ;;  %v4323_v34 = vld [vmem:[#allocation2 + $0x60] sm:$0xff] }
 0x418   :  { %v3992_v49 = vadd.f32 %v3991_v23, %v3977_v57  ;;  %4531 = vperm.xlu1 %4665, %v4485_v63   ;;  %v4079_v11 = vpop.permute.xlu0 %4078 }
 0x419   :  { %v3938_v1 = vpop.permute.xlu1 %3937 }
 0x41a   :  { %v3979_v7 = vmul.f32 %v3938_v1, %v8267_v42  ;;  %v3993_v30 = vadd.f32 %v3992_v49, %v3978_v60  ;;  %v4124_v60 = vmul.f32 %v4059_v9, %v8219_v24  ;;  %v4339_v1 = vmul.f32 0.00390625, %v4323_v34 }
 0x41c   :  { %v3994_v26 = vadd.f32 %v3993_v30, %v3979_v7  ;;  %4666 = vset.pattern.permute.xlu1 %v4706_v0  ;;  %v4089_v18 = vpop.permute.xlu0 %4088 }
 0x41d   :  { %4385 = vperm.xlu1 %4666, %v4335_v37   ;;  %v3948_v12 = vpop.permute.xlu1 %3947 }
 0x41e   :  { %v3981_v50 = vmul.f32 %v3948_v12, %v8281_v6  ;;  %v3995_v41 = vadd.f32 %v3994_v26, %v3980_v20  ;;  %v4126_v26 = vmul.f32 %v4069_v43, %v8235_v27 }
 0x420   :  { %v3996_v39 = vadd.f32 %v3995_v41, %v3981_v50  ;;  %v4099_v58 = vpop.permute.xlu0 %4098 }
 0x421   :  { %4390 = vperm.xlu1 %4666, %v4336_v16   ;;  %v3958_v53 = vpop.permute.xlu1 %3957 }
 0x422   :  { %v3983_v8 = vmul.f32 %v3958_v53, %v8295_v17  ;;  %v3997_v38 = vadd.f32 %v3996_v39, %v3982_v13  ;;  %v4475_v13 = vld [vmem:[#allocation2 + $0x68] sm:$0xff]  ;;  %v4128_v39 = vmul.f32 %v4079_v11, %v8251_v25  ;;  %v4326_v11 = vld [vmem:[#allocation2 + $0x78] sm:$0xff] }
 0x424   :  { %v3998_v61 = vadd.f32 %v3997_v38, %v3983_v8  ;;  %v4109_v41 = vpop.permute.xlu0 %4108  ;;  %v4491_v38 = vmul.f32 0.00390625, %v4475_v13 }
 0x425   :  { %4667 = vset.pattern.permute.xlu1 %v4705_v3  ;;  %v3968_v51 = vpop.permute.xlu1 %3967 }
 0x426   :  { %v3985_v5 = vmul.f32 %v3968_v51, %v8309_v44  ;;  %v3999_v4 = vadd.f32 %v3998_v61, %v3984_v36  ;;  %4541 = vperm.xlu1 %4667, %v4336_v16   ;;  %v4325_v61 = vld [vmem:[#allocation2 + $0x70] sm:$0xff]  ;;  %v4130_v51 = vmul.f32 %v4089_v18, %v8267_v42  ;;  %v4342_v18 = vmul.f32 0.00390625, %v4326_v11 }
 0x428   :  { %v4000_v45 = vadd.f32 %v3999_v4, %v3985_v5  ;;  %v4119_v33 = vpop.permute.xlu0 %4118 }
 0x42a   :  { %v4001_v22 = vrot.slane %v4000_v45, 4  ;;  %4546 = vperm.xlu1 %4667, %v4488_v10   ;;  %v4049_v54 = vpop.permute.xlu1 %4048 }
 0x42b   :  { %v4122_v48 = vmul.f32 %v4049_v54, %v8203_v40  ;;  %v4132_v54 = vmul.f32 %v4099_v58, %v8281_v6 }
 0x42c   :  { %v4002_v29 = vadd.f32 %v4001_v22, %v4000_v45  ;;  %v4341_v22 = vmul.f32 0.00390625, %v4325_v61 }
 0x42d   :  { %v4137_v57 = vadd.f32 %v4122_v48, %v4121_v15 }
 0x42e   :  { %v4003_v52 = vrot.slane %v4002_v29, 2  ;;  %4668 = vset.pattern.permute.xlu1 %v4706_v0  ;;  %v4054_v14 = vpop.permute.xlu1 %4053 }
 0x42f   :  { %v4123_v23 = vmul.f32 %v4054_v14, %v8210_v32  ;;  %4400 = vperm.xlu1 %4668, %v4338_v31  }
 0x430   :  { %v4004_v63 = vadd.f32 %v4003_v52, %v4002_v29  ;;  %v4200_v29 = vpop.permute.xlu0 %4199  ;;  %v4134_v52 = vmul.f32 %v4109_v41, %v8295_v17 }
 0x431   :  { %v4138_v49 = vadd.f32 %v4137_v57, %v4123_v23 }
 0x432   :  { %v4005_v7 = vrot.slane %v4004_v63, 1  ;;  %v4064_v30 = vpop.permute.xlu1 %4063 }
 0x433   :  { %v4125_v21 = vmul.f32 %v4064_v30, %v8227_v35  ;;  %v4139_v37 = vadd.f32 %v4138_v49, %v4124_v60  ;;  %4405 = vperm.xlu1 %4668, %v4339_v1  }
 0x434   :  { %v4006_v20 = vadd.f32 %v4005_v7, %v4004_v63  ;;  %v4215_v63 = vpop.permute.xlu0 %4214 }
 0x435   :  { %v4140_v47 = vadd.f32 %v4139_v37, %v4125_v21 }
 0x436   :  { %v4007_v12 = vadd.f32 %v4006_v20, %v8328_v59  ;;  %v4074_v50 = vpop.permute.xlu1 %4073  ;;  %v4273_v20 = vmul.f32 %v4200_v29, %v8203_v40 }
 0x437   :  { %v4127_v16 = vmul.f32 %v4074_v50, %v8243_v56  ;;  %v4141_v9 = vadd.f32 %v4140_v47, %v4126_v26  ;;  %4670 = vset.pattern.permute.xlu1 %v4705_v3 }
 0x438   :  { %4008 = vst [vmem:[#allocation3 + $0x3] sm:$0x1] %v4007_v12  ;;  %4556 = vperm.xlu1 %4670, %v4339_v1   ;;  %v4225_v30 = vpop.permute.xlu0 %4224 }
 0x439   :  { %v4142_v53 = vadd.f32 %v4141_v9, %v4127_v16 }
 0x43a   :  { %v4084_v8 = vpop.permute.xlu1 %4083 }
 0x43b   :  { %v4129_v43 = vmul.f32 %v4084_v8, %v8259_v2  ;;  %v4143_v36 = vadd.f32 %v4142_v53, %v4128_v39  ;;  %v4276_v39 = vmul.f32 %v4215_v63, %v8227_v35 }
 0x43c   :  { %4561 = vperm.xlu1 %4670, %v4491_v38   ;;  %v4235_v13 = vpop.permute.xlu0 %4234 }
 0x43d   :  { %v4144_v5 = vadd.f32 %v4143_v36, %v4129_v43 }
 0x43e   :  { %v4094_v4 = vpop.permute.xlu1 %4093 }
 0x43f   :  { %v4131_v45 = vmul.f32 %v4094_v4, %v8275_v46  ;;  %v4145_v10 = vadd.f32 %v4144_v5, %v4130_v51  ;;  %v4278_v51 = vmul.f32 %v4225_v30, %v8243_v56 }
 0x440   :  { %4671 = vset.pattern.permute.xlu1 %v4706_v0  ;;  %v4136_v0 = vmul.f32 %v4119_v33, %v8309_v44  ;;  %v4245_v5 = vpop.permute.xlu0 %4244 }
 0x441   :  { %v4146_v19 = vadd.f32 %v4145_v10, %v4131_v45  ;;  %4415 = vperm.xlu1 %4671, %v4341_v22   ;;  %v4280_v22 = vmul.f32 %v4235_v13, %v8259_v2 }
 0x442   :  { %v4104_v48 = vpop.permute.xlu1 %4103 }
 0x443   :  { %v4133_v15 = vmul.f32 %v4104_v48, %v8290_v55  ;;  %v4147_v31 = vadd.f32 %v4146_v19, %v4132_v54 }
 0x444   :  { %v4255_v29 = vpop.permute.xlu0 %4254 }
 0x445   :  { %v4148_v14 = vadd.f32 %v4147_v31, %v4133_v15  ;;  %4420 = vperm.xlu1 %4671, %v4342_v18   ;;  %v4282_v15 = vmul.f32 %v4245_v5, %v8275_v46 }
 0x446   :  { %v4114_v34 = vpop.permute.xlu1 %4113 }
 0x447   :  { %v4135_v57 = vmul.f32 %v4114_v34, %v8303_v28  ;;  %v4149_v23 = vadd.f32 %v4148_v14, %v4134_v52  ;;  %v4284_v34 = vmul.f32 %v4255_v29, %v8290_v55 }
 0x449   :  { %v4150_v60 = vadd.f32 %v4149_v23, %v4135_v57  ;;  %4673 = vset.pattern.permute.xlu1 %v4705_v3  ;;  %v4265_v23 = vpop.permute.xlu0 %4264 }
 0x44a   :  { %4571 = vperm.xlu1 %4673, %v4342_v18  }
 0x44b   :  { %v4151_v49 = vadd.f32 %v4150_v60, %v4136_v0  ;;  %v4195_v58 = vpop.permute.xlu1 %4194 }
 0x44c   :  { %v4272_v7 = vmul.f32 %v4195_v58, %v8197_v62 }
 0x44d   :  { %v4152_v1 = vrot.slane %v4151_v49, 4 }
 0x44e   :  { %v4288_v12 = vadd.f32 %v4273_v20, %v4272_v7 }
 0x44f   :  { %v4153_v21 = vadd.f32 %v4152_v1, %v4151_v49  ;;  %v4205_v37 = vpop.permute.xlu1 %4204  ;;  %v4286_v49 = vmul.f32 %v4265_v23, %v8303_v28 }
 0x450   :  { %v4274_v26 = vmul.f32 %v4205_v37, %v8210_v32 }
 0x451   :  { %v4154_v47 = vrot.slane %v4153_v21, 2 }
 0x452   :  { %v4289_v16 = vadd.f32 %v4288_v12, %v4274_v26 }
 0x453   :  { %v4155_v50 = vadd.f32 %v4154_v47, %v4153_v21  ;;  %v4210_v41 = vpop.permute.xlu1 %4209 }
 0x454   :  { %v4275_v3 = vmul.f32 %v4210_v41, %v8219_v24 }
 0x455   :  { %v4156_v9 = vrot.slane %v4155_v50, 1 }
 0x456   :  { %v4290_v53 = vadd.f32 %v4289_v16, %v4275_v3 }
 0x457   :  { %v4157_v8 = vadd.f32 %v4156_v9, %v4155_v50  ;;  %v4220_v38 = vpop.permute.xlu1 %4219 }
 0x458   :  { %v4277_v43 = vmul.f32 %v4220_v38, %v8235_v27  ;;  %v4291_v36 = vadd.f32 %v4290_v53, %v4276_v39  ;;  %v4502_v53 = vpop.permute.xlu0 %4501 }
 0x459   :  { %v4158_v61 = vadd.f32 %v4157_v8, %v8328_v59 }
 0x45a   :  { %v4292_v33 = vadd.f32 %v4291_v36, %v4277_v43 }
 0x45b   :  { %4159 = vst [vmem:[#allocation3 + $0x4] sm:$0x1] %v4158_v61  ;;  %v4230_v4 = vpop.permute.xlu1 %4229 }
 0x45c   :  { %v4279_v45 = vmul.f32 %v4230_v4, %v8251_v25  ;;  %v4293_v10 = vadd.f32 %v4292_v33, %v4278_v51  ;;  %v4522_v38 = vpop.permute.xlu0 %4521 }
 0x45e   :  { %v4294_v11 = vadd.f32 %v4293_v10, %v4279_v45 }
 0x45f   :  { %v4240_v54 = vpop.permute.xlu1 %4239 }
 0x460   :  { %v4281_v19 = vmul.f32 %v4240_v54, %v8267_v42  ;;  %v4295_v48 = vadd.f32 %v4294_v11, %v4280_v22  ;;  %v4537_v36 = vpop.permute.xlu0 %4536 }
 0x462   :  { %v4296_v31 = vadd.f32 %v4295_v48, %v4281_v19 }
 0x463   :  { %v4250_v18 = vpop.permute.xlu1 %4249 }
 0x464   :  { %v4283_v52 = vmul.f32 %v4250_v18, %v8281_v6  ;;  %v4297_v14 = vadd.f32 %v4296_v31, %v4282_v15  ;;  %v4552_v33 = vpop.permute.xlu0 %4551 }
 0x466   :  { %v4298_v57 = vadd.f32 %v4297_v14, %v4283_v52  ;;  %v4575_v52 = vmul.f32 %v4502_v53, %v8203_v40 }
 0x467   :  { %v4260_v0 = vpop.permute.xlu1 %4259 }
 0x468   :  { %v4285_v63 = vmul.f32 %v4260_v0, %v8295_v17  ;;  %v4299_v60 = vadd.f32 %v4298_v57, %v4284_v34  ;;  %v4346_v4 = vpop.permute.xlu0 %4345 }
 0x469   :  { %v4423_v22 = vmul.f32 %v4346_v4, %v8197_v62 }
 0x46a   :  { %v4300_v58 = vadd.f32 %v4299_v60, %v4285_v63 }
 0x46b   :  { %v4270_v1 = vpop.permute.xlu1 %4269 }
 0x46c   :  { %v4287_v7 = vmul.f32 %v4270_v1, %v8309_v44  ;;  %v4301_v30 = vadd.f32 %v4300_v58, %v4286_v49  ;;  %v4361_v54 = vpop.permute.xlu0 %4360 }
 0x46d   :  { %v4426_v31 = vmul.f32 %v4361_v54, %v8219_v24 }
 0x46e   :  { %v4302_v21 = vadd.f32 %v4301_v30, %v4287_v7 }
 0x470   :  { %v4303_v37 = vrot.slane %v4302_v21, 4  ;;  %v4351_v20 = vpop.permute.xlu1 %4350  ;;  %v4366_v14 = vpop.permute.xlu0 %4365 }
 0x471   :  { %v4424_v10 = vmul.f32 %v4351_v20, %v8203_v40  ;;  %v4427_v63 = vmul.f32 %v4366_v14, %v8227_v35 }
 0x472   :  { %v4304_v26 = vadd.f32 %v4303_v37, %v4302_v21 }
 0x473   :  { %v4439_v48 = vadd.f32 %v4424_v10, %v4423_v22 }
 0x474   :  { %v4305_v47 = vrot.slane %v4304_v26, 2  ;;  %v4356_v12 = vpop.permute.xlu1 %4355  ;;  %v4381_v21 = vpop.permute.xlu0 %4380 }
 0x475   :  { %v4425_v11 = vmul.f32 %v4356_v12, %v8210_v32 }
 0x476   :  { %v4306_v50 = vadd.f32 %v4305_v47, %v4304_v26  ;;  %v4579_v26 = vmul.f32 %v4522_v38, %v8235_v27  ;;  %v4430_v47 = vmul.f32 %v4381_v21, %v8251_v25 }
 0x477   :  { %v4440_v29 = vadd.f32 %v4439_v48, %v4425_v11 }
 0x478   :  { %v4307_v41 = vrot.slane %v4306_v50, 1 }
 0x479   :  { %v4497_v16 = vpop.permute.xlu1 %4496  ;;  %v4441_v57 = vadd.f32 %v4440_v29, %v4426_v31 }
 0x47a   :  { %v4308_v3 = vadd.f32 %v4307_v41, %v4306_v50  ;;  %v4574_v15 = vmul.f32 %v4497_v16, %v8197_v62 }
 0x47b   :  { %v4442_v1 = vadd.f32 %v4441_v57, %v4427_v63 }
 0x47c   :  { %v4309_v9 = vadd.f32 %v4308_v3, %v8328_v59  ;;  %v4590_v23 = vadd.f32 %v4575_v52, %v4574_v15 }
 0x47d   :  { %v4507_v13 = vpop.permute.xlu1 %4506 }
 0x47e   :  { %4310 = vst [vmem:[#allocation3 + $0x5] sm:$0x1] %v4309_v9  ;;  %v4576_v34 = vmul.f32 %v4507_v13, %v8210_v32 }
 0x480   :  { %v4591_v58 = vadd.f32 %v4590_v23, %v4576_v34 }
 0x481   :  { %v4512_v39 = vpop.permute.xlu1 %4511 }
 0x482   :  { %v4577_v0 = vmul.f32 %v4512_v39, %v8219_v24  ;;  %v4396_v39 = vpop.permute.xlu0 %4395 }
 0x483   :  { %v4433_v38 = vmul.f32 %v4396_v39, %v8275_v46 }
 0x484   :  { %v4592_v30 = vadd.f32 %v4591_v58, %v4577_v0 }
 0x485   :  { %v4517_v8 = vpop.permute.xlu1 %4516 }
 0x486   :  { %v4578_v62 = vmul.f32 %v4517_v8, %v8227_v35  ;;  %v4411_v11 = vpop.permute.xlu0 %4410 }
 0x487   :  { %v4436_v48 = vmul.f32 %v4411_v11, %v8295_v17 }
 0x488   :  { %v4593_v37 = vadd.f32 %v4592_v30, %v4578_v62 }
 0x48a   :  { %v4371_v43 = vpop.permute.xlu1 %4370  ;;  %v4594_v50 = vadd.f32 %v4593_v37, %v4579_v26  ;;  %v4567_v14 = vpop.permute.xlu0 %4566 }
 0x48b   :  { %v4428_v60 = vmul.f32 %v4371_v43, %v8235_v27  ;;  %v4582_v27 = vmul.f32 %v4537_v36, %v8259_v2 }
 0x48d   :  { %v4443_v40 = vadd.f32 %v4442_v1, %v4428_v60 }
 0x48e   :  { %v4376_v61 = vpop.permute.xlu1 %4375 }
 0x48f   :  { %v4429_v7 = vmul.f32 %v4376_v61, %v8243_v56 }
 0x491   :  { %v4444_v20 = vadd.f32 %v4443_v40, %v4429_v7 }
 0x493   :  { %v4527_v51 = vpop.permute.xlu1 %4526  ;;  %v4445_v16 = vadd.f32 %v4444_v20, %v4430_v47 }
 0x494   :  { %v4580_v24 = vmul.f32 %v4527_v51, %v8243_v56 }
 0x496   :  { %v4595_v9 = vadd.f32 %v4594_v50, %v4580_v24 }
 0x497   :  { %v4532_v5 = vpop.permute.xlu1 %4531 }
 0x498   :  { %v4581_v35 = vmul.f32 %v4532_v5, %v8251_v25 }
 0x49a   :  { %v4596_v53 = vadd.f32 %v4595_v9, %v4581_v35 }
 0x49c   :  { %v4386_v45 = vpop.permute.xlu1 %4385  ;;  %v4597_v51 = vadd.f32 %v4596_v53, %v4582_v27 }
 0x49d   :  { %v4431_v12 = vmul.f32 %v4386_v45, %v8259_v2  ;;  %v4585_v2 = vmul.f32 %v4552_v33, %v8281_v6 }
 0x49f   :  { %v4446_v13 = vadd.f32 %v4445_v16, %v4431_v12 }
 0x4a0   :  { %v4391_v19 = vpop.permute.xlu1 %4390 }
 0x4a1   :  { %v4432_v3 = vmul.f32 %v4391_v19, %v8267_v42 }
 0x4a3   :  { %v4447_v8 = vadd.f32 %v4446_v13, %v4432_v3 }
 0x4a5   :  { %v4542_v18 = vpop.permute.xlu1 %4541  ;;  %v4448_v5 = vadd.f32 %v4447_v8, %v4433_v38 }
 0x4a6   :  { %v4583_v56 = vmul.f32 %v4542_v18, %v8267_v42 }
 0x4a8   :  { %v4598_v10 = vadd.f32 %v4597_v51, %v4583_v56 }
 0x4a9   :  { %v4547_v49 = vpop.permute.xlu1 %4546 }
 0x4aa   :  { %v4584_v25 = vmul.f32 %v4547_v49, %v8275_v46 }
 0x4ac   :  { %v4599_v54 = vadd.f32 %v4598_v10, %v4584_v25 }
 0x4ae   :  { %v4401_v32 = vpop.permute.xlu1 %4400  ;;  %v4600_v15 = vadd.f32 %v4599_v54, %v4585_v2 }
 0x4af   :  { %v4434_v61 = vmul.f32 %v4401_v32, %v8281_v6  ;;  %v4588_v6 = vmul.f32 %v4567_v14, %v8303_v28 }
 0x4b1   :  { %v4449_v22 = vadd.f32 %v4448_v5, %v4434_v61 }
 0x4b2   :  { %v4406_v41 = vpop.permute.xlu1 %4405 }
 0x4b3   :  { %v4435_v4 = vmul.f32 %v4406_v41, %v8290_v55 }
 0x4b5   :  { %v4450_v19 = vadd.f32 %v4449_v22, %v4435_v4 }
 0x4b7   :  { %v4557_v43 = vpop.permute.xlu1 %4556  ;;  %v4451_v31 = vadd.f32 %v4450_v19, %v4436_v48 }
 0x4b8   :  { %v4586_v42 = vmul.f32 %v4557_v43, %v8290_v55 }
 0x4ba   :  { %v4601_v18 = vadd.f32 %v4600_v15, %v4586_v42 }
 0x4bb   :  { %v4562_v45 = vpop.permute.xlu1 %4561 }
 0x4bc   :  { %v4587_v46 = vmul.f32 %v4562_v45, %v8295_v17 }
 0x4be   :  { %v4602_v23 = vadd.f32 %v4601_v18, %v4587_v46 }
 0x4c0   :  { %v4416_v36 = vpop.permute.xlu1 %4415  ;;  %v4603_v60 = vadd.f32 %v4602_v23, %v4588_v6 }
 0x4c1   :  { %v4437_v29 = vmul.f32 %v4416_v36, %v8303_v28 }
 0x4c3   :  { %v4452_v34 = vadd.f32 %v4451_v31, %v4437_v29 }
 0x4c4   :  { %v4421_v52 = vpop.permute.xlu1 %4420 }
 0x4c5   :  { %v4438_v57 = vmul.f32 %v4421_v52, %v8309_v44 }
 0x4c7   :  { %v4453_v0 = vadd.f32 %v4452_v34, %v4438_v57 }
 0x4c9   :  { %v4454_v55 = vrot.slane %v4453_v0, 4  ;;  %v4572_v33 = vpop.permute.xlu1 %4571 }
 0x4ca   :  { %v4589_v63 = vmul.f32 %v4572_v33, %v8309_v44 }
 0x4cb   :  { %v4455_v49 = vadd.f32 %v4454_v55, %v4453_v0 }
 0x4cc   :  { %v4604_v58 = vadd.f32 %v4603_v60, %v4589_v63 }
 0x4cd   :  { %v4456_v62 = vrot.slane %v4455_v49, 2 }
 0x4ce   :  { %v4605_v17 = vrot.slane %v4604_v58, 4 }
 0x4cf   :  { %v4457_v1 = vadd.f32 %v4456_v62, %v4455_v49 }
 0x4d0   :  { %v4606_v7 = vadd.f32 %v4605_v17, %v4604_v58 }
 0x4d1   :  { %v4458_v30 = vrot.slane %v4457_v1, 1 }
 0x4d2   :  { %v4607_v40 = vrot.slane %v4606_v7, 2 }
 0x4d3   :  { %v4459_v21 = vadd.f32 %v4458_v30, %v4457_v1 }
 0x4d4   :  { %v4608_v37 = vadd.f32 %v4607_v40, %v4606_v7 }
 0x4d5   :  { %v4460_v32 = vadd.f32 %v4459_v21, %v8328_v59 }
 0x4d6   :  { %v4609_v20 = vrot.slane %v4608_v37, 1 }
 0x4d7   :  { %4461 = vst [vmem:[#allocation3 + $0x6] sm:$0x1] %v4460_v32 }
 0x4d8   :  { %v4610_v28 = vadd.f32 %v4609_v20, %v4608_v37 }
 0x4da   :  { %v4611_v44 = vadd.f32 %v4610_v28, %v8328_v59 }
 0x4dc   :  { %4612 = vst [vmem:[#allocation3 + $0x7] sm:$0x1] %v4611_v44 }
 0x4dd   :  { %4685 = shalt.err (!%p4682_p4)
}
 0x4de   :  { %s4686_s27 = scalar_lea.hbm %s8501_s5, 128 }
 0x4df   :  { %p4687_p5 = scmp.ne.s32.totalorder %s8501_s5, %s4686_s27  ;;  %p4690_p6 = scmp.lt.u32.totalorder %s4686_s27, %s8501_s5 }
 0x4e1   :  { %p4692_p7 = pnand %p4690_p6, %p4687_p5 }
 0x4e3   :  { %4695 = shalt.err (!%p4692_p7)
}
 0x4e4   :  { %4622 = dma.vmem_to_hbm [thread:$0]  %s4620_s24, 128, %s8501_s5, [#allocation4]  }
 0x4e5   :  { %4696 = dma.done.wait [#allocation4], 128  }
 0x4e6   :  { %4697 = vsyncadd [#allocation4], 4294967168 }
 0x4e7   :  { %4626 = vsyncpa [#allocation4], 1 }

</bundles_post_ra>
